<compile_context>
chip_gen: v5e
topology: v5e:2x2
jax: 0.10.0
libtpu: 0.0.40
codegen_flags: <defaults>
</compile_context>

<pallas_src>
import jax
import jax.numpy as jnp
import numpy as np
from jax.experimental import pallas as pl
from jax.experimental.pallas import tpu as pltpu

BN_EPS = 1e-5


def fine_decoder_kernel(x_ref, w1_ref, w2_ref, consts_ref, wfct_ref,
                        out_ref, h1_acc):
    k = pl.program_id(0)

    @pl.when(k == 0)
    def _():
        h1_acc[...] = jnp.zeros_like(h1_acc)

    # Layer 1 partial product: (P, tk)bf16 @ (tk, 512)bf16 -> f32 accumulator.
    h1_acc[...] += jnp.dot(x_ref[...], w1_ref[...],
                           preferred_element_type=jnp.float32)

    @pl.when(k == pl.num_programs(0) - 1)
    def _():
        B = out_ref.shape[0]
        P = wfct_ref.shape[0]
        rpb = P // B
        C1 = h1_acc.shape[1]          # 512
        C2 = w2_ref.shape[1]          # 256

        # Unpack the single packed constant slab (static lane slices).
        b1 = consts_ref[:, 0:C1]                               # (1, 512)
        b2 = consts_ref[:, C1:C1 + C2]                         # (1, 256)
        w3row = consts_ref[:, C1 + C2:C1 + 2 * C2]             # (1, 256)
        b3 = consts_ref[:, C1 + 2 * C2:C1 + 2 * C2 + 1]        # (1, 1)
        bfc = consts_ref[:, C1 + 2 * C2 + 128:C1 + 2 * C2 + 131]  # (1, 3)

        # BN bias (scale already folded into w1) + ReLU.
        h1 = jnp.maximum(h1_acc[...] + b1, 0.0)                # (P, 512) f32

        # Conv1x1(512->256) + BN bias (no ReLU); bf16 MXU operands, f32 acc.
        h2 = jnp.dot(h1.astype(jnp.bfloat16), w2_ref[...],
                     preferred_element_type=jnp.float32) + b2  # (P, 256)

        # Conv1x1(256->1) + BN bias + ReLU on the VPU/XLU (N=1 MXU is wasteful).
        h3 = jnp.maximum(
            jnp.sum(h2 * w3row, axis=-1, keepdims=True) + b3, 0.0)  # (P, 1)

        # Linear(49->3): per-row fc weights (zero on pad rows), per-batch sums,
        # then one vectorized normalize and a single (B,3) block store.
        contrib = h3 * wfct_ref[...]                           # (P, 3)
        d = jnp.concatenate(
            [jnp.sum(contrib[b * rpb:(b + 1) * rpb, :], axis=0, keepdims=True)
             for b in range(B)], axis=0) + bfc                 # (B, 3)
        norm = jnp.sqrt(jnp.sum(d * d, axis=1, keepdims=True))
        norm = jnp.where(norm <= 0.0, 1.0, norm)
        out_ref[...] = d / norm


def _fold_bn(gamma, beta, rmean, rvar):
    scale = gamma / jnp.sqrt(rvar + BN_EPS)
    bias = beta - rmean * scale
    return scale.reshape(1, -1), bias.reshape(1, -1)


def prepare_fine_decoder_params(params, B, H, W):
    """One-time weight preparation (hoisted out of the per-call forward path)."""
    HW = H * W
    rpb = ((HW + 63) // 64) * 64                       # 49 -> 64 rows per batch

    # Fold BN scales into the 1x1-conv weights; cast MXU operands to bf16.
    w1 = (params["w1"] * params["s1"]).astype(jnp.bfloat16)        # (3072, 512)
    w2 = (params["w2"] * params["s2"]).astype(jnp.bfloat16)        # (512, 256)
    w3row = (params["w3"] * params["s3"]).reshape(1, -1)           # (1, 256) f32
    C1, C2 = w1.shape[1], w2.shape[1]

    # Pack b1 | b2 | w3row | b3 | bfc into one lane-aligned f32 slab -> 1 DMA.
    const_w = C1 + 2 * C2 + 256
    consts = jnp.zeros((1, const_w), jnp.float32)
    consts = consts.at[:, 0:C1].set(params["b1"].reshape(1, -1))
    consts = consts.at[:, C1:C1 + C2].set(params["b2"].reshape(1, -1))
    consts = consts.at[:, C1 + C2:C1 + 2 * C2].set(w3row)
    consts = consts.at[:, C1 + 2 * C2:C1 + 2 * C2 + 1].set(
        params["b3"].reshape(1, 1))
    consts = consts.at[:, C1 + 2 * C2 + 128:C1 + 2 * C2 + 131].set(
        params["bfc"].reshape(1, 3))

    # Linear(49->3) weights laid out per padded row; pad rows are zero so BN /
    # ReLU leakage in padded rows never reaches the output.
    wfc_t = jnp.pad(params["wfc"].T, ((0, rpb - HW), (0, 0)))      # (64, 3)
    wfct = jnp.tile(wfc_t, (B, 1))                                 # (B*64, 3)

    return dict(w1=w1, w2=w2, consts=consts, wfct=wfct)


def _pick_tk(C):
    """Per-generation K-tile: fewer, larger steps on v7x; keep tiling on v5e/v6e."""
    try:
        kind = jax.devices()[0].device_kind.lower()
    except Exception:
        kind = ""
    if "v5" in kind or "v6" in kind:
        tk = 1024
    else:
        tk = 1536
    if C % tk != 0:
        tk = C
    return tk


def fine_decoder_forward(feats, prep):
    B, C, H, W = feats.shape
    HW = H * W
    rpb = ((HW + 63) // 64) * 64
    P = B * rpb                                        # 128 for B=2

    # Cast to bf16 BEFORE the NCHW->NHWC shuffle (halves that HBM traffic).
    # TODO(synk): have the upstream producer emit NHWC bf16 directly and drop
    # this transpose entirely.
    x = feats.astype(jnp.bfloat16)
    x = jnp.transpose(x, (0, 2, 3, 1)).reshape(B, HW, C)
    x = jnp.pad(x, ((0, 0), (0, rpb - HW), (0, 0))).reshape(P, C)

    w1, w2, consts, wfct = prep["w1"], prep["w2"], prep["consts"], prep["wfct"]
    C1, C2 = w1.shape[1], w2.shape[1]
    const_w = consts.shape[1]

    tk = _pick_tk(C)
    n_k = C // tk

    grid_spec = pltpu.PrefetchScalarGridSpec(
        num_scalar_prefetch=0,
        grid=(n_k,),
        in_specs=[
            pl.BlockSpec((P, tk), lambda k: (0, k)),          # x  (K-tiled)
            pl.BlockSpec((tk, C1), lambda k: (k, 0)),         # w1 (K-tiled)
            pl.BlockSpec((C1, C2), lambda k: (0, 0)),         # w2 (resident)
            pl.BlockSpec((1, const_w), lambda k: (0, 0)),     # packed consts
            pl.BlockSpec((P, 3), lambda k: (0, 0)),           # per-row fc w
        ],
        out_specs=pl.BlockSpec((B, 3), lambda k: (0, 0)),
        scratch_shapes=[pltpu.VMEM((P, C1), jnp.float32)],    # h1 accumulator
    )

    return pl.pallas_call(
        fine_decoder_kernel,
        out_shape=jax.ShapeDtypeStruct((B, 3), jnp.float32),
        grid_spec=grid_spec,
        compiler_params=pltpu.CompilerParams(
            dimension_semantics=("arbitrary",),
            vmem_limit_bytes=32 * 1024 * 1024),
    )(x, w1, w2, consts, wfct)


def init_params(key):
    ks = jax.random.split(key, 16)

    def conv_w(k, cin, cout):
        return jax.random.normal(k, (cin, cout), jnp.float32) / np.sqrt(cin)

    def bn_params(k, c):
        kg, kb, km, kv = jax.random.split(k, 4)
        gamma = 1.0 + 0.1 * jax.random.normal(kg, (c,), jnp.float32)
        beta = 0.1 * jax.random.normal(kb, (c,), jnp.float32)
        rmean = 0.1 * jax.random.normal(km, (c,), jnp.float32)
        rvar = 0.5 + jax.random.uniform(kv, (c,), jnp.float32)
        return _fold_bn(gamma, beta, rmean, rvar)

    w1 = conv_w(ks[0], 3072, 512)
    s1, b1 = bn_params(ks[1], 512)
    w2 = conv_w(ks[2], 512, 256)
    s2, b2 = bn_params(ks[3], 256)
    w3 = conv_w(ks[4], 256, 1)
    s3, b3 = bn_params(ks[5], 1)

    lim = 1.0 / np.sqrt(49.0)
    wfc = jax.random.uniform(ks[6], (3, 49), jnp.float32, -lim, lim)
    bfc = jax.random.uniform(ks[7], (3,), jnp.float32, -lim, lim)

    return dict(w1=w1, s1=s1, b1=b1, w2=w2, s2=s2, b2=b2,
                w3=w3, s3=s3, b3=b3, wfc=wfc, bfc=bfc)


def reference(feats, p):
    # Pure-JAX reference replicating the PyTorch forward (eval-mode BN).
    B, C, H, W = feats.shape
    hp = jax.lax.Precision.HIGHEST
    x = jnp.transpose(feats, (0, 2, 3, 1)).reshape(-1, C)
    h1 = jnp.maximum(jnp.dot(x, p["w1"], precision=hp) * p["s1"] + p["b1"], 0.0)
    h2 = jnp.dot(h1, p["w2"], precision=hp) * p["s2"] + p["b2"]
    h3 = jnp.maximum(jnp.dot(h2, p["w3"], precision=hp) * p["s3"] + p["b3"], 0.0)
    flat = h3.reshape(B, H * W)
    d = jnp.dot(flat, p["wfc"].T, precision=hp) + p["bfc"]
    norm = jnp.sqrt(jnp.sum(d * d, axis=1, keepdims=True))
    norm = jnp.where(norm <= 0.0, 1.0, norm)
    return d / norm


if __name__ == "__main__":
    key = jax.random.PRNGKey(0)
    kf, kp = jax.random.split(key)

    # Shapes implied by the module: Conv2d(3072, ...) and Linear(49, 3) -> 7x7.
    B, C, H, W = 2, 3072, 7, 7
    feats = jax.random.normal(kf, (B, C, H, W), jnp.float32)
    params = init_params(kp)

    # One-time weight preparation (BN fold + bf16 cast + fc pad/tile).
    prep = prepare_fine_decoder_params(params, B, H, W)
    prep = {k: jax.block_until_ready(v) for k, v in prep.items()}

    fwd = jax.jit(fine_decoder_forward)
    out = jax.block_until_ready(fwd(feats, prep))

    ref = reference(feats, params)
    assert out.shape == (B, 3)
    np.testing.assert_allclose(np.asarray(out), np.asarray(ref),
                               rtol=2e-2, atol=2e-2)
    print("KERNEL_OK")
</pallas_src>

<mosaic_0001>
module attributes {stable_mosaic.version = 11 : i64} {
  func.func @fine_decoder_kernel(%arg0: i32, %arg1: memref<128x1536xbf16, #tpu.memory_space<vmem>>, %arg2: memref<1536x512xbf16, #tpu.memory_space<vmem>>, %arg3: memref<512x256xbf16, #tpu.memory_space<vmem>>, %arg4: memref<1x1280xf32, #tpu.memory_space<vmem>>, %arg5: memref<128x3xf32, #tpu.memory_space<vmem>>, %arg6: memref<2x3xf32, #tpu.memory_space<vmem>>, %arg7: memref<128x512xf32, #tpu.memory_space<vmem>>) attributes {dimension_semantics = [#tpu.dimension_semantics<arbitrary>], iteration_bounds = array<i64: 2>, scalar_prefetch = 0 : i64, scratch_operands = 1 : i64, tpu.core_type = #tpu.core_type<tc>, window_params = [{transform_indices = @transform_0, window_bounds = array<i64: 128, 1536>}, {transform_indices = @transform_1, window_bounds = array<i64: 1536, 512>}, {pipeline_mode = #tpu.pipeline_mode<synchronous>, transform_indices = @transform_2, window_bounds = array<i64: 512, 256>}, {pipeline_mode = #tpu.pipeline_mode<synchronous>, transform_indices = @transform_3, window_bounds = array<i64: 1, 1280>}, {pipeline_mode = #tpu.pipeline_mode<synchronous>, transform_indices = @transform_4, window_bounds = array<i64: 128, 3>}, {pipeline_mode = #tpu.pipeline_mode<synchronous>, transform_indices = @transform_5, window_bounds = array<i64: 2, 3>}]} {
    %c0_i32 = arith.constant 0 : i32
    %0 = arith.cmpi eq, %arg0, %c0_i32 : i32
    %1 = arith.extui %0 : i1 to i32
    %c0_i32_0 = arith.constant 0 : i32
    %2 = arith.cmpi ne, %1, %c0_i32_0 : i32
    scf.if %2 {
      %cst_9 = arith.constant 0.000000e+00 : f32
      %12 = vector.broadcast %cst_9 : f32 to vector<128x512xf32>
      %c0_10 = arith.constant 0 : index
      %c0_11 = arith.constant 0 : index
      %13 = vector.load %arg7[%c0_10, %c0_11] : memref<128x512xf32, #tpu.memory_space<vmem>>, vector<128x512xf32>
      tpu.vector_store %arg7[%c0_10, %c0_11], %12 {strides = array<i32>} : memref<128x512xf32, #tpu.memory_space<vmem>>, vector<128x512xf32>,
    } else {
    }
    %c0 = arith.constant 0 : index
    %c0_1 = arith.constant 0 : index
    %3 = vector.load %arg7[%c0, %c0_1] : memref<128x512xf32, #tpu.memory_space<vmem>>, vector<128x512xf32>
    %c0_2 = arith.constant 0 : index
    %c0_3 = arith.constant 0 : index
    %4 = vector.load %arg1[%c0_2, %c0_3] : memref<128x1536xbf16, #tpu.memory_space<vmem>>, vector<128x1536xbf16>
    %c0_4 = arith.constant 0 : index
    %c0_5 = arith.constant 0 : index
    %5 = vector.load %arg2[%c0_4, %c0_5] : memref<1536x512xbf16, #tpu.memory_space<vmem>>, vector<1536x512xbf16>
    %cst = arith.constant dense<0.000000e+00> : vector<128x512xf32>
    %6 = tpu.matmul %4, %5, %cst {dimension_numbers = #tpu.dot_dimension_numbers<[1], [0], [0], [1], [0, 0, 1, 1], [], []>} : vector<128x1536xbf16>, vector<1536x512xbf16>, vector<128x512xf32> -> vector<128x512xf32>
    %7 = arith.addf %3, %6 : vector<128x512xf32>
    %c0_6 = arith.constant 0 : index
    %c0_7 = arith.constant 0 : index
    %8 = vector.load %arg7[%c0_6, %c0_7] : memref<128x512xf32, #tpu.memory_space<vmem>>, vector<128x512xf32>
    tpu.vector_store %arg7[%c0_6, %c0_7], %7 {strides = array<i32>} : memref<128x512xf32, #tpu.memory_space<vmem>>, vector<128x512xf32>,
    %c1_i32 = arith.constant 1 : i32
    %9 = arith.cmpi eq, %arg0, %c1_i32 : i32
    %10 = arith.extui %9 : i1 to i32
    %c0_i32_8 = arith.constant 0 : i32
    %11 = arith.cmpi ne, %10, %c0_i32_8 : i32
    scf.if %11 {
      %c0_9 = arith.constant 0 : index
      %c0_10 = arith.constant 0 : index
      %12 = vector.load %arg4[%c0_9, %c0_10] : memref<1x1280xf32, #tpu.memory_space<vmem>>, vector<1x512xf32>
      %c0_11 = arith.constant 0 : index
      %c512 = arith.constant 512 : index
      %13 = vector.load %arg4[%c0_11, %c512] : memref<1x1280xf32, #tpu.memory_space<vmem>>, vector<1x256xf32>
      %c0_12 = arith.constant 0 : index
      %c768 = arith.constant 768 : index
      %14 = vector.load %arg4[%c0_12, %c768] : memref<1x1280xf32, #tpu.memory_space<vmem>>, vector<1x256xf32>
      %c0_13 = arith.constant 0 : index
      %c1024 = arith.constant 1024 : index
      %15 = vector.load %arg4[%c0_13, %c1024] : memref<1x1280xf32, #tpu.memory_space<vmem>>, vector<1x1xf32>
      %c0_14 = arith.constant 0 : index
      %c1152 = arith.constant 1152 : index
      %16 = vector.load %arg4[%c0_14, %c1152] : memref<1x1280xf32, #tpu.memory_space<vmem>>, vector<1x3xf32>
      %c0_15 = arith.constant 0 : index
      %c0_16 = arith.constant 0 : index
      %17 = vector.load %arg7[%c0_15, %c0_16] : memref<128x512xf32, #tpu.memory_space<vmem>>, vector<128x512xf32>
      %18 = vector.broadcast %12 : vector<1x512xf32> to vector<128x512xf32>
      %19 = arith.addf %17, %18 : vector<128x512xf32>
      %cst_17 = arith.constant 0.000000e+00 : f32
      %20 = vector.broadcast %cst_17 : f32 to vector<128x512xf32>
      %21 = arith.maximumf %19, %20 : vector<128x512xf32>
      %22 = arith.truncf %21 : vector<128x512xf32> to vector<128x512xbf16>
      %c0_18 = arith.constant 0 : index
      %c0_19 = arith.constant 0 : index
      %23 = vector.load %arg3[%c0_18, %c0_19] : memref<512x256xbf16, #tpu.memory_space<vmem>>, vector<512x256xbf16>
      %cst_20 = arith.constant dense<0.000000e+00> : vector<128x256xf32>
      %24 = tpu.matmul %22, %23, %cst_20 {dimension_numbers = #tpu.dot_dimension_numbers<[1], [0], [0], [1], [0, 0, 1, 1], [], []>} : vector<128x512xbf16>, vector<512x256xbf16>, vector<128x256xf32> -> vector<128x256xf32>
      %25 = vector.broadcast %13 : vector<1x256xf32> to vector<128x256xf32>
      %26 = arith.addf %24, %25 : vector<128x256xf32>
      %27 = vector.broadcast %14 : vector<1x256xf32> to vector<128x256xf32>
      %28 = arith.mulf %26, %27 : vector<128x256xf32>
      %cst_21 = arith.constant dense<0.000000e+00> : vector<128xf32>
      %29 = vector.multi_reduction <add>, %28, %cst_21 [1] : vector<128x256xf32> to vector<128xf32>
      %30 = vector.shape_cast %29 : vector<128xf32> to vector<128x1xf32>
      %31 = vector.broadcast %15 : vector<1x1xf32> to vector<128x1xf32>
      %32 = arith.addf %30, %31 : vector<128x1xf32>
      %cst_22 = arith.constant 0.000000e+00 : f32
      %33 = vector.broadcast %cst_22 : f32 to vector<128x1xf32>
      %34 = arith.maximumf %32, %33 : vector<128x1xf32>
      %c0_23 = arith.constant 0 : index
      %c0_24 = arith.constant 0 : index
      %35 = vector.load %arg5[%c0_23, %c0_24] : memref<128x3xf32, #tpu.memory_space<vmem>>, vector<128x3xf32>
      %36 = vector.broadcast %34 : vector<128x1xf32> to vector<128x3xf32>
      %37 = arith.mulf %36, %35 : vector<128x3xf32>
      %38 = vector.extract_strided_slice %37 {offsets = [0, 0], sizes = [64, 3], strides = [1, 1]} : vector<128x3xf32> to vector<64x3xf32>
      %cst_25 = arith.constant dense<0.000000e+00> : vector<3xf32>
      %39 = vector.multi_reduction <add>, %38, %cst_25 [0] : vector<64x3xf32> to vector<3xf32>
      %40 = vector.shape_cast %39 : vector<3xf32> to vector<1x3xf32>
      %41 = vector.extract_strided_slice %37 {offsets = [64, 0], sizes = [64, 3], strides = [1, 1]} : vector<128x3xf32> to vector<64x3xf32>
      %cst_26 = arith.constant dense<0.000000e+00> : vector<3xf32>
      %42 = vector.multi_reduction <add>, %41, %cst_26 [0] : vector<64x3xf32> to vector<3xf32>
      %43 = vector.shape_cast %42 : vector<3xf32> to vector<1x3xf32>
      %44 = tpu.concatenate %40, %43 in 0 : vector<1x3xf32>, vector<1x3xf32> -> vector<2x3xf32>
      %45 = vector.broadcast %16 : vector<1x3xf32> to vector<2x3xf32>
      %46 = arith.addf %44, %45 : vector<2x3xf32>
      %47 = arith.mulf %46, %46 : vector<2x3xf32>
      %cst_27 = arith.constant dense<0.000000e+00> : vector<2xf32>
      %48 = vector.multi_reduction <add>, %47, %cst_27 [1] : vector<2x3xf32> to vector<2xf32>
      %49 = vector.shape_cast %48 : vector<2xf32> to vector<2x1xf32>
      %50 = math.sqrt %49 : vector<2x1xf32>
      %cst_28 = arith.constant 0.000000e+00 : f32
      %51 = vector.broadcast %cst_28 : f32 to vector<2x1xf32>
      %52 = arith.cmpf ole, %50, %51 : vector<2x1xf32>
      %cst_29 = arith.constant 1.000000e+00 : f32
      %53 = vector.broadcast %cst_29 : f32 to vector<2x1xf32>
      %54 = arith.select %52, %53, %50 : vector<2x1xi1>, vector<2x1xf32>
      %55 = vector.broadcast %54 : vector<2x1xf32> to vector<2x3xf32>
      %56 = arith.divf %46, %55 : vector<2x3xf32>
      %c0_30 = arith.constant 0 : index
      %c0_31 = arith.constant 0 : index
      %57 = vector.load %arg6[%c0_30, %c0_31] : memref<2x3xf32, #tpu.memory_space<vmem>>, vector<2x3xf32>
      tpu.vector_store %arg6[%c0_30, %c0_31], %56 {strides = array<i32>} : memref<2x3xf32, #tpu.memory_space<vmem>>, vector<2x3xf32>,
    } else {
    }
    return
  }
  func.func @transform_0(%arg0: i32) -> (i32, i32) {
    %c0_i32 = arith.constant 0 : i32
    %c0_i32_0 = arith.constant 0 : i32
    return %c0_i32, %arg0 : i32, i32
  }
  func.func @transform_1(%arg0: i32) -> (i32, i32) {
    %c0_i32 = arith.constant 0 : i32
    %c0_i32_0 = arith.constant 0 : i32
    return %arg0, %c0_i32 : i32, i32
  }
  func.func @transform_2(%arg0: i32) -> (i32, i32) {
    %c0_i32 = arith.constant 0 : i32
    %c0_i32_0 = arith.constant 0 : i32
    %c0_i32_1 = arith.constant 0 : i32
    return %c0_i32, %c0_i32_0 : i32, i32
  }
  func.func @transform_3(%arg0: i32) -> (i32, i32) {
    %c0_i32 = arith.constant 0 : i32
    %c0_i32_0 = arith.constant 0 : i32
    %c0_i32_1 = arith.constant 0 : i32
    return %c0_i32, %c0_i32_0 : i32, i32
  }
  func.func @transform_4(%arg0: i32) -> (i32, i32) {
    %c0_i32 = arith.constant 0 : i32
    %c0_i32_0 = arith.constant 0 : i32
    %c0_i32_1 = arith.constant 0 : i32
    return %c0_i32, %c0_i32_0 : i32, i32
  }
  func.func @transform_5(%arg0: i32) -> (i32, i32) {
    %c0_i32 = arith.constant 0 : i32
    %c0_i32_0 = arith.constant 0 : i32
    %c0_i32_1 = arith.constant 0 : i32
    return %c0_i32, %c0_i32_0 : i32, i32
  }
}

</mosaic_0001>

<bundles_post_ra>
// kernel: fine_decoder_forward.1
= control target key start
LH: loop header
LB: loop body
LE: loop exit
PB: predicated region body
PF: predicated region fallthrough
CT: control target
= control target key end

     0   :  { %10 = vsyncpa [#allocation5], 0  ;;  %s10212_s18 = smov 0   ;;  %s10214_s19 = smov 0   ;;  %s13250_s0 = inlined_call_operand.vmem [shape: bf16[128,3072], index: 0, kind: input, shape index: {}]   ;;  %s13251_s1 = inlined_call_operand.vmem [shape: bf16[3072,512], index: 1, kind: input, shape index: {}]   ;;  %s13252_s2 = inlined_call_operand.vmem [shape: bf16[512,256], index: 2, kind: input, shape index: {}]   ;;  %s13253_s3 = inlined_call_operand.vmem [shape: f32[1,1280], index: 3, kind: input, shape index: {}]   ;;  %s13254_s4 = inlined_call_operand.vmem [shape: f32[128,3], index: 4, kind: input, shape index: {}]   ;;  %s13255_s5 = inlined_call_operand.hbm [shape: f32[2,3], index: 5, kind: output, shape index: {}]  }
   0x1   :  { %s10216_s20 = smov 0  }
   0x2 LB: > { %s10228_s21 = sadd.s32 4294967295, %s10177_s20   ;;  %s10231_s22 = sadd.s32 1, %s10177_s20   ;;  %s10177_s20 = sphi %s10216_s20, %s13670_s20   ;;  %s10173_s19 = sphi %s10214_s19, %s13669_s19   ;;  %s10169_s18 = sphi %s10212_s18, %s13668_s18  }
   0x3   : > { %s20_s23 = ssub.s32 %s10177_s20, %s10231_s22  ;;  %s23_s24 = sadd.s32 1, %s10173_s19 }
   0x4   : > { %p21_p0 = scmp.eq.s32.totalorder %s20_s23, 0  ;;  %p30_p1 = scmp.ne.s32.totalorder %s10173_s19, %s10169_s18 }
   0x5   : > { %p31_p2 = scmp.eq.s32.totalorder %s10177_s20, 0  ;;  %p7346_p4 = scmp.ge.s32.totalorder %s10177_s20, 2 }
   0x6   : > { %s10240_s25 = scalar_select %p21_p0, %s10173_s19, %s23_s24  }
   0x7   : > { %p32_p3 = por %p31_p2, %p30_p1  ;;  %175 = sbr.rel (%p7346_p4) target bundleno = 113 (0x71), region = 28 }
   0xc   : > { %178 = sbr.rel (!%p32_p3) target bundleno = 113 (0x71), region = 32  ;;  %s180_s26 = sand.u32 (%p32_p3), 1, %s10173_s19  }
   0xd   : > { %s9533_s27 = smul.u32 (%p32_p3), 48, %s10177_s20 }
   0xe   : > { %s10079_s28 = smul.u32 (%p32_p3), 768, %s180_s26 }
   0xf   : > { %s10248_s6 = scalar_lea.vmem (%p32_p3), %s13250_s0, %s9533_s27 }
  0x10   : > { %v198_v0 = vld [vmem:[%s10248_s6] sm:$0xff] (%p32_p3)  ;;  %v200_v1 = vld [vmem:[%s10248_s6 + $0x8] sm:$0xff] (%p32_p3)  ;;  %v202_v2 = vld [vmem:[%s10248_s6 + $0x10] sm:$0xff] (%p32_p3)  ;;  %s10253_s7 = scalar_lea.vmem (%p32_p3), [#allocation3], %s10079_s28 }
  0x11   : > { %199 = vst [vmem:[%s10253_s7] sm:$0xff] %v198_v0  ;;  %v204_v3 = vld [vmem:[%s10248_s6 + $0x18] sm:$0xff]  ;;  %v206_v4 = vld [vmem:[%s10248_s6 + $0x20] sm:$0xff]  ;;  %v208_v5 = vld [vmem:[%s10248_s6 + $0x28] sm:$0xff] }
  0x12   : > { %201 = vst [vmem:[%s10253_s7 + $0x8] sm:$0xff] %v200_v1  ;;  %v210_v6 = vld [vmem:[%s10248_s6 + $0x60] sm:$0xff]  ;;  %v212_v7 = vld [vmem:[%s10248_s6 + $0x68] sm:$0xff]  ;;  %v214_v8 = vld [vmem:[%s10248_s6 + $0x70] sm:$0xff] }
  0x13   : > { %203 = vst [vmem:[%s10253_s7 + $0x10] sm:$0xff] %v202_v2  ;;  %v216_v9 = vld [vmem:[%s10248_s6 + $0x78] sm:$0xff]  ;;  %v218_v10 = vld [vmem:[%s10248_s6 + $0x80] sm:$0xff]  ;;  %v220_v11 = vld [vmem:[%s10248_s6 + $0x88] sm:$0xff] }
  0x14   : > { %205 = vst [vmem:[%s10253_s7 + $0x18] sm:$0xff] %v204_v3  ;;  %v222_v12 = vld [vmem:[%s10248_s6 + $0xc0] sm:$0xff]  ;;  %v224_v13 = vld [vmem:[%s10248_s6 + $0xc8] sm:$0xff]  ;;  %v226_v14 = vld [vmem:[%s10248_s6 + $0xd0] sm:$0xff] }
  0x15   : > { %207 = vst [vmem:[%s10253_s7 + $0x20] sm:$0xff] %v206_v4  ;;  %v228_v15 = vld [vmem:[%s10248_s6 + $0xd8] sm:$0xff]  ;;  %v230_v16 = vld [vmem:[%s10248_s6 + $0xe0] sm:$0xff]  ;;  %v232_v17 = vld [vmem:[%s10248_s6 + $0xe8] sm:$0xff] }
  0x16   : > { %209 = vst [vmem:[%s10253_s7 + $0x28] sm:$0xff] %v208_v5  ;;  %v234_v18 = vld [vmem:[%s10248_s6 + $0x120] sm:$0xff]  ;;  %v236_v19 = vld [vmem:[%s10248_s6 + $0x128] sm:$0xff]  ;;  %v238_v20 = vld [vmem:[%s10248_s6 + $0x130] sm:$0xff] }
  0x17   : > { %211 = vst [vmem:[%s10253_s7 + $0x30] sm:$0xff] %v210_v6  ;;  %v240_v21 = vld [vmem:[%s10248_s6 + $0x138] sm:$0xff]  ;;  %v242_v22 = vld [vmem:[%s10248_s6 + $0x140] sm:$0xff]  ;;  %v244_v23 = vld [vmem:[%s10248_s6 + $0x148] sm:$0xff] }
  0x18   : > { %213 = vst [vmem:[%s10253_s7 + $0x38] sm:$0xff] %v212_v7  ;;  %v246_v24 = vld [vmem:[%s10248_s6 + $0x180] sm:$0xff]  ;;  %v248_v25 = vld [vmem:[%s10248_s6 + $0x188] sm:$0xff]  ;;  %v250_v26 = vld [vmem:[%s10248_s6 + $0x190] sm:$0xff] }
  0x19   : > { %215 = vst [vmem:[%s10253_s7 + $0x40] sm:$0xff] %v214_v8  ;;  %v252_v27 = vld [vmem:[%s10248_s6 + $0x198] sm:$0xff]  ;;  %v254_v28 = vld [vmem:[%s10248_s6 + $0x1a0] sm:$0xff]  ;;  %v256_v29 = vld [vmem:[%s10248_s6 + $0x1a8] sm:$0xff] }
  0x1a   : > { %217 = vst [vmem:[%s10253_s7 + $0x48] sm:$0xff] %v216_v9  ;;  %v258_v30 = vld [vmem:[%s10248_s6 + $0x1e0] sm:$0xff]  ;;  %v260_v31 = vld [vmem:[%s10248_s6 + $0x1e8] sm:$0xff]  ;;  %v262_v32 = vld [vmem:[%s10248_s6 + $0x1f0] sm:$0xff] }
  0x1b   : > { %219 = vst [vmem:[%s10253_s7 + $0x50] sm:$0xff] %v218_v10  ;;  %v264_v33 = vld [vmem:[%s10248_s6 + $0x1f8] sm:$0xff]  ;;  %v266_v34 = vld [vmem:[%s10248_s6 + $0x200] sm:$0xff]  ;;  %v268_v35 = vld [vmem:[%s10248_s6 + $0x208] sm:$0xff] }
  0x1c   : > { %221 = vst [vmem:[%s10253_s7 + $0x58] sm:$0xff] %v220_v11  ;;  %v270_v36 = vld [vmem:[%s10248_s6 + $0x240] sm:$0xff]  ;;  %v272_v37 = vld [vmem:[%s10248_s6 + $0x248] sm:$0xff]  ;;  %v274_v38 = vld [vmem:[%s10248_s6 + $0x250] sm:$0xff] }
  0x1d   : > { %223 = vst [vmem:[%s10253_s7 + $0x60] sm:$0xff] %v222_v12  ;;  %v276_v39 = vld [vmem:[%s10248_s6 + $0x258] sm:$0xff]  ;;  %v278_v40 = vld [vmem:[%s10248_s6 + $0x260] sm:$0xff]  ;;  %v280_v41 = vld [vmem:[%s10248_s6 + $0x268] sm:$0xff] }
  0x1e   : > { %225 = vst [vmem:[%s10253_s7 + $0x68] sm:$0xff] %v224_v13  ;;  %v282_v42 = vld [vmem:[%s10248_s6 + $0x2a0] sm:$0xff]  ;;  %v284_v43 = vld [vmem:[%s10248_s6 + $0x2a8] sm:$0xff]  ;;  %v286_v44 = vld [vmem:[%s10248_s6 + $0x2b0] sm:$0xff] }
  0x1f   : > { %227 = vst [vmem:[%s10253_s7 + $0x70] sm:$0xff] %v226_v14  ;;  %v288_v45 = vld [vmem:[%s10248_s6 + $0x2b8] sm:$0xff]  ;;  %v290_v46 = vld [vmem:[%s10248_s6 + $0x2c0] sm:$0xff]  ;;  %v292_v47 = vld [vmem:[%s10248_s6 + $0x2c8] sm:$0xff] }
  0x20   : > { %229 = vst [vmem:[%s10253_s7 + $0x78] sm:$0xff] %v228_v15  ;;  %v294_v48 = vld [vmem:[%s10248_s6 + $0x300] sm:$0xff]  ;;  %v296_v49 = vld [vmem:[%s10248_s6 + $0x308] sm:$0xff]  ;;  %v298_v50 = vld [vmem:[%s10248_s6 + $0x310] sm:$0xff] }
  0x21   : > { %231 = vst [vmem:[%s10253_s7 + $0x80] sm:$0xff] %v230_v16  ;;  %v300_v51 = vld [vmem:[%s10248_s6 + $0x318] sm:$0xff]  ;;  %v302_v52 = vld [vmem:[%s10248_s6 + $0x320] sm:$0xff]  ;;  %v304_v53 = vld [vmem:[%s10248_s6 + $0x328] sm:$0xff] }
  0x22   : > { %233 = vst [vmem:[%s10253_s7 + $0x88] sm:$0xff] %v232_v17  ;;  %v306_v54 = vld [vmem:[%s10248_s6 + $0x360] sm:$0xff]  ;;  %v308_v55 = vld [vmem:[%s10248_s6 + $0x368] sm:$0xff]  ;;  %v310_v56 = vld [vmem:[%s10248_s6 + $0x370] sm:$0xff] }
  0x23   : > { %235 = vst [vmem:[%s10253_s7 + $0x90] sm:$0xff] %v234_v18  ;;  %v312_v57 = vld [vmem:[%s10248_s6 + $0x378] sm:$0xff]  ;;  %v314_v58 = vld [vmem:[%s10248_s6 + $0x380] sm:$0xff]  ;;  %v316_v59 = vld [vmem:[%s10248_s6 + $0x388] sm:$0xff] }
  0x24   : > { %237 = vst [vmem:[%s10253_s7 + $0x98] sm:$0xff] %v236_v19  ;;  %v318_v60 = vld [vmem:[%s10248_s6 + $0x3c0] sm:$0xff]  ;;  %v320_v61 = vld [vmem:[%s10248_s6 + $0x3c8] sm:$0xff]  ;;  %v322_v62 = vld [vmem:[%s10248_s6 + $0x3d0] sm:$0xff] }
  0x25   : > { %239 = vst [vmem:[%s10253_s7 + $0xa0] sm:$0xff] %v238_v20  ;;  %v324_v63 = vld [vmem:[%s10248_s6 + $0x3d8] sm:$0xff]  ;;  %v326_v0 = vld [vmem:[%s10248_s6 + $0x3e0] sm:$0xff]  ;;  %v328_v1 = vld [vmem:[%s10248_s6 + $0x3e8] sm:$0xff] }
  0x26   : > { %241 = vst [vmem:[%s10253_s7 + $0xa8] sm:$0xff] %v240_v21  ;;  %v330_v2 = vld [vmem:[%s10248_s6 + $0x420] sm:$0xff]  ;;  %v332_v3 = vld [vmem:[%s10248_s6 + $0x428] sm:$0xff]  ;;  %v334_v4 = vld [vmem:[%s10248_s6 + $0x430] sm:$0xff] }
  0x27   : > { %243 = vst [vmem:[%s10253_s7 + $0xb0] sm:$0xff] %v242_v22  ;;  %v336_v5 = vld [vmem:[%s10248_s6 + $0x438] sm:$0xff]  ;;  %v338_v6 = vld [vmem:[%s10248_s6 + $0x440] sm:$0xff]  ;;  %v340_v7 = vld [vmem:[%s10248_s6 + $0x448] sm:$0xff] }
  0x28   : > { %245 = vst [vmem:[%s10253_s7 + $0xb8] sm:$0xff] %v244_v23  ;;  %v342_v8 = vld [vmem:[%s10248_s6 + $0x480] sm:$0xff]  ;;  %v344_v9 = vld [vmem:[%s10248_s6 + $0x488] sm:$0xff]  ;;  %v346_v10 = vld [vmem:[%s10248_s6 + $0x490] sm:$0xff] }
  0x29   : > { %247 = vst [vmem:[%s10253_s7 + $0xc0] sm:$0xff] %v246_v24  ;;  %v348_v11 = vld [vmem:[%s10248_s6 + $0x498] sm:$0xff]  ;;  %v350_v12 = vld [vmem:[%s10248_s6 + $0x4a0] sm:$0xff]  ;;  %v352_v13 = vld [vmem:[%s10248_s6 + $0x4a8] sm:$0xff] }
  0x2a   : > { %249 = vst [vmem:[%s10253_s7 + $0xc8] sm:$0xff] %v248_v25  ;;  %v354_v14 = vld [vmem:[%s10248_s6 + $0x4e0] sm:$0xff]  ;;  %v356_v15 = vld [vmem:[%s10248_s6 + $0x4e8] sm:$0xff]  ;;  %v358_v16 = vld [vmem:[%s10248_s6 + $0x4f0] sm:$0xff] }
  0x2b   : > { %251 = vst [vmem:[%s10253_s7 + $0xd0] sm:$0xff] %v250_v26  ;;  %v360_v17 = vld [vmem:[%s10248_s6 + $0x4f8] sm:$0xff]  ;;  %v362_v18 = vld [vmem:[%s10248_s6 + $0x500] sm:$0xff]  ;;  %v364_v19 = vld [vmem:[%s10248_s6 + $0x508] sm:$0xff] }
  0x2c   : > { %253 = vst [vmem:[%s10253_s7 + $0xd8] sm:$0xff] %v252_v27  ;;  %v366_v20 = vld [vmem:[%s10248_s6 + $0x540] sm:$0xff]  ;;  %v368_v21 = vld [vmem:[%s10248_s6 + $0x548] sm:$0xff]  ;;  %v370_v22 = vld [vmem:[%s10248_s6 + $0x550] sm:$0xff] }
  0x2d   : > { %255 = vst [vmem:[%s10253_s7 + $0xe0] sm:$0xff] %v254_v28  ;;  %v372_v23 = vld [vmem:[%s10248_s6 + $0x558] sm:$0xff]  ;;  %v374_v24 = vld [vmem:[%s10248_s6 + $0x560] sm:$0xff]  ;;  %v376_v25 = vld [vmem:[%s10248_s6 + $0x568] sm:$0xff] }
  0x2e   : > { %257 = vst [vmem:[%s10253_s7 + $0xe8] sm:$0xff] %v256_v29  ;;  %v378_v26 = vld [vmem:[%s10248_s6 + $0x5a0] sm:$0xff]  ;;  %v380_v27 = vld [vmem:[%s10248_s6 + $0x5a8] sm:$0xff]  ;;  %v382_v28 = vld [vmem:[%s10248_s6 + $0x5b0] sm:$0xff] }
  0x2f   : > { %259 = vst [vmem:[%s10253_s7 + $0xf0] sm:$0xff] %v258_v30  ;;  %v384_v29 = vld [vmem:[%s10248_s6 + $0x5b8] sm:$0xff]  ;;  %v386_v30 = vld [vmem:[%s10248_s6 + $0x5c0] sm:$0xff] }
  0x30   : > { %261 = vst [vmem:[%s10253_s7 + $0xf8] sm:$0xff] %v260_v31  ;;  %v388_v31 = vld [vmem:[%s10248_s6 + $0x5c8] sm:$0xff] }
  0x31   : > { %263 = vst [vmem:[%s10253_s7 + $0x100] sm:$0xff] %v262_v32 }
  0x32   : > { %265 = vst [vmem:[%s10253_s7 + $0x108] sm:$0xff] %v264_v33 }
  0x33   : > { %267 = vst [vmem:[%s10253_s7 + $0x110] sm:$0xff] %v266_v34 }
  0x34   : > { %269 = vst [vmem:[%s10253_s7 + $0x118] sm:$0xff] %v268_v35 }
  0x35   : > { %271 = vst [vmem:[%s10253_s7 + $0x120] sm:$0xff] %v270_v36 }
  0x36   : > { %273 = vst [vmem:[%s10253_s7 + $0x128] sm:$0xff] %v272_v37 }
  0x37   : > { %275 = vst [vmem:[%s10253_s7 + $0x130] sm:$0xff] %v274_v38 }
  0x38   : > { %277 = vst [vmem:[%s10253_s7 + $0x138] sm:$0xff] %v276_v39 }
  0x39   : > { %279 = vst [vmem:[%s10253_s7 + $0x140] sm:$0xff] %v278_v40 }
  0x3a   : > { %281 = vst [vmem:[%s10253_s7 + $0x148] sm:$0xff] %v280_v41 }
  0x3b   : > { %283 = vst [vmem:[%s10253_s7 + $0x150] sm:$0xff] %v282_v42 }
  0x3c   : > { %285 = vst [vmem:[%s10253_s7 + $0x158] sm:$0xff] %v284_v43 }
  0x3d   : > { %287 = vst [vmem:[%s10253_s7 + $0x160] sm:$0xff] %v286_v44 }
  0x3e   : > { %289 = vst [vmem:[%s10253_s7 + $0x168] sm:$0xff] %v288_v45 }
  0x3f   : > { %291 = vst [vmem:[%s10253_s7 + $0x170] sm:$0xff] %v290_v46 }
  0x40   : > { %293 = vst [vmem:[%s10253_s7 + $0x178] sm:$0xff] %v292_v47 }
  0x41   : > { %295 = vst [vmem:[%s10253_s7 + $0x180] sm:$0xff] %v294_v48 }
  0x42   : > { %297 = vst [vmem:[%s10253_s7 + $0x188] sm:$0xff] %v296_v49 }
  0x43   : > { %299 = vst [vmem:[%s10253_s7 + $0x190] sm:$0xff] %v298_v50 }
  0x44   : > { %301 = vst [vmem:[%s10253_s7 + $0x198] sm:$0xff] %v300_v51 }
  0x45   : > { %303 = vst [vmem:[%s10253_s7 + $0x1a0] sm:$0xff] %v302_v52 }
  0x46   : > { %305 = vst [vmem:[%s10253_s7 + $0x1a8] sm:$0xff] %v304_v53 }
  0x47   : > { %307 = vst [vmem:[%s10253_s7 + $0x1b0] sm:$0xff] %v306_v54 }
  0x48   : > { %309 = vst [vmem:[%s10253_s7 + $0x1b8] sm:$0xff] %v308_v55 }
  0x49   : > { %311 = vst [vmem:[%s10253_s7 + $0x1c0] sm:$0xff] %v310_v56 }
  0x4a   : > { %313 = vst [vmem:[%s10253_s7 + $0x1c8] sm:$0xff] %v312_v57 }
  0x4b   : > { %315 = vst [vmem:[%s10253_s7 + $0x1d0] sm:$0xff] %v314_v58 }
  0x4c   : > { %317 = vst [vmem:[%s10253_s7 + $0x1d8] sm:$0xff] %v316_v59 }
  0x4d   : > { %319 = vst [vmem:[%s10253_s7 + $0x1e0] sm:$0xff] %v318_v60 }
  0x4e   : > { %321 = vst [vmem:[%s10253_s7 + $0x1e8] sm:$0xff] %v320_v61 }
  0x4f   : > { %323 = vst [vmem:[%s10253_s7 + $0x1f0] sm:$0xff] %v322_v62 }
  0x50   : > { %325 = vst [vmem:[%s10253_s7 + $0x1f8] sm:$0xff] %v324_v63 }
  0x51   : > { %327 = vst [vmem:[%s10253_s7 + $0x200] sm:$0xff] %v326_v0 }
  0x52   : > { %329 = vst [vmem:[%s10253_s7 + $0x208] sm:$0xff] %v328_v1 }
  0x53   : > { %331 = vst [vmem:[%s10253_s7 + $0x210] sm:$0xff] %v330_v2 }
  0x54   : > { %333 = vst [vmem:[%s10253_s7 + $0x218] sm:$0xff] %v332_v3 }
  0x55   : > { %335 = vst [vmem:[%s10253_s7 + $0x220] sm:$0xff] %v334_v4 }
  0x56   : > { %337 = vst [vmem:[%s10253_s7 + $0x228] sm:$0xff] %v336_v5 }
  0x57   : > { %339 = vst [vmem:[%s10253_s7 + $0x230] sm:$0xff] %v338_v6 }
  0x58   : > { %341 = vst [vmem:[%s10253_s7 + $0x238] sm:$0xff] %v340_v7 }
  0x59   : > { %343 = vst [vmem:[%s10253_s7 + $0x240] sm:$0xff] %v342_v8 }
  0x5a   : > { %345 = vst [vmem:[%s10253_s7 + $0x248] sm:$0xff] %v344_v9 }
  0x5b   : > { %347 = vst [vmem:[%s10253_s7 + $0x250] sm:$0xff] %v346_v10 }
  0x5c   : > { %349 = vst [vmem:[%s10253_s7 + $0x258] sm:$0xff] %v348_v11 }
  0x5d   : > { %351 = vst [vmem:[%s10253_s7 + $0x260] sm:$0xff] %v350_v12 }
  0x5e   : > { %353 = vst [vmem:[%s10253_s7 + $0x268] sm:$0xff] %v352_v13 }
  0x5f   : > { %355 = vst [vmem:[%s10253_s7 + $0x270] sm:$0xff] %v354_v14 }
  0x60   : > { %357 = vst [vmem:[%s10253_s7 + $0x278] sm:$0xff] %v356_v15 }
  0x61   : > { %359 = vst [vmem:[%s10253_s7 + $0x280] sm:$0xff] %v358_v16 }
  0x62   : > { %361 = vst [vmem:[%s10253_s7 + $0x288] sm:$0xff] %v360_v17 }
  0x63   : > { %363 = vst [vmem:[%s10253_s7 + $0x290] sm:$0xff] %v362_v18 }
  0x64   : > { %365 = vst [vmem:[%s10253_s7 + $0x298] sm:$0xff] %v364_v19 }
  0x65   : > { %367 = vst [vmem:[%s10253_s7 + $0x2a0] sm:$0xff] %v366_v20 }
  0x66   : > { %369 = vst [vmem:[%s10253_s7 + $0x2a8] sm:$0xff] %v368_v21 }
  0x67   : > { %371 = vst [vmem:[%s10253_s7 + $0x2b0] sm:$0xff] %v370_v22 }
  0x68   : > { %373 = vst [vmem:[%s10253_s7 + $0x2b8] sm:$0xff] %v372_v23 }
  0x69   : > { %375 = vst [vmem:[%s10253_s7 + $0x2c0] sm:$0xff] %v374_v24 }
  0x6a   : > { %377 = vst [vmem:[%s10253_s7 + $0x2c8] sm:$0xff] %v376_v25 }
  0x6b   : > { %379 = vst [vmem:[%s10253_s7 + $0x2d0] sm:$0xff] %v378_v26 }
  0x6c   : > { %381 = vst [vmem:[%s10253_s7 + $0x2d8] sm:$0xff] %v380_v27 }
  0x6d   : > { %383 = vst [vmem:[%s10253_s7 + $0x2e0] sm:$0xff] %v382_v28 }
  0x6e   : > { %385 = vst [vmem:[%s10253_s7 + $0x2e8] sm:$0xff] %v384_v29 }
  0x6f   : > { %387 = vst [vmem:[%s10253_s7 + $0x2f0] sm:$0xff] %v386_v30 }
  0x70   : > { %389 = vst [vmem:[%s10253_s7 + $0x2f8] sm:$0xff] %v388_v31 }
  0x71 PF: > { %p7348_p5 = scmp.ge.s32.totalorder %s10177_s20, 1  ;;  %p404_p6 = scmp.lt.s32.totalorder %s10177_s20, 3 }
  0x73   : > { %p405_p7 = pnand %p7348_p5, %p404_p6 }
  0x75   : > { %408 = sbr.rel (%p405_p7) target bundleno = 2744 (0xab8), region = 59 }
  0x7a   : > { %s411_s8 = sand.u32 1, %s10169_s18   ;;  %s440_s9 = smul.u32 192, %s10228_s21 }
  0x7b   : > { %s10080_s10 = smul.u32 768, %s411_s8  ;;  %p7351_p9 = scmp.ne.s32.totalorder %s10228_s21, 0 }
  0x7c   : > { %p441_p8 = scmp.lt.s32.totalorder %s440_s9, 383 }
  0x7d   : > { %s10453_s15 = scalar_lea.vmem [#allocation3], %s10080_s10  ;;  %450 = sbr.rel (%p7351_p9) target bundleno = 195 (0xc3), region = 67 }
  0x7e   : > { %s13672_s9 = smov (!%p441_p8, %s440_s9), 383 }
  0x7f   : > { %s9534_s11 = sshll.u32 %s13672_s9, 4 }
  0x80   : > { %s10451_s14 = scalar_lea.vmem %s13251_s1, %s9534_s11 }
  0x82   : > { %v10179_v32 = vmov 0.0  }
  0x83   : > { %451 = vst [vmem:[#allocation2 + $0xb0] sm:$0xff] %v10179_v32 }
  0x84   : > { %452 = vst [vmem:[#allocation2 + $0x1b0] sm:$0xff] %v10179_v32 }
  0x85   : > { %453 = vst [vmem:[#allocation2 + $0xd8] sm:$0xff] %v10179_v32 }
  0x86   : > { %454 = vst [vmem:[#allocation2 + $0x18] sm:$0xff] %v10179_v32 }
  0x87   : > { %455 = vst [vmem:[#allocation2 + $0x50] sm:$0xff] %v10179_v32 }
  0x88   : > { %456 = vst [vmem:[#allocation2 + $0x168] sm:$0xff] %v10179_v32 }
  0x89   : > { %457 = vst [vmem:[#allocation2 + $0x130] sm:$0xff] %v10179_v32 }
  0x8a   : > { %458 = vst [vmem:[#allocation2 + $0x48] sm:$0xff] %v10179_v32 }
  0x8b   : > { %459 = vst [vmem:[#allocation2 + $0x180] sm:$0xff] %v10179_v32 }
  0x8c   : > { %460 = vst [vmem:[#allocation2 + $0x110] sm:$0xff] %v10179_v32 }
  0x8d   : > { %461 = vst [vmem:[#allocation2 + $0x118] sm:$0xff] %v10179_v32 }
  0x8e   : > { %462 = vst [vmem:[#allocation2 + $0x98] sm:$0xff] %v10179_v32 }
  0x8f   : > { %463 = vst [vmem:[#allocation2 + $0x120] sm:$0xff] %v10179_v32 }
  0x90   : > { %464 = vst [vmem:[#allocation2 + $0x150] sm:$0xff] %v10179_v32 }
  0x91   : > { %465 = vst [vmem:[#allocation2 + $0x108] sm:$0xff] %v10179_v32 }
  0x92   : > { %466 = vst [vmem:[#allocation2 + $0x60] sm:$0xff] %v10179_v32 }
  0x93   : > { %467 = vst [vmem:[#allocation2 + $0xe0] sm:$0xff] %v10179_v32 }
  0x94   : > { %468 = vst [vmem:[#allocation2 + $0x188] sm:$0xff] %v10179_v32 }
  0x95   : > { %469 = vst [vmem:[#allocation2 + $0x138] sm:$0xff] %v10179_v32 }
  0x96   : > { %470 = vst [vmem:[#allocation2 + $0x140] sm:$0xff] %v10179_v32 }
  0x97   : > { %471 = vst [vmem:[#allocation2 + $0x80] sm:$0xff] %v10179_v32 }
  0x98   : > { %472 = vst [vmem:[#allocation2 + $0x1a8] sm:$0xff] %v10179_v32 }
  0x99   : > { %473 = vst [vmem:[#allocation2 + $0x1b8] sm:$0xff] %v10179_v32 }
  0x9a   : > { %474 = vst [vmem:[#allocation2 + $0x28] sm:$0xff] %v10179_v32 }
  0x9b   : > { %475 = vst [vmem:[#allocation2 + $0x1e8] sm:$0xff] %v10179_v32 }
  0x9c   : > { %476 = vst [vmem:[#allocation2 + $0xf8] sm:$0xff] %v10179_v32 }
  0x9d   : > { %477 = vst [vmem:[#allocation2 + $0x160] sm:$0xff] %v10179_v32 }
  0x9e   : > { %478 = vst [vmem:[#allocation2 + $0x30] sm:$0xff] %v10179_v32 }
  0x9f   : > { %479 = vst [vmem:[#allocation2 + $0x1e0] sm:$0xff] %v10179_v32 }
  0xa0   : > { %480 = vst [vmem:[#allocation2] sm:$0xff] %v10179_v32 }
  0xa1   : > { %481 = vst [vmem:[#allocation2 + $0xf0] sm:$0xff] %v10179_v32 }
  0xa2   : > { %482 = vst [vmem:[#allocation2 + $0x8] sm:$0xff] %v10179_v32 }
  0xa3   : > { %483 = vst [vmem:[#allocation2 + $0x148] sm:$0xff] %v10179_v32 }
  0xa4   : > { %484 = vst [vmem:[#allocation2 + $0x1d0] sm:$0xff] %v10179_v32 }
  0xa5   : > { %485 = vst [vmem:[#allocation2 + $0x100] sm:$0xff] %v10179_v32 }
  0xa6   : > { %486 = vst [vmem:[#allocation2 + $0xc8] sm:$0xff] %v10179_v32 }
  0xa7   : > { %487 = vst [vmem:[#allocation2 + $0x40] sm:$0xff] %v10179_v32 }
  0xa8   : > { %488 = vst [vmem:[#allocation2 + $0x1f8] sm:$0xff] %v10179_v32 }
  0xa9   : > { %489 = vst [vmem:[#allocation2 + $0x20] sm:$0xff] %v10179_v32 }
  0xaa   : > { %490 = vst [vmem:[#allocation2 + $0x128] sm:$0xff] %v10179_v32 }
  0xab   : > { %491 = vst [vmem:[#allocation2 + $0x1a0] sm:$0xff] %v10179_v32 }
  0xac   : > { %492 = vst [vmem:[#allocation2 + $0x1f0] sm:$0xff] %v10179_v32 }
  0xad   : > { %493 = vst [vmem:[#allocation2 + $0xe8] sm:$0xff] %v10179_v32 }
  0xae   : > { %494 = vst [vmem:[#allocation2 + $0x78] sm:$0xff] %v10179_v32 }
  0xaf   : > { %495 = vst [vmem:[#allocation2 + $0x70] sm:$0xff] %v10179_v32 }
  0xb0   : > { %496 = vst [vmem:[#allocation2 + $0x90] sm:$0xff] %v10179_v32 }
  0xb1   : > { %497 = vst [vmem:[#allocation2 + $0x1d8] sm:$0xff] %v10179_v32 }
  0xb2   : > { %498 = vst [vmem:[#allocation2 + $0xd0] sm:$0xff] %v10179_v32 }
  0xb3   : > { %499 = vst [vmem:[#allocation2 + $0xb8] sm:$0xff] %v10179_v32 }
  0xb4   : > { %500 = vst [vmem:[#allocation2 + $0x88] sm:$0xff] %v10179_v32 }
  0xb5   : > { %501 = vst [vmem:[#allocation2 + $0xa8] sm:$0xff] %v10179_v32 }
  0xb6   : > { %502 = vst [vmem:[#allocation2 + $0x1c8] sm:$0xff] %v10179_v32 }
  0xb7   : > { %503 = vst [vmem:[#allocation2 + $0x170] sm:$0xff] %v10179_v32 }
  0xb8   : > { %504 = vst [vmem:[#allocation2 + $0x178] sm:$0xff] %v10179_v32 }
  0xb9   : > { %505 = vst [vmem:[#allocation2 + $0x68] sm:$0xff] %v10179_v32 }
  0xba   : > { %506 = vst [vmem:[#allocation2 + $0x190] sm:$0xff] %v10179_v32 }
  0xbb   : > { %507 = vst [vmem:[#allocation2 + $0x198] sm:$0xff] %v10179_v32 }
  0xbc   : > { %508 = vst [vmem:[#allocation2 + $0x38] sm:$0xff] %v10179_v32 }
  0xbd   : > { %509 = vst [vmem:[#allocation2 + $0xc0] sm:$0xff] %v10179_v32 }
  0xbe   : > { %510 = vst [vmem:[#allocation2 + $0x1c0] sm:$0xff] %v10179_v32 }
  0xbf   : > { %511 = vst [vmem:[#allocation2 + $0x158] sm:$0xff] %v10179_v32 }
  0xc0   : > { %512 = vst [vmem:[#allocation2 + $0x10] sm:$0xff] %v10179_v32 }
  0xc1   : > { %513 = vst [vmem:[#allocation2 + $0x58] sm:$0xff] %v10179_v32 }
  0xc2   : > { %514 = vst [vmem:[#allocation2 + $0xa0] sm:$0xff] %v10179_v32 }
  0xc3 PF: > { %v7850_v33 = vld [vmem:[%s10451_s14 + $0xe0] sm:$0xf]  ;;  %v9661_v34 = vld [vmem:[%s10451_s14 + $0xec] sm:$0xf0]  ;;  %p9272_p10 = scmp.ne.s32.totalorder %s10228_s21, 1 }
  0xc4   : > { %v7978_v35 = vld [vmem:[%s10451_s14 + $0x1e0] sm:$0xf]  ;;  %v7851_v36 = vor.u32 %v9661_v34, %v7850_v33  ;;  %v9693_v37 = vld [vmem:[%s10451_s14 + $0x1ec] sm:$0xf0] }
  0xc5   : > { %v8106_v38 = vld [vmem:[%s10451_s14 + $0x2e0] sm:$0xf]  ;;  %v9725_v39 = vld [vmem:[%s10451_s14 + $0x2ec] sm:$0xf0]  ;;  %v7979_v40 = vor.u32 %v9693_v37, %v7978_v35 }
  0xc6   : > { %v8107_v41 = vor.u32 %v9725_v39, %v8106_v38  ;;  %v8234_v42 = vld [vmem:[%s10451_s14 + $0x3e0] sm:$0xf]  ;;  %v9757_v43 = vld [vmem:[%s10451_s14 + $0x3ec] sm:$0xf0]  ;;  %3459 = vmatpush.bf16.msra.mxu0 %v7851_v36 }
  0xc7   : > { %v7834_v44 = vld [vmem:[%s10451_s14 + $0xc0] sm:$0xf]  ;;  %v8235_v45 = vor.u32 %v9757_v43, %v8234_v42  ;;  %v9657_v46 = vld [vmem:[%s10451_s14 + $0xcc] sm:$0xf0]  ;;  %3508 = vmatpush.bf16.msra.mxu1 %v7979_v40 }
  0xc8   : > { %v7962_v47 = vld [vmem:[%s10451_s14 + $0x1c0] sm:$0xf]  ;;  %v9689_v48 = vld [vmem:[%s10451_s14 + $0x1cc] sm:$0xf0]  ;;  %3557 = vmatpush.bf16.msra.mxu2 %v8107_v41  ;;  %v7835_v49 = vor.u32 %v9657_v46, %v7834_v44 }
  0xc9   : > { %v7963_v50 = vor.u32 %v9689_v48, %v7962_v47  ;;  %v8090_v51 = vld [vmem:[%s10451_s14 + $0x2c0] sm:$0xf]  ;;  %v9721_v52 = vld [vmem:[%s10451_s14 + $0x2cc] sm:$0xf0]  ;;  %3606 = vmatpush.bf16.msra.mxu3 %v8235_v45 }
  0xca   : > { %v8218_v53 = vld [vmem:[%s10451_s14 + $0x3c0] sm:$0xf]  ;;  %v8091_v54 = vor.u32 %v9721_v52, %v8090_v51  ;;  %v9753_v55 = vld [vmem:[%s10451_s14 + $0x3cc] sm:$0xf0]  ;;  %3460 = vmatpush.bf16.msra.mxu0 %v7835_v49 }
  0xcb   : > { %v7818_v56 = vld [vmem:[%s10451_s14 + $0xa0] sm:$0xf]  ;;  %v9653_v57 = vld [vmem:[%s10451_s14 + $0xac] sm:$0xf0]  ;;  %v8219_v58 = vor.u32 %v9753_v55, %v8218_v53  ;;  %3509 = vmatpush.bf16.msra.mxu1 %v7963_v50 }
  0xcc   : > { %v7946_v59 = vld [vmem:[%s10451_s14 + $0x1a0] sm:$0xf]  ;;  %v9685_v60 = vld [vmem:[%s10451_s14 + $0x1ac] sm:$0xf0]  ;;  %v7819_v62 = vor.u32 %v9653_v57, %v7818_v56  ;;  %3558 = vmatpush.bf16.msra.mxu2 %v8091_v54 }
  0xcd   : > { %v8074_v61 = vld [vmem:[%s10451_s14 + $0x2a0] sm:$0xf]  ;;  %v9717_v63 = vld [vmem:[%s10451_s14 + $0x2ac] sm:$0xf0]  ;;  %v7947_v2 = vor.u32 %v9685_v60, %v7946_v59  ;;  %3607 = vmatpush.bf16.msra.mxu3 %v8219_v58 }
  0xce   : > { %v8202_v0 = vld [vmem:[%s10451_s14 + $0x3a0] sm:$0xf]  ;;  %v9749_v1 = vld [vmem:[%s10451_s14 + $0x3ac] sm:$0xf0]  ;;  %v8075_v3 = vor.u32 %v9717_v63, %v8074_v61  ;;  %3461 = vmatpush.bf16.msra.mxu0 %v7819_v62  ;;  %v9535_v63 = vld [vmem:[%s10453_s15 + $0x4] sm:$0xf] }
  0xcf   : > { %v7802_v4 = vld [vmem:[%s10451_s14 + $0x80] sm:$0xf]  ;;  %v9649_v5 = vld [vmem:[%s10451_s14 + $0x8c] sm:$0xf0]  ;;  %v8203_v7 = vor.u32 %v9749_v1, %v8202_v0  ;;  %3510 = vmatpush.bf16.msra.mxu1 %v7947_v2  ;;  %v7356_v0 = vld [vmem:[%s10453_s15 + $0x30] sm:$0xf0] }
  0xd0   : > { %v7930_v6 = vld [vmem:[%s10451_s14 + $0x180] sm:$0xf]  ;;  %v9681_v8 = vld [vmem:[%s10451_s14 + $0x18c] sm:$0xf0]  ;;  %v7803_v13 = vor.u32 %v9649_v5, %v7802_v4  ;;  %3559 = vmatpush.bf16.msra.mxu2 %v8075_v3  ;;  %v7362_v4 = vld [vmem:[%s10453_s15 + $0x8] sm:$0xf] }
  0xd1   : > { %v8058_v9 = vld [vmem:[%s10451_s14 + $0x280] sm:$0xf]  ;;  %v9713_v10 = vld [vmem:[%s10451_s14 + $0x28c] sm:$0xf0]  ;;  %v7931_v14 = vor.u32 %v9681_v8, %v7930_v6  ;;  %3608 = vmatpush.bf16.msra.mxu3 %v8203_v7 }
  0xd2   : > { %v8186_v11 = vld [vmem:[%s10451_s14 + $0x380] sm:$0xf]  ;;  %v9745_v12 = vld [vmem:[%s10451_s14 + $0x38c] sm:$0xf0]  ;;  %v8059_v15 = vor.u32 %v9713_v10, %v8058_v9  ;;  %3462 = vmatpush.bf16.msra.mxu0 %v7803_v13  ;;  %v9542_v9 = vld [vmem:[%s10453_s15 + $0x34] sm:$0xf0] }
  0xd3   : > { %v7786_v16 = vld [vmem:[%s10451_s14 + $0x60] sm:$0xf]  ;;  %v9645_v17 = vld [vmem:[%s10451_s14 + $0x6c] sm:$0xf0]  ;;  %v8187_v19 = vor.u32 %v9745_v12, %v8186_v11  ;;  %3511 = vmatpush.bf16.msra.mxu1 %v7931_v14  ;;  %v9536_v10 = vld [vmem:[%s10453_s15 + $0xc] sm:$0xf] }
  0xd4   : > { %v7914_v18 = vld [vmem:[%s10451_s14 + $0x160] sm:$0xf]  ;;  %v9677_v20 = vld [vmem:[%s10451_s14 + $0x16c] sm:$0xf0]  ;;  %v7787_v25 = vor.u32 %v9645_v17, %v7786_v16  ;;  %3560 = vmatpush.bf16.msra.mxu2 %v8059_v15  ;;  %v7364_v11 = vld [vmem:[%s10453_s15 + $0x38] sm:$0xf0] }
  0xd5   : > { %v8042_v21 = vld [vmem:[%s10451_s14 + $0x260] sm:$0xf]  ;;  %v9709_v22 = vld [vmem:[%s10451_s14 + $0x26c] sm:$0xf0]  ;;  %v7915_v26 = vor.u32 %v9677_v20, %v7914_v18  ;;  %3609 = vmatpush.bf16.msra.mxu3 %v8187_v19 }
  0xd6   : > { %v8170_v23 = vld [vmem:[%s10451_s14 + $0x360] sm:$0xf]  ;;  %v9741_v24 = vld [vmem:[%s10451_s14 + $0x36c] sm:$0xf0]  ;;  %v8043_v27 = vor.u32 %v9709_v22, %v8042_v21  ;;  %3463 = vmatpush.bf16.msra.mxu0 %v7787_v25  ;;  %v10604_v22 = vor.u32 %v9535_v63, %v7356_v0 }
  0xd7   : > { %v7770_v28 = vld [vmem:[%s10451_s14 + $0x40] sm:$0xf]  ;;  %v9641_v29 = vld [vmem:[%s10451_s14 + $0x4c] sm:$0xf0]  ;;  %v8171_v31 = vor.u32 %v9741_v24, %v8170_v23  ;;  %3512 = vmatpush.bf16.msra.mxu1 %v7915_v26  ;;  %v10606_v23 = vor.u32 %v9542_v9, %v7362_v4  ;;  %v10610_v26 = vor.u32 %v9536_v10, %v7364_v11  ;;  %v9559_v11 = vld [vmem:[%s10453_s15 + $0xc4] sm:$0xf] }
  0xd8   : > { %v7898_v30 = vld [vmem:[%s10451_s14 + $0x140] sm:$0xf]  ;;  %v9673_v32 = vld [vmem:[%s10451_s14 + $0x14c] sm:$0xf0]  ;;  %v7771_v37 = vor.u32 %v9641_v29, %v7770_v28  ;;  %3561 = vmatpush.bf16.msra.mxu2 %v8043_v27 }
  0xd9   : > { %v8026_v33 = vld [vmem:[%s10451_s14 + $0x240] sm:$0xf]  ;;  %v9705_v34 = vld [vmem:[%s10451_s14 + $0x24c] sm:$0xf0]  ;;  %v7899_v38 = vor.u32 %v9673_v32, %v7898_v30  ;;  %3610 = vmatpush.bf16.msra.mxu3 %v8171_v31  ;;  %13396 = vst [vmem:[#allocation7_spill] sm:$0xff] %v10606_v23 }
  0xda   : > { %v8154_v35 = vld [vmem:[%s10451_s14 + $0x340] sm:$0xf]  ;;  %v9737_v36 = vld [vmem:[%s10451_s14 + $0x34c] sm:$0xf0]  ;;  %v8027_v39 = vor.u32 %v9705_v34, %v8026_v33  ;;  %3464 = vmatpush.bf16.msra.mxu0 %v7771_v37  ;;  %13397 = vst [vmem:[#allocation8_spill] sm:$0xff] %v10610_v26 }
  0xdb   : > { %v7754_v40 = vld [vmem:[%s10451_s14 + $0x20] sm:$0xf]  ;;  %v9637_v41 = vld [vmem:[%s10451_s14 + $0x2c] sm:$0xf0]  ;;  %v8155_v43 = vor.u32 %v9737_v36, %v8154_v35  ;;  %3513 = vmatpush.bf16.msra.mxu1 %v7899_v38 }
  0xdc   : > { %v7882_v42 = vld [vmem:[%s10451_s14 + $0x120] sm:$0xf]  ;;  %v9669_v44 = vld [vmem:[%s10451_s14 + $0x12c] sm:$0xf0]  ;;  %v7755_v50 = vor.u32 %v9637_v41, %v7754_v40  ;;  %3562 = vmatpush.bf16.msra.mxu2 %v8027_v39 }
  0xdd   : > { %v8010_v45 = vld [vmem:[%s10451_s14 + $0x220] sm:$0xf]  ;;  %v9701_v46 = vld [vmem:[%s10451_s14 + $0x22c] sm:$0xf0]  ;;  %v7883_v54 = vor.u32 %v9669_v44, %v7882_v42  ;;  %3611 = vmatpush.bf16.msra.mxu3 %v8155_v43 }
  0xde   : > { %v8138_v47 = vld [vmem:[%s10451_s14 + $0x320] sm:$0xf]  ;;  %v9733_v48 = vld [vmem:[%s10451_s14 + $0x32c] sm:$0xf0]  ;;  %v8011_v55 = vor.u32 %v9701_v46, %v8010_v45  ;;  %3465 = vmatpush.bf16.msra.mxu0 %v7755_v50 }
  0xdf   : > { %v7738_v49 = vld [vmem:[%s10451_s14] sm:$0xf]  ;;  %v9633_v51 = vld [vmem:[%s10451_s14 + $0xc] sm:$0xf0]  ;;  %v8139_v59 = vor.u32 %v9733_v48, %v8138_v47  ;;  %3514 = vmatpush.bf16.msra.mxu1 %v7883_v54  ;;  %v9554_v54 = vld [vmem:[%s10453_s15 + $0x94] sm:$0xf0] }
  0xe0   : > { %v7866_v52 = vld [vmem:[%s10451_s14 + $0x100] sm:$0xf]  ;;  %v9665_v53 = vld [vmem:[%s10451_s14 + $0x10c] sm:$0xf0]  ;;  %v7739_v3 = vor.u32 %v9633_v51, %v7738_v49  ;;  %3563 = vmatpush.bf16.msra.mxu2 %v8011_v55  ;;  %v9547_v51 = vld [vmem:[%s10453_s15 + $0x64] sm:$0xf] }
  0xe1   : > { %v7994_v56 = vld [vmem:[%s10451_s14 + $0x200] sm:$0xf]  ;;  %v9697_v57 = vld [vmem:[%s10451_s14 + $0x20c] sm:$0xf0]  ;;  %v7867_v7 = vor.u32 %v9665_v53, %v7866_v52  ;;  %3612 = vmatpush.bf16.msra.mxu3 %v8139_v59  ;;  %v7404_v52 = vld [vmem:[%s10453_s15 + $0x90] sm:$0xf0] }
  0xe2   : > { %v8122_v58 = vld [vmem:[%s10451_s14 + $0x300] sm:$0xf]  ;;  %v9729_v60 = vld [vmem:[%s10451_s14 + $0x30c] sm:$0xf0]  ;;  %v7995_v8 = vor.u32 %v9697_v57, %v7994_v56  ;;  %3466 = vmatpush.bf16.msra.mxu0 %v7739_v3  ;;  %v7410_v53 = vld [vmem:[%s10453_s15 + $0x68] sm:$0xf] }
  0xe3   : > { %v7354_v61 = vld [vmem:[%s10453_s15] sm:$0xf]  ;;  %v9541_v62 = vld [vmem:[%s10453_s15 + $0x2c] sm:$0xf0]  ;;  %v8123_v12 = vor.u32 %v9729_v60, %v8122_v58  ;;  %3515 = vmatpush.bf16.msra.mxu1 %v7867_v7  ;;  %v9548_v55 = vld [vmem:[%s10453_s15 + $0x6c] sm:$0xf]  ;;  %v10638_v58 = vor.u32 %v9547_v51, %v7404_v52  ;;  %v10640_v59 = vor.u32 %v9554_v54, %v7410_v53 }
  0xe4   : > { %v8618_v1 = vld [vmem:[%s10451_s14 + $0x6e0] sm:$0xf]  ;;  %v9853_v2 = vld [vmem:[%s10451_s14 + $0x6ec] sm:$0xf0]  ;;  %v10599_v17 = vor.u32 %v9541_v62, %v7354_v61  ;;  %3564 = vmatpush.bf16.msra.mxu2 %v7995_v8  ;;  %v7412_v56 = vld [vmem:[%s10453_s15 + $0x98] sm:$0xf0] }
  0xe5   : > { %v8746_v5 = vld [vmem:[%s10451_s14 + $0x7e0] sm:$0xf]  ;;  %v9885_v6 = vld [vmem:[%s10451_s14 + $0x7ec] sm:$0xf0]  ;;  %v8619_v13 = vor.u32 %v9853_v2, %v8618_v1  ;;  %3613 = vmatpush.bf16.msra.mxu3 %v8123_v12  ;;  %v10642_v60 = vor.u32 %v9548_v55, %v7412_v56  ;;  %v7452_v12 = vld [vmem:[%s10453_s15 + $0xf0] sm:$0xf0] }
  0xe6   : > { %v8362_v14 = vld [vmem:[%s10451_s14 + $0x4e0] sm:$0xf]  ;;  %v9789_v15 = vld [vmem:[%s10451_s14 + $0x4ec] sm:$0xf0]  ;;  %v8747_v18 = vor.u32 %v9885_v6, %v8746_v5  ;;  %3467 = vmatmul.bf16.vlgmr.msra.gmra.mxu0 %v10599_v17  ;;  %3516 = vmatmul.bf16.vlgmr.msra.gmra.mxu1 %v10604_v22 }
  0xe7   : > { %v8490_v16 = vld [vmem:[%s10451_s14 + $0x5e0] sm:$0xf]  ;;  %v9821_v19 = vld [vmem:[%s10451_s14 + $0x5ec] sm:$0xf0]  ;;  %v8363_v27 = vor.u32 %v9789_v15, %v8362_v14  ;;  %3565 = vmatmul.bf16.vlgmr.msra.gmra.mxu2 %v10606_v23  ;;  %v9566_v14 = vld [vmem:[%s10453_s15 + $0xf4] sm:$0xf0] }
  0xe8   : > { %v8602_v20 = vld [vmem:[%s10451_s14 + $0x6c0] sm:$0xf]  ;;  %v9849_v21 = vld [vmem:[%s10451_s14 + $0x6cc] sm:$0xf0]  ;;  %3753 = vmatpush.bf16.msrb.mxu2 %v8619_v13  ;;  %v8491_v28 = vor.u32 %v9821_v19, %v8490_v16  ;;  %3614 = vmatmul.bf16.vlgmr.msra.gmra.mxu3 %v10610_v26  ;;  %v7458_v13 = vld [vmem:[%s10453_s15 + $0xc8] sm:$0xf]  ;;  %v10666_v19 = vor.u32 %v9559_v11, %v7452_v12 }
  0xe9   : > { %v8730_v24 = vld [vmem:[%s10451_s14 + $0x7c0] sm:$0xf]  ;;  %v9881_v25 = vld [vmem:[%s10451_s14 + $0x7cc] sm:$0xf0]  ;;  %v8603_v29 = vor.u32 %v9849_v21, %v8602_v20  ;;  %3802 = vmatpush.bf16.msrb.mxu3 %v8747_v18  ;;  %3655 = vmatpush.bf16.msrb.mxu0 %v8363_v27  ;;  %v9560_v15 = vld [vmem:[%s10453_s15 + $0xcc] sm:$0xf]  ;;  %v10668_v20 = vor.u32 %v9566_v14, %v7458_v13 }
  0xea   : > { %v8346_v30 = vld [vmem:[%s10451_s14 + $0x4c0] sm:$0xf]  ;;  %v9785_v31 = vld [vmem:[%s10451_s14 + $0x4cc] sm:$0xf0]  ;;  %v8731_v32 = vor.u32 %v9881_v25, %v8730_v24  ;;  %3704 = vmatpush.bf16.msrb.mxu1 %v8491_v28  ;;  %v7460_v16 = vld [vmem:[%s10453_s15 + $0xf8] sm:$0xf0] }
  0xeb   : > { %v8474_v33 = vld [vmem:[%s10451_s14 + $0x5c0] sm:$0xf]  ;;  %v9817_v34 = vld [vmem:[%s10451_s14 + $0x5cc] sm:$0xf0]  ;;  %v8347_v35 = vor.u32 %v9785_v31, %v8346_v30  ;;  %v10670_v21 = vor.u32 %v9560_v15, %v7460_v16 }
  0xec   : > { %v8586_v36 = vld [vmem:[%s10451_s14 + $0x6a0] sm:$0xf]  ;;  %v9845_v37 = vld [vmem:[%s10451_s14 + $0x6ac] sm:$0xf0]  ;;  %3754 = vmatpush.bf16.msrb.mxu2 %v8603_v29  ;;  %v8475_v39 = vor.u32 %v9817_v34, %v8474_v33 }
  0xed   : > { %v8330_v38 = vld [vmem:[%s10451_s14 + $0x4a0] sm:$0xf]  ;;  %v8587_v40 = vor.u32 %v9845_v37, %v8586_v36  ;;  %v9781_v41 = vld [vmem:[%s10451_s14 + $0x4ac] sm:$0xf0]  ;;  %3803 = vmatpush.bf16.msrb.mxu3 %v8731_v32  ;;  %3656 = vmatpush.bf16.msrb.mxu0 %v8347_v35 }
  0xee   : > { %v8714_v42 = vld [vmem:[%s10451_s14 + $0x7a0] sm:$0xf]  ;;  %v9877_v43 = vld [vmem:[%s10451_s14 + $0x7ac] sm:$0xf0]  ;;  %v8331_v47 = vor.u32 %v9781_v41, %v8330_v38  ;;  %3705 = vmatpush.bf16.msrb.mxu1 %v8475_v39  ;;  %v9571_v39 = vld [vmem:[%s10453_s15 + $0x124] sm:$0xf] }
  0xef   : > { %v8715_v44 = vor.u32 %v9877_v43, %v8714_v42  ;;  %v8458_v45 = vld [vmem:[%s10451_s14 + $0x5a0] sm:$0xf]  ;;  %v9813_v46 = vld [vmem:[%s10451_s14 + $0x5ac] sm:$0xf0]  ;;  %v7506_v41 = vld [vmem:[%s10453_s15 + $0x128] sm:$0xf] }
  0xf0   : > { %3755 = vmatpush.bf16.msrb.mxu2 %v8587_v40  ;;  %v8459_v48 = vor.u32 %v9813_v46, %v8458_v45  ;;  %v7402_v49 = vld [vmem:[%s10453_s15 + $0x60] sm:$0xf]  ;;  %v9553_v50 = vld [vmem:[%s10453_s15 + $0x8c] sm:$0xf0]  ;;  %v7500_v40 = vld [vmem:[%s10453_s15 + $0x150] sm:$0xf0] }
  0xf1   : > { %3804 = vmatpush.bf16.msrb.mxu3 %v8715_v44  ;;  %3657 = vmatpush.bf16.msrb.mxu0 %v8331_v47  ;;  %v10636_v57 = vor.u32 %v9553_v50, %v7402_v49  ;;  %v8570_v61 = vld [vmem:[%s10451_s14 + $0x680] sm:$0xf]  ;;  %v9841_v62 = vld [vmem:[%s10451_s14 + $0x68c] sm:$0xf0]  ;;  %v9578_v42 = vld [vmem:[%s10453_s15 + $0x154] sm:$0xf0]  ;;  %v10694_v46 = vor.u32 %v9571_v39, %v7500_v40 }
  0xf2   : > { %3706 = vmatpush.bf16.msrb.mxu1 %v8459_v48  ;;  %v8314_v63 = vld [vmem:[%s10451_s14 + $0x480] sm:$0xf]  ;;  %v8571_v0 = vor.u32 %v9841_v62, %v8570_v61  ;;  %v9777_v1 = vld [vmem:[%s10451_s14 + $0x48c] sm:$0xf0]  ;;  %v9572_v43 = vld [vmem:[%s10453_s15 + $0x12c] sm:$0xf]  ;;  %v10696_v47 = vor.u32 %v9578_v42, %v7506_v41 }
  0xf3   : > { %v8698_v2 = vld [vmem:[%s10451_s14 + $0x780] sm:$0xf]  ;;  %v9873_v3 = vld [vmem:[%s10451_s14 + $0x78c] sm:$0xf0]  ;;  %v8315_v4 = vor.u32 %v9777_v1, %v8314_v63  ;;  %v7508_v44 = vld [vmem:[%s10453_s15 + $0x158] sm:$0xf0] }
  0xf4   : > { %v8699_v5 = vor.u32 %v9873_v3, %v8698_v2  ;;  %v8442_v6 = vld [vmem:[%s10451_s14 + $0x580] sm:$0xf]  ;;  %v9809_v7 = vld [vmem:[%s10451_s14 + $0x58c] sm:$0xf0]  ;;  %3756 = vmatpush.bf16.msrb.mxu2 %v8571_v0  ;;  %v10698_v48 = vor.u32 %v9572_v43, %v7508_v44  ;;  %v9583_v3 = vld [vmem:[%s10453_s15 + $0x184] sm:$0xf] }
  0xf5   : > { %v8443_v8 = vor.u32 %v9809_v7, %v8442_v6  ;;  %3658 = vmatpush.bf16.msrb.mxu0 %v8315_v4  ;;  %v7450_v9 = vld [vmem:[%s10453_s15 + $0xc0] sm:$0xf]  ;;  %v9565_v10 = vld [vmem:[%s10453_s15 + $0xec] sm:$0xf0]  ;;  %v7548_v4 = vld [vmem:[%s10453_s15 + $0x1b0] sm:$0xf0] }
  0xf6   : > { %3472 = vmatmul.bf16.gmra.mxu0 %v10636_v57  ;;  %3521 = vmatmul.bf16.gmra.mxu1 %v10638_v58  ;;  %v10664_v18 = vor.u32 %v9565_v10, %v7450_v9  ;;  %v8554_v24 = vld [vmem:[%s10451_s14 + $0x660] sm:$0xf]  ;;  %v9837_v25 = vld [vmem:[%s10451_s14 + $0x66c] sm:$0xf0]  ;;  %v9590_v6 = vld [vmem:[%s10453_s15 + $0x1b4] sm:$0xf0]  ;;  %v10722_v10 = vor.u32 %v9583_v3, %v7548_v4 }
  0xf7   : > { %3570 = vmatmul.bf16.gmra.mxu2 %v10640_v59  ;;  %3805 = vmatpush.bf16.msrb.mxu3 %v8699_v5  ;;  %v8298_v27 = vld [vmem:[%s10451_s14 + $0x460] sm:$0xf]  ;;  %v8555_v28 = vor.u32 %v9837_v25, %v8554_v24  ;;  %v9773_v29 = vld [vmem:[%s10451_s14 + $0x46c] sm:$0xf0]  ;;  %v7554_v5 = vld [vmem:[%s10453_s15 + $0x188] sm:$0xf] }
  0xf8   : > { %3619 = vmatmul.bf16.gmra.mxu3 %v10642_v60  ;;  %3707 = vmatpush.bf16.msrb.mxu1 %v8443_v8  ;;  %v8682_v30 = vld [vmem:[%s10451_s14 + $0x760] sm:$0xf]  ;;  %v9869_v31 = vld [vmem:[%s10451_s14 + $0x76c] sm:$0xf0]  ;;  %v8299_v32 = vor.u32 %v9773_v29, %v8298_v27  ;;  %v9584_v7 = vld [vmem:[%s10453_s15 + $0x18c] sm:$0xf]  ;;  %v10724_v11 = vor.u32 %v9590_v6, %v7554_v5 }
  0xf9   : > { %v8683_v33 = vor.u32 %v9869_v31, %v8682_v30  ;;  %v8426_v34 = vld [vmem:[%s10451_s14 + $0x560] sm:$0xf]  ;;  %v9805_v35 = vld [vmem:[%s10451_s14 + $0x56c] sm:$0xf0]  ;;  %3757 = vmatpush.bf16.msrb.mxu2 %v8555_v28  ;;  %v7556_v8 = vld [vmem:[%s10453_s15 + $0x1b8] sm:$0xf0] }
  0xfa   : > { %v8427_v36 = vor.u32 %v9805_v35, %v8426_v34  ;;  %3659 = vmatpush.bf16.msrb.mxu0 %v8299_v32  ;;  %v7498_v37 = vld [vmem:[%s10453_s15 + $0x120] sm:$0xf]  ;;  %v9577_v38 = vld [vmem:[%s10453_s15 + $0x14c] sm:$0xf0]  ;;  %v10726_v12 = vor.u32 %v9584_v7, %v7556_v8  ;;  %v9595_v35 = vld [vmem:[%s10453_s15 + $0x1e4] sm:$0xf] }
  0xfb   : > { %3806 = vmatpush.bf16.msrb.mxu3 %v8683_v33  ;;  %v10692_v45 = vor.u32 %v9577_v38, %v7498_v37  ;;  %v8538_v49 = vld [vmem:[%s10451_s14 + $0x640] sm:$0xf]  ;;  %v9833_v50 = vld [vmem:[%s10451_s14 + $0x64c] sm:$0xf0]  ;;  %v7602_v37 = vld [vmem:[%s10453_s15 + $0x1e8] sm:$0xf] }
  0xfc   : > { %3708 = vmatpush.bf16.msrb.mxu1 %v8427_v36  ;;  %v8282_v51 = vld [vmem:[%s10451_s14 + $0x440] sm:$0xf]  ;;  %v8539_v52 = vor.u32 %v9833_v50, %v8538_v49  ;;  %v9769_v53 = vld [vmem:[%s10451_s14 + $0x44c] sm:$0xf0]  ;;  %v7596_v36 = vld [vmem:[%s10453_s15 + $0x210] sm:$0xf0] }
  0xfd   : > { %v8666_v54 = vld [vmem:[%s10451_s14 + $0x740] sm:$0xf]  ;;  %v9865_v55 = vld [vmem:[%s10451_s14 + $0x74c] sm:$0xf0]  ;;  %v8283_v56 = vor.u32 %v9769_v53, %v8282_v51  ;;  %v9602_v38 = vld [vmem:[%s10453_s15 + $0x214] sm:$0xf0]  ;;  %v10750_v42 = vor.u32 %v9595_v35, %v7596_v36 }
  0xfe   : > { %v8667_v61 = vor.u32 %v9865_v55, %v8666_v54  ;;  %v8410_v62 = vld [vmem:[%s10451_s14 + $0x540] sm:$0xf]  ;;  %v9801_v63 = vld [vmem:[%s10451_s14 + $0x54c] sm:$0xf0]  ;;  %3758 = vmatpush.bf16.msrb.mxu2 %v8539_v52  ;;  %v9596_v39 = vld [vmem:[%s10453_s15 + $0x1ec] sm:$0xf]  ;;  %v10752_v43 = vor.u32 %v9602_v38, %v7602_v37 }
  0xff   : > { %v8411_v0 = vor.u32 %v9801_v63, %v8410_v62  ;;  %3660 = vmatpush.bf16.msrb.mxu0 %v8283_v56  ;;  %v7546_v1 = vld [vmem:[%s10453_s15 + $0x180] sm:$0xf]  ;;  %v9589_v2 = vld [vmem:[%s10453_s15 + $0x1ac] sm:$0xf0]  ;;  %v7604_v40 = vld [vmem:[%s10453_s15 + $0x218] sm:$0xf0] }
 0x100   : > { %3807 = vmatpush.bf16.msrb.mxu3 %v8667_v61  ;;  %v10720_v9 = vor.u32 %v9589_v2, %v7546_v1  ;;  %v8522_v13 = vld [vmem:[%s10451_s14 + $0x620] sm:$0xf]  ;;  %v9829_v14 = vld [vmem:[%s10451_s14 + $0x62c] sm:$0xf0]  ;;  %v10754_v44 = vor.u32 %v9596_v39, %v7604_v40  ;;  %v9607_v3 = vld [vmem:[%s10453_s15 + $0x244] sm:$0xf] }
 0x101   : > { %3709 = vmatpush.bf16.msrb.mxu1 %v8411_v0  ;;  %v8266_v15 = vld [vmem:[%s10451_s14 + $0x420] sm:$0xf]  ;;  %v8523_v16 = vor.u32 %v9829_v14, %v8522_v13  ;;  %v9765_v24 = vld [vmem:[%s10451_s14 + $0x42c] sm:$0xf0]  ;;  %v7644_v4 = vld [vmem:[%s10453_s15 + $0x270] sm:$0xf0] }
 0x102   : > { %v8650_v25 = vld [vmem:[%s10451_s14 + $0x720] sm:$0xf]  ;;  %v9861_v27 = vld [vmem:[%s10451_s14 + $0x72c] sm:$0xf0]  ;;  %v8267_v28 = vor.u32 %v9765_v24, %v8266_v15  ;;  %v7650_v5 = vld [vmem:[%s10453_s15 + $0x248] sm:$0xf]  ;;  %v10778_v14 = vor.u32 %v9607_v3, %v7644_v4 }
 0x103   : > { %v8651_v29 = vor.u32 %v9861_v27, %v8650_v25  ;;  %v8394_v30 = vld [vmem:[%s10451_s14 + $0x520] sm:$0xf]  ;;  %v9797_v31 = vld [vmem:[%s10451_s14 + $0x52c] sm:$0xf0]  ;;  %3759 = vmatpush.bf16.msrb.mxu2 %v8523_v16  ;;  %v9614_v6 = vld [vmem:[%s10453_s15 + $0x274] sm:$0xf0] }
 0x104   : > { %v8395_v32 = vor.u32 %v9797_v31, %v8394_v30  ;;  %3661 = vmatpush.bf16.msrb.mxu0 %v8267_v28  ;;  %v7594_v33 = vld [vmem:[%s10453_s15 + $0x1e0] sm:$0xf]  ;;  %v9601_v34 = vld [vmem:[%s10453_s15 + $0x20c] sm:$0xf0]  ;;  %v9608_v7 = vld [vmem:[%s10453_s15 + $0x24c] sm:$0xf]  ;;  %v10780_v15 = vor.u32 %v9614_v6, %v7650_v5 }
 0x105   : > { %3808 = vmatpush.bf16.msrb.mxu3 %v8651_v29  ;;  %v10748_v41 = vor.u32 %v9601_v34, %v7594_v33  ;;  %v8506_v49 = vld [vmem:[%s10451_s14 + $0x600] sm:$0xf]  ;;  %v9825_v50 = vld [vmem:[%s10451_s14 + $0x60c] sm:$0xf0]  ;;  %v7652_v8 = vld [vmem:[%s10453_s15 + $0x278] sm:$0xf0] }
 0x106   : > { %3477 = vmatmul.bf16.gmra.mxu0 %v10664_v18  ;;  %3526 = vmatmul.bf16.gmra.mxu1 %v10666_v19  ;;  %v8250_v51 = vld [vmem:[%s10451_s14 + $0x400] sm:$0xf]  ;;  %v8507_v52 = vor.u32 %v9825_v50, %v8506_v49  ;;  %v9761_v53 = vld [vmem:[%s10451_s14 + $0x40c] sm:$0xf0]  ;;  %v10782_v16 = vor.u32 %v9608_v7, %v7652_v8  ;;  %v9619_v39 = vld [vmem:[%s10453_s15 + $0x2a4] sm:$0xf] }
 0x107   : > { %3575 = vmatmul.bf16.gmra.mxu2 %v10668_v20  ;;  %3710 = vmatpush.bf16.msrb.mxu1 %v8395_v32  ;;  %v8634_v54 = vld [vmem:[%s10451_s14 + $0x700] sm:$0xf]  ;;  %v9857_v55 = vld [vmem:[%s10451_s14 + $0x70c] sm:$0xf0]  ;;  %v8251_v56 = vor.u32 %v9761_v53, %v8250_v51  ;;  %v7692_v40 = vld [vmem:[%s10453_s15 + $0x2d0] sm:$0xf0] }
 0x108   : > { %3624 = vmatmul.bf16.gmra.mxu3 %v10670_v21  ;;  %v8635_v61 = vor.u32 %v9857_v55, %v8634_v54  ;;  %v8378_v62 = vld [vmem:[%s10451_s14 + $0x500] sm:$0xf]  ;;  %v9793_v63 = vld [vmem:[%s10451_s14 + $0x50c] sm:$0xf0]  ;;  %3760 = vmatpush.bf16.msrb.mxu2 %v8507_v52  ;;  %13398 = vst [vmem:[#allocation9_spill] sm:$0xff] %v10782_v16  ;;  %v10806_v54 = vor.u32 %v9619_v39, %v7692_v40 }
 0x109   : > { %v8379_v0 = vor.u32 %v9793_v63, %v8378_v62  ;;  %3662 = vmatpush.bf16.msrb.mxu0 %v8251_v56  ;;  %v7642_v1 = vld [vmem:[%s10453_s15 + $0x240] sm:$0xf]  ;;  %v9613_v2 = vld [vmem:[%s10453_s15 + $0x26c] sm:$0xf0]  ;;  %v7698_v49 = vld [vmem:[%s10453_s15 + $0x2a8] sm:$0xf] }
 0x10a   : > { %3809 = vmatpush.bf16.msrb.mxu3 %v8635_v61  ;;  %v10776_v13 = vor.u32 %v9613_v2, %v7642_v1  ;;  %v9130_v24 = vld [vmem:[%s10451_s14 + $0xae0] sm:$0xf]  ;;  %v9981_v25 = vld [vmem:[%s10451_s14 + $0xaec] sm:$0xf0]  ;;  %v9626_v50 = vld [vmem:[%s10453_s15 + $0x2d4] sm:$0xf0] }
 0x10b   : > { %3711 = vmatpush.bf16.msrb.mxu1 %v8379_v0  ;;  %v8874_v27 = vld [vmem:[%s10451_s14 + $0x8e0] sm:$0xf]  ;;  %v9131_v28 = vor.u32 %v9981_v25, %v9130_v24  ;;  %v9917_v29 = vld [vmem:[%s10451_s14 + $0x8ec] sm:$0xf0]  ;;  %v9620_v51 = vld [vmem:[%s10453_s15 + $0x2ac] sm:$0xf]  ;;  %v10808_v55 = vor.u32 %v9626_v50, %v7698_v49 }
 0x10c   : > { %v9258_v30 = vld [vmem:[%s10451_s14 + $0xbe0] sm:$0xf]  ;;  %v10013_v31 = vld [vmem:[%s10451_s14 + $0xbec] sm:$0xf0]  ;;  %v8875_v32 = vor.u32 %v9917_v29, %v8874_v27  ;;  %v7700_v52 = vld [vmem:[%s10453_s15 + $0x2d8] sm:$0xf0] }
 0x10d   : > { %v9259_v33 = vor.u32 %v10013_v31, %v9258_v30  ;;  %3949 = vmatpush.bf16.msra.mxu2 %v9131_v28  ;;  %v9002_v34 = vld [vmem:[%s10451_s14 + $0x9e0] sm:$0xf]  ;;  %v9949_v35 = vld [vmem:[%s10451_s14 + $0x9ec] sm:$0xf0]  ;;  %13400 = vst [vmem:[#allocation11_spill] sm:$0xff] %v10806_v54  ;;  %v10810_v56 = vor.u32 %v9620_v51, %v7700_v52 }
 0x10e   : > { %3851 = vmatpush.bf16.msra.mxu0 %v8875_v32  ;;  %v9003_v36 = vor.u32 %v9949_v35, %v9002_v34  ;;  %v7690_v37 = vld [vmem:[%s10453_s15 + $0x2a0] sm:$0xf]  ;;  %v9625_v38 = vld [vmem:[%s10453_s15 + $0x2cc] sm:$0xf0]  ;;  %13401 = vst [vmem:[#allocation12_spill] sm:$0xff] %v10808_v55 }
 0x10f   : > { %3998 = vmatpush.bf16.msra.mxu3 %v9259_v33  ;;  %v10804_v53 = vor.u32 %v9625_v38, %v7690_v37  ;;  %13402 = vst [vmem:[#allocation13_spill] sm:$0xff] %v10810_v56  ;;  %v9114_v61 = vld [vmem:[%s10451_s14 + $0xac0] sm:$0xf]  ;;  %v9977_v62 = vld [vmem:[%s10451_s14 + $0xacc] sm:$0xf0] }
 0x110   : > { %3900 = vmatpush.bf16.msra.mxu1 %v9003_v36  ;;  %v8858_v63 = vld [vmem:[%s10451_s14 + $0x8c0] sm:$0xf]  ;;  %v9115_v0 = vor.u32 %v9977_v62, %v9114_v61  ;;  %v9913_v1 = vld [vmem:[%s10451_s14 + $0x8cc] sm:$0xf0]  ;;  %v9537_v27 = vld [vmem:[%s10453_s15 + $0x14] sm:$0xf] }
 0x111   : > { %13399 = vst [vmem:[#allocation10_spill] sm:$0xff] %v10804_v53  ;;  %v9242_v2 = vld [vmem:[%s10451_s14 + $0xbc0] sm:$0xf]  ;;  %v10009_v3 = vld [vmem:[%s10451_s14 + $0xbcc] sm:$0xf0]  ;;  %v8859_v4 = vor.u32 %v9913_v1, %v8858_v63 }
 0x112   : > { %v9243_v5 = vor.u32 %v10009_v3, %v9242_v2  ;;  %3950 = vmatpush.bf16.msra.mxu2 %v9115_v0  ;;  %v8986_v6 = vld [vmem:[%s10451_s14 + $0x9c0] sm:$0xf]  ;;  %v9945_v7 = vld [vmem:[%s10451_s14 + $0x9cc] sm:$0xf0]  ;;  %v7372_v28 = vld [vmem:[%s10453_s15 + $0x40] sm:$0xf0] }
 0x113   : > { %3852 = vmatpush.bf16.msra.mxu0 %v8859_v4  ;;  %v8987_v8 = vor.u32 %v9945_v7, %v8986_v6  ;;  %v7370_v24 = vld [vmem:[%s10453_s15 + $0x10] sm:$0xf]  ;;  %v9543_v25 = vld [vmem:[%s10453_s15 + $0x3c] sm:$0xf0]  ;;  %v7378_v29 = vld [vmem:[%s10453_s15 + $0x18] sm:$0xf]  ;;  %v10834_v35 = vor.u32 %v9537_v27, %v7372_v28 }
 0x114   : > { %3999 = vmatpush.bf16.msra.mxu3 %v9243_v5  ;;  %v9544_v30 = vld [vmem:[%s10453_s15 + $0x44] sm:$0xf0]  ;;  %v9538_v31 = vld [vmem:[%s10453_s15 + $0x1c] sm:$0xf]  ;;  %v7380_v32 = vld [vmem:[%s10453_s15 + $0x48] sm:$0xf0]  ;;  %v10832_v33 = vor.u32 %v9543_v25, %v7370_v24 }
 0x115   : > { %3901 = vmatpush.bf16.msra.mxu1 %v8987_v8  ;;  %13404 = vst [vmem:[#allocation15_spill] sm:$0xff] %v10834_v35  ;;  %v10836_v36 = vor.u32 %v9544_v30, %v7378_v29  ;;  %v10838_v38 = vor.u32 %v9538_v31, %v7380_v32  ;;  %v9098_v40 = vld [vmem:[%s10451_s14 + $0xaa0] sm:$0xf]  ;;  %v9973_v49 = vld [vmem:[%s10451_s14 + $0xaac] sm:$0xf0] }
 0x116   : > { %3482 = vmatmul.bf16.gmra.mxu0 %v10692_v45  ;;  %3531 = vmatmul.bf16.gmra.mxu1 %v10694_v46  ;;  %13403 = vst [vmem:[#allocation14_spill] sm:$0xff] %v10832_v33  ;;  %v8842_v50 = vld [vmem:[%s10451_s14 + $0x8a0] sm:$0xf]  ;;  %v9099_v51 = vor.u32 %v9973_v49, %v9098_v40  ;;  %v9909_v52 = vld [vmem:[%s10451_s14 + $0x8ac] sm:$0xf0] }
 0x117   : > { %3580 = vmatmul.bf16.gmra.mxu2 %v10696_v47  ;;  %13405 = vst [vmem:[#allocation16_spill] sm:$0xff] %v10836_v36  ;;  %v9226_v61 = vld [vmem:[%s10451_s14 + $0xba0] sm:$0xf]  ;;  %v10005_v62 = vld [vmem:[%s10451_s14 + $0xbac] sm:$0xf0]  ;;  %v8843_v0 = vor.u32 %v9909_v52, %v8842_v50 }
 0x118   : > { %3629 = vmatmul.bf16.gmra.mxu3 %v10698_v48  ;;  %13406 = vst [vmem:[#allocation17_spill] sm:$0xff] %v10838_v38  ;;  %v9227_v1 = vor.u32 %v10005_v62, %v9226_v61  ;;  %3951 = vmatpush.bf16.msra.mxu2 %v9099_v51  ;;  %v8970_v8 = vld [vmem:[%s10451_s14 + $0x9a0] sm:$0xf]  ;;  %v9941_v24 = vld [vmem:[%s10451_s14 + $0x9ac] sm:$0xf0] }
 0x119   : > { %3853 = vmatpush.bf16.msra.mxu0 %v8843_v0  ;;  %v8971_v25 = vor.u32 %v9941_v24, %v8970_v8  ;;  %v7418_v27 = vld [vmem:[%s10453_s15 + $0x70] sm:$0xf]  ;;  %v9555_v28 = vld [vmem:[%s10453_s15 + $0x9c] sm:$0xf0]  ;;  %v9549_v29 = vld [vmem:[%s10453_s15 + $0x74] sm:$0xf] }
 0x11a   : > { %4000 = vmatpush.bf16.msra.mxu3 %v9227_v1  ;;  %v7420_v30 = vld [vmem:[%s10453_s15 + $0xa0] sm:$0xf0]  ;;  %v7426_v31 = vld [vmem:[%s10453_s15 + $0x78] sm:$0xf]  ;;  %v9556_v32 = vld [vmem:[%s10453_s15 + $0xa4] sm:$0xf0]  ;;  %v10862_v40 = vor.u32 %v9555_v28, %v7418_v27 }
 0x11b   : > { %3902 = vmatpush.bf16.msra.mxu1 %v8971_v25  ;;  %v10864_v52 = vor.u32 %v9549_v29, %v7420_v30  ;;  %v10866_v61 = vor.u32 %v9556_v32, %v7426_v31  ;;  %v9210_v8 = vld [vmem:[%s10451_s14 + $0xb80] sm:$0xf]  ;;  %v10001_v24 = vld [vmem:[%s10451_s14 + $0xb8c] sm:$0xf0] }
 0x11c   : > { %13407 = vst [vmem:[#allocation18_spill] sm:$0xff] %v10862_v40  ;;  %v9211_v28 = vor.u32 %v10001_v24, %v9210_v8 }
 0x11d   : > { %13408 = vst [vmem:[#allocation19_spill] sm:$0xff] %v10864_v52 }
 0x11e   : > { %13409 = vst [vmem:[#allocation20_spill] sm:$0xff] %v10866_v61  ;;  %4001 = vmatpush.bf16.msra.mxu3 %v9211_v28 }
 0x126   : > { %3487 = vmatmul.bf16.gmra.mxu0 %v10720_v9  ;;  %3536 = vmatmul.bf16.gmra.mxu1 %v10722_v10 }
 0x127   : > { %3585 = vmatmul.bf16.gmra.mxu2 %v10724_v11 }
 0x128   : > { %3634 = vmatmul.bf16.gmra.mxu3 %v10726_v12 }
 0x136   : > { %3492 = vmatmul.bf16.gmra.mxu0 %v10748_v41  ;;  %3541 = vmatmul.bf16.gmra.mxu1 %v10750_v42 }
 0x137   : > { %3590 = vmatmul.bf16.gmra.mxu2 %v10752_v43 }
 0x138   : > { %3639 = vmatmul.bf16.gmra.mxu3 %v10754_v44 }
 0x146   : > { %3497 = vmatmul.bf16.gmra.mxu0 %v10776_v13  ;;  %3546 = vmatmul.bf16.gmra.mxu1 %v10778_v14 }
 0x147   : > { %3595 = vmatmul.bf16.gmra.mxu2 %v10780_v15 }
 0x148   : > { %3644 = vmatmul.bf16.gmra.mxu3 %v10782_v16 }
 0x156   : > { %3502 = vmatmul.bf16.gmra.mxu0 %v10804_v53  ;;  %3551 = vmatmul.bf16.gmra.mxu1 %v10806_v54 }
 0x157   : > { %3600 = vmatmul.bf16.gmra.mxu2 %v10808_v55 }
 0x158   : > { %3649 = vmatmul.bf16.gmra.mxu3 %v10810_v56 }
 0x163   : > { %v3468_v34 = vpop.f32.mrf.mxu0  ;;  %v3517_v37 = vpop.f32.mrf.mxu1 }
 0x164   : > { %v3518_v39 = vadd.f32 %v3517_v37, %v3468_v34  ;;  %v9550_v34 = vld [vmem:[%s10453_s15 + $0x7c] sm:$0xf]  ;;  %v7428_v37 = vld [vmem:[%s10453_s15 + $0xa8] sm:$0xf0] }
 0x166   : > { %3663 = vmatmul.bf16.vlgmr.msrb.gmra.mxu0 %v10832_v33  ;;  %3712 = vmatmul.bf16.vlgmr.msrb.gmra.mxu1 %v10834_v35 }
 0x167   : > { %3761 = vmatmul.bf16.vlgmr.msrb.gmra.mxu2 %v10836_v36 }
 0x168   : > { %3810 = vmatmul.bf16.vlgmr.msrb.gmra.mxu3 %v10838_v38 }
 0x16a   : > { %v3566_v63 = vpop.f32.mrf.mxu2 }
 0x16b   : > { %v3567_v2 = vadd.f32 %v3566_v63, %v3518_v39  ;;  %v3615_v3 = vpop.f32.mrf.mxu3  ;;  %v3470_v4 = vpop.f32.mrf.mxu0  ;;  %v10868_v63 = vor.u32 %v9550_v34, %v7428_v37 }
 0x16c   : > { %v3519_v5 = vpop.f32.mrf.mxu1 }
 0x16d   : > { %v10850_v6 = vadd.f32 %v3615_v3, %v3567_v2  ;;  %v3520_v7 = vadd.f32 %v3519_v5, %v3470_v4  ;;  %13410 = vst [vmem:[#allocation21_spill] sm:$0xff] %v10868_v63  ;;  %v9082_v2 = vld [vmem:[%s10451_s14 + $0xa80] sm:$0xf]  ;;  %v9969_v3 = vld [vmem:[%s10451_s14 + $0xa8c] sm:$0xf0] }
 0x16e   : > { %v8826_v4 = vld [vmem:[%s10451_s14 + $0x880] sm:$0xf]  ;;  %v9083_v5 = vor.u32 %v9969_v3, %v9082_v2  ;;  %v9561_v2 = vld [vmem:[%s10453_s15 + $0xd4] sm:$0xf]  ;;  %v7474_v3 = vld [vmem:[%s10453_s15 + $0xd8] sm:$0xf] }
 0x170   : > { %3952 = vmatpush.bf16.msra.mxu2 %v9083_v5  ;;  %v7476_v5 = vld [vmem:[%s10453_s15 + $0x108] sm:$0xf0] }
 0x172   : > { %v3568_v39 = vpop.f32.mrf.mxu2 }
 0x173   : > { %v3569_v49 = vadd.f32 %v3568_v39, %v3520_v7  ;;  %v3617_v50 = vpop.f32.mrf.mxu3  ;;  %v3473_v51 = vpop.f32.mrf.mxu0  ;;  %v9905_v7 = vld [vmem:[%s10451_s14 + $0x88c] sm:$0xf0]  ;;  %v8954_v39 = vld [vmem:[%s10451_s14 + $0x980] sm:$0xf] }
 0x174   : > { %v3522_v62 = vpop.f32.mrf.mxu1  ;;  %v8827_v27 = vor.u32 %v9905_v7, %v8826_v4  ;;  %v9568_v4 = vld [vmem:[%s10453_s15 + $0x104] sm:$0xf0]  ;;  %v9562_v7 = vld [vmem:[%s10453_s15 + $0xdc] sm:$0xf] }
 0x175   : > { %v10870_v0 = vadd.f32 %v3617_v50, %v3569_v49  ;;  %v3523_v1 = vadd.f32 %v3522_v62, %v3473_v51  ;;  %v9937_v49 = vld [vmem:[%s10451_s14 + $0x98c] sm:$0xf0]  ;;  %v9567_v62 = vld [vmem:[%s10453_s15 + $0xfc] sm:$0xf0] }
 0x176   : > { %3668 = vmatmul.bf16.gmra.mxu0 %v10862_v40  ;;  %3717 = vmatmul.bf16.gmra.mxu1 %v10864_v52  ;;  %v8955_v50 = vor.u32 %v9937_v49, %v8954_v39  ;;  %v7466_v51 = vld [vmem:[%s10453_s15 + $0xd0] sm:$0xf] }
 0x177   : > { %3766 = vmatmul.bf16.gmra.mxu2 %v10866_v61  ;;  %3854 = vmatpush.bf16.msra.mxu0 %v8827_v27  ;;  %v10894_v24 = vor.u32 %v9567_v62, %v7466_v51  ;;  %v8810_v51 = vld [vmem:[%s10451_s14 + $0x860] sm:$0xf] }
 0x178   : > { %3815 = vmatmul.bf16.gmra.mxu3 %v10868_v63  ;;  %3903 = vmatpush.bf16.msra.mxu1 %v8955_v50  ;;  %v9965_v50 = vld [vmem:[%s10451_s14 + $0xa6c] sm:$0xf0] }
 0x179   : > { %13411 = vst [vmem:[#allocation22_spill] sm:$0xff] %v10894_v24 }
 0x17a   : > { %v3571_v25 = vpop.f32.mrf.mxu2 }
 0x17b   : > { %v3572_v29 = vadd.f32 %v3571_v25, %v3523_v1  ;;  %v3620_v30 = vpop.f32.mrf.mxu3  ;;  %v3475_v31 = vpop.f32.mrf.mxu0  ;;  %v7468_v1 = vld [vmem:[%s10453_s15 + $0x100] sm:$0xf0] }
 0x17c   : > { %v3524_v32 = vpop.f32.mrf.mxu1 }
 0x17d   : > { %v10882_v34 = vadd.f32 %v3620_v30, %v3572_v29  ;;  %v3525_v37 = vadd.f32 %v3524_v32, %v3475_v31  ;;  %v10896_v29 = vor.u32 %v9561_v2, %v7468_v1  ;;  %v10898_v30 = vor.u32 %v9568_v4, %v7474_v3  ;;  %v9901_v2 = vld [vmem:[%s10451_s14 + $0x86c] sm:$0xf0]  ;;  %v9194_v1 = vld [vmem:[%s10451_s14 + $0xb60] sm:$0xf] }
 0x17e   : > { %v10900_v32 = vor.u32 %v9562_v7, %v7476_v5  ;;  %v9997_v3 = vld [vmem:[%s10451_s14 + $0xb6c] sm:$0xf0]  ;;  %v8811_v7 = vor.u32 %v9901_v2, %v8810_v51 }
 0x17f   : > { %13412 = vst [vmem:[#allocation23_spill] sm:$0xff] %v10896_v29  ;;  %v9195_v5 = vor.u32 %v9997_v3, %v9194_v1  ;;  %v7514_v2 = vld [vmem:[%s10453_s15 + $0x130] sm:$0xf]  ;;  %v9579_v1 = vld [vmem:[%s10453_s15 + $0x15c] sm:$0xf0] }
 0x180   : > { %13413 = vst [vmem:[#allocation24_spill] sm:$0xff] %v10898_v30  ;;  %3855 = vmatpush.bf16.msra.mxu0 %v8811_v7  ;;  %v9573_v3 = vld [vmem:[%s10453_s15 + $0x134] sm:$0xf]  ;;  %v10926_v7 = vor.u32 %v9579_v1, %v7514_v2  ;;  %v8794_v2 = vld [vmem:[%s10451_s14 + $0x840] sm:$0xf] }
 0x181   : > { %13414 = vst [vmem:[#allocation25_spill] sm:$0xff] %v10900_v32  ;;  %4002 = vmatpush.bf16.msra.mxu3 %v9195_v5 }
 0x182   : > { %v3573_v8 = vpop.f32.mrf.mxu2  ;;  %13415 = vst [vmem:[#allocation26_spill] sm:$0xff] %v10926_v7 }
 0x183   : > { %v3574_v25 = vadd.f32 %v3573_v8, %v3525_v37  ;;  %v3622_v27 = vpop.f32.mrf.mxu3  ;;  %v3478_v28 = vpop.f32.mrf.mxu0  ;;  %v9066_v37 = vld [vmem:[%s10451_s14 + $0xa60] sm:$0xf] }
 0x184   : > { %v3527_v31 = vpop.f32.mrf.mxu1  ;;  %v9067_v62 = vor.u32 %v9965_v50, %v9066_v37  ;;  %v8938_v50 = vld [vmem:[%s10451_s14 + $0x960] sm:$0xf] }
 0x185   : > { %v10902_v39 = vadd.f32 %v3622_v27, %v3574_v25  ;;  %v3528_v49 = vadd.f32 %v3527_v31, %v3478_v28 }
 0x186   : > { %3673 = vmatmul.bf16.gmra.mxu0 %v10894_v24  ;;  %3722 = vmatmul.bf16.gmra.mxu1 %v10896_v29  ;;  %v9574_v29 = vld [vmem:[%s10453_s15 + $0x13c] sm:$0xf] }
 0x187   : > { %3771 = vmatmul.bf16.gmra.mxu2 %v10898_v30  ;;  %v9580_v30 = vld [vmem:[%s10453_s15 + $0x164] sm:$0xf0] }
 0x188   : > { %3820 = vmatmul.bf16.gmra.mxu3 %v10900_v32  ;;  %3953 = vmatpush.bf16.msra.mxu2 %v9067_v62  ;;  %v9933_v32 = vld [vmem:[%s10451_s14 + $0x96c] sm:$0xf0]  ;;  %v7524_v62 = vld [vmem:[%s10453_s15 + $0x168] sm:$0xf0] }
 0x189   : > { %v8939_v51 = vor.u32 %v9933_v32, %v8938_v50  ;;  %v10932_v50 = vor.u32 %v9574_v29, %v7524_v62  ;;  %v9178_v29 = vld [vmem:[%s10451_s14 + $0xb40] sm:$0xf] }
 0x18a   : > { %v3576_v4 = vpop.f32.mrf.mxu2 }
 0x18b   : > { %v3577_v8 = vadd.f32 %v3576_v4, %v3528_v49  ;;  %v3625_v25 = vpop.f32.mrf.mxu3  ;;  %v3480_v27 = vpop.f32.mrf.mxu0  ;;  %v7516_v49 = vld [vmem:[%s10453_s15 + $0x160] sm:$0xf0]  ;;  %v7522_v4 = vld [vmem:[%s10453_s15 + $0x138] sm:$0xf]  ;;  %3904 = vmatpush.bf16.msra.mxu1 %v8939_v51  ;;  %13418 = vst [vmem:[#allocation29_spill] sm:$0xff] %v10932_v50 }
 0x18c   : > { %v3529_v28 = vpop.f32.mrf.mxu1  ;;  %v10928_v32 = vor.u32 %v9573_v3, %v7516_v49  ;;  %v9993_v3 = vld [vmem:[%s10451_s14 + $0xb4c] sm:$0xf0] }
 0x18d   : > { %v10914_v31 = vadd.f32 %v3625_v25, %v3577_v8  ;;  %v3530_v37 = vadd.f32 %v3529_v28, %v3480_v27  ;;  %v10930_v27 = vor.u32 %v9580_v30, %v7522_v4  ;;  %v9897_v30 = vld [vmem:[%s10451_s14 + $0x84c] sm:$0xf0]  ;;  %v9179_v62 = vor.u32 %v9993_v3, %v9178_v29  ;;  %v9591_v29 = vld [vmem:[%s10453_s15 + $0x1bc] sm:$0xf0]  ;;  %v9585_v3 = vld [vmem:[%s10453_s15 + $0x194] sm:$0xf] }
 0x18e   : > { %13416 = vst [vmem:[#allocation27_spill] sm:$0xff] %v10928_v32  ;;  %v8795_v4 = vor.u32 %v9897_v30, %v8794_v2  ;;  %v7562_v30 = vld [vmem:[%s10453_s15 + $0x190] sm:$0xf] }
 0x18f   : > { %13417 = vst [vmem:[#allocation28_spill] sm:$0xff] %v10930_v27  ;;  %4003 = vmatpush.bf16.msra.mxu3 %v9179_v62 }
 0x190   : > { %3856 = vmatpush.bf16.msra.mxu0 %v8795_v4  ;;  %v10958_v4 = vor.u32 %v9591_v29, %v7562_v30  ;;  %v8778_v30 = vld [vmem:[%s10451_s14 + $0x820] sm:$0xf] }
 0x192   : > { %v3578_v24 = vpop.f32.mrf.mxu2  ;;  %13419 = vst [vmem:[#allocation30_spill] sm:$0xff] %v10958_v4 }
 0x193   : > { %v3579_v5 = vadd.f32 %v3578_v24, %v3530_v37  ;;  %v3627_v8 = vpop.f32.mrf.mxu3  ;;  %v3483_v25 = vpop.f32.mrf.mxu0  ;;  %v9050_v24 = vld [vmem:[%s10451_s14 + $0xa40] sm:$0xf]  ;;  %v9961_v37 = vld [vmem:[%s10451_s14 + $0xa4c] sm:$0xf0] }
 0x194   : > { %v3532_v28 = vpop.f32.mrf.mxu1  ;;  %v9051_v1 = vor.u32 %v9961_v37, %v9050_v24 }
 0x195   : > { %v10934_v51 = vadd.f32 %v3627_v8, %v3579_v5  ;;  %v3533_v63 = vadd.f32 %v3532_v28, %v3483_v25 }
 0x196   : > { %3678 = vmatmul.bf16.gmra.mxu0 %v10926_v7  ;;  %3727 = vmatmul.bf16.gmra.mxu1 %v10928_v32  ;;  %v9592_v32 = vld [vmem:[%s10453_s15 + $0x1c4] sm:$0xf0]  ;;  %v9586_v7 = vld [vmem:[%s10453_s15 + $0x19c] sm:$0xf] }
 0x197   : > { %3776 = vmatmul.bf16.gmra.mxu2 %v10930_v27  ;;  %v9929_v27 = vld [vmem:[%s10451_s14 + $0x94c] sm:$0xf0] }
 0x198   : > { %3825 = vmatmul.bf16.gmra.mxu3 %v10932_v50  ;;  %3954 = vmatpush.bf16.msra.mxu2 %v9051_v1  ;;  %v8922_v50 = vld [vmem:[%s10451_s14 + $0x940] sm:$0xf]  ;;  %v7572_v1 = vld [vmem:[%s10453_s15 + $0x1c8] sm:$0xf0] }
 0x199   : > { %v8923_v2 = vor.u32 %v9929_v27, %v8922_v50 }
 0x19a   : > { %v3581_v49 = vpop.f32.mrf.mxu2 }
 0x19b   : > { %v3582_v5 = vadd.f32 %v3581_v49, %v3533_v63  ;;  %v3630_v8 = vpop.f32.mrf.mxu3  ;;  %v3485_v25 = vpop.f32.mrf.mxu0  ;;  %v7564_v63 = vld [vmem:[%s10453_s15 + $0x1c0] sm:$0xf0]  ;;  %v7570_v49 = vld [vmem:[%s10453_s15 + $0x198] sm:$0xf]  ;;  %3905 = vmatpush.bf16.msra.mxu1 %v8923_v2 }
 0x19c   : > { %v3534_v28 = vpop.f32.mrf.mxu1  ;;  %v10960_v27 = vor.u32 %v9585_v3, %v7564_v63  ;;  %v10962_v50 = vor.u32 %v9592_v32, %v7570_v49  ;;  %v9893_v32 = vld [vmem:[%s10451_s14 + $0x82c] sm:$0xf0] }
 0x19d   : > { %v10946_v24 = vadd.f32 %v3630_v8, %v3582_v5  ;;  %v3535_v37 = vadd.f32 %v3534_v28, %v3485_v25  ;;  %v10964_v28 = vor.u32 %v9586_v7, %v7572_v1  ;;  %v9162_v7 = vld [vmem:[%s10451_s14 + $0xb20] sm:$0xf]  ;;  %v9989_v3 = vld [vmem:[%s10451_s14 + $0xb2c] sm:$0xf0]  ;;  %v8779_v49 = vor.u32 %v9893_v32, %v8778_v30 }
 0x19e   : > { %13420 = vst [vmem:[#allocation31_spill] sm:$0xff] %v10960_v27  ;;  %v9163_v1 = vor.u32 %v9989_v3, %v9162_v7  ;;  %v7610_v32 = vld [vmem:[%s10453_s15 + $0x1f0] sm:$0xf]  ;;  %v9603_v7 = vld [vmem:[%s10453_s15 + $0x21c] sm:$0xf0] }
 0x19f   : > { %13421 = vst [vmem:[#allocation32_spill] sm:$0xff] %v10962_v50  ;;  %3857 = vmatpush.bf16.msra.mxu0 %v8779_v49  ;;  %v9597_v3 = vld [vmem:[%s10453_s15 + $0x1f4] sm:$0xf]  ;;  %v10990_v49 = vor.u32 %v9603_v7, %v7610_v32  ;;  %v8762_v32 = vld [vmem:[%s10451_s14 + $0x800] sm:$0xf] }
 0x1a0   : > { %13422 = vst [vmem:[#allocation33_spill] sm:$0xff] %v10964_v28  ;;  %4004 = vmatpush.bf16.msra.mxu3 %v9163_v1 }
 0x1a1   : > { %13423 = vst [vmem:[#allocation34_spill] sm:$0xff] %v10990_v49 }
 0x1a2   : > { %v3583_v61 = vpop.f32.mrf.mxu2 }
 0x1a3   : > { %v3584_v62 = vadd.f32 %v3583_v61, %v3535_v37  ;;  %v3632_v5 = vpop.f32.mrf.mxu3  ;;  %v3488_v8 = vpop.f32.mrf.mxu0  ;;  %v9034_v61 = vld [vmem:[%s10451_s14 + $0xa20] sm:$0xf]  ;;  %v9957_v37 = vld [vmem:[%s10451_s14 + $0xa2c] sm:$0xf0] }
 0x1a4   : > { %v3537_v25 = vpop.f32.mrf.mxu1  ;;  %v9035_v29 = vor.u32 %v9957_v37, %v9034_v61 }
 0x1a5   : > { %v10966_v2 = vadd.f32 %v3632_v5, %v3584_v62  ;;  %v3538_v52 = vadd.f32 %v3537_v25, %v3488_v8 }
 0x1a6   : > { %3683 = vmatmul.bf16.gmra.mxu0 %v10958_v4  ;;  %3732 = vmatmul.bf16.gmra.mxu1 %v10960_v27  ;;  %v9604_v27 = vld [vmem:[%s10453_s15 + $0x224] sm:$0xf0]  ;;  %v9598_v4 = vld [vmem:[%s10453_s15 + $0x1fc] sm:$0xf] }
 0x1a7   : > { %3781 = vmatmul.bf16.gmra.mxu2 %v10962_v50  ;;  %v9925_v50 = vld [vmem:[%s10451_s14 + $0x92c] sm:$0xf0] }
 0x1a8   : > { %3830 = vmatmul.bf16.gmra.mxu3 %v10964_v28  ;;  %3955 = vmatpush.bf16.msra.mxu2 %v9035_v29  ;;  %v8906_v28 = vld [vmem:[%s10451_s14 + $0x920] sm:$0xf]  ;;  %v7620_v29 = vld [vmem:[%s10453_s15 + $0x228] sm:$0xf0] }
 0x1a9   : > { %v8907_v30 = vor.u32 %v9925_v50, %v8906_v28 }
 0x1aa   : > { %v3586_v63 = vpop.f32.mrf.mxu2 }
 0x1ab   : > { %v3587_v62 = vadd.f32 %v3586_v63, %v3538_v52  ;;  %v3635_v5 = vpop.f32.mrf.mxu3  ;;  %v3490_v8 = vpop.f32.mrf.mxu0  ;;  %v7612_v52 = vld [vmem:[%s10453_s15 + $0x220] sm:$0xf0]  ;;  %v7618_v63 = vld [vmem:[%s10453_s15 + $0x1f8] sm:$0xf]  ;;  %3906 = vmatpush.bf16.msra.mxu1 %v8907_v30 }
 0x1ac   : > { %v3539_v25 = vpop.f32.mrf.mxu1  ;;  %v10992_v50 = vor.u32 %v9597_v3, %v7612_v52  ;;  %v10994_v28 = vor.u32 %v9604_v27, %v7618_v63  ;;  %v9889_v27 = vld [vmem:[%s10451_s14 + $0x80c] sm:$0xf0] }
 0x1ad   : > { %v10978_v61 = vadd.f32 %v3635_v5, %v3587_v62  ;;  %v3540_v37 = vadd.f32 %v3539_v25, %v3490_v8  ;;  %v10996_v25 = vor.u32 %v9598_v4, %v7620_v29  ;;  %v9146_v4 = vld [vmem:[%s10451_s14 + $0xb00] sm:$0xf]  ;;  %v9985_v3 = vld [vmem:[%s10451_s14 + $0xb0c] sm:$0xf0]  ;;  %v8763_v63 = vor.u32 %v9889_v27, %v8762_v32 }
 0x1ae   : > { %13424 = vst [vmem:[#allocation35_spill] sm:$0xff] %v10992_v50  ;;  %v9147_v29 = vor.u32 %v9985_v3, %v9146_v4  ;;  %v7658_v27 = vld [vmem:[%s10453_s15 + $0x250] sm:$0xf]  ;;  %v9615_v4 = vld [vmem:[%s10453_s15 + $0x27c] sm:$0xf0] }
 0x1af   : > { %13425 = vst [vmem:[#allocation36_spill] sm:$0xff] %v10994_v28  ;;  %3858 = vmatpush.bf16.msra.mxu0 %v8763_v63  ;;  %v9609_v3 = vld [vmem:[%s10453_s15 + $0x254] sm:$0xf]  ;;  %v11022_v63 = vor.u32 %v9615_v4, %v7658_v27  ;;  %v9659_v27 = vld [vmem:[%s10451_s14 + $0xe4] sm:$0xf] }
 0x1b0   : > { %13426 = vst [vmem:[#allocation37_spill] sm:$0xff] %v10996_v25  ;;  %4005 = vmatpush.bf16.msra.mxu3 %v9147_v29 }
 0x1b1   : > { %13427 = vst [vmem:[#allocation38_spill] sm:$0xff] %v11022_v63 }
 0x1b2   : > { %v3588_v40 = vpop.f32.mrf.mxu2 }
 0x1b3   : > { %v3589_v1 = vadd.f32 %v3588_v40, %v3540_v37  ;;  %v3637_v62 = vpop.f32.mrf.mxu3  ;;  %v3493_v5 = vpop.f32.mrf.mxu0  ;;  %v9018_v40 = vld [vmem:[%s10451_s14 + $0xa00] sm:$0xf]  ;;  %v9953_v37 = vld [vmem:[%s10451_s14 + $0xa0c] sm:$0xf0] }
 0x1b4   : > { %v3542_v8 = vpop.f32.mrf.mxu1  ;;  %v9019_v7 = vor.u32 %v9953_v37, %v9018_v40 }
 0x1b5   : > { %v10998_v30 = vadd.f32 %v3637_v62, %v3589_v1  ;;  %v3543_v38 = vadd.f32 %v3542_v8, %v3493_v5 }
 0x1b6   : > { %3688 = vmatmul.bf16.gmra.mxu0 %v10990_v49  ;;  %3737 = vmatmul.bf16.gmra.mxu1 %v10992_v50  ;;  %v9616_v50 = vld [vmem:[%s10453_s15 + $0x284] sm:$0xf0]  ;;  %v9610_v49 = vld [vmem:[%s10453_s15 + $0x25c] sm:$0xf] }
 0x1b7   : > { %3786 = vmatmul.bf16.gmra.mxu2 %v10994_v28  ;;  %v9921_v28 = vld [vmem:[%s10451_s14 + $0x90c] sm:$0xf0] }
 0x1b8   : > { %3835 = vmatmul.bf16.gmra.mxu3 %v10996_v25  ;;  %3956 = vmatpush.bf16.msra.mxu2 %v9019_v7  ;;  %v8890_v25 = vld [vmem:[%s10451_s14 + $0x900] sm:$0xf]  ;;  %v7668_v7 = vld [vmem:[%s10453_s15 + $0x288] sm:$0xf0] }
 0x1b9   : > { %v8891_v32 = vor.u32 %v9921_v28, %v8890_v25 }
 0x1ba   : > { %v3591_v52 = vpop.f32.mrf.mxu2 }
 0x1bb   : > { %v3592_v1 = vadd.f32 %v3591_v52, %v3543_v38  ;;  %v3640_v62 = vpop.f32.mrf.mxu3  ;;  %v3495_v5 = vpop.f32.mrf.mxu0  ;;  %v7660_v38 = vld [vmem:[%s10453_s15 + $0x280] sm:$0xf0]  ;;  %v7666_v52 = vld [vmem:[%s10453_s15 + $0x258] sm:$0xf]  ;;  %3907 = vmatpush.bf16.msra.mxu1 %v8891_v32 }
 0x1bc   : > { %v3544_v8 = vpop.f32.mrf.mxu1  ;;  %v11024_v28 = vor.u32 %v9609_v3, %v7660_v38  ;;  %v11026_v25 = vor.u32 %v9616_v50, %v7666_v52  ;;  %v7852_v50 = vld [vmem:[%s10451_s14 + $0xf0] sm:$0xf0] }
 0x1bd   : > { %v11010_v40 = vadd.f32 %v3640_v62, %v3592_v1  ;;  %v3545_v37 = vadd.f32 %v3544_v8, %v3495_v5  ;;  %v11028_v8 = vor.u32 %v9610_v49, %v7668_v7  ;;  %v9755_v49 = vld [vmem:[%s10451_s14 + $0x3e4] sm:$0xf]  ;;  %v8236_v3 = vld [vmem:[%s10451_s14 + $0x3f0] sm:$0xf0]  ;;  %v7855_v52 = vor.u32 %v9659_v27, %v7852_v50  ;;  %v7706_v50 = vld [vmem:[%s10453_s15 + $0x2b0] sm:$0xf] }
 0x1be   : > { %13428 = vst [vmem:[#allocation39_spill] sm:$0xff] %v11024_v28  ;;  %v8239_v7 = vor.u32 %v9755_v49, %v8236_v3  ;;  %v9627_v49 = vld [vmem:[%s10453_s15 + $0x2dc] sm:$0xf0]  ;;  %v9621_v3 = vld [vmem:[%s10453_s15 + $0x2b4] sm:$0xf] }
 0x1bf   : > { %13429 = vst [vmem:[#allocation40_spill] sm:$0xff] %v11026_v25  ;;  %4047 = vmatpush.bf16.msrb.mxu0 %v7855_v52  ;;  %v11054_v52 = vor.u32 %v9627_v49, %v7706_v50  ;;  %v9655_v50 = vld [vmem:[%s10451_s14 + $0xc4] sm:$0xf] }
 0x1c0   : > { %13430 = vst [vmem:[#allocation41_spill] sm:$0xff] %v11028_v8  ;;  %4194 = vmatpush.bf16.msrb.mxu3 %v8239_v7 }
 0x1c1   : > { %13431 = vst [vmem:[#allocation42_spill] sm:$0xff] %v11054_v52 }
 0x1c2   : > { %v3593_v36 = vpop.f32.mrf.mxu2 }
 0x1c3   : > { %v3594_v29 = vadd.f32 %v3593_v36, %v3545_v37  ;;  %v3642_v1 = vpop.f32.mrf.mxu3  ;;  %v3498_v62 = vpop.f32.mrf.mxu0  ;;  %v9723_v36 = vld [vmem:[%s10451_s14 + $0x2e4] sm:$0xf]  ;;  %v8108_v37 = vld [vmem:[%s10451_s14 + $0x2f0] sm:$0xf0] }
 0x1c4   : > { %v3547_v5 = vpop.f32.mrf.mxu1  ;;  %v8111_v4 = vor.u32 %v9723_v36, %v8108_v37 }
 0x1c5   : > { %v11030_v32 = vadd.f32 %v3642_v1, %v3594_v29  ;;  %v3548_v35 = vadd.f32 %v3547_v5, %v3498_v62 }
 0x1c6   : > { %3693 = vmatmul.bf16.gmra.mxu0 %v11022_v63  ;;  %3742 = vmatmul.bf16.gmra.mxu1 %v11024_v28  ;;  %v9628_v28 = vld [vmem:[%s10453_s15 + $0x2e4] sm:$0xf0]  ;;  %v9622_v63 = vld [vmem:[%s10453_s15 + $0x2bc] sm:$0xf] }
 0x1c7   : > { %3791 = vmatmul.bf16.gmra.mxu2 %v11026_v25  ;;  %v7980_v25 = vld [vmem:[%s10451_s14 + $0x1f0] sm:$0xf0] }
 0x1c8   : > { %3840 = vmatmul.bf16.gmra.mxu3 %v11028_v8  ;;  %4145 = vmatpush.bf16.msrb.mxu2 %v8111_v4  ;;  %v9691_v8 = vld [vmem:[%s10451_s14 + $0x1e4] sm:$0xf]  ;;  %v7716_v4 = vld [vmem:[%s10453_s15 + $0x2e8] sm:$0xf0] }
 0x1c9   : > { %v7983_v27 = vor.u32 %v9691_v8, %v7980_v25 }
 0x1ca   : > { %v3596_v38 = vpop.f32.mrf.mxu2 }
 0x1cb   : > { %v3597_v29 = vadd.f32 %v3596_v38, %v3548_v35  ;;  %v3645_v1 = vpop.f32.mrf.mxu3  ;;  %v3500_v62 = vpop.f32.mrf.mxu0  ;;  %v7708_v35 = vld [vmem:[%s10453_s15 + $0x2e0] sm:$0xf0]  ;;  %v7714_v38 = vld [vmem:[%s10453_s15 + $0x2b8] sm:$0xf]  ;;  %4096 = vmatpush.bf16.msrb.mxu1 %v7983_v27 }
 0x1cc   : > { %v3549_v5 = vpop.f32.mrf.mxu1  ;;  %v11056_v25 = vor.u32 %v9621_v3, %v7708_v35  ;;  %v11058_v8 = vor.u32 %v9628_v28, %v7714_v38  ;;  %v7836_v28 = vld [vmem:[%s10451_s14 + $0xd0] sm:$0xf0] }
 0x1cd   : > { %v11042_v36 = vadd.f32 %v3645_v1, %v3597_v29  ;;  %v3550_v37 = vadd.f32 %v3549_v5, %v3500_v62  ;;  %v11060_v5 = vor.u32 %v9622_v63, %v7716_v4  ;;  %v9751_v63 = vld [vmem:[%s10451_s14 + $0x3c4] sm:$0xf]  ;;  %v8220_v3 = vld [vmem:[%s10451_s14 + $0x3d0] sm:$0xf0]  ;;  %v7839_v38 = vor.u32 %v9655_v50, %v7836_v28  ;;  %v7386_v28 = vld [vmem:[%s10453_s15 + $0x20] sm:$0xf] }
 0x1ce   : > { %13432 = vst [vmem:[#allocation43_spill] sm:$0xff] %v11056_v25  ;;  %v8223_v4 = vor.u32 %v9751_v63, %v8220_v3  ;;  %v9545_v63 = vld [vmem:[%s10453_s15 + $0x4c] sm:$0xf0]  ;;  %v9539_v3 = vld [vmem:[%s10453_s15 + $0x24] sm:$0xf] }
 0x1cf   : > { %13433 = vst [vmem:[#allocation44_spill] sm:$0xff] %v11058_v8  ;;  %4048 = vmatpush.bf16.msrb.mxu0 %v7839_v38  ;;  %v11086_v54 = vor.u32 %v9545_v63, %v7386_v28 }
 0x1d0   : > { %13434 = vst [vmem:[#allocation45_spill] sm:$0xff] %v11060_v5  ;;  %4195 = vmatpush.bf16.msrb.mxu3 %v8223_v4 }
 0x1d1   : > { %13435 = vst [vmem:[#allocation46_spill] sm:$0xff] %v11086_v54 }
 0x1d2   : > { %v3598_v33 = vpop.f32.mrf.mxu2 }
 0x1d3   : > { %v3599_v7 = vadd.f32 %v3598_v33, %v3550_v37  ;;  %v3647_v29 = vpop.f32.mrf.mxu3  ;;  %v3503_v1 = vpop.f32.mrf.mxu0  ;;  %v9719_v33 = vld [vmem:[%s10451_s14 + $0x2c4] sm:$0xf]  ;;  %v8092_v37 = vld [vmem:[%s10451_s14 + $0x2d0] sm:$0xf0] }
 0x1d4   : > { %v3552_v62 = vpop.f32.mrf.mxu1  ;;  %v8095_v49 = vor.u32 %v9719_v33, %v8092_v37 }
 0x1d5   : > { %v11062_v27 = vadd.f32 %v3647_v29, %v3599_v7  ;;  %v3553_v56 = vadd.f32 %v3552_v62, %v3503_v1 }
 0x1d6   : > { %3698 = vmatmul.bf16.gmra.mxu0 %v11054_v52  ;;  %3747 = vmatmul.bf16.gmra.mxu1 %v11056_v25  ;;  %v9546_v25 = vld [vmem:[%s10453_s15 + $0x54] sm:$0xf0]  ;;  %v9540_v52 = vld [vmem:[%s10453_s15 + $0x2c] sm:$0xf] }
 0x1d7   : > { %3796 = vmatmul.bf16.gmra.mxu2 %v11058_v8  ;;  %v7964_v8 = vld [vmem:[%s10451_s14 + $0x1d0] sm:$0xf0] }
 0x1d8   : > { %3845 = vmatmul.bf16.gmra.mxu3 %v11060_v5  ;;  %4146 = vmatpush.bf16.msrb.mxu2 %v8095_v49  ;;  %v9687_v5 = vld [vmem:[%s10451_s14 + $0x1c4] sm:$0xf]  ;;  %v7396_v49 = vld [vmem:[%s10453_s15 + $0x58] sm:$0xf0] }
 0x1d9   : > { %v7967_v50 = vor.u32 %v9687_v5, %v7964_v8 }
 0x1da   : > { %v3601_v35 = vpop.f32.mrf.mxu2 }
 0x1db   : > { %v3602_v7 = vadd.f32 %v3601_v35, %v3553_v56  ;;  %v3650_v29 = vpop.f32.mrf.mxu3  ;;  %v3505_v1 = vpop.f32.mrf.mxu0  ;;  %v7388_v56 = vld [vmem:[%s10453_s15 + $0x50] sm:$0xf0]  ;;  %v7394_v35 = vld [vmem:[%s10453_s15 + $0x28] sm:$0xf]  ;;  %4097 = vmatpush.bf16.msrb.mxu1 %v7967_v50 }
 0x1dc   : > { %v3554_v62 = vpop.f32.mrf.mxu1  ;;  %v11088_v8 = vor.u32 %v9539_v3, %v7388_v56  ;;  %v11090_v5 = vor.u32 %v9546_v25, %v7394_v35  ;;  %v8076_v25 = vld [vmem:[%s10451_s14 + $0x2b0] sm:$0xf0] }
 0x1dd   : > { %v11074_v33 = vadd.f32 %v3650_v29, %v3602_v7  ;;  %v3555_v37 = vadd.f32 %v3554_v62, %v3505_v1  ;;  %v11093_v62 = vor.u32 %v9540_v52, %v7396_v49  ;;  %v9747_v52 = vld [vmem:[%s10451_s14 + $0x3a4] sm:$0xf]  ;;  %v8204_v3 = vld [vmem:[%s10451_s14 + $0x3b0] sm:$0xf0] }
 0x1de   : > { %13436 = vst [vmem:[#allocation47_spill] sm:$0xff] %v11088_v8  ;;  %v8207_v49 = vor.u32 %v9747_v52, %v8204_v3  ;;  %v9557_v3 = vld [vmem:[%s10453_s15 + $0xac] sm:$0xf0] }
 0x1df   : > { %13437 = vst [vmem:[#allocation48_spill] sm:$0xff] %v11090_v5 }
 0x1e0   : > { %13438 = vst [vmem:[#allocation49_spill] sm:$0xff] %v11093_v62  ;;  %4196 = vmatpush.bf16.msrb.mxu3 %v8207_v49 }
 0x1e2   : > { %v3603_v55 = vpop.f32.mrf.mxu2 }
 0x1e3   : > { %v3604_v38 = vadd.f32 %v3603_v55, %v3555_v37  ;;  %v3652_v4 = vpop.f32.mrf.mxu3  ;;  %v3664_v7 = vpop.f32.mrf.mxu0  ;;  %v9715_v55 = vld [vmem:[%s10451_s14 + $0x2a4] sm:$0xf] }
 0x1e4   : > { %v3665_v29 = vadd.f32 %v3664_v7, %v10850_v6  ;;  %v3713_v1 = vpop.f32.mrf.mxu1  ;;  %v9651_v37 = vld [vmem:[%s10451_s14 + $0xa4] sm:$0xf]  ;;  %v8079_v63 = vor.u32 %v9715_v55, %v8076_v25  ;;  %v7820_v6 = vld [vmem:[%s10451_s14 + $0xb0] sm:$0xf0] }
 0x1e5   : > { %v11095_v50 = vadd.f32 %v3652_v4, %v3604_v38  ;;  %v7823_v35 = vor.u32 %v9651_v37, %v7820_v6  ;;  %v9683_v25 = vld [vmem:[%s10451_s14 + $0x1a4] sm:$0xf]  ;;  %v7948_v37 = vld [vmem:[%s10451_s14 + $0x1b0] sm:$0xf0] }
 0x1e6   : > { %v3714_v28 = vadd.f32 %v3713_v1, %v3665_v29  ;;  %3859 = vmatmul.bf16.vlgmr.msra.gmra.mxu0 %v11086_v54  ;;  %3908 = vmatmul.bf16.vlgmr.msra.gmra.mxu1 %v11088_v8  ;;  %v7951_v52 = vor.u32 %v9683_v25, %v7948_v37  ;;  %v9558_v8 = vld [vmem:[%s10453_s15 + $0xb4] sm:$0xf0] }
 0x1e7   : > { %3957 = vmatmul.bf16.vlgmr.msra.gmra.mxu2 %v11090_v5  ;;  %4049 = vmatpush.bf16.msrb.mxu0 %v7823_v35  ;;  %v7442_v5 = vld [vmem:[%s10453_s15 + $0x88] sm:$0xf] }
 0x1e8   : > { %4006 = vmatmul.bf16.vlgmr.msra.gmra.mxu3 %v11093_v62  ;;  %4147 = vmatpush.bf16.msrb.mxu2 %v8079_v63  ;;  %v7436_v62 = vld [vmem:[%s10453_s15 + $0xb0] sm:$0xf0]  ;;  %v9552_v63 = vld [vmem:[%s10453_s15 + $0x8c] sm:$0xf] }
 0x1e9   : > { %4098 = vmatpush.bf16.msrb.mxu1 %v7951_v52 }
 0x1ea   : > { %v3762_v56 = vpop.f32.mrf.mxu2 }
 0x1eb   : > { %v3763_v38 = vadd.f32 %v3762_v56, %v3714_v28  ;;  %v3811_v4 = vpop.f32.mrf.mxu3  ;;  %v3666_v7 = vpop.f32.mrf.mxu0  ;;  %v7434_v28 = vld [vmem:[%s10453_s15 + $0x80] sm:$0xf]  ;;  %v9551_v56 = vld [vmem:[%s10453_s15 + $0x84] sm:$0xf] }
 0x1ec   : > { %v3667_v29 = vadd.f32 %v3666_v7, %v10870_v0  ;;  %v3715_v1 = vpop.f32.mrf.mxu1  ;;  %v7444_v0 = vld [vmem:[%s10453_s15 + $0xb8] sm:$0xf0]  ;;  %v11120_v54 = vor.u32 %v9557_v3, %v7434_v28  ;;  %v9743_v3 = vld [vmem:[%s10451_s14 + $0x384] sm:$0xf] }
 0x1ed   : > { %v11108_v55 = vadd.f32 %v3811_v4, %v3763_v38  ;;  %v11122_v4 = vor.u32 %v9551_v56, %v7436_v62  ;;  %v11127_v37 = vor.u32 %v9552_v63, %v7444_v0  ;;  %v9711_v62 = vld [vmem:[%s10451_s14 + $0x284] sm:$0xf]  ;;  %v8188_v56 = vld [vmem:[%s10451_s14 + $0x390] sm:$0xf0] }
 0x1ee   : > { %v3716_v6 = vadd.f32 %v3715_v1, %v3667_v29  ;;  %13439 = vst [vmem:[#allocation50_spill] sm:$0xff] %v11120_v54  ;;  %v11124_v29 = vor.u32 %v9558_v8, %v7442_v5  ;;  %v8060_v8 = vld [vmem:[%s10451_s14 + $0x290] sm:$0xf0]  ;;  %v9647_v5 = vld [vmem:[%s10451_s14 + $0x84] sm:$0xf] }
 0x1ef   : > { %13440 = vst [vmem:[#allocation51_spill] sm:$0xff] %v11122_v4 }
 0x1f0   : > { %13441 = vst [vmem:[#allocation52_spill] sm:$0xff] %v11124_v29 }
 0x1f1   : > { %13442 = vst [vmem:[#allocation53_spill] sm:$0xff] %v11127_v37 }
 0x1f2   : > { %v3764_v7 = vpop.f32.mrf.mxu2 }
 0x1f3   : > { %v3765_v35 = vadd.f32 %v3764_v7, %v3716_v6  ;;  %v3813_v49 = vpop.f32.mrf.mxu3  ;;  %v3669_v38 = vpop.f32.mrf.mxu0  ;;  %v8063_v6 = vor.u32 %v9711_v62, %v8060_v8  ;;  %v8191_v7 = vor.u32 %v9743_v3, %v8188_v56  ;;  %v9679_v8 = vld [vmem:[%s10451_s14 + $0x184] sm:$0xf]  ;;  %v9569_v56 = vld [vmem:[%s10453_s15 + $0x10c] sm:$0xf0] }
 0x1f4   : > { %v3670_v1 = vadd.f32 %v3669_v38, %v10882_v34  ;;  %v3718_v25 = vpop.f32.mrf.mxu1  ;;  %v7804_v34 = vld [vmem:[%s10451_s14 + $0x90] sm:$0xf0] }
 0x1f5   : > { %v11129_v52 = vadd.f32 %v3813_v49, %v3765_v35  ;;  %v7807_v0 = vor.u32 %v9647_v5, %v7804_v34  ;;  %4148 = vmatpush.bf16.msrb.mxu2 %v8063_v6  ;;  %4197 = vmatpush.bf16.msrb.mxu3 %v8191_v7  ;;  %v7932_v5 = vld [vmem:[%s10451_s14 + $0x190] sm:$0xf0]  ;;  %v9564_v6 = vld [vmem:[%s10453_s15 + $0xec] sm:$0xf] }
 0x1f6   : > { %v3719_v28 = vadd.f32 %v3718_v25, %v3670_v1  ;;  %3864 = vmatmul.bf16.gmra.mxu0 %v11120_v54  ;;  %3913 = vmatmul.bf16.gmra.mxu1 %v11122_v4  ;;  %v7935_v3 = vor.u32 %v9679_v8, %v7932_v5  ;;  %v9570_v4 = vld [vmem:[%s10453_s15 + $0x114] sm:$0xf0] }
 0x1f7   : > { %3962 = vmatmul.bf16.gmra.mxu2 %v11124_v29  ;;  %4050 = vmatpush.bf16.msrb.mxu0 %v7807_v0  ;;  %v7490_v29 = vld [vmem:[%s10453_s15 + $0xe8] sm:$0xf] }
 0x1f8   : > { %4011 = vmatmul.bf16.gmra.mxu3 %v11127_v37  ;;  %v7484_v37 = vld [vmem:[%s10453_s15 + $0x110] sm:$0xf0]  ;;  %4099 = vmatpush.bf16.msrb.mxu1 %v7935_v3 }
 0x1fa   : > { %v3767_v63 = vpop.f32.mrf.mxu2 }
 0x1fb   : > { %v3768_v35 = vadd.f32 %v3767_v63, %v3719_v28  ;;  %v3816_v49 = vpop.f32.mrf.mxu3  ;;  %v3671_v38 = vpop.f32.mrf.mxu0  ;;  %v7482_v28 = vld [vmem:[%s10453_s15 + $0xe0] sm:$0xf]  ;;  %v9563_v63 = vld [vmem:[%s10453_s15 + $0xe4] sm:$0xf] }
 0x1fc   : > { %v3672_v1 = vadd.f32 %v3671_v38, %v10902_v39  ;;  %v3720_v25 = vpop.f32.mrf.mxu1  ;;  %v7492_v39 = vld [vmem:[%s10453_s15 + $0x118] sm:$0xf0]  ;;  %v11154_v54 = vor.u32 %v9569_v56, %v7482_v28  ;;  %v9739_v56 = vld [vmem:[%s10451_s14 + $0x364] sm:$0xf] }
 0x1fd   : > { %v11142_v62 = vadd.f32 %v3816_v49, %v3768_v35  ;;  %v11156_v49 = vor.u32 %v9563_v63, %v7484_v37  ;;  %v11161_v5 = vor.u32 %v9564_v6, %v7492_v39  ;;  %v9707_v37 = vld [vmem:[%s10451_s14 + $0x264] sm:$0xf]  ;;  %v8172_v63 = vld [vmem:[%s10451_s14 + $0x370] sm:$0xf0] }
 0x1fe   : > { %v3721_v34 = vadd.f32 %v3720_v25, %v3672_v1  ;;  %13443 = vst [vmem:[#allocation54_spill] sm:$0xff] %v11154_v54  ;;  %v11158_v1 = vor.u32 %v9570_v4, %v7490_v29  ;;  %v8044_v4 = vld [vmem:[%s10451_s14 + $0x270] sm:$0xf0]  ;;  %v9643_v29 = vld [vmem:[%s10451_s14 + $0x64] sm:$0xf] }
 0x1ff   : > { %13444 = vst [vmem:[#allocation55_spill] sm:$0xff] %v11156_v49 }
 0x200   : > { %13445 = vst [vmem:[#allocation56_spill] sm:$0xff] %v11158_v1 }
 0x201   : > { %13446 = vst [vmem:[#allocation57_spill] sm:$0xff] %v11161_v5 }
 0x202   : > { %v3769_v38 = vpop.f32.mrf.mxu2 }
 0x203   : > { %v3770_v0 = vadd.f32 %v3769_v38, %v3721_v34  ;;  %v3818_v7 = vpop.f32.mrf.mxu3  ;;  %v3674_v35 = vpop.f32.mrf.mxu0  ;;  %v8047_v34 = vor.u32 %v9707_v37, %v8044_v4  ;;  %v8175_v38 = vor.u32 %v9739_v56, %v8172_v63  ;;  %v9675_v4 = vld [vmem:[%s10451_s14 + $0x164] sm:$0xf]  ;;  %v9581_v63 = vld [vmem:[%s10453_s15 + $0x16c] sm:$0xf0] }
 0x204   : > { %v3675_v25 = vadd.f32 %v3674_v35, %v10914_v31  ;;  %v3723_v8 = vpop.f32.mrf.mxu1  ;;  %v7788_v31 = vld [vmem:[%s10451_s14 + $0x70] sm:$0xf0] }
 0x205   : > { %v11163_v3 = vadd.f32 %v3818_v7, %v3770_v0  ;;  %v7791_v39 = vor.u32 %v9643_v29, %v7788_v31  ;;  %4149 = vmatpush.bf16.msrb.mxu2 %v8047_v34  ;;  %4198 = vmatpush.bf16.msrb.mxu3 %v8175_v38  ;;  %v7916_v29 = vld [vmem:[%s10451_s14 + $0x170] sm:$0xf0]  ;;  %v9576_v34 = vld [vmem:[%s10453_s15 + $0x14c] sm:$0xf] }
 0x206   : > { %v3724_v28 = vadd.f32 %v3723_v8, %v3675_v25  ;;  %3869 = vmatmul.bf16.gmra.mxu0 %v11154_v54  ;;  %3918 = vmatmul.bf16.gmra.mxu1 %v11156_v49  ;;  %v7919_v56 = vor.u32 %v9675_v4, %v7916_v29  ;;  %v9582_v49 = vld [vmem:[%s10453_s15 + $0x174] sm:$0xf0] }
 0x207   : > { %3967 = vmatmul.bf16.gmra.mxu2 %v11158_v1  ;;  %4051 = vmatpush.bf16.msrb.mxu0 %v7791_v39  ;;  %v7538_v1 = vld [vmem:[%s10453_s15 + $0x148] sm:$0xf] }
 0x208   : > { %4016 = vmatmul.bf16.gmra.mxu3 %v11161_v5  ;;  %v7532_v5 = vld [vmem:[%s10453_s15 + $0x170] sm:$0xf0]  ;;  %4100 = vmatpush.bf16.msrb.mxu1 %v7919_v56 }
 0x20a   : > { %v3772_v6 = vpop.f32.mrf.mxu2 }
 0x20b   : > { %v3773_v0 = vadd.f32 %v3772_v6, %v3724_v28  ;;  %v3821_v7 = vpop.f32.mrf.mxu3  ;;  %v3676_v35 = vpop.f32.mrf.mxu0  ;;  %v7530_v28 = vld [vmem:[%s10453_s15 + $0x140] sm:$0xf]  ;;  %v9575_v6 = vld [vmem:[%s10453_s15 + $0x144] sm:$0xf] }
 0x20c   : > { %v3677_v25 = vadd.f32 %v3676_v35, %v10934_v51  ;;  %v3725_v8 = vpop.f32.mrf.mxu1  ;;  %v7540_v51 = vld [vmem:[%s10453_s15 + $0x178] sm:$0xf0]  ;;  %v11188_v54 = vor.u32 %v9581_v63, %v7530_v28  ;;  %v9735_v63 = vld [vmem:[%s10451_s14 + $0x344] sm:$0xf] }
 0x20d   : > { %v11176_v37 = vadd.f32 %v3821_v7, %v3773_v0  ;;  %v11190_v7 = vor.u32 %v9575_v6, %v7532_v5  ;;  %v11195_v29 = vor.u32 %v9576_v34, %v7540_v51  ;;  %v9703_v5 = vld [vmem:[%s10451_s14 + $0x244] sm:$0xf]  ;;  %v8156_v6 = vld [vmem:[%s10451_s14 + $0x350] sm:$0xf0] }
 0x20e   : > { %v3726_v31 = vadd.f32 %v3725_v8, %v3677_v25  ;;  %13447 = vst [vmem:[#allocation58_spill] sm:$0xff] %v11188_v54  ;;  %v11192_v25 = vor.u32 %v9582_v49, %v7538_v1  ;;  %v8028_v49 = vld [vmem:[%s10451_s14 + $0x250] sm:$0xf0]  ;;  %v9639_v1 = vld [vmem:[%s10451_s14 + $0x44] sm:$0xf] }
 0x20f   : > { %13448 = vst [vmem:[#allocation59_spill] sm:$0xff] %v11190_v7 }
 0x210   : > { %13449 = vst [vmem:[#allocation60_spill] sm:$0xff] %v11192_v25 }
 0x211   : > { %13450 = vst [vmem:[#allocation61_spill] sm:$0xff] %v11195_v29 }
 0x212   : > { %v3774_v35 = vpop.f32.mrf.mxu2 }
 0x213   : > { %v3775_v39 = vadd.f32 %v3774_v35, %v3726_v31  ;;  %v3823_v38 = vpop.f32.mrf.mxu3  ;;  %v3679_v0 = vpop.f32.mrf.mxu0  ;;  %v8031_v31 = vor.u32 %v9703_v5, %v8028_v49  ;;  %v8159_v35 = vor.u32 %v9735_v63, %v8156_v6  ;;  %v9671_v49 = vld [vmem:[%s10451_s14 + $0x144] sm:$0xf]  ;;  %v9593_v6 = vld [vmem:[%s10453_s15 + $0x1cc] sm:$0xf0] }
 0x214   : > { %v3680_v8 = vadd.f32 %v3679_v0, %v10946_v24  ;;  %v3728_v4 = vpop.f32.mrf.mxu1  ;;  %v7772_v24 = vld [vmem:[%s10451_s14 + $0x50] sm:$0xf0] }
 0x215   : > { %v11197_v56 = vadd.f32 %v3823_v38, %v3775_v39  ;;  %v7775_v51 = vor.u32 %v9639_v1, %v7772_v24  ;;  %4150 = vmatpush.bf16.msrb.mxu2 %v8031_v31  ;;  %4199 = vmatpush.bf16.msrb.mxu3 %v8159_v35  ;;  %v7900_v1 = vld [vmem:[%s10451_s14 + $0x150] sm:$0xf0]  ;;  %v9588_v31 = vld [vmem:[%s10453_s15 + $0x1ac] sm:$0xf] }
 0x216   : > { %v3729_v28 = vadd.f32 %v3728_v4, %v3680_v8  ;;  %3874 = vmatmul.bf16.gmra.mxu0 %v11188_v54  ;;  %3923 = vmatmul.bf16.gmra.mxu1 %v11190_v7  ;;  %v7903_v63 = vor.u32 %v9671_v49, %v7900_v1  ;;  %v9594_v7 = vld [vmem:[%s10453_s15 + $0x1d4] sm:$0xf0] }
 0x217   : > { %3972 = vmatmul.bf16.gmra.mxu2 %v11192_v25  ;;  %4052 = vmatpush.bf16.msrb.mxu0 %v7775_v51  ;;  %v7586_v25 = vld [vmem:[%s10453_s15 + $0x1a8] sm:$0xf] }
 0x218   : > { %4021 = vmatmul.bf16.gmra.mxu3 %v11195_v29  ;;  %v7580_v29 = vld [vmem:[%s10453_s15 + $0x1d0] sm:$0xf0]  ;;  %4101 = vmatpush.bf16.msrb.mxu1 %v7903_v63 }
 0x21a   : > { %v3777_v34 = vpop.f32.mrf.mxu2 }
 0x21b   : > { %v3778_v39 = vadd.f32 %v3777_v34, %v3729_v28  ;;  %v3826_v38 = vpop.f32.mrf.mxu3  ;;  %v3681_v0 = vpop.f32.mrf.mxu0  ;;  %v7578_v28 = vld [vmem:[%s10453_s15 + $0x1a0] sm:$0xf]  ;;  %v9587_v34 = vld [vmem:[%s10453_s15 + $0x1a4] sm:$0xf] }
 0x21c   : > { %v3682_v8 = vadd.f32 %v3681_v0, %v10966_v2  ;;  %v3730_v4 = vpop.f32.mrf.mxu1  ;;  %v7588_v2 = vld [vmem:[%s10453_s15 + $0x1d8] sm:$0xf0]  ;;  %v11222_v54 = vor.u32 %v9593_v6, %v7578_v28  ;;  %v9731_v6 = vld [vmem:[%s10451_s14 + $0x324] sm:$0xf] }
 0x21d   : > { %v11210_v5 = vadd.f32 %v3826_v38, %v3778_v39  ;;  %v11224_v38 = vor.u32 %v9587_v34, %v7580_v29  ;;  %v11229_v1 = vor.u32 %v9588_v31, %v7588_v2  ;;  %v9699_v29 = vld [vmem:[%s10451_s14 + $0x224] sm:$0xf]  ;;  %v8140_v34 = vld [vmem:[%s10451_s14 + $0x330] sm:$0xf0] }
 0x21e   : > { %v3731_v24 = vadd.f32 %v3730_v4, %v3682_v8  ;;  %13451 = vst [vmem:[#allocation62_spill] sm:$0xff] %v11222_v54  ;;  %v11226_v8 = vor.u32 %v9594_v7, %v7586_v25  ;;  %v8012_v7 = vld [vmem:[%s10451_s14 + $0x230] sm:$0xf0]  ;;  %v9635_v25 = vld [vmem:[%s10451_s14 + $0x24] sm:$0xf] }
 0x21f   : > { %13452 = vst [vmem:[#allocation63_spill] sm:$0xff] %v11224_v38 }
 0x220   : > { %13453 = vst [vmem:[#allocation64_spill] sm:$0xff] %v11226_v8 }
 0x221   : > { %13454 = vst [vmem:[#allocation65_spill] sm:$0xff] %v11229_v1 }
 0x222   : > { %v3779_v0 = vpop.f32.mrf.mxu2 }
 0x223   : > { %v3780_v51 = vadd.f32 %v3779_v0, %v3731_v24  ;;  %v3828_v35 = vpop.f32.mrf.mxu3  ;;  %v3684_v39 = vpop.f32.mrf.mxu0  ;;  %v8015_v24 = vor.u32 %v9699_v29, %v8012_v7  ;;  %v8143_v0 = vor.u32 %v9731_v6, %v8140_v34  ;;  %v9667_v7 = vld [vmem:[%s10451_s14 + $0x124] sm:$0xf]  ;;  %v9605_v34 = vld [vmem:[%s10453_s15 + $0x22c] sm:$0xf0] }
 0x224   : > { %v3685_v4 = vadd.f32 %v3684_v39, %v10978_v61  ;;  %v3733_v49 = vpop.f32.mrf.mxu1  ;;  %v7756_v61 = vld [vmem:[%s10451_s14 + $0x30] sm:$0xf0] }
 0x225   : > { %v11231_v63 = vadd.f32 %v3828_v35, %v3780_v51  ;;  %v7759_v2 = vor.u32 %v9635_v25, %v7756_v61  ;;  %4151 = vmatpush.bf16.msrb.mxu2 %v8015_v24  ;;  %4200 = vmatpush.bf16.msrb.mxu3 %v8143_v0  ;;  %v7884_v25 = vld [vmem:[%s10451_s14 + $0x130] sm:$0xf0]  ;;  %v9600_v24 = vld [vmem:[%s10453_s15 + $0x20c] sm:$0xf] }
 0x226   : > { %v3734_v28 = vadd.f32 %v3733_v49, %v3685_v4  ;;  %3879 = vmatmul.bf16.gmra.mxu0 %v11222_v54  ;;  %3928 = vmatmul.bf16.gmra.mxu1 %v11224_v38  ;;  %v7887_v6 = vor.u32 %v9667_v7, %v7884_v25  ;;  %v9606_v38 = vld [vmem:[%s10453_s15 + $0x234] sm:$0xf0] }
 0x227   : > { %3977 = vmatmul.bf16.gmra.mxu2 %v11226_v8  ;;  %4053 = vmatpush.bf16.msrb.mxu0 %v7759_v2  ;;  %v7634_v8 = vld [vmem:[%s10453_s15 + $0x208] sm:$0xf] }
 0x228   : > { %4026 = vmatmul.bf16.gmra.mxu3 %v11229_v1  ;;  %v7628_v1 = vld [vmem:[%s10453_s15 + $0x230] sm:$0xf0]  ;;  %4102 = vmatpush.bf16.msrb.mxu1 %v7887_v6 }
 0x22a   : > { %v3782_v31 = vpop.f32.mrf.mxu2 }
 0x22b   : > { %v3783_v51 = vadd.f32 %v3782_v31, %v3734_v28  ;;  %v3831_v35 = vpop.f32.mrf.mxu3  ;;  %v3686_v39 = vpop.f32.mrf.mxu0  ;;  %v7626_v28 = vld [vmem:[%s10453_s15 + $0x200] sm:$0xf]  ;;  %v9599_v31 = vld [vmem:[%s10453_s15 + $0x204] sm:$0xf] }
 0x22c   : > { %v3687_v4 = vadd.f32 %v3686_v39, %v10998_v30  ;;  %v3735_v49 = vpop.f32.mrf.mxu1  ;;  %v7636_v30 = vld [vmem:[%s10453_s15 + $0x238] sm:$0xf0]  ;;  %v11256_v54 = vor.u32 %v9605_v34, %v7626_v28  ;;  %v9727_v34 = vld [vmem:[%s10451_s14 + $0x304] sm:$0xf] }
 0x22d   : > { %v11244_v29 = vadd.f32 %v3831_v35, %v3783_v51  ;;  %v11258_v35 = vor.u32 %v9599_v31, %v7628_v1  ;;  %v11263_v25 = vor.u32 %v9600_v24, %v7636_v30  ;;  %v9695_v1 = vld [vmem:[%s10451_s14 + $0x204] sm:$0xf]  ;;  %v8124_v31 = vld [vmem:[%s10451_s14 + $0x310] sm:$0xf0] }
 0x22e   : > { %v3736_v61 = vadd.f32 %v3735_v49, %v3687_v4  ;;  %13455 = vst [vmem:[#allocation66_spill] sm:$0xff] %v11256_v54  ;;  %v11260_v4 = vor.u32 %v9606_v38, %v7634_v8  ;;  %v7996_v38 = vld [vmem:[%s10451_s14 + $0x210] sm:$0xf0]  ;;  %v9631_v8 = vld [vmem:[%s10451_s14 + $0x4] sm:$0xf] }
 0x22f   : > { %13456 = vst [vmem:[#allocation67_spill] sm:$0xff] %v11258_v35 }
 0x230   : > { %13457 = vst [vmem:[#allocation68_spill] sm:$0xff] %v11260_v4 }
 0x231   : > { %13458 = vst [vmem:[#allocation69_spill] sm:$0xff] %v11263_v25 }
 0x232   : > { %v3784_v39 = vpop.f32.mrf.mxu2 }
 0x233   : > { %v3785_v2 = vadd.f32 %v3784_v39, %v3736_v61  ;;  %v3833_v0 = vpop.f32.mrf.mxu3  ;;  %v3689_v51 = vpop.f32.mrf.mxu0  ;;  %v7999_v61 = vor.u32 %v9695_v1, %v7996_v38  ;;  %v8127_v39 = vor.u32 %v9727_v34, %v8124_v31  ;;  %v9663_v38 = vld [vmem:[%s10451_s14 + $0x104] sm:$0xf]  ;;  %v9617_v31 = vld [vmem:[%s10453_s15 + $0x28c] sm:$0xf0] }
 0x234   : > { %v3690_v49 = vadd.f32 %v3689_v51, %v11010_v40  ;;  %v3738_v7 = vpop.f32.mrf.mxu1  ;;  %v7740_v40 = vld [vmem:[%s10451_s14 + $0x10] sm:$0xf0] }
 0x235   : > { %v11265_v6 = vadd.f32 %v3833_v0, %v3785_v2  ;;  %v7743_v30 = vor.u32 %v9631_v8, %v7740_v40  ;;  %4152 = vmatpush.bf16.msrb.mxu2 %v7999_v61  ;;  %4201 = vmatpush.bf16.msrb.mxu3 %v8127_v39  ;;  %v7868_v8 = vld [vmem:[%s10451_s14 + $0x110] sm:$0xf0]  ;;  %v9612_v61 = vld [vmem:[%s10453_s15 + $0x26c] sm:$0xf] }
 0x236   : > { %v3739_v28 = vadd.f32 %v3738_v7, %v3690_v49  ;;  %3884 = vmatmul.bf16.gmra.mxu0 %v11256_v54  ;;  %3933 = vmatmul.bf16.gmra.mxu1 %v11258_v35  ;;  %v7871_v34 = vor.u32 %v9663_v38, %v7868_v8  ;;  %v9618_v35 = vld [vmem:[%s10453_s15 + $0x294] sm:$0xf0] }
 0x237   : > { %3982 = vmatmul.bf16.gmra.mxu2 %v11260_v4  ;;  %4054 = vmatpush.bf16.msrb.mxu0 %v7743_v30  ;;  %v7682_v4 = vld [vmem:[%s10453_s15 + $0x268] sm:$0xf] }
 0x238   : > { %4031 = vmatmul.bf16.gmra.mxu3 %v11263_v25  ;;  %v7676_v25 = vld [vmem:[%s10453_s15 + $0x290] sm:$0xf0]  ;;  %4103 = vmatpush.bf16.msrb.mxu1 %v7871_v34 }
 0x23a   : > { %v3787_v24 = vpop.f32.mrf.mxu2 }
 0x23b   : > { %v3788_v2 = vadd.f32 %v3787_v24, %v3739_v28  ;;  %v3836_v0 = vpop.f32.mrf.mxu3  ;;  %v3691_v51 = vpop.f32.mrf.mxu0  ;;  %v7674_v28 = vld [vmem:[%s10453_s15 + $0x260] sm:$0xf]  ;;  %v9611_v24 = vld [vmem:[%s10453_s15 + $0x264] sm:$0xf] }
 0x23c   : > { %v3692_v49 = vadd.f32 %v3691_v51, %v11030_v32  ;;  %v3740_v7 = vpop.f32.mrf.mxu1  ;;  %v7684_v32 = vld [vmem:[%s10453_s15 + $0x298] sm:$0xf0]  ;;  %v11290_v54 = vor.u32 %v9617_v31, %v7674_v28  ;;  %v8364_v31 = vld [vmem:[%s10451_s14 + $0x4f0] sm:$0xf0] }
 0x23d   : > { %v11278_v1 = vadd.f32 %v3836_v0, %v3788_v2  ;;  %v11292_v0 = vor.u32 %v9611_v24, %v7676_v25  ;;  %v11297_v8 = vor.u32 %v9612_v61, %v7684_v32  ;;  %v9851_v25 = vld [vmem:[%s10451_s14 + $0x6e4] sm:$0xf]  ;;  %v8748_v24 = vld [vmem:[%s10451_s14 + $0x7f0] sm:$0xf0] }
 0x23e   : > { %v3741_v40 = vadd.f32 %v3740_v7, %v3692_v49  ;;  %13459 = vst [vmem:[#allocation70_spill] sm:$0xff] %v11290_v54  ;;  %v11294_v49 = vor.u32 %v9618_v35, %v7682_v4  ;;  %v8620_v35 = vld [vmem:[%s10451_s14 + $0x6f0] sm:$0xf0]  ;;  %v9787_v4 = vld [vmem:[%s10451_s14 + $0x4e4] sm:$0xf] }
 0x23f   : > { %13460 = vst [vmem:[#allocation71_spill] sm:$0xff] %v11292_v0  ;;  %v8367_v32 = vor.u32 %v9787_v4, %v8364_v31  ;;  %v7722_v4 = vld [vmem:[%s10453_s15 + $0x2c0] sm:$0xf]  ;;  %v9629_v31 = vld [vmem:[%s10453_s15 + $0x2ec] sm:$0xf0] }
 0x240   : > { %13461 = vst [vmem:[#allocation72_spill] sm:$0xff] %v11294_v49  ;;  %v11324_v53 = vor.u32 %v9629_v31, %v7722_v4  ;;  %v8604_v4 = vld [vmem:[%s10451_s14 + $0x6d0] sm:$0xf0] }
 0x241   : > { %13462 = vst [vmem:[#allocation73_spill] sm:$0xff] %v11297_v8  ;;  %4243 = vmatpush.bf16.msra.mxu0 %v8367_v32 }
 0x242   : > { %v3789_v51 = vpop.f32.mrf.mxu2  ;;  %13463 = vst [vmem:[#allocation74_spill] sm:$0xff] %v11324_v53 }
 0x243   : > { %v3790_v30 = vadd.f32 %v3789_v51, %v3741_v40  ;;  %v3838_v39 = vpop.f32.mrf.mxu3  ;;  %v3694_v2 = vpop.f32.mrf.mxu0  ;;  %v8623_v40 = vor.u32 %v9851_v25, %v8620_v35 }
 0x244   : > { %v3695_v7 = vadd.f32 %v3694_v2, %v11042_v36  ;;  %v3743_v38 = vpop.f32.mrf.mxu1  ;;  %v9883_v36 = vld [vmem:[%s10451_s14 + $0x7e4] sm:$0xf] }
 0x245   : > { %v11299_v34 = vadd.f32 %v3838_v39, %v3790_v30  ;;  %v8751_v51 = vor.u32 %v9883_v36, %v8748_v24  ;;  %4341 = vmatpush.bf16.msra.mxu2 %v8623_v40  ;;  %v9623_v36 = vld [vmem:[%s10453_s15 + $0x2c4] sm:$0xf]  ;;  %v7724_v24 = vld [vmem:[%s10453_s15 + $0x2f0] sm:$0xf0] }
 0x246   : > { %v3744_v28 = vadd.f32 %v3743_v38, %v3695_v7  ;;  %3889 = vmatmul.bf16.gmra.mxu0 %v11290_v54  ;;  %3938 = vmatmul.bf16.gmra.mxu1 %v11292_v0  ;;  %v9819_v0 = vld [vmem:[%s10451_s14 + $0x5e4] sm:$0xf]  ;;  %v8492_v54 = vld [vmem:[%s10451_s14 + $0x5f0] sm:$0xf0] }
 0x247   : > { %3987 = vmatmul.bf16.gmra.mxu2 %v11294_v49  ;;  %4390 = vmatpush.bf16.msra.mxu3 %v8751_v51  ;;  %v7732_v49 = vld [vmem:[%s10453_s15 + $0x2f8] sm:$0xf0] }
 0x248   : > { %4036 = vmatmul.bf16.gmra.mxu3 %v11297_v8  ;;  %v9624_v8 = vld [vmem:[%s10453_s15 + $0x2cc] sm:$0xf] }
 0x249   : > { %v11331_v16 = vor.u32 %v9624_v8, %v7732_v49  ;;  %v8348_v49 = vld [vmem:[%s10451_s14 + $0x4d0] sm:$0xf0]  ;;  %v9879_v8 = vld [vmem:[%s10451_s14 + $0x7c4] sm:$0xf] }
 0x24a   : > { %v3792_v61 = vpop.f32.mrf.mxu2 }
 0x24b   : > { %v3793_v30 = vadd.f32 %v3792_v61, %v3744_v28  ;;  %v3841_v39 = vpop.f32.mrf.mxu3  ;;  %v3696_v2 = vpop.f32.mrf.mxu0  ;;  %v7730_v28 = vld [vmem:[%s10453_s15 + $0x2c8] sm:$0xf]  ;;  %v9630_v61 = vld [vmem:[%s10453_s15 + $0x2f4] sm:$0xf0]  ;;  %13466 = vst [vmem:[#allocation77_spill] sm:$0xff] %v11331_v16 }
 0x24c   : > { %v3697_v7 = vadd.f32 %v3696_v2, %v11062_v27  ;;  %v3745_v38 = vpop.f32.mrf.mxu1  ;;  %v8495_v27 = vor.u32 %v9819_v0, %v8492_v54  ;;  %v11328_v2 = vor.u32 %v9630_v61, %v7730_v28 }
 0x24d   : > { %v11312_v25 = vadd.f32 %v3841_v39, %v3793_v30  ;;  %v11326_v39 = vor.u32 %v9623_v36, %v7724_v24  ;;  %v8732_v24 = vld [vmem:[%s10451_s14 + $0x7d0] sm:$0xf0] }
 0x24e   : > { %v3746_v35 = vadd.f32 %v3745_v38, %v3697_v7  ;;  %13465 = vst [vmem:[#allocation76_spill] sm:$0xff] %v11328_v2  ;;  %4292 = vmatpush.bf16.msra.mxu1 %v8495_v27 }
 0x24f   : > { %13464 = vst [vmem:[#allocation75_spill] sm:$0xff] %v11326_v39 }
 0x252   : > { %v3794_v40 = vpop.f32.mrf.mxu2 }
 0x253   : > { %v3795_v32 = vadd.f32 %v3794_v40, %v3746_v35  ;;  %v3843_v51 = vpop.f32.mrf.mxu3  ;;  %v3699_v30 = vpop.f32.mrf.mxu0  ;;  %v9847_v35 = vld [vmem:[%s10451_s14 + $0x6c4] sm:$0xf] }
 0x254   : > { %v3700_v7 = vadd.f32 %v3699_v30, %v11074_v33  ;;  %v3748_v38 = vpop.f32.mrf.mxu1  ;;  %v9783_v33 = vld [vmem:[%s10451_s14 + $0x4c4] sm:$0xf]  ;;  %v8607_v36 = vor.u32 %v9847_v35, %v8604_v4  ;;  %v8476_v4 = vld [vmem:[%s10451_s14 + $0x5d0] sm:$0xf0] }
 0x255   : > { %v11333_v54 = vadd.f32 %v3843_v51, %v3795_v32  ;;  %v8351_v27 = vor.u32 %v9783_v33, %v8348_v49  ;;  %v8735_v32 = vor.u32 %v9879_v8, %v8732_v24  ;;  %v9815_v35 = vld [vmem:[%s10451_s14 + $0x5c4] sm:$0xf]  ;;  %v8588_v24 = vld [vmem:[%s10451_s14 + $0x6b0] sm:$0xf0] }
 0x256   : > { %v3749_v0 = vadd.f32 %v3748_v38, %v3700_v7  ;;  %3894 = vmatmul.bf16.gmra.mxu0 %v11324_v53  ;;  %3943 = vmatmul.bf16.gmra.mxu1 %v11326_v39  ;;  %v9843_v8 = vld [vmem:[%s10451_s14 + $0x6a4] sm:$0xf] }
 0x257   : > { %3992 = vmatmul.bf16.gmra.mxu2 %v11328_v2  ;;  %4244 = vmatpush.bf16.msra.mxu0 %v8351_v27  ;;  %v8332_v27 = vld [vmem:[%s10451_s14 + $0x4b0] sm:$0xf0] }
 0x258   : > { %4041 = vmatmul.bf16.gmra.mxu3 %v11331_v16  ;;  %4342 = vmatpush.bf16.msra.mxu2 %v8607_v36 }
 0x259   : > { %4391 = vmatpush.bf16.msra.mxu3 %v8735_v32  ;;  %v9875_v32 = vld [vmem:[%s10451_s14 + $0x7a4] sm:$0xf] }
 0x25a   : > { %v3797_v31 = vpop.f32.mrf.mxu2 }
 0x25b   : > { %v3798_v28 = vadd.f32 %v3797_v31, %v3749_v0  ;;  %v3846_v61 = vpop.f32.mrf.mxu3  ;;  %v3701_v40 = vpop.f32.mrf.mxu0  ;;  %v8479_v0 = vor.u32 %v9815_v35, %v8476_v4  ;;  %v515_v4 = vld [vmem:[#allocation2 + $0xb0] sm:$0xff] }
 0x25c   : > { %v3702_v51 = vadd.f32 %v3701_v40, %v11095_v50  ;;  %v3750_v30 = vpop.f32.mrf.mxu1  ;;  %v8591_v40 = vor.u32 %v9843_v8, %v8588_v24  ;;  %v9811_v8 = vld [vmem:[%s10451_s14 + $0x5a4] sm:$0xf]  ;;  %v8460_v24 = vld [vmem:[%s10451_s14 + $0x5b0] sm:$0xf0] }
 0x25d   : > { %v11346_v7 = vadd.f32 %v3846_v61, %v3798_v28  ;;  %4293 = vmatpush.bf16.msra.mxu1 %v8479_v0  ;;  %v9779_v28 = vld [vmem:[%s10451_s14 + $0x4a4] sm:$0xf] }
 0x25e   : > { %v3751_v38 = vadd.f32 %v3750_v30, %v3702_v51  ;;  %4343 = vmatpush.bf16.msra.mxu2 %v8591_v40 }
 0x262   : > { %v3799_v16 = vpop.f32.mrf.mxu2 }
 0x263   : > { %v3800_v31 = vadd.f32 %v3799_v16, %v3751_v38  ;;  %v3848_v2 = vpop.f32.mrf.mxu3  ;;  %v3860_v33 = vpop.f32.mrf.mxu0  ;;  %v8335_v38 = vor.u32 %v9779_v28, %v8332_v27 }
 0x264   : > { %v3909_v50 = vpop.f32.mrf.mxu1  ;;  %v3861_v49 = vadd.f32 %v3860_v33, %v11108_v55 }
 0x265   : > { %v11350_v36 = vadd.f32 %v3848_v2, %v3800_v31  ;;  %v8716_v2 = vld [vmem:[%s10451_s14 + $0x7b0] sm:$0xf0]  ;;  %4245 = vmatpush.bf16.msra.mxu0 %v8335_v38 }
 0x266   : > { %4055 = vmatmul.bf16.vlgmr.msrb.gmra.mxu0 %v10599_v17  ;;  %4104 = vmatmul.bf16.vlgmr.msrb.gmra.mxu1 %v10604_v22  ;;  %v3910_v16 = vadd.f32 %v3909_v50, %v3861_v49  ;;  %v8719_v35 = vor.u32 %v9875_v32, %v8716_v2  ;;  %v519_v32 = vld [vmem:[#allocation2 + $0x50] sm:$0xff] }
 0x267   : > { %4153 = vmatmul.bf16.vlgmr.msrb.gmra.mxu2 %v10606_v23 }
 0x268   : > { %4202 = vmatmul.bf16.vlgmr.msrb.gmra.mxu3 %v10610_v26 }
 0x269   : > { %4392 = vmatpush.bf16.msra.mxu3 %v8719_v35 }
 0x26a   : > { %v3958_v61 = vpop.f32.mrf.mxu2 }
 0x26b   : > { %v3959_v51 = vadd.f32 %v3958_v61, %v3910_v16  ;;  %v4007_v55 = vpop.f32.mrf.mxu3  ;;  %v3862_v30 = vpop.f32.mrf.mxu0  ;;  %v8463_v16 = vor.u32 %v9811_v8, %v8460_v24  ;;  %v8700_v8 = vld [vmem:[%s10451_s14 + $0x790] sm:$0xf0]  ;;  %v523_v24 = vld [vmem:[#allocation2 + $0x180] sm:$0xff] }
 0x26c   : > { %v3911_v0 = vpop.f32.mrf.mxu1  ;;  %v3863_v33 = vadd.f32 %v3862_v30, %v11129_v52  ;;  %v8572_v30 = vld [vmem:[%s10451_s14 + $0x690] sm:$0xf0] }
 0x26d   : > { %v4008_v31 = vadd.f32 %v4007_v55, %v3959_v51  ;;  %4294 = vmatpush.bf16.msra.mxu1 %v8463_v16  ;;  %v9839_v55 = vld [vmem:[%s10451_s14 + $0x684] sm:$0xf] }
 0x26e   : > { %v3912_v49 = vadd.f32 %v3911_v0, %v3863_v33  ;;  %v8575_v35 = vor.u32 %v9839_v55, %v8572_v30  ;;  %v8316_v0 = vld [vmem:[%s10451_s14 + $0x490] sm:$0xf0] }
 0x26f   : > { %v5811_v50 = vadd.f32 %v4008_v31, %v515_v4  ;;  %v9775_v4 = vld [vmem:[%s10451_s14 + $0x484] sm:$0xf] }
 0x270   : > { %v9871_v31 = vld [vmem:[%s10451_s14 + $0x784] sm:$0xf]  ;;  %4344 = vmatpush.bf16.msra.mxu2 %v8575_v35 }
 0x271   : > { %5875 = vst [vmem:[#allocation2 + $0xb0] sm:$0xff] %v5811_v50 }
 0x272   : > { %v3960_v26 = vpop.f32.mrf.mxu2 }
 0x273   : > { %v3961_v61 = vadd.f32 %v3960_v26, %v3912_v49  ;;  %v4009_v28 = vpop.f32.mrf.mxu3  ;;  %v3865_v27 = vpop.f32.mrf.mxu0  ;;  %v8319_v49 = vor.u32 %v9775_v4, %v8316_v0  ;;  %v527_v4 = vld [vmem:[#allocation2 + $0x120] sm:$0xff] }
 0x274   : > { %v3914_v40 = vpop.f32.mrf.mxu1  ;;  %v3866_v2 = vadd.f32 %v3865_v27, %v11142_v62 }
 0x275   : > { %v4010_v52 = vadd.f32 %v4009_v28, %v3961_v61  ;;  %v8703_v61 = vor.u32 %v9871_v31, %v8700_v8  ;;  %4246 = vmatpush.bf16.msra.mxu0 %v8319_v49 }
 0x276   : > { %4060 = vmatmul.bf16.gmra.mxu0 %v10636_v57  ;;  %4109 = vmatmul.bf16.gmra.mxu1 %v10638_v58  ;;  %v3915_v26 = vadd.f32 %v3914_v40, %v3866_v2  ;;  %v8444_v2 = vld [vmem:[%s10451_s14 + $0x590] sm:$0xf0] }
 0x277   : > { %v5815_v51 = vadd.f32 %v4010_v52, %v519_v32  ;;  %4158 = vmatmul.bf16.gmra.mxu2 %v10640_v59  ;;  %4393 = vmatpush.bf16.msra.mxu3 %v8703_v61  ;;  %v9807_v52 = vld [vmem:[%s10451_s14 + $0x584] sm:$0xf] }
 0x278   : > { %4207 = vmatmul.bf16.gmra.mxu3 %v10642_v60  ;;  %v9867_v61 = vld [vmem:[%s10451_s14 + $0x764] sm:$0xf] }
 0x279   : > { %5879 = vst [vmem:[#allocation2 + $0x50] sm:$0xff] %v5815_v51 }
 0x27a   : > { %v3963_v38 = vpop.f32.mrf.mxu2 }
 0x27b   : > { %v3964_v62 = vadd.f32 %v3963_v38, %v3915_v26  ;;  %v4012_v33 = vpop.f32.mrf.mxu3  ;;  %v3867_v50 = vpop.f32.mrf.mxu0  ;;  %v8447_v26 = vor.u32 %v9807_v52, %v8444_v2  ;;  %v531_v52 = vld [vmem:[#allocation2 + $0xe0] sm:$0xff] }
 0x27c   : > { %v3916_v16 = vpop.f32.mrf.mxu1  ;;  %v3868_v27 = vadd.f32 %v3867_v50, %v11163_v3  ;;  %v8556_v50 = vld [vmem:[%s10451_s14 + $0x670] sm:$0xf0] }
 0x27d   : > { %v4013_v28 = vadd.f32 %v4012_v33, %v3964_v62  ;;  %4295 = vmatpush.bf16.msra.mxu1 %v8447_v26  ;;  %v9835_v33 = vld [vmem:[%s10451_s14 + $0x664] sm:$0xf] }
 0x27e   : > { %v3917_v40 = vadd.f32 %v3916_v16, %v3868_v27  ;;  %v8559_v8 = vor.u32 %v9835_v33, %v8556_v50  ;;  %v8300_v16 = vld [vmem:[%s10451_s14 + $0x470] sm:$0xf0]  ;;  %v535_v50 = vld [vmem:[#allocation2 + $0x80] sm:$0xff] }
 0x27f   : > { %v5819_v32 = vadd.f32 %v4013_v28, %v523_v24  ;;  %v9771_v24 = vld [vmem:[%s10451_s14 + $0x464] sm:$0xf] }
 0x280   : > { %4345 = vmatpush.bf16.msra.mxu2 %v8559_v8 }
 0x281   : > { %5883 = vst [vmem:[#allocation2 + $0x180] sm:$0xff] %v5819_v32  ;;  %v8303_v32 = vor.u32 %v9771_v24, %v8300_v16 }
 0x282   : > { %v3965_v51 = vpop.f32.mrf.mxu2 }
 0x283   : > { %v3966_v55 = vadd.f32 %v3965_v51, %v3917_v40  ;;  %v4014_v30 = vpop.f32.mrf.mxu3  ;;  %v3870_v38 = vpop.f32.mrf.mxu0  ;;  %v8684_v40 = vld [vmem:[%s10451_s14 + $0x770] sm:$0xf0]  ;;  %4247 = vmatpush.bf16.msra.mxu0 %v8303_v32  ;;  %v9767_v32 = vld [vmem:[%s10451_s14 + $0x444] sm:$0xf] }
 0x284   : > { %v3919_v35 = vpop.f32.mrf.mxu1  ;;  %v3871_v0 = vadd.f32 %v3870_v38, %v11176_v37  ;;  %v8687_v51 = vor.u32 %v9867_v61, %v8684_v40  ;;  %v9831_v61 = vld [vmem:[%s10451_s14 + $0x644] sm:$0xf]  ;;  %v8284_v40 = vld [vmem:[%s10451_s14 + $0x450] sm:$0xf0] }
 0x285   : > { %v4015_v3 = vadd.f32 %v4014_v30, %v3966_v55 }
 0x286   : > { %4065 = vmatmul.bf16.gmra.mxu0 %v10664_v18  ;;  %4114 = vmatmul.bf16.gmra.mxu1 %v10666_v19  ;;  %v3920_v62 = vadd.f32 %v3919_v35, %v3871_v0  ;;  %v8428_v35 = vld [vmem:[%s10451_s14 + $0x570] sm:$0xf0] }
 0x287   : > { %v5823_v31 = vadd.f32 %v4015_v3, %v527_v4  ;;  %4163 = vmatmul.bf16.gmra.mxu2 %v10668_v20  ;;  %4394 = vmatpush.bf16.msra.mxu3 %v8687_v51  ;;  %v9803_v4 = vld [vmem:[%s10451_s14 + $0x564] sm:$0xf] }
 0x288   : > { %4212 = vmatmul.bf16.gmra.mxu3 %v10670_v21  ;;  %v8431_v0 = vor.u32 %v9803_v4, %v8428_v35 }
 0x289   : > { %5887 = vst [vmem:[#allocation2 + $0x120] sm:$0xff] %v5823_v31 }
 0x28a   : > { %v3968_v49 = vpop.f32.mrf.mxu2  ;;  %4296 = vmatpush.bf16.msra.mxu1 %v8431_v0 }
 0x28b   : > { %v3969_v37 = vadd.f32 %v3968_v49, %v3920_v62  ;;  %v4017_v28 = vpop.f32.mrf.mxu3  ;;  %v3872_v27 = vpop.f32.mrf.mxu0 }
 0x28c   : > { %v3921_v2 = vpop.f32.mrf.mxu1  ;;  %v3873_v55 = vadd.f32 %v3872_v27, %v11197_v56 }
 0x28d   : > { %v4018_v26 = vadd.f32 %v4017_v28, %v3969_v37  ;;  %v8540_v37 = vld [vmem:[%s10451_s14 + $0x650] sm:$0xf0] }
 0x28e   : > { %v3922_v38 = vadd.f32 %v3921_v2, %v3873_v55  ;;  %v8543_v27 = vor.u32 %v9831_v61, %v8540_v37  ;;  %v8668_v55 = vld [vmem:[%s10451_s14 + $0x750] sm:$0xf0] }
 0x28f   : > { %v5827_v30 = vadd.f32 %v4018_v26, %v531_v52  ;;  %v9863_v52 = vld [vmem:[%s10451_s14 + $0x744] sm:$0xf]  ;;  %v8287_v26 = vor.u32 %v9767_v32, %v8284_v40  ;;  %v8524_v40 = vld [vmem:[%s10451_s14 + $0x630] sm:$0xf0] }
 0x290   : > { %4346 = vmatpush.bf16.msra.mxu2 %v8543_v27  ;;  %v8671_v4 = vor.u32 %v9863_v52, %v8668_v55  ;;  %v9827_v32 = vld [vmem:[%s10451_s14 + $0x624] sm:$0xf] }
 0x291   : > { %5891 = vst [vmem:[#allocation2 + $0xe0] sm:$0xff] %v5827_v30  ;;  %v539_v30 = vld [vmem:[#allocation2 + $0x1e8] sm:$0xff]  ;;  %4248 = vmatpush.bf16.msra.mxu0 %v8287_v26  ;;  %v9859_v26 = vld [vmem:[%s10451_s14 + $0x724] sm:$0xf] }
 0x292   : > { %v3970_v3 = vpop.f32.mrf.mxu2  ;;  %4395 = vmatpush.bf16.msra.mxu3 %v8671_v4  ;;  %v8652_v4 = vld [vmem:[%s10451_s14 + $0x730] sm:$0xf0] }
 0x293   : > { %v3971_v31 = vadd.f32 %v3970_v3, %v3922_v38  ;;  %v4019_v62 = vpop.f32.mrf.mxu3  ;;  %v3875_v33 = vpop.f32.mrf.mxu0 }
 0x294   : > { %v3924_v49 = vpop.f32.mrf.mxu1  ;;  %v3876_v8 = vadd.f32 %v3875_v33, %v11210_v5  ;;  %v8412_v33 = vld [vmem:[%s10451_s14 + $0x550] sm:$0xf0] }
 0x295   : > { %v4020_v56 = vadd.f32 %v4019_v62, %v3971_v31  ;;  %v9799_v62 = vld [vmem:[%s10451_s14 + $0x544] sm:$0xf] }
 0x296   : > { %4070 = vmatmul.bf16.gmra.mxu0 %v10692_v45  ;;  %4119 = vmatmul.bf16.gmra.mxu1 %v10694_v46  ;;  %v3925_v16 = vadd.f32 %v3924_v49, %v3876_v8  ;;  %v8415_v49 = vor.u32 %v9799_v62, %v8412_v33 }
 0x297   : > { %v5831_v24 = vadd.f32 %v4020_v56, %v535_v50  ;;  %4168 = vmatmul.bf16.gmra.mxu2 %v10696_v47 }
 0x298   : > { %4217 = vmatmul.bf16.gmra.mxu3 %v10698_v48  ;;  %4297 = vmatpush.bf16.msra.mxu1 %v8415_v49  ;;  %v9795_v49 = vld [vmem:[%s10451_s14 + $0x524] sm:$0xf] }
 0x299   : > { %5895 = vst [vmem:[#allocation2 + $0x80] sm:$0xff] %v5831_v24 }
 0x29a   : > { %v3973_v28 = vpop.f32.mrf.mxu2 }
 0x29b   : > { %v3974_v5 = vadd.f32 %v3973_v28, %v3925_v16  ;;  %v4022_v2 = vpop.f32.mrf.mxu3  ;;  %v3877_v51 = vpop.f32.mrf.mxu0  ;;  %v543_v16 = vld [vmem:[#allocation2 + $0x1e0] sm:$0xff] }
 0x29c   : > { %v3926_v38 = vpop.f32.mrf.mxu1  ;;  %v3878_v3 = vadd.f32 %v3877_v51, %v11231_v63  ;;  %v8268_v51 = vld [vmem:[%s10451_s14 + $0x430] sm:$0xf0] }
 0x29d   : > { %v4023_v35 = vadd.f32 %v4022_v2, %v3974_v5  ;;  %v8527_v5 = vor.u32 %v9827_v32, %v8524_v40  ;;  %v9763_v2 = vld [vmem:[%s10451_s14 + $0x424] sm:$0xf] }
 0x29e   : > { %v3927_v31 = vadd.f32 %v3926_v38, %v3878_v3  ;;  %v8271_v38 = vor.u32 %v9763_v2, %v8268_v51 }
 0x29f   : > { %v5835_v0 = vadd.f32 %v4023_v35, %v539_v30  ;;  %v547_v35 = vld [vmem:[#allocation2 + $0x148] sm:$0xff]  ;;  %4347 = vmatpush.bf16.msra.mxu2 %v8527_v5  ;;  %v8508_v5 = vld [vmem:[%s10451_s14 + $0x610] sm:$0xf0] }
 0x2a0   : > { %4249 = vmatpush.bf16.msra.mxu0 %v8271_v38 }
 0x2a1   : > { %5899 = vst [vmem:[#allocation2 + $0x1e8] sm:$0xff] %v5835_v0  ;;  %v8655_v0 = vor.u32 %v9859_v26, %v8652_v4  ;;  %v9759_v26 = vld [vmem:[%s10451_s14 + $0x404] sm:$0xf] }
 0x2a2   : > { %v3975_v50 = vpop.f32.mrf.mxu2 }
 0x2a3   : > { %v3976_v56 = vadd.f32 %v3975_v50, %v3927_v31  ;;  %v4024_v8 = vpop.f32.mrf.mxu3  ;;  %v3880_v24 = vpop.f32.mrf.mxu0  ;;  %4396 = vmatpush.bf16.msra.mxu3 %v8655_v0 }
 0x2a4   : > { %v3929_v61 = vpop.f32.mrf.mxu1  ;;  %v3881_v37 = vadd.f32 %v3880_v24, %v11244_v29 }
 0x2a5   : > { %v4025_v63 = vadd.f32 %v4024_v8, %v3976_v56  ;;  %v8396_v56 = vld [vmem:[%s10451_s14 + $0x530] sm:$0xf0] }
 0x2a6   : > { %4075 = vmatmul.bf16.gmra.mxu0 %v10720_v9  ;;  %4124 = vmatmul.bf16.gmra.mxu1 %v10722_v10  ;;  %v3930_v27 = vadd.f32 %v3929_v61, %v3881_v37  ;;  %v8399_v24 = vor.u32 %v9795_v49, %v8396_v56  ;;  %v551_v37 = vld [vmem:[#allocation2 + $0x40] sm:$0xff] }
 0x2a7   : > { %v5839_v28 = vadd.f32 %v4025_v63, %v543_v16  ;;  %4173 = vmatmul.bf16.gmra.mxu2 %v10724_v11  ;;  %v9791_v56 = vld [vmem:[%s10451_s14 + $0x504] sm:$0xf] }
 0x2a8   : > { %4222 = vmatmul.bf16.gmra.mxu3 %v10726_v12  ;;  %4298 = vmatpush.bf16.msra.mxu1 %v8399_v24 }
 0x2a9   : > { %5903 = vst [vmem:[#allocation2 + $0x1e0] sm:$0xff] %v5839_v28 }
 0x2aa   : > { %v3978_v52 = vpop.f32.mrf.mxu2 }
 0x2ab   : > { %v3979_v29 = vadd.f32 %v3978_v52, %v3930_v27  ;;  %v4027_v55 = vpop.f32.mrf.mxu3  ;;  %v3882_v30 = vpop.f32.mrf.mxu0  ;;  %v9823_v52 = vld [vmem:[%s10451_s14 + $0x604] sm:$0xf] }
 0x2ac   : > { %v3931_v3 = vpop.f32.mrf.mxu1  ;;  %v3883_v62 = vadd.f32 %v3882_v30, %v11265_v6  ;;  %v8511_v51 = vor.u32 %v9823_v52, %v8508_v5  ;;  %v9979_v5 = vld [vmem:[%s10451_s14 + $0xae4] sm:$0xf] }
 0x2ad   : > { %v4028_v31 = vadd.f32 %v4027_v55, %v3979_v29  ;;  %v8252_v29 = vld [vmem:[%s10451_s14 + $0x410] sm:$0xf0]  ;;  %v9855_v55 = vld [vmem:[%s10451_s14 + $0x704] sm:$0xf] }
 0x2ae   : > { %v3932_v50 = vadd.f32 %v3931_v3, %v3883_v62  ;;  %v8255_v4 = vor.u32 %v9759_v26, %v8252_v29  ;;  %v555_v3 = vld [vmem:[#allocation2 + $0x1a0] sm:$0xff]  ;;  %4348 = vmatpush.bf16.msra.mxu2 %v8511_v51 }
 0x2af   : > { %v5843_v33 = vadd.f32 %v4028_v31, %v547_v35  ;;  %v8636_v35 = vld [vmem:[%s10451_s14 + $0x710] sm:$0xf0]  ;;  %v9915_v29 = vld [vmem:[%s10451_s14 + $0x8e4] sm:$0xf] }
 0x2b0   : > { %v8639_v31 = vor.u32 %v9855_v55, %v8636_v35  ;;  %4250 = vmatpush.bf16.msra.mxu0 %v8255_v4  ;;  %v10011_v55 = vld [vmem:[%s10451_s14 + $0xbe4] sm:$0xf]  ;;  %v9260_v35 = vld [vmem:[%s10451_s14 + $0xbf0] sm:$0xf0] }
 0x2b1   : > { %5907 = vst [vmem:[#allocation2 + $0x148] sm:$0xff] %v5843_v33 }
 0x2b2   : > { %v3980_v8 = vpop.f32.mrf.mxu2  ;;  %4397 = vmatpush.bf16.msra.mxu3 %v8639_v31  ;;  %v9263_v31 = vor.u32 %v10011_v55, %v9260_v35 }
 0x2b3   : > { %v3981_v16 = vadd.f32 %v3980_v8, %v3932_v50  ;;  %v4029_v61 = vpop.f32.mrf.mxu3  ;;  %v3885_v63 = vpop.f32.mrf.mxu0  ;;  %v8380_v8 = vld [vmem:[%s10451_s14 + $0x510] sm:$0xf0] }
 0x2b4   : > { %v3934_v28 = vpop.f32.mrf.mxu1  ;;  %v3886_v27 = vadd.f32 %v3885_v63, %v11278_v1 }
 0x2b5   : > { %v4030_v6 = vadd.f32 %v4029_v61, %v3981_v16  ;;  %v8383_v16 = vor.u32 %v9791_v56, %v8380_v8 }
 0x2b6   : > { %4080 = vmatmul.bf16.gmra.mxu0 %v10748_v41  ;;  %4129 = vmatmul.bf16.gmra.mxu1 %v10750_v42  ;;  %v3935_v40 = vadd.f32 %v3934_v28, %v3886_v27  ;;  %v559_v28 = vld [vmem:[#allocation2 + $0x70] sm:$0xff] }
 0x2b7   : > { %v5847_v32 = vadd.f32 %v4030_v6, %v551_v37  ;;  %4178 = vmatmul.bf16.gmra.mxu2 %v10752_v43  ;;  %4299 = vmatpush.bf16.msra.mxu1 %v8383_v16 }
 0x2b8   : > { %4227 = vmatmul.bf16.gmra.mxu3 %v10754_v44 }
 0x2b9   : > { %5911 = vst [vmem:[#allocation2 + $0x40] sm:$0xff] %v5847_v32  ;;  %4586 = vmatpush.bf16.msrb.mxu3 %v9263_v31 }
 0x2ba   : > { %v3983_v2 = vpop.f32.mrf.mxu2 }
 0x2bb   : > { %v3984_v1 = vadd.f32 %v3983_v2, %v3935_v40  ;;  %v4032_v30 = vpop.f32.mrf.mxu3  ;;  %v3887_v38 = vpop.f32.mrf.mxu0  ;;  %v13467_v40 = vld [vmem:[#allocation9_spill] sm:$0xff] }
 0x2bc   : > { %v3936_v0 = vpop.f32.mrf.mxu1  ;;  %v3888_v33 = vadd.f32 %v3887_v38, %v11299_v34  ;;  %v9132_v2 = vld [vmem:[%s10451_s14 + $0xaf0] sm:$0xf0] }
 0x2bd   : > { %v4033_v62 = vadd.f32 %v4032_v30, %v3984_v1  ;;  %v9135_v26 = vor.u32 %v9979_v5, %v9132_v2  ;;  %v13470_v5 = vld [vmem:[#allocation12_spill] sm:$0xff]  ;;  %v13471_v2 = vld [vmem:[#allocation13_spill] sm:$0xff] }
 0x2be   : > { %v3937_v49 = vadd.f32 %v3936_v0, %v3888_v33 }
 0x2bf   : > { %v5851_v50 = vadd.f32 %v4033_v62, %v555_v3  ;;  %v563_v3 = vld [vmem:[#allocation2 + $0xb8] sm:$0xff]  ;;  %4537 = vmatpush.bf16.msrb.mxu2 %v9135_v26  ;;  %v9116_v26 = vld [vmem:[%s10451_s14 + $0xad0] sm:$0xf0] }
 0x2c1   : > { %5915 = vst [vmem:[#allocation2 + $0x1a0] sm:$0xff] %v5851_v50  ;;  %v9947_v50 = vld [vmem:[%s10451_s14 + $0x9e4] sm:$0xf] }
 0x2c2   : > { %v3985_v24 = vpop.f32.mrf.mxu2 }
 0x2c3   : > { %v3986_v61 = vadd.f32 %v3985_v24, %v3937_v49  ;;  %v4034_v63 = vpop.f32.mrf.mxu3  ;;  %v3890_v37 = vpop.f32.mrf.mxu0  ;;  %v9004_v49 = vld [vmem:[%s10451_s14 + $0x9f0] sm:$0xf0] }
 0x2c4   : > { %v3939_v6 = vpop.f32.mrf.mxu1  ;;  %v3891_v27 = vadd.f32 %v3890_v37, %v11312_v25  ;;  %v8876_v25 = vld [vmem:[%s10451_s14 + $0x8f0] sm:$0xf0]  ;;  %v9007_v56 = vor.u32 %v9947_v50, %v9004_v49 }
 0x2c5   : > { %v4035_v34 = vadd.f32 %v4034_v63, %v3986_v61  ;;  %v8879_v4 = vor.u32 %v9915_v29, %v8876_v25  ;;  %v9911_v29 = vld [vmem:[%s10451_s14 + $0x8c4] sm:$0xf] }
 0x2c6   : > { %4085 = vmatmul.bf16.gmra.mxu0 %v10776_v13  ;;  %4134 = vmatmul.bf16.gmra.mxu1 %v10778_v14  ;;  %v3940_v52 = vadd.f32 %v3939_v6, %v3891_v27  ;;  %v13468_v27 = vld [vmem:[#allocation10_spill] sm:$0xff] }
 0x2c7   : > { %v5855_v32 = vadd.f32 %v4035_v34, %v559_v28  ;;  %4183 = vmatmul.bf16.gmra.mxu2 %v10780_v15  ;;  %4439 = vmatpush.bf16.msrb.mxu0 %v8879_v4  ;;  %v567_v28 = vld [vmem:[#allocation2 + $0x170] sm:$0xff] }
 0x2c8   : > { %4232 = vmatmul.bf16.gmra.mxu3 %v13467_v40  ;;  %4488 = vmatpush.bf16.msrb.mxu1 %v9007_v56  ;;  %v9244_v4 = vld [vmem:[%s10451_s14 + $0xbd0] sm:$0xf0]  ;;  %v9943_v56 = vld [vmem:[%s10451_s14 + $0x9c4] sm:$0xf] }
 0x2c9   : > { %5919 = vst [vmem:[#allocation2 + $0x70] sm:$0xff] %v5855_v32 }
 0x2ca   : > { %v3988_v51 = vpop.f32.mrf.mxu2 }
 0x2cb   : > { %v3989_v1 = vadd.f32 %v3988_v51, %v3940_v52  ;;  %v4037_v30 = vpop.f32.mrf.mxu3  ;;  %v3892_v38 = vpop.f32.mrf.mxu0  ;;  %v13469_v52 = vld [vmem:[#allocation11_spill] sm:$0xff] }
 0x2cc   : > { %v3941_v0 = vpop.f32.mrf.mxu1  ;;  %v3893_v33 = vadd.f32 %v3892_v38, %v11333_v54  ;;  %v9975_v51 = vld [vmem:[%s10451_s14 + $0xac4] sm:$0xf] }
 0x2cd   : > { %v4038_v62 = vadd.f32 %v4037_v30, %v3989_v1  ;;  %v9119_v55 = vor.u32 %v9975_v51, %v9116_v26  ;;  %v8860_v1 = vld [vmem:[%s10451_s14 + $0x8d0] sm:$0xf0]  ;;  %v10007_v30 = vld [vmem:[%s10451_s14 + $0xbc4] sm:$0xf]  ;;  %v13472_v51 = vld [vmem:[#allocation14_spill] sm:$0xff] }
 0x2ce   : > { %v3942_v24 = vadd.f32 %v3941_v0, %v3893_v33  ;;  %v8863_v38 = vor.u32 %v9911_v29, %v8860_v1  ;;  %v9247_v31 = vor.u32 %v10007_v30, %v9244_v4  ;;  %v13473_v29 = vld [vmem:[#allocation15_spill] sm:$0xff]  ;;  %v9100_v30 = vld [vmem:[%s10451_s14 + $0xab0] sm:$0xf0] }
 0x2cf   : > { %v5859_v8 = vadd.f32 %v4038_v62, %v563_v3  ;;  %4538 = vmatpush.bf16.msrb.mxu2 %v9119_v55  ;;  %v571_v62 = vld [vmem:[#allocation2 + $0x198] sm:$0xff]  ;;  %v9971_v1 = vld [vmem:[%s10451_s14 + $0xaa4] sm:$0xf]  ;;  %v8844_v4 = vld [vmem:[%s10451_s14 + $0x8b0] sm:$0xf0] }
 0x2d0   : > { %4440 = vmatpush.bf16.msrb.mxu0 %v8863_v38  ;;  %4587 = vmatpush.bf16.msrb.mxu3 %v9247_v31  ;;  %v13475_v55 = vld [vmem:[#allocation17_spill] sm:$0xff]  ;;  %v9103_v38 = vor.u32 %v9971_v1, %v9100_v30  ;;  %v13477_v1 = vld [vmem:[#allocation19_spill] sm:$0xff]  ;;  %v13478_v30 = vld [vmem:[#allocation20_spill] sm:$0xff] }
 0x2d1   : > { %5923 = vst [vmem:[#allocation2 + $0xb8] sm:$0xff] %v5859_v8  ;;  %v8988_v8 = vld [vmem:[%s10451_s14 + $0x9d0] sm:$0xf0] }
 0x2d2   : > { %v3990_v16 = vpop.f32.mrf.mxu2  ;;  %v9228_v31 = vld [vmem:[%s10451_s14 + $0xbb0] sm:$0xf0] }
 0x2d3   : > { %v3991_v61 = vadd.f32 %v3990_v16, %v3942_v24  ;;  %v4039_v63 = vpop.f32.mrf.mxu3  ;;  %v3895_v37 = vpop.f32.mrf.mxu0  ;;  %v8991_v24 = vor.u32 %v9943_v56, %v8988_v8  ;;  %4539 = vmatpush.bf16.msrb.mxu2 %v9103_v38  ;;  %v9967_v38 = vld [vmem:[%s10451_s14 + $0xa84] sm:$0xf] }
 0x2d4   : > { %v3944_v54 = vpop.f32.mrf.mxu1  ;;  %v3896_v34 = vadd.f32 %v3895_v37, %v11346_v7 }
 0x2d5   : > { %v4040_v6 = vadd.f32 %v4039_v63, %v3991_v61  ;;  %4489 = vmatpush.bf16.msrb.mxu1 %v8991_v24 }
 0x2d6   : > { %4090 = vmatmul.bf16.gmra.mxu0 %v13468_v27  ;;  %4139 = vmatmul.bf16.gmra.mxu1 %v13469_v52  ;;  %v3945_v25 = vadd.f32 %v3944_v54, %v3896_v34 }
 0x2d7   : > { %v5863_v32 = vadd.f32 %v4040_v6, %v567_v28  ;;  %4188 = vmatmul.bf16.gmra.mxu2 %v13470_v5  ;;  %v575_v6 = vld [vmem:[#allocation2 + $0x158] sm:$0xff] }
 0x2d8   : > { %4237 = vmatmul.bf16.gmra.mxu3 %v13471_v2  ;;  %v7970_v2 = vld [vmem:[%s10451_s14 + $0x1c8] sm:$0xf] }
 0x2d9   : > { %5927 = vst [vmem:[#allocation2 + $0x170] sm:$0xff] %v5863_v32 }
 0x2da   : > { %v3993_v7 = vpop.f32.mrf.mxu2 }
 0x2db   : > { %v3994_v35 = vadd.f32 %v3993_v7, %v3945_v25  ;;  %v4042_v3 = vpop.f32.mrf.mxu3  ;;  %v3897_v0 = vpop.f32.mrf.mxu0  ;;  %v13474_v25 = vld [vmem:[#allocation16_spill] sm:$0xff]  ;;  %v9907_v7 = vld [vmem:[%s10451_s14 + $0x8a4] sm:$0xf] }
 0x2dc   : > { %v3946_v33 = vpop.f32.mrf.mxu1  ;;  %v3898_v49 = vadd.f32 %v3897_v0, %v11350_v36  ;;  %v8847_v0 = vor.u32 %v9907_v7, %v8844_v4  ;;  %v13479_v7 = vld [vmem:[#allocation21_spill] sm:$0xff] }
 0x2dd   : > { %v4043_v50 = vadd.f32 %v4042_v3, %v3994_v35  ;;  %v10003_v35 = vld [vmem:[%s10451_s14 + $0xba4] sm:$0xf]  ;;  %v9084_v4 = vld [vmem:[%s10451_s14 + $0xa90] sm:$0xf0] }
 0x2de   : > { %v3947_v61 = vadd.f32 %v3946_v33, %v3898_v49  ;;  %v9231_v49 = vor.u32 %v10003_v35, %v9228_v31  ;;  %4441 = vmatpush.bf16.msrb.mxu0 %v8847_v0  ;;  %v9903_v35 = vld [vmem:[%s10451_s14 + $0x884] sm:$0xf]  ;;  %v8828_v0 = vld [vmem:[%s10451_s14 + $0x890] sm:$0xf0] }
 0x2df   : > { %v5867_v16 = vadd.f32 %v4043_v50, %v571_v62  ;;  %v9999_v31 = vld [vmem:[%s10451_s14 + $0xb84] sm:$0xf] }
 0x2e0   : > { %4588 = vmatpush.bf16.msrb.mxu3 %v9231_v49 }
 0x2e1   : > { %5931 = vst [vmem:[#allocation2 + $0x198] sm:$0xff] %v5867_v16  ;;  %v9939_v16 = vld [vmem:[%s10451_s14 + $0x9a4] sm:$0xf] }
 0x2e2   : > { %v3995_v63 = vpop.f32.mrf.mxu2 }
 0x2e3   : > { %v3996_v37 = vadd.f32 %v3995_v63, %v3947_v61  ;;  %v4044_v28 = vpop.f32.mrf.mxu3  ;;  %v4056_v54 = vpop.f32.mrf.mxu0  ;;  %v8972_v61 = vld [vmem:[%s10451_s14 + $0x9b0] sm:$0xf0] }
 0x2e4   : > { %v4105_v34 = vpop.f32.mrf.mxu1  ;;  %v8975_v63 = vor.u32 %v9939_v16, %v8972_v61 }
 0x2e5   : > { %v4045_v36 = vadd.f32 %v4044_v28, %v3996_v37  ;;  %v4106_v32 = vadd.f32 %v4105_v34, %v4056_v54 }
 0x2e6   : > { %4251 = vmatmul.bf16.vlgmr.msra.gmra.mxu0 %v13472_v51  ;;  %4300 = vmatmul.bf16.vlgmr.msra.gmra.mxu1 %v13473_v29 }
 0x2e7   : > { %v5871_v26 = vadd.f32 %v4045_v36, %v575_v6  ;;  %4349 = vmatmul.bf16.vlgmr.msra.gmra.mxu2 %v13474_v25  ;;  %4490 = vmatpush.bf16.msrb.mxu1 %v8975_v63 }
 0x2e8   : > { %4398 = vmatmul.bf16.vlgmr.msra.gmra.mxu3 %v13475_v55 }
 0x2e9   : > { %5935 = vst [vmem:[#allocation2 + $0x158] sm:$0xff] %v5871_v26  ;;  %v13476_v26 = vld [vmem:[#allocation18_spill] sm:$0xff] }
 0x2ea   : > { %v4154_v3 = vpop.f32.mrf.mxu2 }
 0x2eb   : > { %v4155_v62 = vadd.f32 %v4154_v3, %v4106_v32  ;;  %v4203_v33 = vpop.f32.mrf.mxu3  ;;  %v4058_v50 = vpop.f32.mrf.mxu0  ;;  %v9087_v3 = vor.u32 %v9967_v38, %v9084_v4 }
 0x2ec   : > { %v4107_v56 = vpop.f32.mrf.mxu1 }
 0x2ed   : > { %v11474_v8 = vadd.f32 %v4203_v33, %v4155_v62  ;;  %v4108_v24 = vadd.f32 %v4107_v56, %v4058_v50  ;;  %v9212_v62 = vld [vmem:[%s10451_s14 + $0xb90] sm:$0xf0]  ;;  %v8831_v50 = vor.u32 %v9903_v35, %v8828_v0  ;;  %4540 = vmatpush.bf16.msrb.mxu2 %v9087_v3 }
 0x2ee   : > { %v9215_v49 = vor.u32 %v9999_v31, %v9212_v62  ;;  %v13480_v31 = vld [vmem:[#allocation22_spill] sm:$0xff]  ;;  %v13481_v62 = vld [vmem:[#allocation23_spill] sm:$0xff] }
 0x2ef   : > { %4442 = vmatpush.bf16.msrb.mxu0 %v8831_v50  ;;  %v13483_v50 = vld [vmem:[#allocation25_spill] sm:$0xff] }
 0x2f0   : > { %4589 = vmatpush.bf16.msrb.mxu3 %v9215_v49  ;;  %v9963_v49 = vld [vmem:[%s10451_s14 + $0xa64] sm:$0xf] }
 0x2f2   : > { %v4156_v37 = vpop.f32.mrf.mxu2 }
 0x2f3   : > { %v4157_v28 = vadd.f32 %v4156_v37, %v4108_v24  ;;  %v4205_v54 = vpop.f32.mrf.mxu3  ;;  %v4061_v6 = vpop.f32.mrf.mxu0 }
 0x2f4   : > { %v4110_v34 = vpop.f32.mrf.mxu1 }
 0x2f5   : > { %v11478_v36 = vadd.f32 %v4205_v54, %v4157_v28  ;;  %v4111_v32 = vadd.f32 %v4110_v34, %v4061_v6  ;;  %v9935_v28 = vld [vmem:[%s10451_s14 + $0x984] sm:$0xf]  ;;  %v8956_v54 = vld [vmem:[%s10451_s14 + $0x990] sm:$0xf0] }
 0x2f6   : > { %4256 = vmatmul.bf16.gmra.mxu0 %v13476_v26  ;;  %4305 = vmatmul.bf16.gmra.mxu1 %v13477_v1  ;;  %v8959_v6 = vor.u32 %v9935_v28, %v8956_v54  ;;  %v9196_v28 = vld [vmem:[%s10451_s14 + $0xb70] sm:$0xf0] }
 0x2f7   : > { %4354 = vmatmul.bf16.gmra.mxu2 %v13478_v30 }
 0x2f8   : > { %4403 = vmatmul.bf16.gmra.mxu3 %v13479_v7  ;;  %4491 = vmatpush.bf16.msrb.mxu1 %v8959_v6 }
 0x2fa   : > { %v4159_v33 = vpop.f32.mrf.mxu2 }
 0x2fb   : > { %v4160_v56 = vadd.f32 %v4159_v33, %v4111_v32  ;;  %v4208_v24 = vpop.f32.mrf.mxu3  ;;  %v4063_v16 = vpop.f32.mrf.mxu0  ;;  %v13482_v33 = vld [vmem:[#allocation24_spill] sm:$0xff] }
 0x2fc   : > { %v4112_v61 = vpop.f32.mrf.mxu1 }
 0x2fd   : > { %v11490_v63 = vadd.f32 %v4208_v24, %v4160_v56  ;;  %v4113_v37 = vadd.f32 %v4112_v61, %v4063_v16  ;;  %v9068_v56 = vld [vmem:[%s10451_s14 + $0xa70] sm:$0xf0]  ;;  %v9899_v24 = vld [vmem:[%s10451_s14 + $0x864] sm:$0xf] }
 0x2fe   : > { %v9071_v16 = vor.u32 %v9963_v49, %v9068_v56  ;;  %v8812_v61 = vld [vmem:[%s10451_s14 + $0x870] sm:$0xf0]  ;;  %v9931_v49 = vld [vmem:[%s10451_s14 + $0x964] sm:$0xf] }
 0x2ff   : > { %v8815_v6 = vor.u32 %v9899_v24, %v8812_v61  ;;  %v8940_v56 = vld [vmem:[%s10451_s14 + $0x970] sm:$0xf0] }
 0x300   : > { %4541 = vmatpush.bf16.msrb.mxu2 %v9071_v16 }
 0x301   : > { %4443 = vmatpush.bf16.msrb.mxu0 %v8815_v6  ;;  %v13484_v6 = vld [vmem:[#allocation26_spill] sm:$0xff] }
 0x302   : > { %v4161_v34 = vpop.f32.mrf.mxu2 }
 0x303   : > { %v4162_v32 = vadd.f32 %v4161_v34, %v4113_v37  ;;  %v4210_v38 = vpop.f32.mrf.mxu3  ;;  %v4066_v4 = vpop.f32.mrf.mxu0  ;;  %v9995_v37 = vld [vmem:[%s10451_s14 + $0xb64] sm:$0xf] }
 0x304   : > { %v4115_v35 = vpop.f32.mrf.mxu1  ;;  %v9199_v34 = vor.u32 %v9995_v37, %v9196_v28 }
 0x305   : > { %v11494_v3 = vadd.f32 %v4210_v38, %v4162_v32  ;;  %v4116_v0 = vadd.f32 %v4115_v35, %v4066_v4 }
 0x306   : > { %4261 = vmatmul.bf16.gmra.mxu0 %v13480_v31  ;;  %4310 = vmatmul.bf16.gmra.mxu1 %v13481_v62  ;;  %v8943_v62 = vor.u32 %v9931_v49, %v8940_v56  ;;  %v9991_v56 = vld [vmem:[%s10451_s14 + $0xb44] sm:$0xf] }
 0x307   : > { %4359 = vmatmul.bf16.gmra.mxu2 %v13482_v33  ;;  %4590 = vmatpush.bf16.msrb.mxu3 %v9199_v34  ;;  %v13485_v34 = vld [vmem:[#allocation27_spill] sm:$0xff] }
 0x308   : > { %4408 = vmatmul.bf16.gmra.mxu3 %v13483_v50  ;;  %4492 = vmatpush.bf16.msrb.mxu1 %v8943_v62  ;;  %v9959_v62 = vld [vmem:[%s10451_s14 + $0xa44] sm:$0xf] }
 0x30a   : > { %v4164_v54 = vpop.f32.mrf.mxu2 }
 0x30b   : > { %v4165_v32 = vadd.f32 %v4164_v54, %v4116_v0  ;;  %v4213_v38 = vpop.f32.mrf.mxu3  ;;  %v4068_v4 = vpop.f32.mrf.mxu0 }
 0x30c   : > { %v4117_v35 = vpop.f32.mrf.mxu1 }
 0x30d   : > { %v11506_v50 = vadd.f32 %v4213_v38, %v4165_v32  ;;  %v4118_v33 = vadd.f32 %v4117_v35, %v4068_v4  ;;  %v13486_v32 = vld [vmem:[#allocation28_spill] sm:$0xff]  ;;  %v13487_v38 = vld [vmem:[#allocation29_spill] sm:$0xff]  ;;  %v9895_v35 = vld [vmem:[%s10451_s14 + $0x844] sm:$0xf] }
 0x30e   : > { %v9052_v4 = vld [vmem:[%s10451_s14 + $0xa50] sm:$0xf0] }
 0x30f   : > { %v9055_v49 = vor.u32 %v9959_v62, %v9052_v4  ;;  %v9927_v62 = vld [vmem:[%s10451_s14 + $0x944] sm:$0xf]  ;;  %v8924_v4 = vld [vmem:[%s10451_s14 + $0x950] sm:$0xf0] }
 0x310   : > { %v8927_v7 = vor.u32 %v9927_v62, %v8924_v4  ;;  %v9987_v4 = vld [vmem:[%s10451_s14 + $0xb24] sm:$0xf] }
 0x311   : > { %4542 = vmatpush.bf16.msrb.mxu2 %v9055_v49 }
 0x312   : > { %v4166_v24 = vpop.f32.mrf.mxu2  ;;  %4493 = vmatpush.bf16.msrb.mxu1 %v8927_v7  ;;  %v9955_v7 = vld [vmem:[%s10451_s14 + $0xa24] sm:$0xf] }
 0x313   : > { %v4167_v0 = vadd.f32 %v4166_v24, %v4118_v33  ;;  %v4215_v61 = vpop.f32.mrf.mxu3  ;;  %v4071_v16 = vpop.f32.mrf.mxu0  ;;  %v8796_v33 = vld [vmem:[%s10451_s14 + $0x850] sm:$0xf0] }
 0x314   : > { %v4120_v37 = vpop.f32.mrf.mxu1  ;;  %v9180_v24 = vld [vmem:[%s10451_s14 + $0xb50] sm:$0xf0] }
 0x315   : > { %v11510_v28 = vadd.f32 %v4215_v61, %v4167_v0  ;;  %v4121_v54 = vadd.f32 %v4120_v37, %v4071_v16  ;;  %v8799_v61 = vor.u32 %v9895_v35, %v8796_v33  ;;  %v9183_v16 = vor.u32 %v9991_v56, %v9180_v24 }
 0x316   : > { %4266 = vmatmul.bf16.gmra.mxu0 %v13484_v6  ;;  %4315 = vmatmul.bf16.gmra.mxu1 %v13485_v34 }
 0x317   : > { %4364 = vmatmul.bf16.gmra.mxu2 %v13486_v32  ;;  %4444 = vmatpush.bf16.msrb.mxu0 %v8799_v61  ;;  %v13491_v61 = vld [vmem:[#allocation33_spill] sm:$0xff] }
 0x318   : > { %4413 = vmatmul.bf16.gmra.mxu3 %v13487_v38 }
 0x319   : > { %4591 = vmatpush.bf16.msrb.mxu3 %v9183_v16  ;;  %v9036_v16 = vld [vmem:[%s10451_s14 + $0xa30] sm:$0xf0] }
 0x31a   : > { %v4169_v0 = vpop.f32.mrf.mxu2  ;;  %v9039_v62 = vor.u32 %v9955_v7, %v9036_v16  ;;  %v9923_v7 = vld [vmem:[%s10451_s14 + $0x924] sm:$0xf]  ;;  %v8908_v16 = vld [vmem:[%s10451_s14 + $0x930] sm:$0xf0] }
 0x31b   : > { %v4170_v37 = vadd.f32 %v4169_v0, %v4121_v54  ;;  %v4218_v6 = vpop.f32.mrf.mxu3  ;;  %v4073_v31 = vpop.f32.mrf.mxu0  ;;  %v13488_v0 = vld [vmem:[#allocation30_spill] sm:$0xff]  ;;  %v8911_v1 = vor.u32 %v9923_v7, %v8908_v16  ;;  %v9983_v16 = vld [vmem:[%s10451_s14 + $0xb04] sm:$0xf] }
 0x31c   : > { %v4122_v34 = vpop.f32.mrf.mxu1  ;;  %4543 = vmatpush.bf16.msrb.mxu2 %v9039_v62 }
 0x31d   : > { %v11522_v38 = vadd.f32 %v4218_v6, %v4170_v37  ;;  %v4123_v32 = vadd.f32 %v4122_v34, %v4073_v31  ;;  %v13489_v31 = vld [vmem:[#allocation31_spill] sm:$0xff]  ;;  %v13490_v34 = vld [vmem:[#allocation32_spill] sm:$0xff]  ;;  %4494 = vmatpush.bf16.msrb.mxu1 %v8911_v1 }
 0x31e   : > { %v9891_v37 = vld [vmem:[%s10451_s14 + $0x824] sm:$0xf] }
 0x31f   : > { %v9951_v1 = vld [vmem:[%s10451_s14 + $0xa04] sm:$0xf] }
 0x322   : > { %v4171_v35 = vpop.f32.mrf.mxu2 }
 0x323   : > { %v4172_v54 = vadd.f32 %v4171_v35, %v4123_v32  ;;  %v4220_v33 = vpop.f32.mrf.mxu3  ;;  %v4076_v49 = vpop.f32.mrf.mxu0  ;;  %v8780_v32 = vld [vmem:[%s10451_s14 + $0x830] sm:$0xf0] }
 0x324   : > { %v4125_v56 = vpop.f32.mrf.mxu1  ;;  %v9164_v35 = vld [vmem:[%s10451_s14 + $0xb30] sm:$0xf0] }
 0x325   : > { %v11526_v24 = vadd.f32 %v4220_v33, %v4172_v54  ;;  %v4126_v6 = vadd.f32 %v4125_v56, %v4076_v49  ;;  %v8783_v33 = vor.u32 %v9891_v37, %v8780_v32  ;;  %v9167_v49 = vor.u32 %v9987_v4, %v9164_v35 }
 0x326   : > { %4271 = vmatmul.bf16.gmra.mxu0 %v13488_v0  ;;  %4320 = vmatmul.bf16.gmra.mxu1 %v13489_v31 }
 0x327   : > { %4369 = vmatmul.bf16.gmra.mxu2 %v13490_v34  ;;  %4445 = vmatpush.bf16.msrb.mxu0 %v8783_v33  ;;  %v13495_v33 = vld [vmem:[#allocation37_spill] sm:$0xff] }
 0x328   : > { %4418 = vmatmul.bf16.gmra.mxu3 %v13491_v61 }
 0x329   : > { %4592 = vmatpush.bf16.msrb.mxu3 %v9167_v49  ;;  %v9020_v49 = vld [vmem:[%s10451_s14 + $0xa10] sm:$0xf0] }
 0x32a   : > { %v4174_v54 = vpop.f32.mrf.mxu2  ;;  %v9023_v7 = vor.u32 %v9951_v1, %v9020_v49  ;;  %v9919_v1 = vld [vmem:[%s10451_s14 + $0x904] sm:$0xf]  ;;  %v8892_v49 = vld [vmem:[%s10451_s14 + $0x910] sm:$0xf0] }
 0x32b   : > { %v4175_v56 = vadd.f32 %v4174_v54, %v4126_v6  ;;  %v4223_v0 = vpop.f32.mrf.mxu3  ;;  %v4078_v30 = vpop.f32.mrf.mxu0  ;;  %v13492_v54 = vld [vmem:[#allocation34_spill] sm:$0xff]  ;;  %v8895_v55 = vor.u32 %v9919_v1, %v8892_v49  ;;  %v8242_v49 = vld [vmem:[%s10451_s14 + $0x3e8] sm:$0xf] }
 0x32c   : > { %v4127_v31 = vpop.f32.mrf.mxu1  ;;  %4544 = vmatpush.bf16.msrb.mxu2 %v9023_v7 }
 0x32d   : > { %v11538_v61 = vadd.f32 %v4223_v0, %v4175_v56  ;;  %v4128_v34 = vadd.f32 %v4127_v31, %v4078_v30  ;;  %v13493_v30 = vld [vmem:[#allocation35_spill] sm:$0xff]  ;;  %v13494_v31 = vld [vmem:[#allocation36_spill] sm:$0xff]  ;;  %4495 = vmatpush.bf16.msrb.mxu1 %v8895_v55 }
 0x32e   : > { %v9887_v56 = vld [vmem:[%s10451_s14 + $0x804] sm:$0xf]  ;;  %v8114_v55 = vld [vmem:[%s10451_s14 + $0x2e8] sm:$0xf] }
 0x332   : > { %v4176_v37 = vpop.f32.mrf.mxu2 }
 0x333   : > { %v4177_v6 = vadd.f32 %v4176_v37, %v4128_v34  ;;  %v4225_v32 = vpop.f32.mrf.mxu3  ;;  %v4081_v62 = vpop.f32.mrf.mxu0  ;;  %v8764_v34 = vld [vmem:[%s10451_s14 + $0x810] sm:$0xf0] }
 0x334   : > { %v4130_v4 = vpop.f32.mrf.mxu1  ;;  %v9148_v37 = vld [vmem:[%s10451_s14 + $0xb10] sm:$0xf0] }
 0x335   : > { %v11542_v35 = vadd.f32 %v4225_v32, %v4177_v6  ;;  %v4131_v0 = vadd.f32 %v4130_v4, %v4081_v62  ;;  %v8767_v32 = vor.u32 %v9887_v56, %v8764_v34  ;;  %v9151_v62 = vor.u32 %v9983_v16, %v9148_v37 }
 0x336   : > { %4276 = vmatmul.bf16.gmra.mxu0 %v13492_v54  ;;  %4325 = vmatmul.bf16.gmra.mxu1 %v13493_v30 }
 0x337   : > { %4374 = vmatmul.bf16.gmra.mxu2 %v13494_v31  ;;  %4446 = vmatpush.bf16.msrb.mxu0 %v8767_v32  ;;  %v13499_v32 = vld [vmem:[#allocation41_spill] sm:$0xff] }
 0x338   : > { %4423 = vmatmul.bf16.gmra.mxu3 %v13495_v33 }
 0x339   : > { %4593 = vmatpush.bf16.msrb.mxu3 %v9151_v62  ;;  %v9726_v62 = vld [vmem:[%s10451_s14 + $0x2f4] sm:$0xf0] }
 0x33a   : > { %v4179_v6 = vpop.f32.mrf.mxu2  ;;  %v8115_v1 = vor.u32 %v9726_v62, %v8114_v55  ;;  %v7986_v55 = vld [vmem:[%s10451_s14 + $0x1e8] sm:$0xf]  ;;  %v9694_v62 = vld [vmem:[%s10451_s14 + $0x1f4] sm:$0xf0] }
 0x33b   : > { %v4180_v4 = vadd.f32 %v4179_v6, %v4131_v0  ;;  %v4228_v54 = vpop.f32.mrf.mxu3  ;;  %v4083_v26 = vpop.f32.mrf.mxu0  ;;  %v13496_v6 = vld [vmem:[#allocation38_spill] sm:$0xff]  ;;  %v7987_v29 = vor.u32 %v9694_v62, %v7986_v55  ;;  %v8226_v62 = vld [vmem:[%s10451_s14 + $0x3c8] sm:$0xf] }
 0x33c   : > { %v4132_v30 = vpop.f32.mrf.mxu1  ;;  %4733 = vmatpush.bf16.msra.mxu2 %v8115_v1 }
 0x33d   : > { %v11554_v33 = vadd.f32 %v4228_v54, %v4180_v4  ;;  %v4133_v31 = vadd.f32 %v4132_v30, %v4083_v26  ;;  %v13497_v26 = vld [vmem:[#allocation39_spill] sm:$0xff]  ;;  %v13498_v30 = vld [vmem:[#allocation40_spill] sm:$0xff]  ;;  %4684 = vmatpush.bf16.msra.mxu1 %v7987_v29 }
 0x33e   : > { %v7858_v4 = vld [vmem:[%s10451_s14 + $0xe8] sm:$0xf] }
 0x33f   : > { %v8098_v29 = vld [vmem:[%s10451_s14 + $0x2c8] sm:$0xf] }
 0x342   : > { %v4181_v56 = vpop.f32.mrf.mxu2 }
 0x343   : > { %v4182_v0 = vadd.f32 %v4181_v56, %v4133_v31  ;;  %v4230_v34 = vpop.f32.mrf.mxu3  ;;  %v4086_v7 = vpop.f32.mrf.mxu0  ;;  %v9662_v31 = vld [vmem:[%s10451_s14 + $0xf4] sm:$0xf0] }
 0x344   : > { %v4135_v16 = vpop.f32.mrf.mxu1  ;;  %v9758_v56 = vld [vmem:[%s10451_s14 + $0x3f4] sm:$0xf0] }
 0x345   : > { %v11558_v37 = vadd.f32 %v4230_v34, %v4182_v0  ;;  %v4136_v54 = vadd.f32 %v4135_v16, %v4086_v7  ;;  %v7859_v34 = vor.u32 %v9662_v31, %v7858_v4  ;;  %v8243_v7 = vor.u32 %v9758_v56, %v8242_v49 }
 0x346   : > { %4281 = vmatmul.bf16.gmra.mxu0 %v13496_v6  ;;  %4330 = vmatmul.bf16.gmra.mxu1 %v13497_v26 }
 0x347   : > { %4379 = vmatmul.bf16.gmra.mxu2 %v13498_v30  ;;  %4635 = vmatpush.bf16.msra.mxu0 %v7859_v34  ;;  %v13503_v34 = vld [vmem:[#allocation45_spill] sm:$0xff] }
 0x348   : > { %4428 = vmatmul.bf16.gmra.mxu3 %v13499_v32 }
 0x349   : > { %4782 = vmatpush.bf16.msra.mxu3 %v8243_v7  ;;  %v9722_v7 = vld [vmem:[%s10451_s14 + $0x2d4] sm:$0xf0] }
 0x34a   : > { %v4184_v0 = vpop.f32.mrf.mxu2  ;;  %v8099_v55 = vor.u32 %v9722_v7, %v8098_v29  ;;  %v9690_v29 = vld [vmem:[%s10451_s14 + $0x1d4] sm:$0xf0] }
 0x34b   : > { %v4185_v16 = vadd.f32 %v4184_v0, %v4136_v54  ;;  %v4233_v6 = vpop.f32.mrf.mxu3  ;;  %v4088_v25 = vpop.f32.mrf.mxu0  ;;  %v13500_v0 = vld [vmem:[#allocation42_spill] sm:$0xff]  ;;  %v7971_v7 = vor.u32 %v9690_v29, %v7970_v2  ;;  %v13506_v2 = vld [vmem:[#allocation48_spill] sm:$0xff] }
 0x34c   : > { %v4137_v26 = vpop.f32.mrf.mxu1  ;;  %4734 = vmatpush.bf16.msra.mxu2 %v8099_v55  ;;  %v9750_v29 = vld [vmem:[%s10451_s14 + $0x3b4] sm:$0xf0] }
 0x34d   : > { %v11570_v32 = vadd.f32 %v4233_v6, %v4185_v16  ;;  %v4138_v30 = vadd.f32 %v4137_v26, %v4088_v25  ;;  %v13501_v25 = vld [vmem:[#allocation43_spill] sm:$0xff]  ;;  %v13502_v26 = vld [vmem:[#allocation44_spill] sm:$0xff]  ;;  %4685 = vmatpush.bf16.msra.mxu1 %v7971_v7 }
 0x34e   : > { %v7842_v16 = vld [vmem:[%s10451_s14 + $0xc8] sm:$0xf] }
 0x352   : > { %v4186_v4 = vpop.f32.mrf.mxu2 }
 0x353   : > { %v4187_v54 = vadd.f32 %v4186_v4, %v4138_v30  ;;  %v4235_v31 = vpop.f32.mrf.mxu3  ;;  %v4091_v1 = vpop.f32.mrf.mxu0  ;;  %v9658_v30 = vld [vmem:[%s10451_s14 + $0xd4] sm:$0xf0] }
 0x354   : > { %v4140_v49 = vpop.f32.mrf.mxu1  ;;  %v9754_v4 = vld [vmem:[%s10451_s14 + $0x3d4] sm:$0xf0] }
 0x355   : > { %v11574_v56 = vadd.f32 %v4235_v31, %v4187_v54  ;;  %v4141_v6 = vadd.f32 %v4140_v49, %v4091_v1  ;;  %v7843_v31 = vor.u32 %v9658_v30, %v7842_v16  ;;  %v8227_v1 = vor.u32 %v9754_v4, %v8226_v62  ;;  %v13505_v4 = vld [vmem:[#allocation47_spill] sm:$0xff] }
 0x356   : > { %4286 = vmatmul.bf16.gmra.mxu0 %v13500_v0  ;;  %4335 = vmatmul.bf16.gmra.mxu1 %v13501_v25 }
 0x357   : > { %4384 = vmatmul.bf16.gmra.mxu2 %v13502_v26  ;;  %4636 = vmatpush.bf16.msra.mxu0 %v7843_v31  ;;  %v8082_v31 = vld [vmem:[%s10451_s14 + $0x2a8] sm:$0xf] }
 0x358   : > { %4433 = vmatmul.bf16.gmra.mxu3 %v13503_v34 }
 0x359   : > { %4783 = vmatpush.bf16.msra.mxu3 %v8227_v1 }
 0x35a   : > { %v4189_v54 = vpop.f32.mrf.mxu2 }
 0x35b   : > { %v4190_v49 = vadd.f32 %v4189_v54, %v4141_v6  ;;  %v4238_v0 = vpop.f32.mrf.mxu3  ;;  %v4093_v51 = vpop.f32.mrf.mxu0  ;;  %v13507_v54 = vld [vmem:[#allocation49_spill] sm:$0xff] }
 0x35c   : > { %v4142_v25 = vpop.f32.mrf.mxu1 }
 0x35d   : > { %v11586_v34 = vadd.f32 %v4238_v0, %v4190_v49  ;;  %v4143_v26 = vadd.f32 %v4142_v25, %v4093_v51  ;;  %v13504_v25 = vld [vmem:[#allocation46_spill] sm:$0xff] }
 0x35e   : > { %v9654_v49 = vld [vmem:[%s10451_s14 + $0xb4] sm:$0xf0] }
 0x362   : > { %v4191_v5 = vpop.f32.mrf.mxu2 }
 0x363   : > { %v4192_v16 = vadd.f32 %v4191_v5, %v4143_v26  ;;  %v4240_v6 = vpop.f32.mrf.mxu3  ;;  %v4252_v55 = vpop.f32.mrf.mxu0  ;;  %v9718_v5 = vld [vmem:[%s10451_s14 + $0x2b4] sm:$0xf0]  ;;  %v7826_v26 = vld [vmem:[%s10451_s14 + $0xa8] sm:$0xf] }
 0x364   : > { %v4253_v30 = vadd.f32 %v4252_v55, %v11474_v8  ;;  %v4301_v62 = vpop.f32.mrf.mxu1  ;;  %v8083_v1 = vor.u32 %v9718_v5, %v8082_v31  ;;  %v8210_v8 = vld [vmem:[%s10451_s14 + $0x3a8] sm:$0xf]  ;;  %v9686_v5 = vld [vmem:[%s10451_s14 + $0x1b4] sm:$0xf0] }
 0x365   : > { %v11591_v0 = vadd.f32 %v4240_v6, %v4192_v16  ;;  %v7827_v16 = vor.u32 %v9654_v49, %v7826_v26  ;;  %v8211_v6 = vor.u32 %v9750_v29, %v8210_v8  ;;  %v7954_v31 = vld [vmem:[%s10451_s14 + $0x1a8] sm:$0xf] }
 0x366   : > { %v4302_v51 = vadd.f32 %v4301_v62, %v4253_v30  ;;  %4447 = vmatmul.bf16.vlgmr.msrb.gmra.mxu0 %v13504_v25  ;;  %4496 = vmatmul.bf16.vlgmr.msrb.gmra.mxu1 %v13505_v4  ;;  %v7955_v52 = vor.u32 %v9686_v5, %v7954_v31  ;;  %v9746_v31 = vld [vmem:[%s10451_s14 + $0x394] sm:$0xf0] }
 0x367   : > { %4545 = vmatmul.bf16.vlgmr.msrb.gmra.mxu2 %v13506_v2  ;;  %4637 = vmatpush.bf16.msra.mxu0 %v7827_v16  ;;  %v13508_v16 = vld [vmem:[#allocation50_spill] sm:$0xff] }
 0x368   : > { %4594 = vmatmul.bf16.vlgmr.msrb.gmra.mxu3 %v13507_v54  ;;  %4735 = vmatpush.bf16.msra.mxu2 %v8083_v1 }
 0x369   : > { %4784 = vmatpush.bf16.msra.mxu3 %v8211_v6  ;;  %4686 = vmatpush.bf16.msra.mxu1 %v7955_v52  ;;  %v13511_v52 = vld [vmem:[#allocation53_spill] sm:$0xff]  ;;  %v8066_v6 = vld [vmem:[%s10451_s14 + $0x288] sm:$0xf] }
 0x36a   : > { %v4350_v7 = vpop.f32.mrf.mxu2 }
 0x36b   : > { %v4351_v55 = vadd.f32 %v4350_v7, %v4302_v51  ;;  %v4399_v30 = vpop.f32.mrf.mxu3  ;;  %v4254_v62 = vpop.f32.mrf.mxu0 }
 0x36c   : > { %v4255_v2 = vadd.f32 %v4254_v62, %v11478_v36  ;;  %v4303_v4 = vpop.f32.mrf.mxu1  ;;  %v9650_v62 = vld [vmem:[%s10451_s14 + $0x94] sm:$0xf0] }
 0x36d   : > { %v11604_v54 = vadd.f32 %v4399_v30, %v4351_v55  ;;  %v7810_v55 = vld [vmem:[%s10451_s14 + $0x88] sm:$0xf] }
 0x36e   : > { %v4304_v25 = vadd.f32 %v4303_v4, %v4255_v2  ;;  %v13509_v4 = vld [vmem:[#allocation51_spill] sm:$0xff]  ;;  %v13510_v2 = vld [vmem:[#allocation52_spill] sm:$0xff] }
 0x372   : > { %v4352_v26 = vpop.f32.mrf.mxu2 }
 0x373   : > { %v4353_v51 = vadd.f32 %v4352_v26, %v4304_v25  ;;  %v4401_v1 = vpop.f32.mrf.mxu3  ;;  %v4257_v36 = vpop.f32.mrf.mxu0  ;;  %v9714_v25 = vld [vmem:[%s10451_s14 + $0x294] sm:$0xf0]  ;;  %v7811_v26 = vor.u32 %v9650_v62, %v7810_v55 }
 0x374   : > { %v4258_v49 = vadd.f32 %v4257_v36, %v11490_v63  ;;  %v4306_v8 = vpop.f32.mrf.mxu1  ;;  %v8067_v30 = vor.u32 %v9714_v25, %v8066_v6  ;;  %v8194_v63 = vld [vmem:[%s10451_s14 + $0x388] sm:$0xf]  ;;  %v9682_v25 = vld [vmem:[%s10451_s14 + $0x194] sm:$0xf0] }
 0x375   : > { %v11609_v29 = vadd.f32 %v4401_v1, %v4353_v51  ;;  %v8195_v51 = vor.u32 %v9746_v31, %v8194_v63  ;;  %4638 = vmatpush.bf16.msra.mxu0 %v7811_v26  ;;  %v7938_v6 = vld [vmem:[%s10451_s14 + $0x188] sm:$0xf]  ;;  %v13512_v26 = vld [vmem:[#allocation54_spill] sm:$0xff] }
 0x376   : > { %v4307_v7 = vadd.f32 %v4306_v8, %v4258_v49  ;;  %4452 = vmatmul.bf16.gmra.mxu0 %v13508_v16  ;;  %4501 = vmatmul.bf16.gmra.mxu1 %v13509_v4  ;;  %v7939_v16 = vor.u32 %v9682_v25, %v7938_v6  ;;  %v9742_v6 = vld [vmem:[%s10451_s14 + $0x374] sm:$0xf0] }
 0x377   : > { %4550 = vmatmul.bf16.gmra.mxu2 %v13510_v2  ;;  %4785 = vmatpush.bf16.msra.mxu3 %v8195_v51  ;;  %v13514_v51 = vld [vmem:[#allocation56_spill] sm:$0xff] }
 0x378   : > { %4599 = vmatmul.bf16.gmra.mxu3 %v13511_v52  ;;  %4736 = vmatpush.bf16.msra.mxu2 %v8067_v30 }
 0x379   : > { %4687 = vmatpush.bf16.msra.mxu1 %v7939_v16  ;;  %v13515_v16 = vld [vmem:[#allocation57_spill] sm:$0xff] }
 0x37a   : > { %v4355_v5 = vpop.f32.mrf.mxu2 }
 0x37b   : > { %v4356_v1 = vadd.f32 %v4355_v5, %v4307_v7  ;;  %v4404_v36 = vpop.f32.mrf.mxu3  ;;  %v4259_v49 = vpop.f32.mrf.mxu0 }
 0x37c   : > { %v4260_v8 = vadd.f32 %v4259_v49, %v11494_v3  ;;  %v4308_v2 = vpop.f32.mrf.mxu1 }
 0x37d   : > { %v11622_v52 = vadd.f32 %v4404_v36, %v4356_v1  ;;  %v8050_v1 = vld [vmem:[%s10451_s14 + $0x268] sm:$0xf] }
 0x37e   : > { %v4309_v4 = vadd.f32 %v4308_v2, %v4260_v8  ;;  %v13513_v2 = vld [vmem:[#allocation55_spill] sm:$0xff]  ;;  %v9646_v8 = vld [vmem:[%s10451_s14 + $0x74] sm:$0xf0] }
 0x37f   : > { %v7794_v36 = vld [vmem:[%s10451_s14 + $0x68] sm:$0xf] }
 0x382   : > { %v4357_v55 = vpop.f32.mrf.mxu2 }
 0x383   : > { %v4358_v7 = vadd.f32 %v4357_v55, %v4309_v4  ;;  %v4406_v30 = vpop.f32.mrf.mxu3  ;;  %v4262_v3 = vpop.f32.mrf.mxu0  ;;  %v9710_v4 = vld [vmem:[%s10451_s14 + $0x274] sm:$0xf0]  ;;  %v7795_v55 = vor.u32 %v9646_v8, %v7794_v36 }
 0x384   : > { %v4263_v62 = vadd.f32 %v4262_v3, %v11506_v50  ;;  %v4311_v63 = vpop.f32.mrf.mxu1  ;;  %v8051_v49 = vor.u32 %v9710_v4, %v8050_v1  ;;  %v8178_v50 = vld [vmem:[%s10451_s14 + $0x368] sm:$0xf]  ;;  %v9678_v4 = vld [vmem:[%s10451_s14 + $0x174] sm:$0xf0] }
 0x385   : > { %v11627_v31 = vadd.f32 %v4406_v30, %v4358_v7  ;;  %v8179_v7 = vor.u32 %v9742_v6, %v8178_v50  ;;  %4639 = vmatpush.bf16.msra.mxu0 %v7795_v55  ;;  %v7922_v1 = vld [vmem:[%s10451_s14 + $0x168] sm:$0xf]  ;;  %v13516_v55 = vld [vmem:[#allocation58_spill] sm:$0xff] }
 0x386   : > { %v4312_v5 = vadd.f32 %v4311_v63, %v4263_v62  ;;  %4457 = vmatmul.bf16.gmra.mxu0 %v13512_v26  ;;  %4506 = vmatmul.bf16.gmra.mxu1 %v13513_v2  ;;  %v7923_v26 = vor.u32 %v9678_v4, %v7922_v1  ;;  %v9738_v1 = vld [vmem:[%s10451_s14 + $0x354] sm:$0xf0] }
 0x387   : > { %4555 = vmatmul.bf16.gmra.mxu2 %v13514_v51  ;;  %4786 = vmatpush.bf16.msra.mxu3 %v8179_v7  ;;  %v13518_v7 = vld [vmem:[#allocation60_spill] sm:$0xff] }
 0x388   : > { %4604 = vmatmul.bf16.gmra.mxu3 %v13515_v16  ;;  %4737 = vmatpush.bf16.msra.mxu2 %v8051_v49 }
 0x389   : > { %4688 = vmatpush.bf16.msra.mxu1 %v7923_v26  ;;  %v13519_v26 = vld [vmem:[#allocation61_spill] sm:$0xff] }
 0x38a   : > { %v4360_v25 = vpop.f32.mrf.mxu2 }
 0x38b   : > { %v4361_v30 = vadd.f32 %v4360_v25, %v4312_v5  ;;  %v4409_v3 = vpop.f32.mrf.mxu3  ;;  %v4264_v62 = vpop.f32.mrf.mxu0 }
 0x38c   : > { %v4265_v63 = vadd.f32 %v4264_v62, %v11510_v28  ;;  %v4313_v51 = vpop.f32.mrf.mxu1 }
 0x38d   : > { %v11640_v16 = vadd.f32 %v4409_v3, %v4361_v30  ;;  %v8034_v30 = vld [vmem:[%s10451_s14 + $0x248] sm:$0xf] }
 0x38e   : > { %v4314_v2 = vadd.f32 %v4313_v51, %v4265_v63  ;;  %v13517_v51 = vld [vmem:[#allocation59_spill] sm:$0xff]  ;;  %v9642_v63 = vld [vmem:[%s10451_s14 + $0x54] sm:$0xf0] }
 0x38f   : > { %v7778_v3 = vld [vmem:[%s10451_s14 + $0x48] sm:$0xf] }
 0x392   : > { %v4362_v36 = vpop.f32.mrf.mxu2 }
 0x393   : > { %v4363_v5 = vadd.f32 %v4362_v36, %v4314_v2  ;;  %v4411_v49 = vpop.f32.mrf.mxu3  ;;  %v4267_v28 = vpop.f32.mrf.mxu0  ;;  %v9706_v2 = vld [vmem:[%s10451_s14 + $0x254] sm:$0xf0]  ;;  %v7779_v36 = vor.u32 %v9642_v63, %v7778_v3 }
 0x394   : > { %v4268_v8 = vadd.f32 %v4267_v28, %v11522_v38  ;;  %v4316_v50 = vpop.f32.mrf.mxu1  ;;  %v8035_v62 = vor.u32 %v9706_v2, %v8034_v30  ;;  %v8162_v38 = vld [vmem:[%s10451_s14 + $0x348] sm:$0xf]  ;;  %v9674_v2 = vld [vmem:[%s10451_s14 + $0x154] sm:$0xf0] }
 0x395   : > { %v11645_v6 = vadd.f32 %v4411_v49, %v4363_v5  ;;  %v8163_v5 = vor.u32 %v9738_v1, %v8162_v38  ;;  %4640 = vmatpush.bf16.msra.mxu0 %v7779_v36  ;;  %v7906_v30 = vld [vmem:[%s10451_s14 + $0x148] sm:$0xf]  ;;  %v13520_v36 = vld [vmem:[#allocation62_spill] sm:$0xff] }
 0x396   : > { %v4317_v25 = vadd.f32 %v4316_v50, %v4268_v8  ;;  %4462 = vmatmul.bf16.gmra.mxu0 %v13516_v55  ;;  %4511 = vmatmul.bf16.gmra.mxu1 %v13517_v51  ;;  %v7907_v55 = vor.u32 %v9674_v2, %v7906_v30  ;;  %v9734_v30 = vld [vmem:[%s10451_s14 + $0x334] sm:$0xf0] }
 0x397   : > { %4560 = vmatmul.bf16.gmra.mxu2 %v13518_v7  ;;  %4787 = vmatpush.bf16.msra.mxu3 %v8163_v5  ;;  %v13522_v5 = vld [vmem:[#allocation64_spill] sm:$0xff] }
 0x398   : > { %4609 = vmatmul.bf16.gmra.mxu3 %v13519_v26  ;;  %4738 = vmatpush.bf16.msra.mxu2 %v8035_v62 }
 0x399   : > { %4689 = vmatpush.bf16.msra.mxu1 %v7907_v55  ;;  %v13523_v55 = vld [vmem:[#allocation65_spill] sm:$0xff] }
 0x39a   : > { %v4365_v4 = vpop.f32.mrf.mxu2 }
 0x39b   : > { %v4366_v49 = vadd.f32 %v4365_v4, %v4317_v25  ;;  %v4414_v28 = vpop.f32.mrf.mxu3  ;;  %v4269_v8 = vpop.f32.mrf.mxu0 }
 0x39c   : > { %v4270_v50 = vadd.f32 %v4269_v8, %v11526_v24  ;;  %v4318_v7 = vpop.f32.mrf.mxu1 }
 0x39d   : > { %v11658_v26 = vadd.f32 %v4414_v28, %v4366_v49  ;;  %v8018_v49 = vld [vmem:[%s10451_s14 + $0x228] sm:$0xf] }
 0x39e   : > { %v4319_v51 = vadd.f32 %v4318_v7, %v4270_v50  ;;  %v13521_v7 = vld [vmem:[#allocation63_spill] sm:$0xff]  ;;  %v9638_v50 = vld [vmem:[%s10451_s14 + $0x34] sm:$0xf0] }
 0x39f   : > { %v7762_v28 = vld [vmem:[%s10451_s14 + $0x28] sm:$0xf] }
 0x3a2   : > { %v4367_v3 = vpop.f32.mrf.mxu2 }
 0x3a3   : > { %v4368_v25 = vadd.f32 %v4367_v3, %v4319_v51  ;;  %v4416_v62 = vpop.f32.mrf.mxu3  ;;  %v4272_v24 = vpop.f32.mrf.mxu0  ;;  %v9702_v51 = vld [vmem:[%s10451_s14 + $0x234] sm:$0xf0]  ;;  %v7763_v3 = vor.u32 %v9638_v50, %v7762_v28 }
 0x3a4   : > { %v4273_v63 = vadd.f32 %v4272_v24, %v11538_v61  ;;  %v4321_v38 = vpop.f32.mrf.mxu1  ;;  %v8019_v8 = vor.u32 %v9702_v51, %v8018_v49  ;;  %v8146_v61 = vld [vmem:[%s10451_s14 + $0x328] sm:$0xf]  ;;  %v9670_v51 = vld [vmem:[%s10451_s14 + $0x134] sm:$0xf0] }
 0x3a5   : > { %v11663_v1 = vadd.f32 %v4416_v62, %v4368_v25  ;;  %v8147_v25 = vor.u32 %v9734_v30, %v8146_v61  ;;  %4641 = vmatpush.bf16.msra.mxu0 %v7763_v3  ;;  %v7890_v49 = vld [vmem:[%s10451_s14 + $0x128] sm:$0xf]  ;;  %v13524_v3 = vld [vmem:[#allocation66_spill] sm:$0xff] }
 0x3a6   : > { %v4322_v4 = vadd.f32 %v4321_v38, %v4273_v63  ;;  %4467 = vmatmul.bf16.gmra.mxu0 %v13520_v36  ;;  %4516 = vmatmul.bf16.gmra.mxu1 %v13521_v7  ;;  %v7891_v36 = vor.u32 %v9670_v51, %v7890_v49  ;;  %v9730_v49 = vld [vmem:[%s10451_s14 + $0x314] sm:$0xf0] }
 0x3a7   : > { %4565 = vmatmul.bf16.gmra.mxu2 %v13522_v5  ;;  %4788 = vmatpush.bf16.msra.mxu3 %v8147_v25  ;;  %v13526_v25 = vld [vmem:[#allocation68_spill] sm:$0xff] }
 0x3a8   : > { %4614 = vmatmul.bf16.gmra.mxu3 %v13523_v55  ;;  %4739 = vmatpush.bf16.msra.mxu2 %v8019_v8 }
 0x3a9   : > { %4690 = vmatpush.bf16.msra.mxu1 %v7891_v36  ;;  %v13527_v36 = vld [vmem:[#allocation69_spill] sm:$0xff] }
 0x3aa   : > { %v4370_v2 = vpop.f32.mrf.mxu2 }
 0x3ab   : > { %v4371_v62 = vadd.f32 %v4370_v2, %v4322_v4  ;;  %v4419_v24 = vpop.f32.mrf.mxu3  ;;  %v4274_v63 = vpop.f32.mrf.mxu0 }
 0x3ac   : > { %v4275_v38 = vadd.f32 %v4274_v63, %v11542_v35  ;;  %v4323_v5 = vpop.f32.mrf.mxu1 }
 0x3ad   : > { %v11676_v55 = vadd.f32 %v4419_v24, %v4371_v62  ;;  %v8002_v62 = vld [vmem:[%s10451_s14 + $0x208] sm:$0xf] }
 0x3ae   : > { %v4324_v7 = vadd.f32 %v4323_v5, %v4275_v38  ;;  %v13525_v5 = vld [vmem:[#allocation67_spill] sm:$0xff]  ;;  %v9634_v38 = vld [vmem:[%s10451_s14 + $0x14] sm:$0xf0] }
 0x3af   : > { %v7746_v24 = vld [vmem:[%s10451_s14 + $0x8] sm:$0xf] }
 0x3b2   : > { %v4372_v28 = vpop.f32.mrf.mxu2 }
 0x3b3   : > { %v4373_v4 = vadd.f32 %v4372_v28, %v4324_v7  ;;  %v4421_v8 = vpop.f32.mrf.mxu3  ;;  %v4277_v35 = vpop.f32.mrf.mxu0  ;;  %v9698_v7 = vld [vmem:[%s10451_s14 + $0x214] sm:$0xf0]  ;;  %v7747_v28 = vor.u32 %v9634_v38, %v7746_v24 }
 0x3b4   : > { %v4278_v50 = vadd.f32 %v4277_v35, %v11554_v33  ;;  %v4326_v61 = vpop.f32.mrf.mxu1  ;;  %v8003_v63 = vor.u32 %v9698_v7, %v8002_v62  ;;  %v8130_v33 = vld [vmem:[%s10451_s14 + $0x308] sm:$0xf]  ;;  %v9666_v7 = vld [vmem:[%s10451_s14 + $0x114] sm:$0xf0] }
 0x3b5   : > { %v11681_v30 = vadd.f32 %v4421_v8, %v4373_v4  ;;  %v8131_v4 = vor.u32 %v9730_v49, %v8130_v33  ;;  %4642 = vmatpush.bf16.msra.mxu0 %v7747_v28  ;;  %v7874_v62 = vld [vmem:[%s10451_s14 + $0x108] sm:$0xf]  ;;  %v13528_v28 = vld [vmem:[#allocation70_spill] sm:$0xff] }
 0x3b6   : > { %v4327_v2 = vadd.f32 %v4326_v61, %v4278_v50  ;;  %4472 = vmatmul.bf16.gmra.mxu0 %v13524_v3  ;;  %4521 = vmatmul.bf16.gmra.mxu1 %v13525_v5  ;;  %v7875_v3 = vor.u32 %v9666_v7, %v7874_v62  ;;  %v8754_v62 = vld [vmem:[%s10451_s14 + $0x7e8] sm:$0xf] }
 0x3b7   : > { %4570 = vmatmul.bf16.gmra.mxu2 %v13526_v25  ;;  %4789 = vmatpush.bf16.msra.mxu3 %v8131_v4  ;;  %v13530_v4 = vld [vmem:[#allocation72_spill] sm:$0xff] }
 0x3b8   : > { %4619 = vmatmul.bf16.gmra.mxu3 %v13527_v36  ;;  %4740 = vmatpush.bf16.msra.mxu2 %v8003_v63 }
 0x3b9   : > { %4691 = vmatpush.bf16.msra.mxu1 %v7875_v3  ;;  %v13531_v3 = vld [vmem:[#allocation73_spill] sm:$0xff] }
 0x3ba   : > { %v4375_v51 = vpop.f32.mrf.mxu2 }
 0x3bb   : > { %v4376_v8 = vadd.f32 %v4375_v51, %v4327_v2  ;;  %v4424_v35 = vpop.f32.mrf.mxu3  ;;  %v4279_v50 = vpop.f32.mrf.mxu0 }
 0x3bc   : > { %v4280_v61 = vadd.f32 %v4279_v50, %v11558_v37  ;;  %v4328_v25 = vpop.f32.mrf.mxu1 }
 0x3bd   : > { %v11694_v36 = vadd.f32 %v4424_v35, %v4376_v8  ;;  %v8626_v8 = vld [vmem:[%s10451_s14 + $0x6e8] sm:$0xf] }
 0x3be   : > { %v4329_v5 = vadd.f32 %v4328_v25, %v4280_v61  ;;  %v13529_v25 = vld [vmem:[#allocation71_spill] sm:$0xff]  ;;  %v9790_v61 = vld [vmem:[%s10451_s14 + $0x4f4] sm:$0xf0] }
 0x3bf   : > { %v8370_v35 = vld [vmem:[%s10451_s14 + $0x4e8] sm:$0xf] }
 0x3c2   : > { %v4377_v24 = vpop.f32.mrf.mxu2 }
 0x3c3   : > { %v4378_v2 = vadd.f32 %v4377_v24, %v4329_v5  ;;  %v4426_v63 = vpop.f32.mrf.mxu3  ;;  %v4282_v37 = vpop.f32.mrf.mxu0  ;;  %v9854_v5 = vld [vmem:[%s10451_s14 + $0x6f4] sm:$0xf0]  ;;  %v8371_v24 = vor.u32 %v9790_v61, %v8370_v35 }
 0x3c4   : > { %v4283_v38 = vadd.f32 %v4282_v37, %v11570_v32  ;;  %v4331_v33 = vpop.f32.mrf.mxu1  ;;  %v8627_v50 = vor.u32 %v9854_v5, %v8626_v8  ;;  %v9886_v32 = vld [vmem:[%s10451_s14 + $0x7f4] sm:$0xf0]  ;;  %v8498_v5 = vld [vmem:[%s10451_s14 + $0x5e8] sm:$0xf] }
 0x3c5   : > { %v11699_v49 = vadd.f32 %v4426_v63, %v4378_v2  ;;  %v8755_v2 = vor.u32 %v9886_v32, %v8754_v62  ;;  %4831 = vmatpush.bf16.msrb.mxu0 %v8371_v24  ;;  %v9850_v24 = vld [vmem:[%s10451_s14 + $0x6d4] sm:$0xf0] }
 0x3c6   : > { %v4332_v51 = vadd.f32 %v4331_v33, %v4283_v38  ;;  %4477 = vmatmul.bf16.gmra.mxu0 %v13528_v28  ;;  %4526 = vmatmul.bf16.gmra.mxu1 %v13529_v25  ;;  %v9822_v25 = vld [vmem:[%s10451_s14 + $0x5f4] sm:$0xf0] }
 0x3c7   : > { %4575 = vmatmul.bf16.gmra.mxu2 %v13530_v4  ;;  %4978 = vmatpush.bf16.msrb.mxu3 %v8755_v2  ;;  %v8499_v35 = vor.u32 %v9822_v25, %v8498_v5  ;;  %v13533_v25 = vld [vmem:[#allocation77_spill] sm:$0xff]  ;;  %v8354_v2 = vld [vmem:[%s10451_s14 + $0x4c8] sm:$0xf] }
 0x3c8   : > { %4624 = vmatmul.bf16.gmra.mxu3 %v13531_v3  ;;  %4929 = vmatpush.bf16.msrb.mxu2 %v8627_v50 }
 0x3c9   : > { %4880 = vmatpush.bf16.msrb.mxu1 %v8499_v35 }
 0x3ca   : > { %v4380_v7 = vpop.f32.mrf.mxu2 }
 0x3cb   : > { %v4381_v63 = vadd.f32 %v4380_v7, %v4332_v51  ;;  %v4429_v37 = vpop.f32.mrf.mxu3  ;;  %v4284_v38 = vpop.f32.mrf.mxu0  ;;  %v13532_v7 = vld [vmem:[#allocation76_spill] sm:$0xff] }
 0x3cc   : > { %v4285_v33 = vadd.f32 %v4284_v38, %v11574_v56  ;;  %v4333_v4 = vpop.f32.mrf.mxu1  ;;  %v8738_v38 = vld [vmem:[%s10451_s14 + $0x7c8] sm:$0xf] }
 0x3cd   : > { %v11712_v3 = vadd.f32 %v4429_v37, %v4381_v63 }
 0x3ce   : > { %v4334_v8 = vadd.f32 %v4333_v4, %v4285_v33  ;;  %v9882_v33 = vld [vmem:[%s10451_s14 + $0x7d4] sm:$0xf0] }
 0x3d2   : > { %v4382_v28 = vpop.f32.mrf.mxu2 }
 0x3d3   : > { %v4383_v61 = vadd.f32 %v4382_v28, %v4334_v8  ;;  %v4431_v51 = vpop.f32.mrf.mxu3  ;;  %v4287_v62 = vpop.f32.mrf.mxu0  ;;  %v8610_v28 = vld [vmem:[%s10451_s14 + $0x6c8] sm:$0xf] }
 0x3d4   : > { %v4288_v56 = vadd.f32 %v4287_v62, %v11586_v34  ;;  %v4336_v50 = vpop.f32.mrf.mxu1  ;;  %v8611_v37 = vor.u32 %v9850_v24, %v8610_v28  ;;  %v9786_v34 = vld [vmem:[%s10451_s14 + $0x4d4] sm:$0xf0]  ;;  %v8482_v28 = vld [vmem:[%s10451_s14 + $0x5c8] sm:$0xf] }
 0x3d5   : > { %v11717_v32 = vadd.f32 %v4431_v51, %v4383_v61  ;;  %v8355_v61 = vor.u32 %v9786_v34, %v8354_v2  ;;  %v8739_v51 = vor.u32 %v9882_v33, %v8738_v38  ;;  %v9818_v24 = vld [vmem:[%s10451_s14 + $0x5d4] sm:$0xf0]  ;;  %v13534_v38 = vld [vmem:[#allocation8_spill] sm:$0xff] }
 0x3d6   : > { %v4337_v4 = vadd.f32 %v4336_v50, %v4288_v56  ;;  %4482 = vmatmul.bf16.gmra.mxu0 %v11324_v53  ;;  %4531 = vmatmul.bf16.gmra.mxu1 %v11326_v39  ;;  %v9846_v33 = vld [vmem:[%s10451_s14 + $0x6b4] sm:$0xf0] }
 0x3d7   : > { %4580 = vmatmul.bf16.gmra.mxu2 %v13532_v7  ;;  %4832 = vmatpush.bf16.msrb.mxu0 %v8355_v61  ;;  %v9782_v61 = vld [vmem:[%s10451_s14 + $0x4b4] sm:$0xf0] }
 0x3d8   : > { %4629 = vmatmul.bf16.gmra.mxu3 %v13533_v25  ;;  %4930 = vmatpush.bf16.msrb.mxu2 %v8611_v37 }
 0x3d9   : > { %4979 = vmatpush.bf16.msrb.mxu3 %v8739_v51  ;;  %v8722_v51 = vld [vmem:[%s10451_s14 + $0x7a8] sm:$0xf] }
 0x3da   : > { %v4385_v63 = vpop.f32.mrf.mxu2 }
 0x3db   : > { %v4386_v8 = vadd.f32 %v4385_v63, %v4337_v4  ;;  %v4434_v5 = vpop.f32.mrf.mxu3  ;;  %v4289_v35 = vpop.f32.mrf.mxu0  ;;  %v8483_v4 = vor.u32 %v9818_v24, %v8482_v28 }
 0x3dc   : > { %v4290_v62 = vadd.f32 %v4289_v35, %v11591_v0  ;;  %v4338_v56 = vpop.f32.mrf.mxu1 }
 0x3dd   : > { %v11730_v50 = vadd.f32 %v4434_v5, %v4386_v8  ;;  %4881 = vmatpush.bf16.msrb.mxu1 %v8483_v4  ;;  %v8338_v8 = vld [vmem:[%s10451_s14 + $0x4a8] sm:$0xf]  ;;  %v516_v4 = vld [vmem:[#allocation2 + $0x1b0] sm:$0xff] }
 0x3de   : > { %v4339_v25 = vadd.f32 %v4338_v56, %v4290_v62  ;;  %v8339_v28 = vor.u32 %v9782_v61, %v8338_v8 }
 0x3e0   : > { %4833 = vmatpush.bf16.msrb.mxu0 %v8339_v28 }
 0x3e2   : > { %v4387_v7 = vpop.f32.mrf.mxu2 }
 0x3e3   : > { %v4388_v63 = vadd.f32 %v4387_v7, %v4339_v25  ;;  %v4436_v39 = vpop.f32.mrf.mxu3  ;;  %v4448_v2 = vpop.f32.mrf.mxu0  ;;  %v8594_v25 = vld [vmem:[%s10451_s14 + $0x6a8] sm:$0xf] }
 0x3e4   : > { %v4497_v0 = vpop.f32.mrf.mxu1  ;;  %v4449_v34 = vadd.f32 %v4448_v2, %v11604_v54  ;;  %v8595_v35 = vor.u32 %v9846_v33, %v8594_v25  ;;  %v8466_v33 = vld [vmem:[%s10451_s14 + $0x5a8] sm:$0xf] }
 0x3e5   : > { %v11734_v37 = vadd.f32 %v4436_v39, %v4388_v63  ;;  %v9878_v39 = vld [vmem:[%s10451_s14 + $0x7b4] sm:$0xf0] }
 0x3e6   : > { %4643 = vmatmul.bf16.vlgmr.msra.gmra.mxu0 %v10599_v17  ;;  %4692 = vmatmul.bf16.vlgmr.msra.gmra.mxu1 %v10604_v22  ;;  %v4498_v7 = vadd.f32 %v4497_v0, %v4449_v34  ;;  %v8723_v24 = vor.u32 %v9878_v39, %v8722_v51  ;;  %v520_v51 = vld [vmem:[#allocation2 + $0x168] sm:$0xff] }
 0x3e7   : > { %4741 = vmatmul.bf16.vlgmr.msra.gmra.mxu2 %v10606_v23 }
 0x3e8   : > { %4790 = vmatmul.bf16.vlgmr.msra.gmra.mxu3 %v13534_v38  ;;  %4931 = vmatpush.bf16.msrb.mxu2 %v8595_v35  ;;  %v9814_v38 = vld [vmem:[%s10451_s14 + $0x5b4] sm:$0xf0] }
 0x3e9   : > { %4980 = vmatpush.bf16.msrb.mxu3 %v8723_v24  ;;  %v8322_v24 = vld [vmem:[%s10451_s14 + $0x488] sm:$0xf] }
 0x3ea   : > { %v4546_v5 = vpop.f32.mrf.mxu2 }
 0x3eb   : > { %v4547_v62 = vadd.f32 %v4546_v5, %v4498_v7  ;;  %v4595_v54 = vpop.f32.mrf.mxu3  ;;  %v4450_v56 = vpop.f32.mrf.mxu0  ;;  %v8467_v7 = vor.u32 %v9814_v38, %v8466_v33  ;;  %v8578_v38 = vld [vmem:[%s10451_s14 + $0x688] sm:$0xf]  ;;  %v524_v33 = vld [vmem:[#allocation2 + $0x110] sm:$0xff] }
 0x3ec   : > { %v4499_v63 = vpop.f32.mrf.mxu1  ;;  %v4451_v0 = vadd.f32 %v4450_v56, %v11609_v29 }
 0x3ed   : > { %v4596_v2 = vadd.f32 %v4595_v54, %v4547_v62  ;;  %4882 = vmatpush.bf16.msrb.mxu1 %v8467_v7  ;;  %v9842_v54 = vld [vmem:[%s10451_s14 + $0x694] sm:$0xf0] }
 0x3ee   : > { %v4500_v25 = vadd.f32 %v4499_v63, %v4451_v0  ;;  %v8579_v28 = vor.u32 %v9842_v54, %v8578_v38  ;;  %v8706_v63 = vld [vmem:[%s10451_s14 + $0x788] sm:$0xf] }
 0x3ef   : > { %v5812_v34 = vadd.f32 %v4596_v2, %v516_v4  ;;  %v9778_v4 = vld [vmem:[%s10451_s14 + $0x494] sm:$0xf0] }
 0x3f0   : > { %4932 = vmatpush.bf16.msrb.mxu2 %v8579_v28 }
 0x3f1   : > { %5876 = vst [vmem:[#allocation2 + $0x1b0] sm:$0xff] %v5812_v34  ;;  %v8323_v34 = vor.u32 %v9778_v4, %v8322_v24  ;;  %v528_v24 = vld [vmem:[#allocation2 + $0x150] sm:$0xff] }
 0x3f2   : > { %v4548_v23 = vpop.f32.mrf.mxu2 }
 0x3f3   : > { %v4549_v5 = vadd.f32 %v4548_v23, %v4500_v25  ;;  %v4597_v8 = vpop.f32.mrf.mxu3  ;;  %v4453_v61 = vpop.f32.mrf.mxu0  ;;  %v9874_v25 = vld [vmem:[%s10451_s14 + $0x794] sm:$0xf0]  ;;  %4834 = vmatpush.bf16.msrb.mxu0 %v8323_v34 }
 0x3f4   : > { %v4502_v35 = vpop.f32.mrf.mxu1  ;;  %v4454_v39 = vadd.f32 %v4453_v61, %v11622_v52 }
 0x3f5   : > { %v4598_v29 = vadd.f32 %v4597_v8, %v4549_v5  ;;  %v8707_v5 = vor.u32 %v9874_v25, %v8706_v63 }
 0x3f6   : > { %4648 = vmatmul.bf16.gmra.mxu0 %v10636_v57  ;;  %4697 = vmatmul.bf16.gmra.mxu1 %v10638_v58  ;;  %v4503_v23 = vadd.f32 %v4502_v35, %v4454_v39  ;;  %v9810_v39 = vld [vmem:[%s10451_s14 + $0x594] sm:$0xf0] }
 0x3f7   : > { %v5816_v62 = vadd.f32 %v4598_v29, %v520_v51  ;;  %4746 = vmatmul.bf16.gmra.mxu2 %v10640_v59  ;;  %4981 = vmatpush.bf16.msrb.mxu3 %v8707_v5  ;;  %v8450_v29 = vld [vmem:[%s10451_s14 + $0x588] sm:$0xf] }
 0x3f8   : > { %4795 = vmatmul.bf16.gmra.mxu3 %v10642_v60  ;;  %v8690_v5 = vld [vmem:[%s10451_s14 + $0x768] sm:$0xf] }
 0x3f9   : > { %5880 = vst [vmem:[#allocation2 + $0x168] sm:$0xff] %v5816_v62 }
 0x3fa   : > { %v4551_v56 = vpop.f32.mrf.mxu2 }
 0x3fb   : > { %v4552_v52 = vadd.f32 %v4551_v56, %v4503_v23  ;;  %v4600_v2 = vpop.f32.mrf.mxu3  ;;  %v4455_v0 = vpop.f32.mrf.mxu0  ;;  %v8451_v23 = vor.u32 %v9810_v39, %v8450_v29  ;;  %v532_v29 = vld [vmem:[#allocation2 + $0x188] sm:$0xff] }
 0x3fc   : > { %v4504_v7 = vpop.f32.mrf.mxu1  ;;  %v4456_v61 = vadd.f32 %v4455_v0, %v11627_v31  ;;  %v9838_v0 = vld [vmem:[%s10451_s14 + $0x674] sm:$0xf0] }
 0x3fd   : > { %v4601_v8 = vadd.f32 %v4600_v2, %v4552_v52  ;;  %4883 = vmatpush.bf16.msrb.mxu1 %v8451_v23  ;;  %v8562_v2 = vld [vmem:[%s10451_s14 + $0x668] sm:$0xf] }
 0x3fe   : > { %v4505_v35 = vadd.f32 %v4504_v7, %v4456_v61  ;;  %v8563_v25 = vor.u32 %v9838_v0, %v8562_v2  ;;  %v9774_v7 = vld [vmem:[%s10451_s14 + $0x474] sm:$0xf0]  ;;  %v536_v0 = vld [vmem:[#allocation2 + $0x1a8] sm:$0xff] }
 0x3ff   : > { %v5820_v51 = vadd.f32 %v4601_v8, %v524_v33  ;;  %v8306_v33 = vld [vmem:[%s10451_s14 + $0x468] sm:$0xf] }
 0x400   : > { %4933 = vmatpush.bf16.msrb.mxu2 %v8563_v25 }
 0x401   : > { %5884 = vst [vmem:[#allocation2 + $0x110] sm:$0xff] %v5820_v51  ;;  %v8307_v51 = vor.u32 %v9774_v7, %v8306_v33 }
 0x402   : > { %v4553_v62 = vpop.f32.mrf.mxu2 }
 0x403   : > { %v4554_v38 = vadd.f32 %v4553_v62, %v4505_v35  ;;  %v4602_v54 = vpop.f32.mrf.mxu3  ;;  %v4458_v56 = vpop.f32.mrf.mxu0  ;;  %v9870_v35 = vld [vmem:[%s10451_s14 + $0x774] sm:$0xf0]  ;;  %4835 = vmatpush.bf16.msrb.mxu0 %v8307_v51  ;;  %v8290_v51 = vld [vmem:[%s10451_s14 + $0x448] sm:$0xf] }
 0x404   : > { %v4507_v28 = vpop.f32.mrf.mxu1  ;;  %v4459_v4 = vadd.f32 %v4458_v56, %v11640_v16  ;;  %v8691_v62 = vor.u32 %v9870_v35, %v8690_v5  ;;  %v8546_v5 = vld [vmem:[%s10451_s14 + $0x648] sm:$0xf]  ;;  %v9770_v35 = vld [vmem:[%s10451_s14 + $0x454] sm:$0xf0] }
 0x405   : > { %v4603_v31 = vadd.f32 %v4602_v54, %v4554_v38 }
 0x406   : > { %4653 = vmatmul.bf16.gmra.mxu0 %v10664_v18  ;;  %4702 = vmatmul.bf16.gmra.mxu1 %v10666_v19  ;;  %v4508_v52 = vadd.f32 %v4507_v28, %v4459_v4  ;;  %v9806_v28 = vld [vmem:[%s10451_s14 + $0x574] sm:$0xf0] }
 0x407   : > { %v5824_v63 = vadd.f32 %v4603_v31, %v528_v24  ;;  %4751 = vmatmul.bf16.gmra.mxu2 %v10668_v20  ;;  %4982 = vmatpush.bf16.msrb.mxu3 %v8691_v62  ;;  %v8434_v24 = vld [vmem:[%s10451_s14 + $0x568] sm:$0xf] }
 0x408   : > { %4800 = vmatmul.bf16.gmra.mxu3 %v10670_v21  ;;  %v8435_v4 = vor.u32 %v9806_v28, %v8434_v24 }
 0x409   : > { %5888 = vst [vmem:[#allocation2 + $0x150] sm:$0xff] %v5824_v63 }
 0x40a   : > { %v4556_v34 = vpop.f32.mrf.mxu2  ;;  %4884 = vmatpush.bf16.msrb.mxu1 %v8435_v4 }
 0x40b   : > { %v4557_v16 = vadd.f32 %v4556_v34, %v4508_v52  ;;  %v4605_v8 = vpop.f32.mrf.mxu3  ;;  %v4460_v61 = vpop.f32.mrf.mxu0 }
 0x40c   : > { %v4509_v39 = vpop.f32.mrf.mxu1  ;;  %v4461_v38 = vadd.f32 %v4460_v61, %v11645_v6 }
 0x40d   : > { %v4606_v23 = vadd.f32 %v4605_v8, %v4557_v16  ;;  %v9834_v16 = vld [vmem:[%s10451_s14 + $0x654] sm:$0xf0] }
 0x40e   : > { %v4510_v56 = vadd.f32 %v4509_v39, %v4461_v38  ;;  %v8547_v61 = vor.u32 %v9834_v16, %v8546_v5  ;;  %v9866_v38 = vld [vmem:[%s10451_s14 + $0x754] sm:$0xf0] }
 0x40f   : > { %v5828_v54 = vadd.f32 %v4606_v23, %v532_v29  ;;  %v8674_v29 = vld [vmem:[%s10451_s14 + $0x748] sm:$0xf]  ;;  %v8291_v23 = vor.u32 %v9770_v35, %v8290_v51  ;;  %v9830_v35 = vld [vmem:[%s10451_s14 + $0x634] sm:$0xf0] }
 0x410   : > { %4934 = vmatpush.bf16.msrb.mxu2 %v8547_v61  ;;  %v8675_v24 = vor.u32 %v9866_v38, %v8674_v29  ;;  %v8530_v51 = vld [vmem:[%s10451_s14 + $0x628] sm:$0xf] }
 0x411   : > { %5892 = vst [vmem:[#allocation2 + $0x188] sm:$0xff] %v5828_v54  ;;  %v540_v54 = vld [vmem:[#allocation2 + $0xf8] sm:$0xff]  ;;  %4836 = vmatpush.bf16.msrb.mxu0 %v8291_v23  ;;  %v8658_v23 = vld [vmem:[%s10451_s14 + $0x728] sm:$0xf] }
 0x412   : > { %v4558_v31 = vpop.f32.mrf.mxu2  ;;  %4983 = vmatpush.bf16.msrb.mxu3 %v8675_v24  ;;  %v9862_v24 = vld [vmem:[%s10451_s14 + $0x734] sm:$0xf0] }
 0x413   : > { %v4559_v63 = vadd.f32 %v4558_v31, %v4510_v56  ;;  %v4607_v52 = vpop.f32.mrf.mxu3  ;;  %v4463_v2 = vpop.f32.mrf.mxu0 }
 0x414   : > { %v4512_v34 = vpop.f32.mrf.mxu1  ;;  %v4464_v25 = vadd.f32 %v4463_v2, %v11658_v26  ;;  %v9802_v2 = vld [vmem:[%s10451_s14 + $0x554] sm:$0xf0] }
 0x415   : > { %v4608_v6 = vadd.f32 %v4607_v52, %v4559_v63  ;;  %v8418_v52 = vld [vmem:[%s10451_s14 + $0x548] sm:$0xf] }
 0x416   : > { %4658 = vmatmul.bf16.gmra.mxu0 %v10692_v45  ;;  %4707 = vmatmul.bf16.gmra.mxu1 %v10694_v46  ;;  %v4513_v7 = vadd.f32 %v4512_v34, %v4464_v25  ;;  %v8419_v34 = vor.u32 %v9802_v2, %v8418_v52 }
 0x417   : > { %v5832_v33 = vadd.f32 %v4608_v6, %v536_v0  ;;  %4756 = vmatmul.bf16.gmra.mxu2 %v10696_v47 }
 0x418   : > { %4805 = vmatmul.bf16.gmra.mxu3 %v10698_v48  ;;  %4885 = vmatpush.bf16.msrb.mxu1 %v8419_v34  ;;  %v8402_v34 = vld [vmem:[%s10451_s14 + $0x528] sm:$0xf] }
 0x419   : > { %5896 = vst [vmem:[#allocation2 + $0x1a8] sm:$0xff] %v5832_v33 }
 0x41a   : > { %v4561_v8 = vpop.f32.mrf.mxu2 }
 0x41b   : > { %v4562_v26 = vadd.f32 %v4561_v8, %v4513_v7  ;;  %v4610_v39 = vpop.f32.mrf.mxu3  ;;  %v4465_v62 = vpop.f32.mrf.mxu0  ;;  %v544_v7 = vld [vmem:[#allocation2] sm:$0xff] }
 0x41c   : > { %v4514_v56 = vpop.f32.mrf.mxu1  ;;  %v4466_v31 = vadd.f32 %v4465_v62, %v11663_v1  ;;  %v9766_v62 = vld [vmem:[%s10451_s14 + $0x434] sm:$0xf0] }
 0x41d   : > { %v4611_v28 = vadd.f32 %v4610_v39, %v4562_v26  ;;  %v8531_v26 = vor.u32 %v9830_v35, %v8530_v51  ;;  %v8274_v39 = vld [vmem:[%s10451_s14 + $0x428] sm:$0xf] }
 0x41e   : > { %v4515_v63 = vadd.f32 %v4514_v56, %v4466_v31  ;;  %v8275_v56 = vor.u32 %v9766_v62, %v8274_v39 }
 0x41f   : > { %v5836_v4 = vadd.f32 %v4611_v28, %v540_v54  ;;  %v548_v28 = vld [vmem:[#allocation2 + $0x1d0] sm:$0xff]  ;;  %4935 = vmatpush.bf16.msrb.mxu2 %v8531_v26  ;;  %v9826_v26 = vld [vmem:[%s10451_s14 + $0x614] sm:$0xf0] }
 0x420   : > { %4837 = vmatpush.bf16.msrb.mxu0 %v8275_v56 }
 0x421   : > { %5900 = vst [vmem:[#allocation2 + $0xf8] sm:$0xff] %v5836_v4  ;;  %v8659_v4 = vor.u32 %v9862_v24, %v8658_v23  ;;  %v8258_v23 = vld [vmem:[%s10451_s14 + $0x408] sm:$0xf] }
 0x422   : > { %v4563_v0 = vpop.f32.mrf.mxu2 }
 0x423   : > { %v4564_v6 = vadd.f32 %v4563_v0, %v4515_v63  ;;  %v4612_v25 = vpop.f32.mrf.mxu3  ;;  %v4468_v33 = vpop.f32.mrf.mxu0  ;;  %4984 = vmatpush.bf16.msrb.mxu3 %v8659_v4 }
 0x424   : > { %v4517_v5 = vpop.f32.mrf.mxu1  ;;  %v4469_v16 = vadd.f32 %v4468_v33, %v11676_v55 }
 0x425   : > { %v4613_v1 = vadd.f32 %v4612_v25, %v4564_v6  ;;  %v9798_v6 = vld [vmem:[%s10451_s14 + $0x534] sm:$0xf0] }
 0x426   : > { %4663 = vmatmul.bf16.gmra.mxu0 %v10720_v9  ;;  %4712 = vmatmul.bf16.gmra.mxu1 %v10722_v10  ;;  %v4518_v61 = vadd.f32 %v4517_v5, %v4469_v16  ;;  %v8403_v33 = vor.u32 %v9798_v6, %v8402_v34  ;;  %v552_v16 = vld [vmem:[#allocation2 + $0x1f8] sm:$0xff]  ;;  %v8386_v6 = vld [vmem:[%s10451_s14 + $0x508] sm:$0xf] }
 0x427   : > { %v5840_v8 = vadd.f32 %v4613_v1, %v544_v7  ;;  %4761 = vmatmul.bf16.gmra.mxu2 %v10724_v11 }
 0x428   : > { %4810 = vmatmul.bf16.gmra.mxu3 %v10726_v12  ;;  %4886 = vmatpush.bf16.msrb.mxu1 %v8403_v33 }
 0x429   : > { %5904 = vst [vmem:[#allocation2] sm:$0xff] %v5840_v8 }
 0x42a   : > { %v4566_v29 = vpop.f32.mrf.mxu2 }
 0x42b   : > { %v4567_v55 = vadd.f32 %v4566_v29, %v4518_v61  ;;  %v4615_v38 = vpop.f32.mrf.mxu3  ;;  %v4470_v54 = vpop.f32.mrf.mxu0  ;;  %v8514_v29 = vld [vmem:[%s10451_s14 + $0x608] sm:$0xf] }
 0x42c   : > { %v4519_v31 = vpop.f32.mrf.mxu1  ;;  %v4471_v52 = vadd.f32 %v4470_v54, %v11681_v30  ;;  %v8515_v62 = vor.u32 %v9826_v26, %v8514_v29  ;;  %v9138_v29 = vld [vmem:[%s10451_s14 + $0xae8] sm:$0xf]  ;;  %v9982_v26 = vld [vmem:[%s10451_s14 + $0xaf4] sm:$0xf0] }
 0x42d   : > { %v4616_v63 = vadd.f32 %v4615_v38, %v4567_v55  ;;  %v9762_v55 = vld [vmem:[%s10451_s14 + $0x414] sm:$0xf0]  ;;  %v8642_v38 = vld [vmem:[%s10451_s14 + $0x708] sm:$0xf] }
 0x42e   : > { %v4520_v0 = vadd.f32 %v4519_v31, %v4471_v52  ;;  %v8259_v24 = vor.u32 %v9762_v55, %v8258_v23  ;;  %v556_v31 = vld [vmem:[#allocation2 + $0x1f0] sm:$0xff]  ;;  %4936 = vmatpush.bf16.msrb.mxu2 %v8515_v62  ;;  %v9139_v62 = vor.u32 %v9982_v26, %v9138_v29  ;;  %v8882_v23 = vld [vmem:[%s10451_s14 + $0x8e8] sm:$0xf]  ;;  %v9978_v26 = vld [vmem:[%s10451_s14 + $0xad4] sm:$0xf0] }
 0x42f   : > { %v5844_v2 = vadd.f32 %v4616_v63, %v548_v28  ;;  %v9858_v28 = vld [vmem:[%s10451_s14 + $0x714] sm:$0xf0]  ;;  %v9266_v55 = vld [vmem:[%s10451_s14 + $0xbe8] sm:$0xf] }
 0x430   : > { %v8643_v63 = vor.u32 %v9858_v28, %v8642_v38  ;;  %4838 = vmatpush.bf16.msrb.mxu0 %v8259_v24  ;;  %v10014_v24 = vld [vmem:[%s10451_s14 + $0xbf4] sm:$0xf0]  ;;  %v564_v28 = vld [vmem:[#allocation2 + $0x88] sm:$0xff] }
 0x431   : > { %5908 = vst [vmem:[#allocation2 + $0x1d0] sm:$0xff] %v5844_v2  ;;  %v9122_v29 = vld [vmem:[%s10451_s14 + $0xac8] sm:$0xf] }
 0x432   : > { %v4568_v25 = vpop.f32.mrf.mxu2  ;;  %4985 = vmatpush.bf16.msrb.mxu3 %v8643_v63  ;;  %5125 = vmatpush.bf16.msra.mxu2 %v9139_v62 }
 0x433   : > { %v4569_v7 = vadd.f32 %v4568_v25, %v4520_v0  ;;  %v4617_v5 = vpop.f32.mrf.mxu3  ;;  %v4473_v1 = vpop.f32.mrf.mxu0  ;;  %v9794_v25 = vld [vmem:[%s10451_s14 + $0x514] sm:$0xf0] }
 0x434   : > { %v4522_v8 = vpop.f32.mrf.mxu1  ;;  %v4474_v61 = vadd.f32 %v4473_v1, %v11694_v36 }
 0x435   : > { %v4618_v30 = vadd.f32 %v4617_v5, %v4569_v7  ;;  %v8387_v7 = vor.u32 %v9794_v25, %v8386_v6 }
 0x436   : > { %4668 = vmatmul.bf16.gmra.mxu0 %v10748_v41  ;;  %4717 = vmatmul.bf16.gmra.mxu1 %v10750_v42  ;;  %v4523_v35 = vadd.f32 %v4522_v8, %v4474_v61  ;;  %v560_v8 = vld [vmem:[#allocation2 + $0x90] sm:$0xff] }
 0x437   : > { %v5848_v51 = vadd.f32 %v4618_v30, %v552_v16  ;;  %4766 = vmatmul.bf16.gmra.mxu2 %v10752_v43  ;;  %4887 = vmatpush.bf16.msrb.mxu1 %v8387_v7 }
 0x438   : > { %4815 = vmatmul.bf16.gmra.mxu3 %v10754_v44 }
 0x439   : > { %5912 = vst [vmem:[#allocation2 + $0x1f8] sm:$0xff] %v5848_v51 }
 0x43a   : > { %v4571_v39 = vpop.f32.mrf.mxu2 }
 0x43b   : > { %v4572_v36 = vadd.f32 %v4571_v39, %v4523_v35  ;;  %v4620_v54 = vpop.f32.mrf.mxu3  ;;  %v4475_v56 = vpop.f32.mrf.mxu0 }
 0x43c   : > { %v4524_v4 = vpop.f32.mrf.mxu1  ;;  %v4476_v2 = vadd.f32 %v4475_v56, %v11699_v49 }
 0x43d   : > { %v4621_v52 = vadd.f32 %v4620_v54, %v4572_v36 }
 0x43e   : > { %v4525_v34 = vadd.f32 %v4524_v4, %v4476_v2  ;;  %v9267_v4 = vor.u32 %v10014_v24, %v9266_v55  ;;  %v9010_v2 = vld [vmem:[%s10451_s14 + $0x9e8] sm:$0xf] }
 0x43f   : > { %v5852_v0 = vadd.f32 %v4621_v52, %v556_v31  ;;  %v9250_v55 = vld [vmem:[%s10451_s14 + $0xbc8] sm:$0xf] }
 0x440   : > { %5174 = vmatpush.bf16.msra.mxu3 %v9267_v4 }
 0x441   : > { %5916 = vst [vmem:[#allocation2 + $0x1f0] sm:$0xff] %v5852_v0  ;;  %v9950_v0 = vld [vmem:[%s10451_s14 + $0x9f4] sm:$0xf0] }
 0x442   : > { %v4573_v33 = vpop.f32.mrf.mxu2 }
 0x443   : > { %v4574_v5 = vadd.f32 %v4573_v33, %v4525_v34  ;;  %v4622_v1 = vpop.f32.mrf.mxu3  ;;  %v4478_v16 = vpop.f32.mrf.mxu0  ;;  %v9011_v34 = vor.u32 %v9950_v0, %v9010_v2  ;;  %v8994_v2 = vld [vmem:[%s10451_s14 + $0x9c8] sm:$0xf]  ;;  %v9946_v0 = vld [vmem:[%s10451_s14 + $0x9d4] sm:$0xf0] }
 0x444   : > { %v4527_v30 = vpop.f32.mrf.mxu1  ;;  %v4479_v61 = vadd.f32 %v4478_v16, %v11712_v3  ;;  %v9918_v3 = vld [vmem:[%s10451_s14 + $0x8f4] sm:$0xf0] }
 0x445   : > { %v4623_v49 = vadd.f32 %v4622_v1, %v4574_v5  ;;  %v8883_v56 = vor.u32 %v9918_v3, %v8882_v23  ;;  %5076 = vmatpush.bf16.msra.mxu1 %v9011_v34  ;;  %v568_v16 = vld [vmem:[#allocation2 + $0x178] sm:$0xff]  ;;  %v9123_v23 = vor.u32 %v9978_v26, %v9122_v29  ;;  %v8995_v34 = vor.u32 %v9946_v0, %v8994_v2  ;;  %v13539_v29 = vld [vmem:[#allocation15_spill] sm:$0xff]  ;;  %v13540_v26 = vld [vmem:[#allocation16_spill] sm:$0xff] }
 0x446   : > { %4673 = vmatmul.bf16.gmra.mxu0 %v10776_v13  ;;  %4722 = vmatmul.bf16.gmra.mxu1 %v10778_v14  ;;  %v4528_v35 = vadd.f32 %v4527_v30, %v4479_v61  ;;  %v13535_v61 = vld [vmem:[#allocation11_spill] sm:$0xff]  ;;  %v9914_v3 = vld [vmem:[%s10451_s14 + $0x8d4] sm:$0xf0] }
 0x447   : > { %v5856_v51 = vadd.f32 %v4623_v49, %v560_v8  ;;  %4771 = vmatmul.bf16.gmra.mxu2 %v10780_v15  ;;  %5027 = vmatpush.bf16.msra.mxu0 %v8883_v56  ;;  %v8978_v0 = vld [vmem:[%s10451_s14 + $0x9a8] sm:$0xf] }
 0x448   : > { %4820 = vmatmul.bf16.gmra.mxu3 %v13467_v40  ;;  %5126 = vmatpush.bf16.msra.mxu2 %v9123_v23  ;;  %v9974_v23 = vld [vmem:[%s10451_s14 + $0xab4] sm:$0xf0] }
 0x449   : > { %5920 = vst [vmem:[#allocation2 + $0x90] sm:$0xff] %v5856_v51  ;;  %v13536_v51 = vld [vmem:[#allocation12_spill] sm:$0xff]  ;;  %5077 = vmatpush.bf16.msra.mxu1 %v8995_v34  ;;  %v9942_v34 = vld [vmem:[%s10451_s14 + $0x9b4] sm:$0xf0] }
 0x44a   : > { %v4576_v39 = vpop.f32.mrf.mxu2 }
 0x44b   : > { %v4577_v38 = vadd.f32 %v4576_v39, %v4528_v35  ;;  %v4625_v36 = vpop.f32.mrf.mxu3  ;;  %v4480_v54 = vpop.f32.mrf.mxu0  ;;  %v13537_v35 = vld [vmem:[#allocation13_spill] sm:$0xff]  ;;  %v8866_v39 = vld [vmem:[%s10451_s14 + $0x8c8] sm:$0xf] }
 0x44c   : > { %v4529_v31 = vpop.f32.mrf.mxu1  ;;  %v4481_v52 = vadd.f32 %v4480_v54, %v11717_v32 }
 0x44d   : > { %v4626_v63 = vadd.f32 %v4625_v36, %v4577_v38  ;;  %v8867_v38 = vor.u32 %v9914_v3, %v8866_v39  ;;  %v10010_v36 = vld [vmem:[%s10451_s14 + $0xbd4] sm:$0xf0]  ;;  %v8850_v3 = vld [vmem:[%s10451_s14 + $0x8a8] sm:$0xf] }
 0x44e   : > { %v4530_v25 = vadd.f32 %v4529_v31, %v4481_v52  ;;  %v572_v31 = vld [vmem:[#allocation2 + $0x38] sm:$0xff] }
 0x44f   : > { %v5860_v6 = vadd.f32 %v4626_v63, %v564_v28  ;;  %v9251_v28 = vor.u32 %v10010_v36, %v9250_v55  ;;  %5028 = vmatpush.bf16.msra.mxu0 %v8867_v38  ;;  %v13541_v39 = vld [vmem:[#allocation17_spill] sm:$0xff]  ;;  %v9234_v38 = vld [vmem:[%s10451_s14 + $0xba8] sm:$0xf] }
 0x451   : > { %5924 = vst [vmem:[#allocation2 + $0x88] sm:$0xff] %v5860_v6  ;;  %5175 = vmatpush.bf16.msra.mxu3 %v9251_v28 }
 0x452   : > { %v4578_v33 = vpop.f32.mrf.mxu2 }
 0x453   : > { %v4579_v7 = vadd.f32 %v4578_v33, %v4530_v25  ;;  %v4627_v5 = vpop.f32.mrf.mxu3  ;;  %v4483_v1 = vpop.f32.mrf.mxu0 }
 0x454   : > { %v4532_v32 = vpop.f32.mrf.mxu1  ;;  %v4484_v30 = vadd.f32 %v4483_v1, %v11730_v50 }
 0x455   : > { %v4628_v8 = vadd.f32 %v4627_v5, %v4579_v7 }
 0x456   : > { %4678 = vmatmul.bf16.gmra.mxu0 %v13468_v27  ;;  %4727 = vmatmul.bf16.gmra.mxu1 %v13535_v61  ;;  %v4533_v62 = vadd.f32 %v4532_v32, %v4484_v30  ;;  %v13538_v30 = vld [vmem:[#allocation14_spill] sm:$0xff] }
 0x457   : > { %v5864_v49 = vadd.f32 %v4628_v8, %v568_v16  ;;  %4776 = vmatmul.bf16.gmra.mxu2 %v13536_v51  ;;  %v576_v16 = vld [vmem:[#allocation2 + $0x10] sm:$0xff] }
 0x458   : > { %4825 = vmatmul.bf16.gmra.mxu3 %v13537_v35 }
 0x459   : > { %5928 = vst [vmem:[#allocation2 + $0x178] sm:$0xff] %v5864_v49 }
 0x45a   : > { %v4581_v50 = vpop.f32.mrf.mxu2 }
 0x45b   : > { %v4582_v54 = vadd.f32 %v4581_v50, %v4533_v62  ;;  %v4630_v56 = vpop.f32.mrf.mxu3  ;;  %v4485_v24 = vpop.f32.mrf.mxu0  ;;  %v9106_v62 = vld [vmem:[%s10451_s14 + $0xaa8] sm:$0xf]  ;;  %v9910_v50 = vld [vmem:[%s10451_s14 + $0x8b4] sm:$0xf0] }
 0x45c   : > { %v4534_v4 = vpop.f32.mrf.mxu1  ;;  %v4486_v52 = vadd.f32 %v4485_v24, %v11734_v37  ;;  %v9107_v55 = vor.u32 %v9974_v23, %v9106_v62  ;;  %v13545_v62 = vld [vmem:[#allocation21_spill] sm:$0xff]  ;;  %v9090_v23 = vld [vmem:[%s10451_s14 + $0xa88] sm:$0xf] }
 0x45d   : > { %v4631_v63 = vadd.f32 %v4630_v56, %v4582_v54  ;;  %v8851_v54 = vor.u32 %v9910_v50, %v8850_v3  ;;  %v10006_v56 = vld [vmem:[%s10451_s14 + $0xbb4] sm:$0xf0] }
 0x45e   : > { %v4535_v25 = vadd.f32 %v4534_v4, %v4486_v52  ;;  %5127 = vmatpush.bf16.msra.mxu2 %v9107_v55  ;;  %v9235_v4 = vor.u32 %v10006_v56, %v9234_v38  ;;  %v9970_v3 = vld [vmem:[%s10451_s14 + $0xa94] sm:$0xf0]  ;;  %v8834_v55 = vld [vmem:[%s10451_s14 + $0x888] sm:$0xf] }
 0x45f   : > { %v5868_v6 = vadd.f32 %v4631_v63, %v572_v31  ;;  %5029 = vmatpush.bf16.msra.mxu0 %v8851_v54  ;;  %v9091_v50 = vor.u32 %v9970_v3, %v9090_v23  ;;  %v9906_v38 = vld [vmem:[%s10451_s14 + $0x894] sm:$0xf0] }
 0x460   : > { %5176 = vmatpush.bf16.msra.mxu3 %v9235_v4  ;;  %v10002_v54 = vld [vmem:[%s10451_s14 + $0xb94] sm:$0xf0] }
 0x461   : > { %5932 = vst [vmem:[#allocation2 + $0x38] sm:$0xff] %v5868_v6  ;;  %v8979_v6 = vor.u32 %v9942_v34, %v8978_v0 }
 0x462   : > { %v4583_v33 = vpop.f32.mrf.mxu2  ;;  %5128 = vmatpush.bf16.msra.mxu2 %v9091_v50  ;;  %v13546_v50 = vld [vmem:[#allocation22_spill] sm:$0xff] }
 0x463   : > { %v4584_v7 = vadd.f32 %v4583_v33, %v4535_v25  ;;  %v4632_v5 = vpop.f32.mrf.mxu3  ;;  %v4644_v1 = vpop.f32.mrf.mxu0  ;;  %5078 = vmatpush.bf16.msra.mxu1 %v8979_v6  ;;  %v8962_v6 = vld [vmem:[%s10451_s14 + $0x988] sm:$0xf] }
 0x464   : > { %v4693_v32 = vpop.f32.mrf.mxu1 }
 0x465   : > { %v4633_v37 = vadd.f32 %v4632_v5, %v4584_v7  ;;  %v4694_v8 = vadd.f32 %v4693_v32, %v4644_v1 }
 0x466   : > { %4839 = vmatmul.bf16.vlgmr.msrb.gmra.mxu0 %v13538_v30  ;;  %4888 = vmatmul.bf16.vlgmr.msrb.gmra.mxu1 %v13539_v29  ;;  %v9688_v29 = vld [vmem:[%s10451_s14 + $0x1cc] sm:$0xf] }
 0x467   : > { %v5872_v49 = vadd.f32 %v4633_v37, %v576_v16  ;;  %4937 = vmatmul.bf16.vlgmr.msrb.gmra.mxu2 %v13540_v26  ;;  %v13542_v37 = vld [vmem:[#allocation18_spill] sm:$0xff] }
 0x468   : > { %4986 = vmatmul.bf16.vlgmr.msrb.gmra.mxu3 %v13541_v39 }
 0x469   : > { %5936 = vst [vmem:[#allocation2 + $0x10] sm:$0xff] %v5872_v49  ;;  %v13544_v49 = vld [vmem:[#allocation20_spill] sm:$0xff] }
 0x46a   : > { %v4742_v36 = vpop.f32.mrf.mxu2 }
 0x46b   : > { %v4743_v24 = vadd.f32 %v4742_v36, %v4694_v8  ;;  %v4791_v28 = vpop.f32.mrf.mxu3  ;;  %v4646_v31 = vpop.f32.mrf.mxu0  ;;  %v13543_v8 = vld [vmem:[#allocation19_spill] sm:$0xff] }
 0x46c   : > { %v4695_v63 = vpop.f32.mrf.mxu1  ;;  %v9218_v36 = vld [vmem:[%s10451_s14 + $0xb88] sm:$0xf] }
 0x46d   : > { %v11858_v52 = vadd.f32 %v4791_v28, %v4743_v24  ;;  %v4696_v2 = vadd.f32 %v4695_v63, %v4646_v31  ;;  %v8835_v24 = vor.u32 %v9906_v38, %v8834_v55  ;;  %v9219_v28 = vor.u32 %v10002_v54, %v9218_v36  ;;  %v13547_v38 = vld [vmem:[#allocation23_spill] sm:$0xff]  ;;  %v13548_v36 = vld [vmem:[#allocation24_spill] sm:$0xff]  ;;  %v13549_v54 = vld [vmem:[#allocation25_spill] sm:$0xff] }
 0x46f   : > { %5030 = vmatpush.bf16.msra.mxu0 %v8835_v24  ;;  %5177 = vmatpush.bf16.msra.mxu3 %v9219_v28  ;;  %v9966_v24 = vld [vmem:[%s10451_s14 + $0xa74] sm:$0xf0]  ;;  %v8818_v28 = vld [vmem:[%s10451_s14 + $0x868] sm:$0xf] }
 0x472   : > { %v4744_v25 = vpop.f32.mrf.mxu2 }
 0x473   : > { %v4745_v33 = vadd.f32 %v4744_v25, %v4696_v2  ;;  %v4793_v7 = vpop.f32.mrf.mxu3  ;;  %v4649_v5 = vpop.f32.mrf.mxu0  ;;  %v9938_v25 = vld [vmem:[%s10451_s14 + $0x994] sm:$0xf0] }
 0x474   : > { %v4698_v1 = vpop.f32.mrf.mxu1 }
 0x475   : > { %v11862_v16 = vadd.f32 %v4793_v7, %v4745_v33  ;;  %v4699_v32 = vadd.f32 %v4698_v1, %v4649_v5  ;;  %v8963_v33 = vor.u32 %v9938_v25, %v8962_v6 }
 0x476   : > { %4844 = vmatmul.bf16.gmra.mxu0 %v13542_v37  ;;  %4893 = vmatmul.bf16.gmra.mxu1 %v13543_v8 }
 0x477   : > { %4942 = vmatmul.bf16.gmra.mxu2 %v13544_v49  ;;  %5079 = vmatpush.bf16.msra.mxu1 %v8963_v33 }
 0x478   : > { %4991 = vmatmul.bf16.gmra.mxu3 %v13545_v62 }
 0x47a   : > { %v4747_v56 = vpop.f32.mrf.mxu2 }
 0x47b   : > { %v4748_v31 = vadd.f32 %v4747_v56, %v4699_v32  ;;  %v4796_v4 = vpop.f32.mrf.mxu3  ;;  %v4651_v63 = vpop.f32.mrf.mxu0  ;;  %v9074_v56 = vld [vmem:[%s10451_s14 + $0xa68] sm:$0xf] }
 0x47c   : > { %v4700_v2 = vpop.f32.mrf.mxu1 }
 0x47d   : > { %v11874_v0 = vadd.f32 %v4796_v4, %v4748_v31  ;;  %v4701_v34 = vadd.f32 %v4700_v2, %v4651_v63  ;;  %v9075_v31 = vor.u32 %v9966_v24, %v9074_v56  ;;  %v9902_v4 = vld [vmem:[%s10451_s14 + $0x874] sm:$0xf0]  ;;  %v9202_v63 = vld [vmem:[%s10451_s14 + $0xb68] sm:$0xf] }
 0x47e   : > { %v9998_v2 = vld [vmem:[%s10451_s14 + $0xb74] sm:$0xf0]  ;;  %v8819_v6 = vor.u32 %v9902_v4, %v8818_v28  ;;  %v8946_v56 = vld [vmem:[%s10451_s14 + $0x968] sm:$0xf] }
 0x47f   : > { %v9203_v25 = vor.u32 %v9998_v2, %v9202_v63  ;;  %5129 = vmatpush.bf16.msra.mxu2 %v9075_v31  ;;  %v9934_v24 = vld [vmem:[%s10451_s14 + $0x974] sm:$0xf0] }
 0x480   : > { %5031 = vmatpush.bf16.msra.mxu0 %v8819_v6  ;;  %v13550_v6 = vld [vmem:[#allocation26_spill] sm:$0xff] }
 0x481   : > { %5178 = vmatpush.bf16.msra.mxu3 %v9203_v25  ;;  %v13551_v25 = vld [vmem:[#allocation27_spill] sm:$0xff] }
 0x482   : > { %v4749_v7 = vpop.f32.mrf.mxu2 }
 0x483   : > { %v4750_v5 = vadd.f32 %v4749_v7, %v4701_v34  ;;  %v4798_v1 = vpop.f32.mrf.mxu3  ;;  %v4654_v32 = vpop.f32.mrf.mxu0 }
 0x484   : > { %v4703_v23 = vpop.f32.mrf.mxu1 }
 0x485   : > { %v11878_v3 = vadd.f32 %v4798_v1, %v4750_v5  ;;  %v4704_v55 = vadd.f32 %v4703_v23, %v4654_v32 }
 0x486   : > { %4849 = vmatmul.bf16.gmra.mxu0 %v13546_v50  ;;  %4898 = vmatmul.bf16.gmra.mxu1 %v13547_v38 }
 0x487   : > { %4947 = vmatmul.bf16.gmra.mxu2 %v13548_v36 }
 0x488   : > { %4996 = vmatmul.bf16.gmra.mxu3 %v13549_v54  ;;  %v8947_v54 = vor.u32 %v9934_v24, %v8946_v56  ;;  %v9186_v24 = vld [vmem:[%s10451_s14 + $0xb48] sm:$0xf] }
 0x48a   : > { %v4752_v34 = vpop.f32.mrf.mxu2  ;;  %5080 = vmatpush.bf16.msra.mxu1 %v8947_v54  ;;  %v9058_v54 = vld [vmem:[%s10451_s14 + $0xa48] sm:$0xf] }
 0x48b   : > { %v4753_v33 = vadd.f32 %v4752_v34, %v4704_v55  ;;  %v4801_v7 = vpop.f32.mrf.mxu3  ;;  %v4656_v5 = vpop.f32.mrf.mxu0 }
 0x48c   : > { %v4705_v1 = vpop.f32.mrf.mxu1 }
 0x48d   : > { %v11890_v32 = vadd.f32 %v4801_v7, %v4753_v33  ;;  %v4706_v23 = vadd.f32 %v4705_v1, %v4656_v5  ;;  %v13552_v33 = vld [vmem:[#allocation28_spill] sm:$0xff]  ;;  %v13553_v7 = vld [vmem:[#allocation29_spill] sm:$0xff] }
 0x48e   : > { %v9962_v5 = vld [vmem:[%s10451_s14 + $0xa54] sm:$0xf0]  ;;  %v8802_v1 = vld [vmem:[%s10451_s14 + $0x848] sm:$0xf] }
 0x48f   : > { %v9059_v56 = vor.u32 %v9962_v5, %v9058_v54  ;;  %v8930_v54 = vld [vmem:[%s10451_s14 + $0x948] sm:$0xf]  ;;  %v9930_v5 = vld [vmem:[%s10451_s14 + $0x954] sm:$0xf0] }
 0x490   : > { %v8931_v38 = vor.u32 %v9930_v5, %v8930_v54  ;;  %v9170_v5 = vld [vmem:[%s10451_s14 + $0xb28] sm:$0xf] }
 0x491   : > { %5130 = vmatpush.bf16.msra.mxu2 %v9059_v56 }
 0x492   : > { %v4754_v28 = vpop.f32.mrf.mxu2  ;;  %5081 = vmatpush.bf16.msra.mxu1 %v8931_v38  ;;  %v9042_v38 = vld [vmem:[%s10451_s14 + $0xa28] sm:$0xf] }
 0x493   : > { %v4755_v55 = vadd.f32 %v4754_v28, %v4706_v23  ;;  %v4803_v4 = vpop.f32.mrf.mxu3  ;;  %v4659_v31 = vpop.f32.mrf.mxu0  ;;  %v9898_v23 = vld [vmem:[%s10451_s14 + $0x854] sm:$0xf0] }
 0x494   : > { %v4708_v63 = vpop.f32.mrf.mxu1  ;;  %v9994_v28 = vld [vmem:[%s10451_s14 + $0xb54] sm:$0xf0] }
 0x495   : > { %v11894_v2 = vadd.f32 %v4803_v4, %v4755_v55  ;;  %v4709_v34 = vadd.f32 %v4708_v63, %v4659_v31  ;;  %v8803_v4 = vor.u32 %v9898_v23, %v8802_v1  ;;  %v9187_v31 = vor.u32 %v9994_v28, %v9186_v24 }
 0x496   : > { %4854 = vmatmul.bf16.gmra.mxu0 %v13550_v6  ;;  %4903 = vmatmul.bf16.gmra.mxu1 %v13551_v25 }
 0x497   : > { %4952 = vmatmul.bf16.gmra.mxu2 %v13552_v33  ;;  %5032 = vmatpush.bf16.msra.mxu0 %v8803_v4  ;;  %v13557_v4 = vld [vmem:[#allocation33_spill] sm:$0xff] }
 0x498   : > { %5001 = vmatmul.bf16.gmra.mxu3 %v13553_v7 }
 0x499   : > { %5179 = vmatpush.bf16.msra.mxu3 %v9187_v31  ;;  %v9958_v31 = vld [vmem:[%s10451_s14 + $0xa34] sm:$0xf0] }
 0x49a   : > { %v4757_v55 = vpop.f32.mrf.mxu2  ;;  %v9043_v54 = vor.u32 %v9958_v31, %v9042_v38  ;;  %v8914_v38 = vld [vmem:[%s10451_s14 + $0x928] sm:$0xf]  ;;  %v9926_v31 = vld [vmem:[%s10451_s14 + $0x934] sm:$0xf0] }
 0x49b   : > { %v4758_v63 = vadd.f32 %v4757_v55, %v4709_v34  ;;  %v4806_v6 = vpop.f32.mrf.mxu3  ;;  %v4661_v36 = vpop.f32.mrf.mxu0  ;;  %v13554_v55 = vld [vmem:[#allocation30_spill] sm:$0xff]  ;;  %v8915_v62 = vor.u32 %v9926_v31, %v8914_v38  ;;  %v9154_v31 = vld [vmem:[%s10451_s14 + $0xb08] sm:$0xf] }
 0x49c   : > { %v4710_v25 = vpop.f32.mrf.mxu1  ;;  %5131 = vmatpush.bf16.msra.mxu2 %v9043_v54 }
 0x49d   : > { %v11906_v7 = vadd.f32 %v4806_v6, %v4758_v63  ;;  %v4711_v33 = vadd.f32 %v4710_v25, %v4661_v36  ;;  %v13555_v36 = vld [vmem:[#allocation31_spill] sm:$0xff]  ;;  %v13556_v25 = vld [vmem:[#allocation32_spill] sm:$0xff]  ;;  %5082 = vmatpush.bf16.msra.mxu1 %v8915_v62 }
 0x49e   : > { %v8786_v63 = vld [vmem:[%s10451_s14 + $0x828] sm:$0xf] }
 0x49f   : > { %v9026_v62 = vld [vmem:[%s10451_s14 + $0xa08] sm:$0xf] }
 0x4a2   : > { %v4759_v1 = vpop.f32.mrf.mxu2 }
 0x4a3   : > { %v4760_v34 = vadd.f32 %v4759_v1, %v4711_v33  ;;  %v4808_v23 = vpop.f32.mrf.mxu3  ;;  %v4664_v56 = vpop.f32.mrf.mxu0  ;;  %v9894_v33 = vld [vmem:[%s10451_s14 + $0x834] sm:$0xf0] }
 0x4a4   : > { %v4713_v24 = vpop.f32.mrf.mxu1  ;;  %v9990_v1 = vld [vmem:[%s10451_s14 + $0xb34] sm:$0xf0] }
 0x4a5   : > { %v11910_v28 = vadd.f32 %v4808_v23, %v4760_v34  ;;  %v4714_v6 = vadd.f32 %v4713_v24, %v4664_v56  ;;  %v8787_v23 = vor.u32 %v9894_v33, %v8786_v63  ;;  %v9171_v56 = vor.u32 %v9990_v1, %v9170_v5 }
 0x4a6   : > { %4859 = vmatmul.bf16.gmra.mxu0 %v13554_v55  ;;  %4908 = vmatmul.bf16.gmra.mxu1 %v13555_v36 }
 0x4a7   : > { %4957 = vmatmul.bf16.gmra.mxu2 %v13556_v25  ;;  %5033 = vmatpush.bf16.msra.mxu0 %v8787_v23  ;;  %v13561_v23 = vld [vmem:[#allocation37_spill] sm:$0xff] }
 0x4a8   : > { %5006 = vmatmul.bf16.gmra.mxu3 %v13557_v4 }
 0x4a9   : > { %5180 = vmatpush.bf16.msra.mxu3 %v9171_v56  ;;  %v9954_v56 = vld [vmem:[%s10451_s14 + $0xa14] sm:$0xf0] }
 0x4aa   : > { %v4762_v34 = vpop.f32.mrf.mxu2  ;;  %v9027_v38 = vor.u32 %v9954_v56, %v9026_v62  ;;  %v8898_v62 = vld [vmem:[%s10451_s14 + $0x908] sm:$0xf]  ;;  %v9922_v56 = vld [vmem:[%s10451_s14 + $0x914] sm:$0xf0] }
 0x4ab   : > { %v4763_v24 = vadd.f32 %v4762_v34, %v4714_v6  ;;  %v4811_v55 = vpop.f32.mrf.mxu3  ;;  %v4666_v50 = vpop.f32.mrf.mxu0  ;;  %v13558_v34 = vld [vmem:[#allocation34_spill] sm:$0xff]  ;;  %v8899_v8 = vor.u32 %v9922_v56, %v8898_v62  ;;  %v9756_v56 = vld [vmem:[%s10451_s14 + $0x3ec] sm:$0xf] }
 0x4ac   : > { %v4715_v36 = vpop.f32.mrf.mxu1  ;;  %5132 = vmatpush.bf16.msra.mxu2 %v9027_v38 }
 0x4ad   : > { %v11922_v4 = vadd.f32 %v4811_v55, %v4763_v24  ;;  %v4716_v25 = vadd.f32 %v4715_v36, %v4666_v50  ;;  %v13559_v50 = vld [vmem:[#allocation35_spill] sm:$0xff]  ;;  %v13560_v36 = vld [vmem:[#allocation36_spill] sm:$0xff]  ;;  %5083 = vmatpush.bf16.msra.mxu1 %v8899_v8 }
 0x4ae   : > { %v8770_v24 = vld [vmem:[%s10451_s14 + $0x808] sm:$0xf]  ;;  %v9724_v8 = vld [vmem:[%s10451_s14 + $0x2ec] sm:$0xf] }
 0x4b2   : > { %v4764_v63 = vpop.f32.mrf.mxu2 }
 0x4b3   : > { %v4765_v6 = vadd.f32 %v4764_v63, %v4716_v25  ;;  %v4813_v33 = vpop.f32.mrf.mxu3  ;;  %v4669_v54 = vpop.f32.mrf.mxu0  ;;  %v9890_v25 = vld [vmem:[%s10451_s14 + $0x814] sm:$0xf0] }
 0x4b4   : > { %v4718_v5 = vpop.f32.mrf.mxu1  ;;  %v9986_v63 = vld [vmem:[%s10451_s14 + $0xb14] sm:$0xf0] }
 0x4b5   : > { %v11926_v1 = vadd.f32 %v4813_v33, %v4765_v6  ;;  %v4719_v55 = vadd.f32 %v4718_v5, %v4669_v54  ;;  %v8771_v33 = vor.u32 %v9890_v25, %v8770_v24  ;;  %v9155_v54 = vor.u32 %v9986_v63, %v9154_v31 }
 0x4b6   : > { %4864 = vmatmul.bf16.gmra.mxu0 %v13558_v34  ;;  %4913 = vmatmul.bf16.gmra.mxu1 %v13559_v50 }
 0x4b7   : > { %4962 = vmatmul.bf16.gmra.mxu2 %v13560_v36  ;;  %5034 = vmatpush.bf16.msra.mxu0 %v8771_v33  ;;  %v13565_v33 = vld [vmem:[#allocation41_spill] sm:$0xff] }
 0x4b8   : > { %5011 = vmatmul.bf16.gmra.mxu3 %v13561_v23 }
 0x4b9   : > { %5181 = vmatpush.bf16.msra.mxu3 %v9155_v54  ;;  %v8116_v54 = vld [vmem:[%s10451_s14 + $0x2f8] sm:$0xf0] }
 0x4ba   : > { %v4767_v6 = vpop.f32.mrf.mxu2  ;;  %v8119_v62 = vor.u32 %v9724_v8, %v8116_v54  ;;  %v9692_v8 = vld [vmem:[%s10451_s14 + $0x1ec] sm:$0xf]  ;;  %v7988_v54 = vld [vmem:[%s10451_s14 + $0x1f8] sm:$0xf0] }
 0x4bb   : > { %v4768_v5 = vadd.f32 %v4767_v6, %v4719_v55  ;;  %v4816_v34 = vpop.f32.mrf.mxu3  ;;  %v4671_v49 = vpop.f32.mrf.mxu0  ;;  %v13562_v6 = vld [vmem:[#allocation38_spill] sm:$0xff]  ;;  %v7991_v39 = vor.u32 %v9692_v8, %v7988_v54  ;;  %v9752_v54 = vld [vmem:[%s10451_s14 + $0x3cc] sm:$0xf] }
 0x4bc   : > { %v4720_v50 = vpop.f32.mrf.mxu1  ;;  %5321 = vmatpush.bf16.msrb.mxu2 %v8119_v62 }
 0x4bd   : > { %v11938_v23 = vadd.f32 %v4816_v34, %v4768_v5  ;;  %v4721_v36 = vadd.f32 %v4720_v50, %v4671_v49  ;;  %v13563_v49 = vld [vmem:[#allocation39_spill] sm:$0xff]  ;;  %v13564_v50 = vld [vmem:[#allocation40_spill] sm:$0xff]  ;;  %5272 = vmatpush.bf16.msrb.mxu1 %v7991_v39 }
 0x4be   : > { %v9660_v5 = vld [vmem:[%s10451_s14 + $0xec] sm:$0xf] }
 0x4bf   : > { %v9720_v39 = vld [vmem:[%s10451_s14 + $0x2cc] sm:$0xf] }
 0x4c2   : > { %v4769_v24 = vpop.f32.mrf.mxu2 }
 0x4c3   : > { %v4770_v55 = vadd.f32 %v4769_v24, %v4721_v36  ;;  %v4818_v25 = vpop.f32.mrf.mxu3  ;;  %v4674_v38 = vpop.f32.mrf.mxu0  ;;  %v7860_v36 = vld [vmem:[%s10451_s14 + $0xf8] sm:$0xf0] }
 0x4c4   : > { %v4723_v31 = vpop.f32.mrf.mxu1  ;;  %v8244_v24 = vld [vmem:[%s10451_s14 + $0x3f8] sm:$0xf0] }
 0x4c5   : > { %v11942_v63 = vadd.f32 %v4818_v25, %v4770_v55  ;;  %v4724_v34 = vadd.f32 %v4723_v31, %v4674_v38  ;;  %v7863_v25 = vor.u32 %v9660_v5, %v7860_v36  ;;  %v8247_v38 = vor.u32 %v9756_v56, %v8244_v24 }
 0x4c6   : > { %4869 = vmatmul.bf16.gmra.mxu0 %v13562_v6  ;;  %4918 = vmatmul.bf16.gmra.mxu1 %v13563_v49 }
 0x4c7   : > { %4967 = vmatmul.bf16.gmra.mxu2 %v13564_v50  ;;  %5223 = vmatpush.bf16.msrb.mxu0 %v7863_v25  ;;  %v13569_v25 = vld [vmem:[#allocation45_spill] sm:$0xff] }
 0x4c8   : > { %5016 = vmatmul.bf16.gmra.mxu3 %v13565_v33 }
 0x4c9   : > { %5370 = vmatpush.bf16.msrb.mxu3 %v8247_v38  ;;  %v8100_v38 = vld [vmem:[%s10451_s14 + $0x2d8] sm:$0xf0] }
 0x4ca   : > { %v4772_v55 = vpop.f32.mrf.mxu2  ;;  %v8103_v8 = vor.u32 %v9720_v39, %v8100_v38  ;;  %v7972_v39 = vld [vmem:[%s10451_s14 + $0x1d8] sm:$0xf0] }
 0x4cb   : > { %v4773_v31 = vadd.f32 %v4772_v55, %v4724_v34  ;;  %v4821_v6 = vpop.f32.mrf.mxu3  ;;  %v4676_v37 = vpop.f32.mrf.mxu0  ;;  %v13566_v55 = vld [vmem:[#allocation42_spill] sm:$0xff]  ;;  %v7975_v38 = vor.u32 %v9688_v29, %v7972_v39  ;;  %v13572_v29 = vld [vmem:[#allocation48_spill] sm:$0xff] }
 0x4cc   : > { %v4725_v49 = vpop.f32.mrf.mxu1  ;;  %5322 = vmatpush.bf16.msrb.mxu2 %v8103_v8  ;;  %v8212_v39 = vld [vmem:[%s10451_s14 + $0x3b8] sm:$0xf0] }
 0x4cd   : > { %v11954_v33 = vadd.f32 %v4821_v6, %v4773_v31  ;;  %v4726_v50 = vadd.f32 %v4725_v49, %v4676_v37  ;;  %v13567_v37 = vld [vmem:[#allocation43_spill] sm:$0xff]  ;;  %v13568_v49 = vld [vmem:[#allocation44_spill] sm:$0xff]  ;;  %5273 = vmatpush.bf16.msrb.mxu1 %v7975_v38 }
 0x4ce   : > { %v9656_v31 = vld [vmem:[%s10451_s14 + $0xcc] sm:$0xf] }
 0x4d2   : > { %v4774_v5 = vpop.f32.mrf.mxu2 }
 0x4d3   : > { %v4775_v34 = vadd.f32 %v4774_v5, %v4726_v50  ;;  %v4823_v36 = vpop.f32.mrf.mxu3  ;;  %v4679_v62 = vpop.f32.mrf.mxu0  ;;  %v7844_v50 = vld [vmem:[%s10451_s14 + $0xd8] sm:$0xf0] }
 0x4d4   : > { %v4728_v56 = vpop.f32.mrf.mxu1  ;;  %v8228_v5 = vld [vmem:[%s10451_s14 + $0x3d8] sm:$0xf0] }
 0x4d5   : > { %v11958_v24 = vadd.f32 %v4823_v36, %v4775_v34  ;;  %v4729_v6 = vadd.f32 %v4728_v56, %v4679_v62  ;;  %v7847_v36 = vor.u32 %v9656_v31, %v7844_v50  ;;  %v8231_v62 = vor.u32 %v9752_v54, %v8228_v5  ;;  %v13571_v5 = vld [vmem:[#allocation47_spill] sm:$0xff] }
 0x4d6   : > { %4874 = vmatmul.bf16.gmra.mxu0 %v13566_v55  ;;  %4923 = vmatmul.bf16.gmra.mxu1 %v13567_v37 }
 0x4d7   : > { %4972 = vmatmul.bf16.gmra.mxu2 %v13568_v49  ;;  %5224 = vmatpush.bf16.msrb.mxu0 %v7847_v36  ;;  %v9716_v36 = vld [vmem:[%s10451_s14 + $0x2ac] sm:$0xf] }
 0x4d8   : > { %5021 = vmatmul.bf16.gmra.mxu3 %v13569_v25 }
 0x4d9   : > { %5371 = vmatpush.bf16.msrb.mxu3 %v8231_v62 }
 0x4da   : > { %v4777_v34 = vpop.f32.mrf.mxu2 }
 0x4db   : > { %v4778_v56 = vadd.f32 %v4777_v34, %v4729_v6  ;;  %v4826_v55 = vpop.f32.mrf.mxu3  ;;  %v4681_v26 = vpop.f32.mrf.mxu0  ;;  %v13573_v34 = vld [vmem:[#allocation49_spill] sm:$0xff] }
 0x4dc   : > { %v4730_v37 = vpop.f32.mrf.mxu1 }
 0x4dd   : > { %v11970_v25 = vadd.f32 %v4826_v55, %v4778_v56  ;;  %v4731_v49 = vadd.f32 %v4730_v37, %v4681_v26  ;;  %v13570_v37 = vld [vmem:[#allocation46_spill] sm:$0xff] }
 0x4de   : > { %v7828_v56 = vld [vmem:[%s10451_s14 + $0xb8] sm:$0xf0] }
 0x4e2   : > { %v4779_v30 = vpop.f32.mrf.mxu2 }
 0x4e3   : > { %v4780_v31 = vadd.f32 %v4779_v30, %v4731_v49  ;;  %v4828_v6 = vpop.f32.mrf.mxu3  ;;  %v4840_v8 = vpop.f32.mrf.mxu0  ;;  %v8084_v30 = vld [vmem:[%s10451_s14 + $0x2b8] sm:$0xf0]  ;;  %v9652_v49 = vld [vmem:[%s10451_s14 + $0xac] sm:$0xf] }
 0x4e4   : > { %v4841_v50 = vadd.f32 %v4840_v8, %v11858_v52  ;;  %v4889_v54 = vpop.f32.mrf.mxu1  ;;  %v8087_v62 = vor.u32 %v9716_v36, %v8084_v30  ;;  %v9748_v52 = vld [vmem:[%s10451_s14 + $0x3ac] sm:$0xf]  ;;  %v7956_v30 = vld [vmem:[%s10451_s14 + $0x1b8] sm:$0xf0] }
 0x4e5   : > { %v11975_v55 = vadd.f32 %v4828_v6, %v4780_v31  ;;  %v7831_v31 = vor.u32 %v9652_v49, %v7828_v56  ;;  %v8215_v6 = vor.u32 %v9748_v52, %v8212_v39  ;;  %v9684_v36 = vld [vmem:[%s10451_s14 + $0x1ac] sm:$0xf] }
 0x4e6   : > { %v4890_v26 = vadd.f32 %v4889_v54, %v4841_v50  ;;  %5035 = vmatmul.bf16.vlgmr.msra.gmra.mxu0 %v13570_v37  ;;  %5084 = vmatmul.bf16.vlgmr.msra.gmra.mxu1 %v13571_v5  ;;  %v7959_v35 = vor.u32 %v9684_v36, %v7956_v30  ;;  %v8196_v36 = vld [vmem:[%s10451_s14 + $0x398] sm:$0xf0] }
 0x4e7   : > { %5133 = vmatmul.bf16.vlgmr.msra.gmra.mxu2 %v13572_v29  ;;  %5225 = vmatpush.bf16.msrb.mxu0 %v7831_v31  ;;  %v13574_v31 = vld [vmem:[#allocation50_spill] sm:$0xff] }
 0x4e8   : > { %5182 = vmatmul.bf16.vlgmr.msra.gmra.mxu3 %v13573_v34  ;;  %5323 = vmatpush.bf16.msrb.mxu2 %v8087_v62 }
 0x4e9   : > { %5372 = vmatpush.bf16.msrb.mxu3 %v8215_v6  ;;  %5274 = vmatpush.bf16.msrb.mxu1 %v7959_v35  ;;  %v13577_v35 = vld [vmem:[#allocation53_spill] sm:$0xff]  ;;  %v9712_v6 = vld [vmem:[%s10451_s14 + $0x28c] sm:$0xf] }
 0x4ea   : > { %v4938_v38 = vpop.f32.mrf.mxu2 }
 0x4eb   : > { %v4939_v8 = vadd.f32 %v4938_v38, %v4890_v26  ;;  %v4987_v50 = vpop.f32.mrf.mxu3  ;;  %v4842_v54 = vpop.f32.mrf.mxu0 }
 0x4ec   : > { %v4843_v29 = vadd.f32 %v4842_v54, %v11862_v16  ;;  %v4891_v5 = vpop.f32.mrf.mxu1  ;;  %v7812_v54 = vld [vmem:[%s10451_s14 + $0x98] sm:$0xf0] }
 0x4ed   : > { %v11988_v34 = vadd.f32 %v4987_v50, %v4939_v8  ;;  %v9648_v8 = vld [vmem:[%s10451_s14 + $0x8c] sm:$0xf] }
 0x4ee   : > { %v4892_v37 = vadd.f32 %v4891_v5, %v4843_v29  ;;  %v13575_v5 = vld [vmem:[#allocation51_spill] sm:$0xff]  ;;  %v13576_v29 = vld [vmem:[#allocation52_spill] sm:$0xff] }
 0x4f2   : > { %v4940_v49 = vpop.f32.mrf.mxu2 }
 0x4f3   : > { %v4941_v26 = vadd.f32 %v4940_v49, %v4892_v37  ;;  %v4989_v62 = vpop.f32.mrf.mxu3  ;;  %v4845_v16 = vpop.f32.mrf.mxu0  ;;  %v8068_v37 = vld [vmem:[%s10451_s14 + $0x298] sm:$0xf0]  ;;  %v7815_v49 = vor.u32 %v9648_v8, %v7812_v54 }
 0x4f4   : > { %v4846_v56 = vadd.f32 %v4845_v16, %v11874_v0  ;;  %v4894_v52 = vpop.f32.mrf.mxu1  ;;  %v8071_v50 = vor.u32 %v9712_v6, %v8068_v37  ;;  %v9744_v0 = vld [vmem:[%s10451_s14 + $0x38c] sm:$0xf]  ;;  %v7940_v37 = vld [vmem:[%s10451_s14 + $0x198] sm:$0xf0] }
 0x4f5   : > { %v11993_v39 = vadd.f32 %v4989_v62, %v4941_v26  ;;  %v8199_v26 = vor.u32 %v9744_v0, %v8196_v36  ;;  %5226 = vmatpush.bf16.msrb.mxu0 %v7815_v49  ;;  %v9680_v6 = vld [vmem:[%s10451_s14 + $0x18c] sm:$0xf]  ;;  %v13578_v49 = vld [vmem:[#allocation54_spill] sm:$0xff] }
 0x4f6   : > { %v4895_v38 = vadd.f32 %v4894_v52, %v4846_v56  ;;  %5040 = vmatmul.bf16.gmra.mxu0 %v13574_v31  ;;  %5089 = vmatmul.bf16.gmra.mxu1 %v13575_v5  ;;  %v7943_v31 = vor.u32 %v9680_v6, %v7940_v37  ;;  %v8180_v6 = vld [vmem:[%s10451_s14 + $0x378] sm:$0xf0] }
 0x4f7   : > { %5138 = vmatmul.bf16.gmra.mxu2 %v13576_v29  ;;  %5373 = vmatpush.bf16.msrb.mxu3 %v8199_v26  ;;  %v13580_v26 = vld [vmem:[#allocation56_spill] sm:$0xff] }
 0x4f8   : > { %5187 = vmatmul.bf16.gmra.mxu3 %v13577_v35  ;;  %5324 = vmatpush.bf16.msrb.mxu2 %v8071_v50 }
 0x4f9   : > { %5275 = vmatpush.bf16.msrb.mxu1 %v7943_v31  ;;  %v13581_v31 = vld [vmem:[#allocation57_spill] sm:$0xff] }
 0x4fa   : > { %v4943_v30 = vpop.f32.mrf.mxu2 }
 0x4fb   : > { %v4944_v62 = vadd.f32 %v4943_v30, %v4895_v38  ;;  %v4992_v16 = vpop.f32.mrf.mxu3  ;;  %v4847_v56 = vpop.f32.mrf.mxu0 }
 0x4fc   : > { %v4848_v52 = vadd.f32 %v4847_v56, %v11878_v3  ;;  %v4896_v29 = vpop.f32.mrf.mxu1 }
 0x4fd   : > { %v12006_v35 = vadd.f32 %v4992_v16, %v4944_v62  ;;  %v9708_v62 = vld [vmem:[%s10451_s14 + $0x26c] sm:$0xf] }
 0x4fe   : > { %v4897_v5 = vadd.f32 %v4896_v29, %v4848_v52  ;;  %v13579_v29 = vld [vmem:[#allocation55_spill] sm:$0xff]  ;;  %v9644_v16 = vld [vmem:[%s10451_s14 + $0x6c] sm:$0xf]  ;;  %v7796_v52 = vld [vmem:[%s10451_s14 + $0x78] sm:$0xf0] }
 0x502   : > { %v4945_v8 = vpop.f32.mrf.mxu2 }
 0x503   : > { %v4946_v38 = vadd.f32 %v4945_v8, %v4897_v5  ;;  %v4994_v50 = vpop.f32.mrf.mxu3  ;;  %v4850_v3 = vpop.f32.mrf.mxu0  ;;  %v8052_v5 = vld [vmem:[%s10451_s14 + $0x278] sm:$0xf0]  ;;  %v7799_v8 = vor.u32 %v9644_v16, %v7796_v52 }
 0x504   : > { %v4851_v54 = vadd.f32 %v4850_v3, %v11890_v32  ;;  %v4899_v0 = vpop.f32.mrf.mxu1  ;;  %v8055_v56 = vor.u32 %v9708_v62, %v8052_v5  ;;  %v9740_v32 = vld [vmem:[%s10451_s14 + $0x36c] sm:$0xf]  ;;  %v7924_v5 = vld [vmem:[%s10451_s14 + $0x178] sm:$0xf0] }
 0x505   : > { %v12011_v36 = vadd.f32 %v4994_v50, %v4946_v38  ;;  %v8183_v38 = vor.u32 %v9740_v32, %v8180_v6  ;;  %5227 = vmatpush.bf16.msrb.mxu0 %v7799_v8  ;;  %v9676_v62 = vld [vmem:[%s10451_s14 + $0x16c] sm:$0xf]  ;;  %v13582_v8 = vld [vmem:[#allocation58_spill] sm:$0xff] }
 0x506   : > { %v4900_v30 = vadd.f32 %v4899_v0, %v4851_v54  ;;  %5045 = vmatmul.bf16.gmra.mxu0 %v13578_v49  ;;  %5094 = vmatmul.bf16.gmra.mxu1 %v13579_v29  ;;  %v7927_v49 = vor.u32 %v9676_v62, %v7924_v5  ;;  %v8164_v62 = vld [vmem:[%s10451_s14 + $0x358] sm:$0xf0] }
 0x507   : > { %5143 = vmatmul.bf16.gmra.mxu2 %v13580_v26  ;;  %5374 = vmatpush.bf16.msrb.mxu3 %v8183_v38  ;;  %v13584_v38 = vld [vmem:[#allocation60_spill] sm:$0xff] }
 0x508   : > { %5192 = vmatmul.bf16.gmra.mxu3 %v13581_v31  ;;  %5325 = vmatpush.bf16.msrb.mxu2 %v8055_v56 }
 0x509   : > { %5276 = vmatpush.bf16.msrb.mxu1 %v7927_v49  ;;  %v13585_v49 = vld [vmem:[#allocation61_spill] sm:$0xff] }
 0x50a   : > { %v4948_v37 = vpop.f32.mrf.mxu2 }
 0x50b   : > { %v4949_v50 = vadd.f32 %v4948_v37, %v4900_v30  ;;  %v4997_v3 = vpop.f32.mrf.mxu3  ;;  %v4852_v54 = vpop.f32.mrf.mxu0 }
 0x50c   : > { %v4853_v0 = vadd.f32 %v4852_v54, %v11894_v2  ;;  %v4901_v26 = vpop.f32.mrf.mxu1 }
 0x50d   : > { %v12024_v31 = vadd.f32 %v4997_v3, %v4949_v50  ;;  %v9704_v50 = vld [vmem:[%s10451_s14 + $0x24c] sm:$0xf] }
 0x50e   : > { %v4902_v29 = vadd.f32 %v4901_v26, %v4853_v0  ;;  %v13583_v26 = vld [vmem:[#allocation59_spill] sm:$0xff]  ;;  %v9640_v3 = vld [vmem:[%s10451_s14 + $0x4c] sm:$0xf]  ;;  %v7780_v0 = vld [vmem:[%s10451_s14 + $0x58] sm:$0xf0] }
 0x512   : > { %v4950_v16 = vpop.f32.mrf.mxu2 }
 0x513   : > { %v4951_v30 = vadd.f32 %v4950_v16, %v4902_v29  ;;  %v4999_v56 = vpop.f32.mrf.mxu3  ;;  %v4855_v2 = vpop.f32.mrf.mxu0  ;;  %v8036_v29 = vld [vmem:[%s10451_s14 + $0x258] sm:$0xf0]  ;;  %v7783_v16 = vor.u32 %v9640_v3, %v7780_v0 }
 0x514   : > { %v4856_v52 = vadd.f32 %v4855_v2, %v11906_v7  ;;  %v4904_v32 = vpop.f32.mrf.mxu1  ;;  %v8039_v54 = vor.u32 %v9704_v50, %v8036_v29  ;;  %v9736_v7 = vld [vmem:[%s10451_s14 + $0x34c] sm:$0xf]  ;;  %v7908_v29 = vld [vmem:[%s10451_s14 + $0x158] sm:$0xf0] }
 0x515   : > { %v12029_v6 = vadd.f32 %v4999_v56, %v4951_v30  ;;  %v8167_v30 = vor.u32 %v9736_v7, %v8164_v62  ;;  %5228 = vmatpush.bf16.msrb.mxu0 %v7783_v16  ;;  %v9672_v50 = vld [vmem:[%s10451_s14 + $0x14c] sm:$0xf]  ;;  %v13586_v16 = vld [vmem:[#allocation62_spill] sm:$0xff] }
 0x516   : > { %v4905_v37 = vadd.f32 %v4904_v32, %v4856_v52  ;;  %5050 = vmatmul.bf16.gmra.mxu0 %v13582_v8  ;;  %5099 = vmatmul.bf16.gmra.mxu1 %v13583_v26  ;;  %v7911_v8 = vor.u32 %v9672_v50, %v7908_v29  ;;  %v8148_v50 = vld [vmem:[%s10451_s14 + $0x338] sm:$0xf0] }
 0x517   : > { %5148 = vmatmul.bf16.gmra.mxu2 %v13584_v38  ;;  %5375 = vmatpush.bf16.msrb.mxu3 %v8167_v30  ;;  %v13588_v30 = vld [vmem:[#allocation64_spill] sm:$0xff] }
 0x518   : > { %5197 = vmatmul.bf16.gmra.mxu3 %v13585_v49  ;;  %5326 = vmatpush.bf16.msrb.mxu2 %v8039_v54 }
 0x519   : > { %5277 = vmatpush.bf16.msrb.mxu1 %v7911_v8  ;;  %v13589_v8 = vld [vmem:[#allocation65_spill] sm:$0xff] }
 0x51a   : > { %v4953_v5 = vpop.f32.mrf.mxu2 }
 0x51b   : > { %v4954_v56 = vadd.f32 %v4953_v5, %v4905_v37  ;;  %v5002_v2 = vpop.f32.mrf.mxu3  ;;  %v4857_v52 = vpop.f32.mrf.mxu0 }
 0x51c   : > { %v4858_v32 = vadd.f32 %v4857_v52, %v11910_v28  ;;  %v4906_v38 = vpop.f32.mrf.mxu1 }
 0x51d   : > { %v12042_v49 = vadd.f32 %v5002_v2, %v4954_v56  ;;  %v9700_v56 = vld [vmem:[%s10451_s14 + $0x22c] sm:$0xf] }
 0x51e   : > { %v4907_v26 = vadd.f32 %v4906_v38, %v4858_v32  ;;  %v13587_v38 = vld [vmem:[#allocation63_spill] sm:$0xff]  ;;  %v9636_v2 = vld [vmem:[%s10451_s14 + $0x2c] sm:$0xf]  ;;  %v7764_v32 = vld [vmem:[%s10451_s14 + $0x38] sm:$0xf0] }
 0x522   : > { %v4955_v3 = vpop.f32.mrf.mxu2 }
 0x523   : > { %v4956_v37 = vadd.f32 %v4955_v3, %v4907_v26  ;;  %v5004_v54 = vpop.f32.mrf.mxu3  ;;  %v4860_v28 = vpop.f32.mrf.mxu0  ;;  %v8020_v26 = vld [vmem:[%s10451_s14 + $0x238] sm:$0xf0]  ;;  %v7767_v3 = vor.u32 %v9636_v2, %v7764_v32 }
 0x524   : > { %v4861_v0 = vadd.f32 %v4860_v28, %v11922_v4  ;;  %v4909_v7 = vpop.f32.mrf.mxu1  ;;  %v8023_v52 = vor.u32 %v9700_v56, %v8020_v26  ;;  %v9732_v4 = vld [vmem:[%s10451_s14 + $0x32c] sm:$0xf]  ;;  %v7892_v26 = vld [vmem:[%s10451_s14 + $0x138] sm:$0xf0] }
 0x525   : > { %v12047_v62 = vadd.f32 %v5004_v54, %v4956_v37  ;;  %v8151_v37 = vor.u32 %v9732_v4, %v8148_v50  ;;  %5229 = vmatpush.bf16.msrb.mxu0 %v7767_v3  ;;  %v9668_v56 = vld [vmem:[%s10451_s14 + $0x12c] sm:$0xf]  ;;  %v13590_v3 = vld [vmem:[#allocation66_spill] sm:$0xff] }
 0x526   : > { %v4910_v5 = vadd.f32 %v4909_v7, %v4861_v0  ;;  %5055 = vmatmul.bf16.gmra.mxu0 %v13586_v16  ;;  %5104 = vmatmul.bf16.gmra.mxu1 %v13587_v38  ;;  %v7895_v16 = vor.u32 %v9668_v56, %v7892_v26  ;;  %v8132_v56 = vld [vmem:[%s10451_s14 + $0x318] sm:$0xf0] }
 0x527   : > { %5153 = vmatmul.bf16.gmra.mxu2 %v13588_v30  ;;  %5376 = vmatpush.bf16.msrb.mxu3 %v8151_v37  ;;  %v13592_v37 = vld [vmem:[#allocation68_spill] sm:$0xff] }
 0x528   : > { %5202 = vmatmul.bf16.gmra.mxu3 %v13589_v8  ;;  %5327 = vmatpush.bf16.msrb.mxu2 %v8023_v52 }
 0x529   : > { %5278 = vmatpush.bf16.msrb.mxu1 %v7895_v16  ;;  %v13593_v16 = vld [vmem:[#allocation69_spill] sm:$0xff] }
 0x52a   : > { %v4958_v29 = vpop.f32.mrf.mxu2 }
 0x52b   : > { %v4959_v54 = vadd.f32 %v4958_v29, %v4910_v5  ;;  %v5007_v28 = vpop.f32.mrf.mxu3  ;;  %v4862_v0 = vpop.f32.mrf.mxu0 }
 0x52c   : > { %v4863_v7 = vadd.f32 %v4862_v0, %v11926_v1  ;;  %v4911_v30 = vpop.f32.mrf.mxu1 }
 0x52d   : > { %v12060_v8 = vadd.f32 %v5007_v28, %v4959_v54  ;;  %v9696_v54 = vld [vmem:[%s10451_s14 + $0x20c] sm:$0xf] }
 0x52e   : > { %v4912_v38 = vadd.f32 %v4911_v30, %v4863_v7  ;;  %v13591_v30 = vld [vmem:[#allocation67_spill] sm:$0xff]  ;;  %v9632_v28 = vld [vmem:[%s10451_s14 + $0xc] sm:$0xf]  ;;  %v7748_v7 = vld [vmem:[%s10451_s14 + $0x18] sm:$0xf0] }
 0x532   : > { %v4960_v2 = vpop.f32.mrf.mxu2 }
 0x533   : > { %v4961_v5 = vadd.f32 %v4960_v2, %v4912_v38  ;;  %v5009_v52 = vpop.f32.mrf.mxu3  ;;  %v4865_v1 = vpop.f32.mrf.mxu0  ;;  %v8004_v38 = vld [vmem:[%s10451_s14 + $0x218] sm:$0xf0]  ;;  %v7751_v2 = vor.u32 %v9632_v28, %v7748_v7 }
 0x534   : > { %v4866_v32 = vadd.f32 %v4865_v1, %v11938_v23  ;;  %v4914_v4 = vpop.f32.mrf.mxu1  ;;  %v8007_v0 = vor.u32 %v9696_v54, %v8004_v38  ;;  %v9728_v23 = vld [vmem:[%s10451_s14 + $0x30c] sm:$0xf]  ;;  %v7876_v38 = vld [vmem:[%s10451_s14 + $0x118] sm:$0xf0] }
 0x535   : > { %v12065_v50 = vadd.f32 %v5009_v52, %v4961_v5  ;;  %v8135_v5 = vor.u32 %v9728_v23, %v8132_v56  ;;  %5230 = vmatpush.bf16.msrb.mxu0 %v7751_v2  ;;  %v9664_v54 = vld [vmem:[%s10451_s14 + $0x10c] sm:$0xf]  ;;  %v13594_v2 = vld [vmem:[#allocation70_spill] sm:$0xff] }
 0x536   : > { %v4915_v29 = vadd.f32 %v4914_v4, %v4866_v32  ;;  %5060 = vmatmul.bf16.gmra.mxu0 %v13590_v3  ;;  %5109 = vmatmul.bf16.gmra.mxu1 %v13591_v30  ;;  %v7879_v3 = vor.u32 %v9664_v54, %v7876_v38  ;;  %v9884_v54 = vld [vmem:[%s10451_s14 + $0x7ec] sm:$0xf] }
 0x537   : > { %5158 = vmatmul.bf16.gmra.mxu2 %v13592_v37  ;;  %5377 = vmatpush.bf16.msrb.mxu3 %v8135_v5  ;;  %v13596_v5 = vld [vmem:[#allocation72_spill] sm:$0xff] }
 0x538   : > { %5207 = vmatmul.bf16.gmra.mxu3 %v13593_v16  ;;  %5328 = vmatpush.bf16.msrb.mxu2 %v8007_v0 }
 0x539   : > { %5279 = vmatpush.bf16.msrb.mxu1 %v7879_v3  ;;  %v13597_v3 = vld [vmem:[#allocation73_spill] sm:$0xff] }
 0x53a   : > { %v4963_v26 = vpop.f32.mrf.mxu2 }
 0x53b   : > { %v4964_v52 = vadd.f32 %v4963_v26, %v4915_v29  ;;  %v5012_v1 = vpop.f32.mrf.mxu3  ;;  %v4867_v32 = vpop.f32.mrf.mxu0 }
 0x53c   : > { %v4868_v4 = vadd.f32 %v4867_v32, %v11942_v63  ;;  %v4916_v37 = vpop.f32.mrf.mxu1 }
 0x53d   : > { %v12078_v16 = vadd.f32 %v5012_v1, %v4964_v52  ;;  %v9852_v52 = vld [vmem:[%s10451_s14 + $0x6ec] sm:$0xf] }
 0x53e   : > { %v4917_v30 = vadd.f32 %v4916_v37, %v4868_v4  ;;  %v13595_v37 = vld [vmem:[#allocation71_spill] sm:$0xff]  ;;  %v9788_v1 = vld [vmem:[%s10451_s14 + $0x4ec] sm:$0xf]  ;;  %v8372_v4 = vld [vmem:[%s10451_s14 + $0x4f8] sm:$0xf0] }
 0x542   : > { %v4965_v28 = vpop.f32.mrf.mxu2 }
 0x543   : > { %v4966_v29 = vadd.f32 %v4965_v28, %v4917_v30  ;;  %v5014_v0 = vpop.f32.mrf.mxu3  ;;  %v4870_v63 = vpop.f32.mrf.mxu0  ;;  %v8628_v30 = vld [vmem:[%s10451_s14 + $0x6f8] sm:$0xf0]  ;;  %v8375_v28 = vor.u32 %v9788_v1, %v8372_v4 }
 0x544   : > { %v4871_v7 = vadd.f32 %v4870_v63, %v11954_v33  ;;  %v4919_v23 = vpop.f32.mrf.mxu1  ;;  %v8631_v32 = vor.u32 %v9852_v52, %v8628_v30  ;;  %v8756_v33 = vld [vmem:[%s10451_s14 + $0x7f8] sm:$0xf0]  ;;  %v9820_v30 = vld [vmem:[%s10451_s14 + $0x5ec] sm:$0xf] }
 0x545   : > { %v12083_v56 = vadd.f32 %v5014_v0, %v4966_v29  ;;  %v8759_v29 = vor.u32 %v9884_v54, %v8756_v33  ;;  %5419 = vmatpush.bf16.msra.mxu0 %v8375_v28  ;;  %v13599_v28 = vld [vmem:[#allocation76_spill] sm:$0xff] }
 0x546   : > { %v4920_v26 = vadd.f32 %v4919_v23, %v4871_v7  ;;  %5065 = vmatmul.bf16.gmra.mxu0 %v13594_v2  ;;  %5114 = vmatmul.bf16.gmra.mxu1 %v13595_v37  ;;  %v8500_v37 = vld [vmem:[%s10451_s14 + $0x5f8] sm:$0xf0] }
 0x547   : > { %5163 = vmatmul.bf16.gmra.mxu2 %v13596_v5  ;;  %5566 = vmatpush.bf16.msra.mxu3 %v8759_v29  ;;  %v8503_v1 = vor.u32 %v9820_v30, %v8500_v37  ;;  %v13600_v37 = vld [vmem:[#allocation77_spill] sm:$0xff]  ;;  %v8612_v29 = vld [vmem:[%s10451_s14 + $0x6d8] sm:$0xf0] }
 0x548   : > { %5212 = vmatmul.bf16.gmra.mxu3 %v13597_v3  ;;  %5517 = vmatpush.bf16.msra.mxu2 %v8631_v32 }
 0x549   : > { %5468 = vmatpush.bf16.msra.mxu1 %v8503_v1 }
 0x54a   : > { %v4968_v38 = vpop.f32.mrf.mxu2 }
 0x54b   : > { %v4969_v0 = vadd.f32 %v4968_v38, %v4920_v26  ;;  %v5017_v63 = vpop.f32.mrf.mxu3  ;;  %v4872_v7 = vpop.f32.mrf.mxu0  ;;  %v13598_v38 = vld [vmem:[#allocation75_spill] sm:$0xff] }
 0x54c   : > { %v4873_v23 = vadd.f32 %v4872_v7, %v11958_v24  ;;  %v4921_v5 = vpop.f32.mrf.mxu1 }
 0x54d   : > { %v12096_v3 = vadd.f32 %v5017_v63, %v4969_v0  ;;  %v9784_v0 = vld [vmem:[%s10451_s14 + $0x4cc] sm:$0xf] }
 0x54e   : > { %v4922_v52 = vadd.f32 %v4921_v5, %v4873_v23  ;;  %v9880_v23 = vld [vmem:[%s10451_s14 + $0x7cc] sm:$0xf] }
 0x552   : > { %v4970_v2 = vpop.f32.mrf.mxu2 }
 0x553   : > { %v4971_v4 = vadd.f32 %v4970_v2, %v4922_v52  ;;  %v5019_v26 = vpop.f32.mrf.mxu3  ;;  %v4875_v54 = vpop.f32.mrf.mxu0  ;;  %v9848_v2 = vld [vmem:[%s10451_s14 + $0x6cc] sm:$0xf]  ;;  %v8740_v52 = vld [vmem:[%s10451_s14 + $0x7d8] sm:$0xf0] }
 0x554   : > { %v4876_v24 = vadd.f32 %v4875_v54, %v11970_v25  ;;  %v4924_v32 = vpop.f32.mrf.mxu1  ;;  %v8615_v7 = vor.u32 %v9848_v2, %v8612_v29  ;;  %v8356_v25 = vld [vmem:[%s10451_s14 + $0x4d8] sm:$0xf0]  ;;  %v8743_v54 = vor.u32 %v9880_v23, %v8740_v52  ;;  %v9816_v2 = vld [vmem:[%s10451_s14 + $0x5cc] sm:$0xf]  ;;  %v13601_v23 = vld [vmem:[#allocation7_spill] sm:$0xff] }
 0x555   : > { %v12101_v33 = vadd.f32 %v5019_v26, %v4971_v4  ;;  %v8359_v26 = vor.u32 %v9784_v0, %v8356_v25  ;;  %v8484_v29 = vld [vmem:[%s10451_s14 + $0x5d8] sm:$0xf0]  ;;  %v13602_v52 = vld [vmem:[#allocation8_spill] sm:$0xff] }
 0x556   : > { %v4925_v5 = vadd.f32 %v4924_v32, %v4876_v24  ;;  %5070 = vmatmul.bf16.gmra.mxu0 %v11324_v53  ;;  %5119 = vmatmul.bf16.gmra.mxu1 %v13598_v38 }
 0x557   : > { %5168 = vmatmul.bf16.gmra.mxu2 %v13599_v28  ;;  %5420 = vmatpush.bf16.msra.mxu0 %v8359_v26 }
 0x558   : > { %5217 = vmatmul.bf16.gmra.mxu3 %v13600_v37  ;;  %5518 = vmatpush.bf16.msra.mxu2 %v8615_v7 }
 0x559   : > { %5567 = vmatpush.bf16.msra.mxu3 %v8743_v54  ;;  %v8340_v54 = vld [vmem:[%s10451_s14 + $0x4b8] sm:$0xf0] }
 0x55a   : > { %v4973_v63 = vpop.f32.mrf.mxu2 }
 0x55b   : > { %v4974_v30 = vadd.f32 %v4973_v63, %v4925_v5  ;;  %v5022_v1 = vpop.f32.mrf.mxu3  ;;  %v4877_v4 = vpop.f32.mrf.mxu0  ;;  %v8487_v5 = vor.u32 %v9816_v2, %v8484_v29  ;;  %v517_v29 = vld [vmem:[#allocation2 + $0xd8] sm:$0xff] }
 0x55c   : > { %v4878_v24 = vadd.f32 %v4877_v4, %v11975_v55  ;;  %v4926_v32 = vpop.f32.mrf.mxu1 }
 0x55d   : > { %v12114_v37 = vadd.f32 %v5022_v1, %v4974_v30  ;;  %5469 = vmatpush.bf16.msra.mxu1 %v8487_v5  ;;  %v8596_v30 = vld [vmem:[%s10451_s14 + $0x6b8] sm:$0xf0]  ;;  %v9780_v1 = vld [vmem:[%s10451_s14 + $0x4ac] sm:$0xf] }
 0x55e   : > { %v4927_v28 = vadd.f32 %v4926_v32, %v4878_v24  ;;  %v9876_v24 = vld [vmem:[%s10451_s14 + $0x7ac] sm:$0xf]  ;;  %v8343_v2 = vor.u32 %v9780_v1, %v8340_v54  ;;  %v521_v54 = vld [vmem:[#allocation2 + $0x130] sm:$0xff] }
 0x560   : > { %5421 = vmatpush.bf16.msra.mxu0 %v8343_v2 }
 0x562   : > { %v4975_v38 = vpop.f32.mrf.mxu2 }
 0x563   : > { %v4976_v63 = vadd.f32 %v4975_v38, %v4927_v28  ;;  %v5024_v53 = vpop.f32.mrf.mxu3  ;;  %v5036_v0 = vpop.f32.mrf.mxu0  ;;  %v9844_v28 = vld [vmem:[%s10451_s14 + $0x6ac] sm:$0xf] }
 0x564   : > { %v5085_v55 = vpop.f32.mrf.mxu1  ;;  %v5037_v25 = vadd.f32 %v5036_v0, %v11988_v34  ;;  %v8599_v26 = vor.u32 %v9844_v28, %v8596_v30 }
 0x565   : > { %v12118_v7 = vadd.f32 %v5024_v53, %v4976_v63  ;;  %v8724_v53 = vld [vmem:[%s10451_s14 + $0x7b8] sm:$0xf0] }
 0x566   : > { %5231 = vmatmul.bf16.vlgmr.msrb.gmra.mxu0 %v10599_v17  ;;  %5280 = vmatmul.bf16.vlgmr.msrb.gmra.mxu1 %v10604_v22  ;;  %v5086_v38 = vadd.f32 %v5085_v55, %v5037_v25  ;;  %v8727_v22 = vor.u32 %v9876_v24, %v8724_v53 }
 0x567   : > { %5329 = vmatmul.bf16.vlgmr.msrb.gmra.mxu2 %v13601_v23  ;;  %v9812_v23 = vld [vmem:[%s10451_s14 + $0x5ac] sm:$0xf] }
 0x568   : > { %5378 = vmatmul.bf16.vlgmr.msrb.gmra.mxu3 %v13602_v52  ;;  %5519 = vmatpush.bf16.msra.mxu2 %v8599_v26  ;;  %v8468_v52 = vld [vmem:[%s10451_s14 + $0x5b8] sm:$0xf0] }
 0x569   : > { %5568 = vmatpush.bf16.msra.mxu3 %v8727_v22 }
 0x56a   : > { %v5134_v4 = vpop.f32.mrf.mxu2 }
 0x56b   : > { %v5135_v32 = vadd.f32 %v5134_v4, %v5086_v38  ;;  %v5183_v34 = vpop.f32.mrf.mxu3  ;;  %v5038_v17 = vpop.f32.mrf.mxu0  ;;  %v8471_v38 = vor.u32 %v9812_v23, %v8468_v52 }
 0x56c   : > { %v5087_v5 = vpop.f32.mrf.mxu1  ;;  %v5039_v0 = vadd.f32 %v5038_v17, %v11993_v39  ;;  %v8580_v17 = vld [vmem:[%s10451_s14 + $0x698] sm:$0xf0] }
 0x56d   : > { %v5184_v63 = vadd.f32 %v5183_v34, %v5135_v32  ;;  %5470 = vmatpush.bf16.msra.mxu1 %v8471_v38  ;;  %v9840_v34 = vld [vmem:[%s10451_s14 + $0x68c] sm:$0xf] }
 0x56e   : > { %v5088_v25 = vadd.f32 %v5087_v5, %v5039_v0  ;;  %v8583_v22 = vor.u32 %v9840_v34, %v8580_v17  ;;  %v8324_v5 = vld [vmem:[%s10451_s14 + $0x498] sm:$0xf0] }
 0x56f   : > { %v5813_v55 = vadd.f32 %v5184_v63, %v517_v29  ;;  %v9776_v29 = vld [vmem:[%s10451_s14 + $0x48c] sm:$0xf] }
 0x570   : > { %v9872_v63 = vld [vmem:[%s10451_s14 + $0x78c] sm:$0xf]  ;;  %5520 = vmatpush.bf16.msra.mxu2 %v8583_v22 }
 0x571   : > { %5877 = vst [vmem:[#allocation2 + $0xd8] sm:$0xff] %v5813_v55  ;;  %v8708_v55 = vld [vmem:[%s10451_s14 + $0x798] sm:$0xf0]  ;;  %v9836_v22 = vld [vmem:[%s10451_s14 + $0x66c] sm:$0xf] }
 0x572   : > { %v5136_v28 = vpop.f32.mrf.mxu2 }
 0x573   : > { %v5137_v30 = vadd.f32 %v5136_v28, %v5088_v25  ;;  %v5185_v1 = vpop.f32.mrf.mxu3  ;;  %v5041_v4 = vpop.f32.mrf.mxu0  ;;  %v525_v25 = vld [vmem:[#allocation2 + $0x118] sm:$0xff] }
 0x574   : > { %v5090_v26 = vpop.f32.mrf.mxu1  ;;  %v5042_v24 = vadd.f32 %v5041_v4, %v12006_v35 }
 0x575   : > { %v5186_v39 = vadd.f32 %v5185_v1, %v5137_v30  ;;  %v9808_v30 = vld [vmem:[%s10451_s14 + $0x58c] sm:$0xf]  ;;  %v8452_v1 = vld [vmem:[%s10451_s14 + $0x598] sm:$0xf0] }
 0x576   : > { %5236 = vmatmul.bf16.gmra.mxu0 %v10636_v57  ;;  %5285 = vmatmul.bf16.gmra.mxu1 %v10638_v58  ;;  %v5091_v32 = vadd.f32 %v5090_v26, %v5042_v24  ;;  %v8327_v58 = vor.u32 %v9776_v29, %v8324_v5  ;;  %v8564_v29 = vld [vmem:[%s10451_s14 + $0x678] sm:$0xf0] }
 0x577   : > { %v5817_v53 = vadd.f32 %v5186_v39, %v521_v54  ;;  %5334 = vmatmul.bf16.gmra.mxu2 %v10640_v59  ;;  %v8455_v54 = vor.u32 %v9808_v30, %v8452_v1 }
 0x578   : > { %5383 = vmatmul.bf16.gmra.mxu3 %v10642_v60  ;;  %v8711_v60 = vor.u32 %v9872_v63, %v8708_v55  ;;  %5422 = vmatpush.bf16.msra.mxu0 %v8327_v58  ;;  %v8567_v63 = vor.u32 %v9836_v22, %v8564_v29  ;;  %v8692_v55 = vld [vmem:[%s10451_s14 + $0x778] sm:$0xf0]  ;;  %v9768_v29 = vld [vmem:[%s10451_s14 + $0x44c] sm:$0xf] }
 0x579   : > { %5881 = vst [vmem:[#allocation2 + $0x130] sm:$0xff] %v5817_v53  ;;  %v529_v53 = vld [vmem:[#allocation2 + $0x108] sm:$0xff]  ;;  %5471 = vmatpush.bf16.msra.mxu1 %v8455_v54 }
 0x57a   : > { %v5139_v2 = vpop.f32.mrf.mxu2  ;;  %5569 = vmatpush.bf16.msra.mxu3 %v8711_v60  ;;  %5521 = vmatpush.bf16.msra.mxu2 %v8567_v63  ;;  %v9864_v63 = vld [vmem:[%s10451_s14 + $0x74c] sm:$0xf] }
 0x57b   : > { %v5140_v35 = vadd.f32 %v5139_v2, %v5091_v32  ;;  %v5188_v57 = vpop.f32.mrf.mxu3  ;;  %v5043_v0 = vpop.f32.mrf.mxu0 }
 0x57c   : > { %v5092_v59 = vpop.f32.mrf.mxu1  ;;  %v5044_v52 = vadd.f32 %v5043_v0, %v12011_v36  ;;  %v9868_v0 = vld [vmem:[%s10451_s14 + $0x76c] sm:$0xf] }
 0x57d   : > { %v5189_v23 = vadd.f32 %v5188_v57, %v5140_v35  ;;  %v9772_v35 = vld [vmem:[%s10451_s14 + $0x46c] sm:$0xf]  ;;  %v8308_v57 = vld [vmem:[%s10451_s14 + $0x478] sm:$0xf0] }
 0x57e   : > { %v5093_v38 = vadd.f32 %v5092_v59, %v5044_v52 }
 0x57f   : > { %v5821_v28 = vadd.f32 %v5189_v23, %v525_v25  ;;  %v533_v25 = vld [vmem:[#allocation2 + $0x138] sm:$0xff] }
 0x581   : > { %5885 = vst [vmem:[#allocation2 + $0x118] sm:$0xff] %v5821_v28  ;;  %v9804_v28 = vld [vmem:[%s10451_s14 + $0x56c] sm:$0xf] }
 0x582   : > { %v5141_v4 = vpop.f32.mrf.mxu2 }
 0x583   : > { %v5142_v26 = vadd.f32 %v5141_v4, %v5093_v38  ;;  %v5190_v39 = vpop.f32.mrf.mxu3  ;;  %v5046_v24 = vpop.f32.mrf.mxu0  ;;  %v8436_v38 = vld [vmem:[%s10451_s14 + $0x578] sm:$0xf0] }
 0x584   : > { %v5095_v32 = vpop.f32.mrf.mxu1  ;;  %v5047_v34 = vadd.f32 %v5046_v24, %v12024_v31  ;;  %v8439_v1 = vor.u32 %v9804_v28, %v8436_v38 }
 0x585   : > { %v5191_v36 = vadd.f32 %v5190_v39, %v5142_v26  ;;  %v537_v39 = vld [vmem:[#allocation2 + $0x1b8] sm:$0xff] }
 0x586   : > { %5241 = vmatmul.bf16.gmra.mxu0 %v10664_v18  ;;  %5290 = vmatmul.bf16.gmra.mxu1 %v10666_v19  ;;  %v5096_v2 = vadd.f32 %v5095_v32, %v5047_v34  ;;  %v8311_v19 = vor.u32 %v9772_v35, %v8308_v57  ;;  %v9832_v34 = vld [vmem:[%s10451_s14 + $0x64c] sm:$0xf]  ;;  %v8676_v57 = vld [vmem:[%s10451_s14 + $0x758] sm:$0xf0] }
 0x587   : > { %v5825_v17 = vadd.f32 %v5191_v36, %v529_v53  ;;  %5339 = vmatmul.bf16.gmra.mxu2 %v10668_v20  ;;  %5472 = vmatpush.bf16.msra.mxu1 %v8439_v1 }
 0x588   : > { %5388 = vmatmul.bf16.gmra.mxu3 %v10670_v21  ;;  %v8695_v21 = vor.u32 %v9868_v0, %v8692_v55  ;;  %5423 = vmatpush.bf16.msra.mxu0 %v8311_v19  ;;  %v541_v0 = vld [vmem:[#allocation2 + $0x160] sm:$0xff]  ;;  %v9800_v55 = vld [vmem:[%s10451_s14 + $0x54c] sm:$0xf] }
 0x589   : > { %5889 = vst [vmem:[#allocation2 + $0x108] sm:$0xff] %v5825_v17  ;;  %v8548_v17 = vld [vmem:[%s10451_s14 + $0x658] sm:$0xf0] }
 0x58a   : > { %v5144_v5 = vpop.f32.mrf.mxu2  ;;  %5570 = vmatpush.bf16.msra.mxu3 %v8695_v21  ;;  %v8551_v22 = vor.u32 %v9832_v34, %v8548_v17  ;;  %v549_v34 = vld [vmem:[#allocation2 + $0x100] sm:$0xff] }
 0x58b   : > { %v5145_v31 = vadd.f32 %v5144_v5, %v5096_v2  ;;  %v5193_v18 = vpop.f32.mrf.mxu3  ;;  %v5048_v58 = vpop.f32.mrf.mxu0  ;;  %v8292_v5 = vld [vmem:[%s10451_s14 + $0x458] sm:$0xf0] }
 0x58c   : > { %v5097_v20 = vpop.f32.mrf.mxu1  ;;  %v5049_v60 = vadd.f32 %v5048_v58, %v12029_v6  ;;  %5522 = vmatpush.bf16.msra.mxu2 %v8551_v22 }
 0x58d   : > { %v5194_v59 = vadd.f32 %v5193_v18, %v5145_v31 }
 0x58e   : > { %v5098_v52 = vadd.f32 %v5097_v20, %v5049_v60 }
 0x58f   : > { %v5829_v23 = vadd.f32 %v5194_v59, %v533_v25  ;;  %v8420_v25 = vld [vmem:[%s10451_s14 + $0x558] sm:$0xf0] }
 0x590   : > { %v8423_v21 = vor.u32 %v9800_v55, %v8420_v25 }
 0x591   : > { %5893 = vst [vmem:[#allocation2 + $0x138] sm:$0xff] %v5829_v23 }
 0x592   : > { %v5146_v30 = vpop.f32.mrf.mxu2  ;;  %5473 = vmatpush.bf16.msra.mxu1 %v8423_v21  ;;  %v8260_v21 = vld [vmem:[%s10451_s14 + $0x418] sm:$0xf0] }
 0x593   : > { %v5147_v4 = vadd.f32 %v5146_v30, %v5098_v52  ;;  %v5195_v54 = vpop.f32.mrf.mxu3  ;;  %v5051_v26 = vpop.f32.mrf.mxu0  ;;  %v545_v52 = vld [vmem:[#allocation2 + $0xf0] sm:$0xff] }
 0x594   : > { %v5100_v24 = vpop.f32.mrf.mxu1  ;;  %v5052_v53 = vadd.f32 %v5051_v26, %v12042_v49 }
 0x595   : > { %v5196_v6 = vadd.f32 %v5195_v54, %v5147_v4  ;;  %v9828_v4 = vld [vmem:[%s10451_s14 + $0x62c] sm:$0xf]  ;;  %v8532_v54 = vld [vmem:[%s10451_s14 + $0x638] sm:$0xf0] }
 0x596   : > { %5246 = vmatmul.bf16.gmra.mxu0 %v10692_v45  ;;  %5295 = vmatmul.bf16.gmra.mxu1 %v10694_v46  ;;  %v5101_v36 = vadd.f32 %v5100_v24, %v5052_v53  ;;  %v8295_v46 = vor.u32 %v9768_v29, %v8292_v5  ;;  %v9764_v24 = vld [vmem:[%s10451_s14 + $0x42c] sm:$0xf] }
 0x597   : > { %v5833_v32 = vadd.f32 %v5196_v6, %v537_v39  ;;  %5344 = vmatmul.bf16.gmra.mxu2 %v10696_v47  ;;  %v8535_v39 = vor.u32 %v9828_v4, %v8532_v54  ;;  %v8276_v6 = vld [vmem:[%s10451_s14 + $0x438] sm:$0xf0]  ;;  %v9860_v53 = vld [vmem:[%s10451_s14 + $0x72c] sm:$0xf] }
 0x598   : > { %5393 = vmatmul.bf16.gmra.mxu3 %v10698_v48  ;;  %v8679_v48 = vor.u32 %v9864_v63, %v8676_v57  ;;  %5424 = vmatpush.bf16.msra.mxu0 %v8295_v46  ;;  %v9796_v5 = vld [vmem:[%s10451_s14 + $0x52c] sm:$0xf]  ;;  %v8404_v63 = vld [vmem:[%s10451_s14 + $0x538] sm:$0xf0] }
 0x599   : > { %5897 = vst [vmem:[#allocation2 + $0x1b8] sm:$0xff] %v5833_v32  ;;  %5523 = vmatpush.bf16.msra.mxu2 %v8535_v39  ;;  %v8388_v4 = vld [vmem:[%s10451_s14 + $0x518] sm:$0xf0] }
 0x59a   : > { %v5149_v2 = vpop.f32.mrf.mxu2  ;;  %5571 = vmatpush.bf16.msra.mxu3 %v8679_v48 }
 0x59b   : > { %v5150_v49 = vadd.f32 %v5149_v2, %v5101_v36  ;;  %v5198_v45 = vpop.f32.mrf.mxu3  ;;  %v5053_v35 = vpop.f32.mrf.mxu0  ;;  %v8660_v36 = vld [vmem:[%s10451_s14 + $0x738] sm:$0xf0] }
 0x59c   : > { %v5102_v47 = vpop.f32.mrf.mxu1  ;;  %v5054_v18 = vadd.f32 %v5053_v35, %v12047_v62 }
 0x59d   : > { %v5199_v31 = vadd.f32 %v5198_v45, %v5150_v49  ;;  %v8407_v45 = vor.u32 %v9796_v5, %v8404_v63  ;;  %v9268_v5 = vld [vmem:[%s10451_s14 + $0xbf8] sm:$0xf0]  ;;  %v565_v63 = vld [vmem:[#allocation2 + $0xa8] sm:$0xff] }
 0x59e   : > { %v5103_v19 = vadd.f32 %v5102_v47, %v5054_v18 }
 0x59f   : > { %v5837_v58 = vadd.f32 %v5199_v31, %v541_v0  ;;  %v553_v0 = vld [vmem:[#allocation2 + $0x20] sm:$0xff]  ;;  %5474 = vmatpush.bf16.msra.mxu1 %v8407_v45 }
 0x5a1   : > { %5901 = vst [vmem:[#allocation2 + $0x160] sm:$0xff] %v5837_v58  ;;  %v9824_v58 = vld [vmem:[%s10451_s14 + $0x60c] sm:$0xf] }
 0x5a2   : > { %v5151_v20 = vpop.f32.mrf.mxu2 }
 0x5a3   : > { %v5152_v59 = vadd.f32 %v5151_v20, %v5103_v19  ;;  %v5200_v60 = vpop.f32.mrf.mxu3  ;;  %v5056_v23 = vpop.f32.mrf.mxu0  ;;  %v8516_v19 = vld [vmem:[%s10451_s14 + $0x618] sm:$0xf0]  ;;  %v9760_v20 = vld [vmem:[%s10451_s14 + $0x40c] sm:$0xf] }
 0x5a4   : > { %v5105_v28 = vpop.f32.mrf.mxu1  ;;  %v5057_v38 = vadd.f32 %v5056_v23, %v12060_v8  ;;  %v8519_v25 = vor.u32 %v9824_v58, %v8516_v19  ;;  %v8644_v23 = vld [vmem:[%s10451_s14 + $0x718] sm:$0xf0]  ;;  %v569_v58 = vld [vmem:[#allocation2 + $0x68] sm:$0xff] }
 0x5a5   : > { %v5201_v62 = vadd.f32 %v5200_v60, %v5152_v59  ;;  %v9856_v59 = vld [vmem:[%s10451_s14 + $0x70c] sm:$0xf] }
 0x5a6   : > { %5251 = vmatmul.bf16.gmra.mxu0 %v10720_v9  ;;  %5300 = vmatmul.bf16.gmra.mxu1 %v10722_v10  ;;  %v5106_v1 = vadd.f32 %v5105_v28, %v5057_v38  ;;  %v8279_v10 = vor.u32 %v9764_v24, %v8276_v6 }
 0x5a7   : > { %v5841_v30 = vadd.f32 %v5201_v62, %v545_v52  ;;  %5349 = vmatmul.bf16.gmra.mxu2 %v10724_v11  ;;  %v557_v52 = vld [vmem:[#allocation2 + $0xe8] sm:$0xff] }
 0x5a8   : > { %5398 = vmatmul.bf16.gmra.mxu3 %v10726_v12  ;;  %v8663_v12 = vor.u32 %v9860_v53, %v8660_v36  ;;  %5425 = vmatpush.bf16.msra.mxu0 %v8279_v10  ;;  %v561_v53 = vld [vmem:[#allocation2 + $0x1d8] sm:$0xff]  ;;  %v9980_v36 = vld [vmem:[%s10451_s14 + $0xaec] sm:$0xf] }
 0x5a9   : > { %5905 = vst [vmem:[#allocation2 + $0xf0] sm:$0xff] %v5841_v30  ;;  %5524 = vmatpush.bf16.msra.mxu2 %v8519_v25 }
 0x5aa   : > { %v5154_v26 = vpop.f32.mrf.mxu2  ;;  %5572 = vmatpush.bf16.msra.mxu3 %v8663_v12 }
 0x5ab   : > { %v5155_v8 = vadd.f32 %v5154_v26, %v5106_v1  ;;  %v5203_v9 = vpop.f32.mrf.mxu3  ;;  %v5058_v32 = vpop.f32.mrf.mxu0  ;;  %v9792_v1 = vld [vmem:[%s10451_s14 + $0x50c] sm:$0xf] }
 0x5ac   : > { %v5107_v11 = vpop.f32.mrf.mxu1  ;;  %v5059_v2 = vadd.f32 %v5058_v32, %v12065_v50  ;;  %v8391_v26 = vor.u32 %v9792_v1, %v8388_v4  ;;  %v9944_v1 = vld [vmem:[%s10451_s14 + $0x9cc] sm:$0xf]  ;;  %v8996_v4 = vld [vmem:[%s10451_s14 + $0x9d8] sm:$0xf0] }
 0x5ad   : > { %v5204_v17 = vadd.f32 %v5203_v9, %v5155_v8 }
 0x5ae   : > { %v5108_v29 = vadd.f32 %v5107_v11, %v5059_v2  ;;  %5475 = vmatpush.bf16.msra.mxu1 %v8391_v26  ;;  %v10012_v2 = vld [vmem:[%s10451_s14 + $0xbec] sm:$0xf] }
 0x5af   : > { %v5845_v22 = vadd.f32 %v5204_v17, %v549_v34  ;;  %v9140_v34 = vld [vmem:[%s10451_s14 + $0xaf8] sm:$0xf0]  ;;  %v9916_v17 = vld [vmem:[%s10451_s14 + $0x8ec] sm:$0xf] }
 0x5b0   : > { %v9143_v12 = vor.u32 %v9980_v36, %v9140_v34  ;;  %v13605_v34 = vld [vmem:[#allocation15_spill] sm:$0xff] }
 0x5b1   : > { %5909 = vst [vmem:[#allocation2 + $0x100] sm:$0xff] %v5845_v22 }
 0x5b2   : > { %v5156_v49 = vpop.f32.mrf.mxu2  ;;  %5713 = vmatpush.bf16.msrb.mxu2 %v9143_v12  ;;  %v13607_v12 = vld [vmem:[#allocation17_spill] sm:$0xff] }
 0x5b3   : > { %v5157_v35 = vadd.f32 %v5156_v49, %v5108_v29  ;;  %v5205_v46 = vpop.f32.mrf.mxu3  ;;  %v5061_v57 = vpop.f32.mrf.mxu0 }
 0x5b4   : > { %v5110_v47 = vpop.f32.mrf.mxu1  ;;  %v5062_v48 = vadd.f32 %v5061_v57, %v12078_v16 }
 0x5b5   : > { %v5206_v50 = vadd.f32 %v5205_v46, %v5157_v35  ;;  %v9948_v35 = vld [vmem:[%s10451_s14 + $0x9ec] sm:$0xf]  ;;  %v9012_v46 = vld [vmem:[%s10451_s14 + $0x9f8] sm:$0xf0] }
 0x5b6   : > { %5256 = vmatmul.bf16.gmra.mxu0 %v10748_v41  ;;  %5305 = vmatmul.bf16.gmra.mxu1 %v10750_v42  ;;  %v5111_v18 = vadd.f32 %v5110_v47, %v5062_v48  ;;  %v8263_v42 = vor.u32 %v9760_v20, %v8260_v21  ;;  %v9015_v57 = vor.u32 %v9948_v35, %v9012_v46  ;;  %v13603_v20 = vld [vmem:[#allocation13_spill] sm:$0xff]  ;;  %v9976_v21 = vld [vmem:[%s10451_s14 + $0xacc] sm:$0xf] }
 0x5b7   : > { %v5849_v31 = vadd.f32 %v5206_v50, %v553_v0  ;;  %5354 = vmatmul.bf16.gmra.mxu2 %v10752_v43 }
 0x5b8   : > { %5403 = vmatmul.bf16.gmra.mxu3 %v10754_v44  ;;  %v8647_v44 = vor.u32 %v9856_v59, %v8644_v23  ;;  %5426 = vmatpush.bf16.msra.mxu0 %v8263_v42  ;;  %v9124_v59 = vld [vmem:[%s10451_s14 + $0xad8] sm:$0xf0]  ;;  %v10008_v23 = vld [vmem:[%s10451_s14 + $0xbcc] sm:$0xf] }
 0x5b9   : > { %5913 = vst [vmem:[#allocation2 + $0x20] sm:$0xff] %v5849_v31  ;;  %5664 = vmatpush.bf16.msrb.mxu1 %v9015_v57  ;;  %v8868_v42 = vld [vmem:[%s10451_s14 + $0x8d8] sm:$0xf0] }
 0x5ba   : > { %v5159_v55 = vpop.f32.mrf.mxu2  ;;  %5573 = vmatpush.bf16.msra.mxu3 %v8647_v44 }
 0x5bb   : > { %v5160_v16 = vadd.f32 %v5159_v55, %v5111_v18  ;;  %v5208_v41 = vpop.f32.mrf.mxu3  ;;  %v5063_v60 = vpop.f32.mrf.mxu0 }
 0x5bc   : > { %v5112_v43 = vpop.f32.mrf.mxu1  ;;  %v5064_v62 = vadd.f32 %v5063_v60, %v12083_v56  ;;  %v9127_v60 = vor.u32 %v9976_v21, %v9124_v59  ;;  %v13610_v21 = vld [vmem:[#allocation20_spill] sm:$0xff]  ;;  %v13611_v59 = vld [vmem:[#allocation21_spill] sm:$0xff] }
 0x5bd   : > { %v5209_v28 = vadd.f32 %v5208_v41, %v5160_v16  ;;  %v9912_v16 = vld [vmem:[%s10451_s14 + $0x8cc] sm:$0xf] }
 0x5be   : > { %v5113_v30 = vadd.f32 %v5112_v43, %v5064_v62  ;;  %5714 = vmatpush.bf16.msrb.mxu2 %v9127_v60  ;;  %v9904_v60 = vld [vmem:[%s10451_s14 + $0x88c] sm:$0xf] }
 0x5bf   : > { %v5853_v38 = vadd.f32 %v5209_v28, %v557_v52  ;;  %v8871_v52 = vor.u32 %v9912_v16, %v8868_v42  ;;  %v573_v28 = vld [vmem:[#allocation2 + $0xc0] sm:$0xff]  ;;  %v9968_v16 = vld [vmem:[%s10451_s14 + $0xa8c] sm:$0xf] }
 0x5c1   : > { %5917 = vst [vmem:[#allocation2 + $0xe8] sm:$0xff] %v5853_v38 }
 0x5c2   : > { %v5161_v54 = vpop.f32.mrf.mxu2 }
 0x5c3   : > { %v5162_v39 = vadd.f32 %v5161_v54, %v5113_v30  ;;  %v5210_v24 = vpop.f32.mrf.mxu3  ;;  %v5066_v6 = vpop.f32.mrf.mxu0  ;;  %v8999_v54 = vor.u32 %v9944_v1, %v8996_v4  ;;  %v9936_v1 = vld [vmem:[%s10451_s14 + $0x98c] sm:$0xf]  ;;  %v8964_v4 = vld [vmem:[%s10451_s14 + $0x998] sm:$0xf0] }
 0x5c4   : > { %v5115_v8 = vpop.f32.mrf.mxu1  ;;  %v5067_v9 = vadd.f32 %v5066_v6, %v12096_v3  ;;  %v8884_v3 = vld [vmem:[%s10451_s14 + $0x8f8] sm:$0xf0] }
 0x5c5   : > { %v5211_v56 = vadd.f32 %v5210_v24, %v5162_v39  ;;  %5665 = vmatpush.bf16.msrb.mxu1 %v8999_v54  ;;  %v8967_v54 = vor.u32 %v9936_v1, %v8964_v4  ;;  %v8932_v1 = vld [vmem:[%s10451_s14 + $0x958] sm:$0xf0] }
 0x5c6   : > { %5261 = vmatmul.bf16.gmra.mxu0 %v10776_v13  ;;  %5310 = vmatmul.bf16.gmra.mxu1 %v10778_v14  ;;  %v5116_v10 = vadd.f32 %v5115_v8, %v5067_v9  ;;  %v8887_v14 = vor.u32 %v9916_v17, %v8884_v3  ;;  %v9972_v17 = vld [vmem:[%s10451_s14 + $0xaac] sm:$0xf]  ;;  %v9108_v3 = vld [vmem:[%s10451_s14 + $0xab8] sm:$0xf0] }
 0x5c7   : > { %v5857_v32 = vadd.f32 %v5211_v56, %v561_v53  ;;  %5359 = vmatmul.bf16.gmra.mxu2 %v10780_v15  ;;  %v577_v56 = vld [vmem:[#allocation2 + $0x58] sm:$0xff] }
 0x5c8   : > { %5408 = vmatmul.bf16.gmra.mxu3 %v13467_v40  ;;  %v9271_v40 = vor.u32 %v10012_v2, %v9268_v5  ;;  %5615 = vmatpush.bf16.msrb.mxu0 %v8887_v14  ;;  %v9908_v2 = vld [vmem:[%s10451_s14 + $0x8ac] sm:$0xf] }
 0x5c9   : > { %5921 = vst [vmem:[#allocation2 + $0x1d8] sm:$0xff] %v5857_v32 }
 0x5ca   : > { %v5164_v11 = vpop.f32.mrf.mxu2  ;;  %5762 = vmatpush.bf16.msrb.mxu3 %v9271_v40 }
 0x5cb   : > { %v5165_v13 = vadd.f32 %v5164_v11, %v5116_v10  ;;  %v5213_v22 = vpop.f32.mrf.mxu3  ;;  %v5068_v29 = vpop.f32.mrf.mxu0  ;;  %v13604_v10 = vld [vmem:[#allocation14_spill] sm:$0xff]  ;;  %v13606_v11 = vld [vmem:[#allocation16_spill] sm:$0xff] }
 0x5cc   : > { %v5117_v15 = vpop.f32.mrf.mxu1  ;;  %v5069_v45 = vadd.f32 %v5068_v29, %v12101_v33  ;;  %5616 = vmatpush.bf16.msrb.mxu0 %v8871_v52  ;;  %v10004_v29 = vld [vmem:[%s10451_s14 + $0xbac] sm:$0xf]  ;;  %v9220_v52 = vld [vmem:[%s10451_s14 + $0xb98] sm:$0xf0] }
 0x5cd   : > { %v5214_v49 = vadd.f32 %v5213_v22, %v5165_v13  ;;  %v9111_v13 = vor.u32 %v9972_v17, %v9108_v3  ;;  %v8852_v22 = vld [vmem:[%s10451_s14 + $0x8b8] sm:$0xf0]  ;;  %v9996_v3 = vld [vmem:[%s10451_s14 + $0xb6c] sm:$0xf] }
 0x5ce   : > { %v5118_v47 = vadd.f32 %v5117_v15, %v5069_v45  ;;  %v8855_v5 = vor.u32 %v9908_v2, %v8852_v22  ;;  %v8820_v17 = vld [vmem:[%s10451_s14 + $0x878] sm:$0xf0] }
 0x5cf   : > { %v5861_v0 = vadd.f32 %v5214_v49, %v565_v63  ;;  %v9236_v63 = vld [vmem:[%s10451_s14 + $0xbb8] sm:$0xf0]  ;;  %5715 = vmatpush.bf16.msrb.mxu2 %v9111_v13 }
 0x5d0   : > { %v9239_v45 = vor.u32 %v10004_v29, %v9236_v63  ;;  %5617 = vmatpush.bf16.msrb.mxu0 %v8855_v5  ;;  %v9204_v2 = vld [vmem:[%s10451_s14 + $0xb78] sm:$0xf0] }
 0x5d1   : > { %5925 = vst [vmem:[#allocation2 + $0xa8] sm:$0xff] %v5861_v0  ;;  %v9940_v0 = vld [vmem:[%s10451_s14 + $0x9ac] sm:$0xf]  ;;  %v9207_v29 = vor.u32 %v9996_v3, %v9204_v2  ;;  %v9172_v2 = vld [vmem:[%s10451_s14 + $0xb38] sm:$0xf0] }
 0x5d2   : > { %v5166_v50 = vpop.f32.mrf.mxu2  ;;  %v9988_v3 = vld [vmem:[%s10451_s14 + $0xb2c] sm:$0xf] }
 0x5d3   : > { %v5167_v48 = vadd.f32 %v5166_v50, %v5118_v47  ;;  %v5215_v31 = vpop.f32.mrf.mxu3  ;;  %v5071_v18 = vpop.f32.mrf.mxu0  ;;  %v8980_v47 = vld [vmem:[%s10451_s14 + $0x9b8] sm:$0xf0] }
 0x5d4   : > { %v5120_v33 = vpop.f32.mrf.mxu1  ;;  %v5072_v55 = vadd.f32 %v5071_v18, %v12114_v37  ;;  %v8983_v50 = vor.u32 %v9940_v0, %v8980_v47 }
 0x5d5   : > { %v5216_v19 = vadd.f32 %v5215_v31, %v5167_v48 }
 0x5d6   : > { %5266 = vmatmul.bf16.gmra.mxu0 %v13468_v27  ;;  %5315 = vmatmul.bf16.gmra.mxu1 %v13535_v61  ;;  %v5121_v41 = vadd.f32 %v5120_v33, %v5072_v55  ;;  %v9252_v27 = vld [vmem:[%s10451_s14 + $0xbd8] sm:$0xf0] }
 0x5d7   : > { %v5865_v25 = vadd.f32 %v5216_v19, %v569_v58  ;;  %5364 = vmatmul.bf16.gmra.mxu2 %v13536_v51  ;;  %v9255_v51 = vor.u32 %v10008_v23, %v9252_v27  ;;  %5666 = vmatpush.bf16.msrb.mxu1 %v8983_v50  ;;  %v8836_v23 = vld [vmem:[%s10451_s14 + $0x898] sm:$0xf0] }
 0x5d8   : > { %5413 = vmatmul.bf16.gmra.mxu3 %v13603_v20  ;;  %v13609_v20 = vld [vmem:[#allocation19_spill] sm:$0xff] }
 0x5d9   : > { %5929 = vst [vmem:[#allocation2 + $0x68] sm:$0xff] %v5865_v25  ;;  %5763 = vmatpush.bf16.msrb.mxu3 %v9255_v51  ;;  %v13608_v25 = vld [vmem:[#allocation18_spill] sm:$0xff] }
 0x5da   : > { %v5169_v37 = vpop.f32.mrf.mxu2 }
 0x5db   : > { %v5170_v43 = vadd.f32 %v5169_v37, %v5121_v41  ;;  %v5218_v44 = vpop.f32.mrf.mxu3  ;;  %v5073_v61 = vpop.f32.mrf.mxu0  ;;  %v9092_v41 = vld [vmem:[%s10451_s14 + $0xa98] sm:$0xf0]  ;;  %v10000_v37 = vld [vmem:[%s10451_s14 + $0xb8c] sm:$0xf]  ;;  %5667 = vmatpush.bf16.msrb.mxu1 %v8967_v54 }
 0x5dc   : > { %v5122_v62 = vpop.f32.mrf.mxu1  ;;  %v5074_v30 = vadd.f32 %v5073_v61, %v12118_v7  ;;  %v9095_v42 = vor.u32 %v9968_v16, %v9092_v41  ;;  %v9896_v16 = vld [vmem:[%s10451_s14 + $0x84c] sm:$0xf] }
 0x5dd   : > { %v5219_v38 = vadd.f32 %v5218_v44, %v5170_v43  ;;  %5764 = vmatpush.bf16.msrb.mxu3 %v9239_v45  ;;  %v8839_v43 = vor.u32 %v9904_v60, %v8836_v23  ;;  %v9223_v44 = vor.u32 %v10000_v37, %v9220_v52  ;;  %v9932_v45 = vld [vmem:[%s10451_s14 + $0x96c] sm:$0xf]  ;;  %v8804_v60 = vld [vmem:[%s10451_s14 + $0x858] sm:$0xf0] }
 0x5de   : > { %v5123_v39 = vadd.f32 %v5122_v62, %v5074_v30  ;;  %5716 = vmatpush.bf16.msrb.mxu2 %v9095_v42  ;;  %v9992_v42 = vld [vmem:[%s10451_s14 + $0xb4c] sm:$0xf]  ;;  %v9188_v23 = vld [vmem:[%s10451_s14 + $0xb58] sm:$0xf0]  ;;  %v8807_v52 = vor.u32 %v9896_v16, %v8804_v60 }
 0x5df   : > { %v5869_v26 = vadd.f32 %v5219_v38, %v573_v28  ;;  %5618 = vmatpush.bf16.msrb.mxu0 %v8839_v43  ;;  %v9952_v16 = vld [vmem:[%s10451_s14 + $0xa0c] sm:$0xf] }
 0x5e0   : > { %v9888_v60 = vld [vmem:[%s10451_s14 + $0x80c] sm:$0xf] }
 0x5e1   : > { %5933 = vst [vmem:[#allocation2 + $0xc0] sm:$0xff] %v5869_v26  ;;  %5765 = vmatpush.bf16.msrb.mxu3 %v9223_v44 }
 0x5e2   : > { %v5171_v24 = vpop.f32.mrf.mxu2 }
 0x5e3   : > { %v5172_v6 = vadd.f32 %v5171_v24, %v5123_v39  ;;  %v5220_v53 = vpop.f32.mrf.mxu3  ;;  %v5232_v8 = vpop.f32.mrf.mxu0 }
 0x5e4   : > { %v5281_v9 = vpop.f32.mrf.mxu1 }
 0x5e5   : > { %v5221_v7 = vadd.f32 %v5220_v53, %v5172_v6  ;;  %v5282_v32 = vadd.f32 %v5281_v9, %v5232_v8  ;;  %v13612_v9 = vld [vmem:[#allocation22_spill] sm:$0xff]  ;;  %5766 = vmatpush.bf16.msrb.mxu3 %v9207_v29  ;;  %v9175_v29 = vor.u32 %v9988_v3, %v9172_v2 }
 0x5e6   : > { %5427 = vmatmul.bf16.vlgmr.msra.gmra.mxu0 %v13604_v10  ;;  %5476 = vmatmul.bf16.vlgmr.msra.gmra.mxu1 %v13605_v34  ;;  %v13615_v10 = vld [vmem:[#allocation25_spill] sm:$0xff]  ;;  %v9076_v34 = vld [vmem:[%s10451_s14 + $0xa78] sm:$0xf0] }
 0x5e7   : > { %v5873_v36 = vadd.f32 %v5221_v7, %v577_v56  ;;  %5525 = vmatmul.bf16.vlgmr.msra.gmra.mxu2 %v13606_v11  ;;  %v13613_v7 = vld [vmem:[#allocation23_spill] sm:$0xff]  ;;  %v9900_v11 = vld [vmem:[%s10451_s14 + $0x86c] sm:$0xf] }
 0x5e8   : > { %5574 = vmatmul.bf16.vlgmr.msra.gmra.mxu3 %v13607_v12  ;;  %v8823_v22 = vor.u32 %v9900_v11, %v8820_v17  ;;  %v9892_v11 = vld [vmem:[%s10451_s14 + $0x82c] sm:$0xf]  ;;  %v8788_v17 = vld [vmem:[%s10451_s14 + $0x838] sm:$0xf0] }
 0x5e9   : > { %5937 = vst [vmem:[#allocation2 + $0x58] sm:$0xff] %v5873_v36  ;;  %v9964_v36 = vld [vmem:[%s10451_s14 + $0xa6c] sm:$0xf] }
 0x5ea   : > { %v5330_v14 = vpop.f32.mrf.mxu2  ;;  %v9079_v12 = vor.u32 %v9964_v36, %v9076_v34  ;;  %5619 = vmatpush.bf16.msrb.mxu0 %v8823_v22  ;;  %v9956_v36 = vld [vmem:[%s10451_s14 + $0xa2c] sm:$0xf]  ;;  %v9044_v34 = vld [vmem:[%s10451_s14 + $0xa38] sm:$0xf0]  ;;  %v8791_v22 = vor.u32 %v9892_v11, %v8788_v17 }
 0x5eb   : > { %v5331_v15 = vadd.f32 %v5330_v14, %v5282_v32  ;;  %v5379_v40 = vpop.f32.mrf.mxu3  ;;  %v5234_v49 = vpop.f32.mrf.mxu0  ;;  %v13614_v32 = vld [vmem:[#allocation24_spill] sm:$0xff] }
 0x5ec   : > { %v5283_v35 = vpop.f32.mrf.mxu1  ;;  %5717 = vmatpush.bf16.msrb.mxu2 %v9079_v12  ;;  %v9047_v12 = vor.u32 %v9956_v36, %v9044_v34  ;;  %v13628_v36 = vld [vmem:[#allocation38_spill] sm:$0xff]  ;;  %v13629_v34 = vld [vmem:[#allocation39_spill] sm:$0xff]  ;;  %v13630_v11 = vld [vmem:[#allocation40_spill] sm:$0xff] }
 0x5ed   : > { %v12242_v46 = vadd.f32 %v5379_v40, %v5331_v15  ;;  %v5284_v57 = vadd.f32 %v5283_v35, %v5234_v49  ;;  %v8948_v35 = vld [vmem:[%s10451_s14 + $0x978] sm:$0xf0] }
 0x5ee   : > { %5620 = vmatpush.bf16.msrb.mxu0 %v8807_v52  ;;  %v9156_v52 = vld [vmem:[%s10451_s14 + $0xb18] sm:$0xf0] }
 0x5f2   : > { %v5332_v48 = vpop.f32.mrf.mxu2  ;;  %5621 = vmatpush.bf16.msrb.mxu0 %v8791_v22 }
 0x5f3   : > { %v5333_v31 = vadd.f32 %v5332_v48, %v5284_v57  ;;  %v5381_v18 = vpop.f32.mrf.mxu3  ;;  %v5237_v58 = vpop.f32.mrf.mxu0  ;;  %v8951_v57 = vor.u32 %v9932_v45, %v8948_v35  ;;  %v9924_v35 = vld [vmem:[%s10451_s14 + $0x92c] sm:$0xf] }
 0x5f4   : > { %v5286_v33 = vpop.f32.mrf.mxu1 }
 0x5f5   : > { %v12246_v19 = vadd.f32 %v5381_v18, %v5333_v31  ;;  %v5287_v55 = vadd.f32 %v5286_v33, %v5237_v58  ;;  %5668 = vmatpush.bf16.msrb.mxu1 %v8951_v57  ;;  %v13616_v33 = vld [vmem:[#allocation26_spill] sm:$0xff] }
 0x5f6   : > { %5432 = vmatmul.bf16.gmra.mxu0 %v13608_v25  ;;  %5481 = vmatmul.bf16.gmra.mxu1 %v13609_v20  ;;  %v13618_v25 = vld [vmem:[#allocation28_spill] sm:$0xff]  ;;  %v13619_v20 = vld [vmem:[#allocation29_spill] sm:$0xff]  ;;  %v8916_v57 = vld [vmem:[%s10451_s14 + $0x938] sm:$0xf0] }
 0x5f7   : > { %5530 = vmatmul.bf16.gmra.mxu2 %v13610_v21  ;;  %v9960_v21 = vld [vmem:[%s10451_s14 + $0xa4c] sm:$0xf] }
 0x5f8   : > { %5579 = vmatmul.bf16.gmra.mxu3 %v13611_v59  ;;  %v9060_v59 = vld [vmem:[%s10451_s14 + $0xa58] sm:$0xf0] }
 0x5f9   : > { %v9063_v41 = vor.u32 %v9960_v21, %v9060_v59  ;;  %v13626_v21 = vld [vmem:[#allocation36_spill] sm:$0xff]  ;;  %v13627_v59 = vld [vmem:[#allocation37_spill] sm:$0xff] }
 0x5fa   : > { %v5335_v27 = vpop.f32.mrf.mxu2 }
 0x5fb   : > { %v5336_v61 = vadd.f32 %v5335_v27, %v5287_v55  ;;  %v5384_v51 = vpop.f32.mrf.mxu3  ;;  %v5239_v28 = vpop.f32.mrf.mxu0  ;;  %v13617_v55 = vld [vmem:[#allocation27_spill] sm:$0xff]  ;;  %v9191_v27 = vor.u32 %v9992_v42, %v9188_v23  ;;  %5718 = vmatpush.bf16.msrb.mxu2 %v9063_v41  ;;  %v9028_v41 = vld [vmem:[%s10451_s14 + $0xa18] sm:$0xf0] }
 0x5fc   : > { %v5288_v62 = vpop.f32.mrf.mxu1  ;;  %v9031_v42 = vor.u32 %v9952_v16, %v9028_v41  ;;  %v8772_v23 = vld [vmem:[%s10451_s14 + $0x818] sm:$0xf0] }
 0x5fd   : > { %v12258_v38 = vadd.f32 %v5384_v51, %v5336_v61  ;;  %v5289_v30 = vadd.f32 %v5288_v62, %v5239_v28  ;;  %5767 = vmatpush.bf16.msrb.mxu3 %v9191_v27 }
 0x5ff   : > { %5719 = vmatpush.bf16.msrb.mxu2 %v9047_v12  ;;  %v13631_v12 = vld [vmem:[#allocation41_spill] sm:$0xff] }
 0x601   : > { %5768 = vmatpush.bf16.msrb.mxu3 %v9175_v29 }
 0x602   : > { %v5337_v26 = vpop.f32.mrf.mxu2 }
 0x603   : > { %v5338_v39 = vadd.f32 %v5337_v26, %v5289_v30  ;;  %v5386_v24 = vpop.f32.mrf.mxu3  ;;  %v5242_v6 = vpop.f32.mrf.mxu0  ;;  %v9928_v30 = vld [vmem:[%s10451_s14 + $0x94c] sm:$0xf]  ;;  %5720 = vmatpush.bf16.msrb.mxu2 %v9031_v42 }
 0x604   : > { %v5291_v53 = vpop.f32.mrf.mxu1  ;;  %v8935_v4 = vor.u32 %v9928_v30, %v8932_v1 }
 0x605   : > { %v12262_v8 = vadd.f32 %v5386_v24, %v5338_v39  ;;  %v5292_v56 = vadd.f32 %v5291_v53, %v5242_v6 }
 0x606   : > { %5437 = vmatmul.bf16.gmra.mxu0 %v13612_v9  ;;  %5486 = vmatmul.bf16.gmra.mxu1 %v13613_v7  ;;  %v13620_v9 = vld [vmem:[#allocation30_spill] sm:$0xff]  ;;  %v13621_v7 = vld [vmem:[#allocation31_spill] sm:$0xff] }
 0x607   : > { %5535 = vmatmul.bf16.gmra.mxu2 %v13614_v32  ;;  %5669 = vmatpush.bf16.msrb.mxu1 %v8935_v4  ;;  %v13622_v32 = vld [vmem:[#allocation32_spill] sm:$0xff] }
 0x608   : > { %5584 = vmatmul.bf16.gmra.mxu3 %v13615_v10  ;;  %v13623_v10 = vld [vmem:[#allocation33_spill] sm:$0xff] }
 0x60a   : > { %v5340_v13 = vpop.f32.mrf.mxu2 }
 0x60b   : > { %v5341_v14 = vadd.f32 %v5340_v13, %v5292_v56  ;;  %v5389_v5 = vpop.f32.mrf.mxu3  ;;  %v5244_v63 = vpop.f32.mrf.mxu0 }
 0x60c   : > { %v5293_v15 = vpop.f32.mrf.mxu1 }
 0x60d   : > { %v12274_v40 = vadd.f32 %v5389_v5, %v5341_v14  ;;  %v5294_v49 = vadd.f32 %v5293_v15, %v5244_v63 }
 0x612   : > { %v5342_v0 = vpop.f32.mrf.mxu2 }
 0x613   : > { %v5343_v47 = vadd.f32 %v5342_v0, %v5294_v49  ;;  %v5391_v50 = vpop.f32.mrf.mxu3  ;;  %v5247_v48 = vpop.f32.mrf.mxu0  ;;  %v8919_v0 = vor.u32 %v9924_v35, %v8916_v57 }
 0x614   : > { %v5296_v31 = vpop.f32.mrf.mxu1 }
 0x615   : > { %v12278_v18 = vadd.f32 %v5391_v50, %v5343_v47  ;;  %v5297_v58 = vadd.f32 %v5296_v31, %v5247_v48  ;;  %5670 = vmatpush.bf16.msrb.mxu1 %v8919_v0 }
 0x616   : > { %5442 = vmatmul.bf16.gmra.mxu0 %v13616_v33  ;;  %5491 = vmatmul.bf16.gmra.mxu1 %v13617_v55 }
 0x617   : > { %5540 = vmatmul.bf16.gmra.mxu2 %v13618_v25  ;;  %v13624_v25 = vld [vmem:[#allocation34_spill] sm:$0xff] }
 0x618   : > { %5589 = vmatmul.bf16.gmra.mxu3 %v13619_v20  ;;  %v13625_v20 = vld [vmem:[#allocation35_spill] sm:$0xff] }
 0x61a   : > { %v5345_v37 = vpop.f32.mrf.mxu2 }
 0x61b   : > { %v5346_v43 = vadd.f32 %v5345_v37, %v5297_v58  ;;  %v5394_v44 = vpop.f32.mrf.mxu3  ;;  %v5249_v61 = vpop.f32.mrf.mxu0  ;;  %v9984_v37 = vld [vmem:[%s10451_s14 + $0xb0c] sm:$0xf] }
 0x61c   : > { %v5298_v51 = vpop.f32.mrf.mxu1 }
 0x61d   : > { %v12290_v28 = vadd.f32 %v5394_v44, %v5346_v43  ;;  %v5299_v62 = vadd.f32 %v5298_v51, %v5249_v61  ;;  %v8775_v43 = vor.u32 %v9888_v60, %v8772_v23  ;;  %v9159_v44 = vor.u32 %v9984_v37, %v9156_v52 }
 0x61f   : > { %5622 = vmatpush.bf16.msrb.mxu0 %v8775_v43  ;;  %5769 = vmatpush.bf16.msrb.mxu3 %v9159_v44  ;;  %v13636_v44 = vld [vmem:[#allocation46_spill] sm:$0xff] }
 0x622   : > { %v5347_v54 = vpop.f32.mrf.mxu2 }
 0x623   : > { %v5348_v26 = vadd.f32 %v5347_v54, %v5299_v62  ;;  %v5396_v39 = vpop.f32.mrf.mxu3  ;;  %v5252_v24 = vpop.f32.mrf.mxu0  ;;  %v9920_v54 = vld [vmem:[%s10451_s14 + $0x90c] sm:$0xf] }
 0x624   : > { %v5301_v6 = vpop.f32.mrf.mxu1 }
 0x625   : > { %v12294_v53 = vadd.f32 %v5396_v39, %v5348_v26  ;;  %v5302_v56 = vadd.f32 %v5301_v6, %v5252_v24  ;;  %v8900_v26 = vld [vmem:[%s10451_s14 + $0x918] sm:$0xf0] }
 0x626   : > { %5447 = vmatmul.bf16.gmra.mxu0 %v13620_v9  ;;  %5496 = vmatmul.bf16.gmra.mxu1 %v13621_v7  ;;  %v8903_v39 = vor.u32 %v9920_v54, %v8900_v26 }
 0x627   : > { %5545 = vmatmul.bf16.gmra.mxu2 %v13622_v32 }
 0x628   : > { %5594 = vmatmul.bf16.gmra.mxu3 %v13623_v10  ;;  %5671 = vmatpush.bf16.msrb.mxu1 %v8903_v39 }
 0x62a   : > { %v5350_v13 = vpop.f32.mrf.mxu2 }
 0x62b   : > { %v5351_v14 = vadd.f32 %v5350_v13, %v5302_v56  ;;  %v5399_v5 = vpop.f32.mrf.mxu3  ;;  %v5254_v63 = vpop.f32.mrf.mxu0 }
 0x62c   : > { %v5303_v15 = vpop.f32.mrf.mxu1 }
 0x62d   : > { %v12306_v49 = vadd.f32 %v5399_v5, %v5351_v14  ;;  %v5304_v45 = vadd.f32 %v5303_v15, %v5254_v63 }
 0x632   : > { %v5352_v47 = vpop.f32.mrf.mxu2 }
 0x633   : > { %v5353_v50 = vadd.f32 %v5352_v47, %v5304_v45  ;;  %v5401_v48 = vpop.f32.mrf.mxu3  ;;  %v5257_v31 = vpop.f32.mrf.mxu0  ;;  %v13632_v47 = vld [vmem:[#allocation42_spill] sm:$0xff] }
 0x634   : > { %v5306_v58 = vpop.f32.mrf.mxu1 }
 0x635   : > { %v12310_v33 = vadd.f32 %v5401_v48, %v5353_v50  ;;  %v5307_v55 = vadd.f32 %v5306_v58, %v5257_v31  ;;  %v13633_v50 = vld [vmem:[#allocation43_spill] sm:$0xff]  ;;  %v13634_v48 = vld [vmem:[#allocation44_spill] sm:$0xff]  ;;  %v13635_v31 = vld [vmem:[#allocation45_spill] sm:$0xff] }
 0x636   : > { %5452 = vmatmul.bf16.gmra.mxu0 %v13624_v25  ;;  %5501 = vmatmul.bf16.gmra.mxu1 %v13625_v20 }
 0x637   : > { %5550 = vmatmul.bf16.gmra.mxu2 %v13626_v21 }
 0x638   : > { %5599 = vmatmul.bf16.gmra.mxu3 %v13627_v59 }
 0x63a   : > { %v5355_v27 = vpop.f32.mrf.mxu2 }
 0x63b   : > { %v5356_v61 = vadd.f32 %v5355_v27, %v5307_v55  ;;  %v5404_v51 = vpop.f32.mrf.mxu3  ;;  %v5259_v62 = vpop.f32.mrf.mxu0 }
 0x63c   : > { %v5308_v30 = vpop.f32.mrf.mxu1 }
 0x63d   : > { %v12322_v1 = vadd.f32 %v5404_v51, %v5356_v61  ;;  %v5309_v4 = vadd.f32 %v5308_v30, %v5259_v62  ;;  %v13637_v61 = vld [vmem:[#allocation47_spill] sm:$0xff]  ;;  %v13638_v51 = vld [vmem:[#allocation48_spill] sm:$0xff]  ;;  %v13639_v62 = vld [vmem:[#allocation49_spill] sm:$0xff] }
 0x642   : > { %v5357_v24 = vpop.f32.mrf.mxu2 }
 0x643   : > { %v5358_v6 = vadd.f32 %v5357_v24, %v5309_v4  ;;  %v5406_v56 = vpop.f32.mrf.mxu3  ;;  %v5262_v9 = vpop.f32.mrf.mxu0 }
 0x644   : > { %v5311_v7 = vpop.f32.mrf.mxu1 }
 0x645   : > { %v12326_v32 = vadd.f32 %v5406_v56, %v5358_v6  ;;  %v5312_v10 = vadd.f32 %v5311_v7, %v5262_v9 }
 0x646   : > { %5457 = vmatmul.bf16.gmra.mxu0 %v13628_v36  ;;  %5506 = vmatmul.bf16.gmra.mxu1 %v13629_v34 }
 0x647   : > { %5555 = vmatmul.bf16.gmra.mxu2 %v13630_v11 }
 0x648   : > { %5604 = vmatmul.bf16.gmra.mxu3 %v13631_v12 }
 0x64a   : > { %v5360_v17 = vpop.f32.mrf.mxu2 }
 0x64b   : > { %v5361_v3 = vadd.f32 %v5360_v17, %v5312_v10  ;;  %v5409_v2 = vpop.f32.mrf.mxu3  ;;  %v5264_v13 = vpop.f32.mrf.mxu0  ;;  %v13640_v17 = vld [vmem:[#allocation50_spill] sm:$0xff] }
 0x64c   : > { %v5313_v22 = vpop.f32.mrf.mxu1 }
 0x64d   : > { %v12332_v29 = vadd.f32 %v5409_v2, %v5361_v3  ;;  %v5314_v14 = vadd.f32 %v5313_v22, %v5264_v13  ;;  %v13641_v3 = vld [vmem:[#allocation51_spill] sm:$0xff]  ;;  %v13642_v2 = vld [vmem:[#allocation52_spill] sm:$0xff] }
 0x652   : > { %v5362_v5 = vpop.f32.mrf.mxu2 }
 0x653   : > { %v5363_v63 = vadd.f32 %v5362_v5, %v5314_v14  ;;  %v5411_v15 = vpop.f32.mrf.mxu3  ;;  %v5267_v45 = vpop.f32.mrf.mxu0 }
 0x654   : > { %v5316_v35 = vpop.f32.mrf.mxu1 }
 0x655   : > { %v12334_v57 = vadd.f32 %v5411_v15, %v5363_v63  ;;  %v5317_v0 = vadd.f32 %v5316_v35, %v5267_v45 }
 0x656   : > { %5462 = vmatmul.bf16.gmra.mxu0 %v13632_v47  ;;  %5511 = vmatmul.bf16.gmra.mxu1 %v13633_v50 }
 0x657   : > { %5560 = vmatmul.bf16.gmra.mxu2 %v13634_v48 }
 0x658   : > { %5609 = vmatmul.bf16.gmra.mxu3 %v13635_v31 }
 0x65a   : > { %v5365_v58 = vpop.f32.mrf.mxu2 }
 0x65b   : > { %v5366_v55 = vadd.f32 %v5365_v58, %v5317_v0  ;;  %v5414_v25 = vpop.f32.mrf.mxu3  ;;  %v5269_v20 = vpop.f32.mrf.mxu0 }
 0x65c   : > { %v5318_v21 = vpop.f32.mrf.mxu1 }
 0x65d   : > { %v12340_v59 = vadd.f32 %v5414_v25, %v5366_v55  ;;  %v5319_v16 = vadd.f32 %v5318_v21, %v5269_v20  ;;  %v13644_v25 = vld [vmem:[#allocation54_spill] sm:$0xff]  ;;  %v13645_v20 = vld [vmem:[#allocation55_spill] sm:$0xff]  ;;  %v13646_v21 = vld [vmem:[#allocation56_spill] sm:$0xff] }
 0x662   : > { %v5367_v41 = vpop.f32.mrf.mxu2 }
 0x663   : > { %v5368_v60 = vadd.f32 %v5367_v41, %v5319_v16  ;;  %v5416_v42 = vpop.f32.mrf.mxu3  ;;  %v5428_v23 = vpop.f32.mrf.mxu0 }
 0x664   : > { %v5429_v37 = vadd.f32 %v5428_v23, %v12242_v46  ;;  %v5477_v52 = vpop.f32.mrf.mxu1 }
 0x665   : > { %v12343_v27 = vadd.f32 %v5416_v42, %v5368_v60 }
 0x666   : > { %v5478_v43 = vadd.f32 %v5477_v52, %v5429_v37  ;;  %5623 = vmatmul.bf16.vlgmr.msrb.gmra.mxu0 %v13636_v44  ;;  %5672 = vmatmul.bf16.vlgmr.msrb.gmra.mxu1 %v13637_v61 }
 0x667   : > { %5721 = vmatmul.bf16.vlgmr.msrb.gmra.mxu2 %v13638_v51 }
 0x668   : > { %5770 = vmatmul.bf16.vlgmr.msrb.gmra.mxu3 %v13639_v62 }
 0x66a   : > { %v5526_v30 = vpop.f32.mrf.mxu2 }
 0x66b   : > { %v5527_v4 = vadd.f32 %v5526_v30, %v5478_v43  ;;  %v5575_v54 = vpop.f32.mrf.mxu3  ;;  %v5430_v26 = vpop.f32.mrf.mxu0 }
 0x66c   : > { %v5431_v39 = vadd.f32 %v5430_v26, %v12246_v19  ;;  %v5479_v24 = vpop.f32.mrf.mxu1  ;;  %v13643_v19 = vld [vmem:[#allocation53_spill] sm:$0xff]  ;;  %v13648_v26 = vld [vmem:[#allocation58_spill] sm:$0xff] }
 0x66d   : > { %v12350_v46 = vadd.f32 %v5575_v54, %v5527_v4 }
 0x66e   : > { %v5480_v6 = vadd.f32 %v5479_v24, %v5431_v39  ;;  %v13649_v39 = vld [vmem:[#allocation59_spill] sm:$0xff]  ;;  %v13650_v24 = vld [vmem:[#allocation60_spill] sm:$0xff] }
 0x672   : > { %v5528_v56 = vpop.f32.mrf.mxu2 }
 0x673   : > { %v5529_v9 = vadd.f32 %v5528_v56, %v5480_v6  ;;  %v5577_v7 = vpop.f32.mrf.mxu3  ;;  %v5433_v10 = vpop.f32.mrf.mxu0 }
 0x674   : > { %v5434_v36 = vadd.f32 %v5433_v10, %v12258_v38  ;;  %v5482_v34 = vpop.f32.mrf.mxu1 }
 0x675   : > { %v12353_v11 = vadd.f32 %v5577_v7, %v5529_v9 }
 0x676   : > { %v5483_v12 = vadd.f32 %v5482_v34, %v5434_v36  ;;  %5628 = vmatmul.bf16.gmra.mxu0 %v13640_v17  ;;  %5677 = vmatmul.bf16.gmra.mxu1 %v13641_v3 }
 0x677   : > { %5726 = vmatmul.bf16.gmra.mxu2 %v13642_v2 }
 0x678   : > { %5775 = vmatmul.bf16.gmra.mxu3 %v13643_v19 }
 0x67a   : > { %v5531_v13 = vpop.f32.mrf.mxu2 }
 0x67b   : > { %v5532_v22 = vadd.f32 %v5531_v13, %v5483_v12  ;;  %v5580_v14 = vpop.f32.mrf.mxu3  ;;  %v5435_v5 = vpop.f32.mrf.mxu0 }
 0x67c   : > { %v5436_v63 = vadd.f32 %v5435_v5, %v12262_v8  ;;  %v5484_v15 = vpop.f32.mrf.mxu1  ;;  %v13647_v8 = vld [vmem:[#allocation57_spill] sm:$0xff]  ;;  %v13652_v5 = vld [vmem:[#allocation62_spill] sm:$0xff] }
 0x67d   : > { %v12360_v38 = vadd.f32 %v5580_v14, %v5532_v22 }
 0x67e   : > { %v5485_v45 = vadd.f32 %v5484_v15, %v5436_v63  ;;  %v13653_v63 = vld [vmem:[#allocation63_spill] sm:$0xff]  ;;  %v13654_v15 = vld [vmem:[#allocation64_spill] sm:$0xff] }
 0x682   : > { %v5533_v35 = vpop.f32.mrf.mxu2 }
 0x683   : > { %v5534_v0 = vadd.f32 %v5533_v35, %v5485_v45  ;;  %v5582_v47 = vpop.f32.mrf.mxu3  ;;  %v5438_v50 = vpop.f32.mrf.mxu0 }
 0x684   : > { %v5439_v48 = vadd.f32 %v5438_v50, %v12274_v40  ;;  %v5487_v31 = vpop.f32.mrf.mxu1 }
 0x685   : > { %v12363_v58 = vadd.f32 %v5582_v47, %v5534_v0 }
 0x686   : > { %v5488_v55 = vadd.f32 %v5487_v31, %v5439_v48  ;;  %5633 = vmatmul.bf16.gmra.mxu0 %v13644_v25  ;;  %5682 = vmatmul.bf16.gmra.mxu1 %v13645_v20 }
 0x687   : > { %5731 = vmatmul.bf16.gmra.mxu2 %v13646_v21 }
 0x688   : > { %5780 = vmatmul.bf16.gmra.mxu3 %v13647_v8 }
 0x68a   : > { %v5536_v16 = vpop.f32.mrf.mxu2 }
 0x68b   : > { %v5537_v41 = vadd.f32 %v5536_v16, %v5488_v55  ;;  %v5585_v60 = vpop.f32.mrf.mxu3  ;;  %v5440_v42 = vpop.f32.mrf.mxu0 }
 0x68c   : > { %v5441_v23 = vadd.f32 %v5440_v42, %v12278_v18  ;;  %v5489_v37 = vpop.f32.mrf.mxu1  ;;  %v13651_v18 = vld [vmem:[#allocation61_spill] sm:$0xff]  ;;  %v13656_v42 = vld [vmem:[#allocation66_spill] sm:$0xff] }
 0x68d   : > { %v12370_v40 = vadd.f32 %v5585_v60, %v5537_v41 }
 0x68e   : > { %v5490_v52 = vadd.f32 %v5489_v37, %v5441_v23  ;;  %v13657_v23 = vld [vmem:[#allocation67_spill] sm:$0xff]  ;;  %v13658_v37 = vld [vmem:[#allocation68_spill] sm:$0xff] }
 0x692   : > { %v5538_v43 = vpop.f32.mrf.mxu2 }
 0x693   : > { %v5539_v44 = vadd.f32 %v5538_v43, %v5490_v52  ;;  %v5587_v61 = vpop.f32.mrf.mxu3  ;;  %v5443_v51 = vpop.f32.mrf.mxu0 }
 0x694   : > { %v5444_v62 = vadd.f32 %v5443_v51, %v12290_v28  ;;  %v5492_v30 = vpop.f32.mrf.mxu1 }
 0x695   : > { %v12373_v4 = vadd.f32 %v5587_v61, %v5539_v44 }
 0x696   : > { %v5493_v54 = vadd.f32 %v5492_v30, %v5444_v62  ;;  %5638 = vmatmul.bf16.gmra.mxu0 %v13648_v26  ;;  %5687 = vmatmul.bf16.gmra.mxu1 %v13649_v39 }
 0x697   : > { %5736 = vmatmul.bf16.gmra.mxu2 %v13650_v24 }
 0x698   : > { %5785 = vmatmul.bf16.gmra.mxu3 %v13651_v18 }
 0x69a   : > { %v5541_v6 = vpop.f32.mrf.mxu2 }
 0x69b   : > { %v5542_v56 = vadd.f32 %v5541_v6, %v5493_v54  ;;  %v5590_v9 = vpop.f32.mrf.mxu3  ;;  %v5445_v7 = vpop.f32.mrf.mxu0 }
 0x69c   : > { %v5446_v10 = vadd.f32 %v5445_v7, %v12294_v53  ;;  %v5494_v36 = vpop.f32.mrf.mxu1  ;;  %v13655_v53 = vld [vmem:[#allocation65_spill] sm:$0xff]  ;;  %v13660_v7 = vld [vmem:[#allocation70_spill] sm:$0xff] }
 0x69d   : > { %v12380_v28 = vadd.f32 %v5590_v9, %v5542_v56 }
 0x69e   : > { %v5495_v34 = vadd.f32 %v5494_v36, %v5446_v10  ;;  %v13661_v10 = vld [vmem:[#allocation71_spill] sm:$0xff]  ;;  %v13662_v36 = vld [vmem:[#allocation72_spill] sm:$0xff] }
 0x6a2   : > { %v5543_v12 = vpop.f32.mrf.mxu2 }
 0x6a3   : > { %v5544_v17 = vadd.f32 %v5543_v12, %v5495_v34  ;;  %v5592_v3 = vpop.f32.mrf.mxu3  ;;  %v5448_v2 = vpop.f32.mrf.mxu0 }
 0x6a4   : > { %v5449_v19 = vadd.f32 %v5448_v2, %v12306_v49  ;;  %v5497_v13 = vpop.f32.mrf.mxu1 }
 0x6a5   : > { %v12383_v22 = vadd.f32 %v5592_v3, %v5544_v17 }
 0x6a6   : > { %v5498_v14 = vadd.f32 %v5497_v13, %v5449_v19  ;;  %5643 = vmatmul.bf16.gmra.mxu0 %v13652_v5  ;;  %5692 = vmatmul.bf16.gmra.mxu1 %v13653_v63 }
 0x6a7   : > { %5741 = vmatmul.bf16.gmra.mxu2 %v13654_v15 }
 0x6a8   : > { %5790 = vmatmul.bf16.gmra.mxu3 %v13655_v53 }
 0x6aa   : > { %v5546_v45 = vpop.f32.mrf.mxu2 }
 0x6ab   : > { %v5547_v35 = vadd.f32 %v5546_v45, %v5498_v14  ;;  %v5595_v0 = vpop.f32.mrf.mxu3  ;;  %v5450_v47 = vpop.f32.mrf.mxu0 }
 0x6ac   : > { %v5451_v50 = vadd.f32 %v5450_v47, %v12310_v33  ;;  %v5499_v48 = vpop.f32.mrf.mxu1  ;;  %v13659_v33 = vld [vmem:[#allocation69_spill] sm:$0xff]  ;;  %v13664_v47 = vld [vmem:[#allocation74_spill] sm:$0xff] }
 0x6ad   : > { %v12390_v49 = vadd.f32 %v5595_v0, %v5547_v35 }
 0x6ae   : > { %v5500_v31 = vadd.f32 %v5499_v48, %v5451_v50  ;;  %v13665_v50 = vld [vmem:[#allocation75_spill] sm:$0xff]  ;;  %v13666_v48 = vld [vmem:[#allocation76_spill] sm:$0xff] }
 0x6b2   : > { %v5548_v55 = vpop.f32.mrf.mxu2 }
 0x6b3   : > { %v5549_v25 = vadd.f32 %v5548_v55, %v5500_v31  ;;  %v5597_v20 = vpop.f32.mrf.mxu3  ;;  %v5453_v21 = vpop.f32.mrf.mxu0 }
 0x6b4   : > { %v5454_v8 = vadd.f32 %v5453_v21, %v12322_v1  ;;  %v5502_v16 = vpop.f32.mrf.mxu1 }
 0x6b5   : > { %v12393_v41 = vadd.f32 %v5597_v20, %v5549_v25 }
 0x6b6   : > { %v5503_v60 = vadd.f32 %v5502_v16, %v5454_v8  ;;  %5648 = vmatmul.bf16.gmra.mxu0 %v13656_v42  ;;  %5697 = vmatmul.bf16.gmra.mxu1 %v13657_v23 }
 0x6b7   : > { %5746 = vmatmul.bf16.gmra.mxu2 %v13658_v37 }
 0x6b8   : > { %5795 = vmatmul.bf16.gmra.mxu3 %v13659_v33 }
 0x6ba   : > { %v5551_v52 = vpop.f32.mrf.mxu2 }
 0x6bb   : > { %v5552_v43 = vadd.f32 %v5551_v52, %v5503_v60  ;;  %v5600_v44 = vpop.f32.mrf.mxu3  ;;  %v5455_v61 = vpop.f32.mrf.mxu0 }
 0x6bc   : > { %v5456_v51 = vadd.f32 %v5455_v61, %v12326_v32  ;;  %v5504_v62 = vpop.f32.mrf.mxu1  ;;  %v13663_v32 = vld [vmem:[#allocation73_spill] sm:$0xff] }
 0x6bd   : > { %v12400_v1 = vadd.f32 %v5600_v44, %v5552_v43 }
 0x6be   : > { %v5505_v30 = vadd.f32 %v5504_v62, %v5456_v51 }
 0x6c2   : > { %v5553_v54 = vpop.f32.mrf.mxu2 }
 0x6c3   : > { %v5554_v26 = vadd.f32 %v5553_v54, %v5505_v30  ;;  %v5602_v39 = vpop.f32.mrf.mxu3  ;;  %v5458_v24 = vpop.f32.mrf.mxu0  ;;  %v518_v54 = vld [vmem:[#allocation2 + $0x18] sm:$0xff] }
 0x6c4   : > { %v5459_v18 = vadd.f32 %v5458_v24, %v12332_v29  ;;  %v5507_v6 = vpop.f32.mrf.mxu1 }
 0x6c5   : > { %v12403_v56 = vadd.f32 %v5602_v39, %v5554_v26 }
 0x6c6   : > { %v5508_v9 = vadd.f32 %v5507_v6, %v5459_v18  ;;  %5653 = vmatmul.bf16.gmra.mxu0 %v13660_v7  ;;  %5702 = vmatmul.bf16.gmra.mxu1 %v13661_v10 }
 0x6c7   : > { %5751 = vmatmul.bf16.gmra.mxu2 %v13662_v36  ;;  %v522_v36 = vld [vmem:[#allocation2 + $0x48] sm:$0xff] }
 0x6c8   : > { %5800 = vmatmul.bf16.gmra.mxu3 %v13663_v32 }
 0x6ca   : > { %v5556_v34 = vpop.f32.mrf.mxu2 }
 0x6cb   : > { %v5557_v12 = vadd.f32 %v5556_v34, %v5508_v9  ;;  %v5605_v17 = vpop.f32.mrf.mxu3  ;;  %v5460_v3 = vpop.f32.mrf.mxu0 }
 0x6cc   : > { %v5461_v2 = vadd.f32 %v5460_v3, %v12334_v57  ;;  %v5509_v19 = vpop.f32.mrf.mxu1  ;;  %v13667_v57 = vld [vmem:[#allocation77_spill] sm:$0xff] }
 0x6cd   : > { %v12410_v29 = vadd.f32 %v5605_v17, %v5557_v12 }
 0x6ce   : > { %v5510_v13 = vadd.f32 %v5509_v19, %v5461_v2 }
 0x6d2   : > { %v5558_v14 = vpop.f32.mrf.mxu2 }
 0x6d3   : > { %v5559_v5 = vadd.f32 %v5558_v14, %v5510_v13  ;;  %v5607_v63 = vpop.f32.mrf.mxu3  ;;  %v5463_v15 = vpop.f32.mrf.mxu0 }
 0x6d4   : > { %v5464_v53 = vadd.f32 %v5463_v15, %v12340_v59  ;;  %v5512_v45 = vpop.f32.mrf.mxu1 }
 0x6d5   : > { %v12413_v35 = vadd.f32 %v5607_v63, %v5559_v5 }
 0x6d6   : > { %v5513_v0 = vadd.f32 %v5512_v45, %v5464_v53  ;;  %5658 = vmatmul.bf16.gmra.mxu0 %v13664_v47  ;;  %5707 = vmatmul.bf16.gmra.mxu1 %v13665_v50 }
 0x6d7   : > { %5756 = vmatmul.bf16.gmra.mxu2 %v13666_v48 }
 0x6d8   : > { %5805 = vmatmul.bf16.gmra.mxu3 %v13667_v57 }
 0x6da   : > { %v5561_v31 = vpop.f32.mrf.mxu2 }
 0x6db   : > { %v5562_v55 = vadd.f32 %v5561_v31, %v5513_v0  ;;  %v5610_v25 = vpop.f32.mrf.mxu3  ;;  %v5465_v20 = vpop.f32.mrf.mxu0 }
 0x6dc   : > { %v5466_v21 = vadd.f32 %v5465_v20, %v12343_v27  ;;  %v5514_v8 = vpop.f32.mrf.mxu1 }
 0x6dd   : > { %v12420_v59 = vadd.f32 %v5610_v25, %v5562_v55 }
 0x6de   : > { %v5515_v16 = vadd.f32 %v5514_v8, %v5466_v21 }
 0x6e2   : > { %v5563_v60 = vpop.f32.mrf.mxu2 }
 0x6e3   : > { %v5564_v42 = vadd.f32 %v5563_v60, %v5515_v16  ;;  %v5612_v23 = vpop.f32.mrf.mxu3  ;;  %v5624_v37 = vpop.f32.mrf.mxu0 }
 0x6e4   : > { %v5673_v33 = vpop.f32.mrf.mxu1  ;;  %v5625_v43 = vadd.f32 %v5624_v37, %v12350_v46 }
 0x6e5   : > { %v12422_v52 = vadd.f32 %v5612_v23, %v5564_v42 }
 0x6e6   : > { %v5674_v44 = vadd.f32 %v5673_v33, %v5625_v43 }
 0x6ea   : > { %v5722_v61 = vpop.f32.mrf.mxu2 }
 0x6eb   : > { %v5723_v51 = vadd.f32 %v5722_v61, %v5674_v44  ;;  %v5771_v62 = vpop.f32.mrf.mxu3  ;;  %v5626_v30 = vpop.f32.mrf.mxu0 }
 0x6ec   : > { %v5675_v27 = vpop.f32.mrf.mxu1  ;;  %v5627_v39 = vadd.f32 %v5626_v30, %v12353_v11  ;;  %v526_v11 = vld [vmem:[#allocation2 + $0x98] sm:$0xff] }
 0x6ed   : > { %v5772_v26 = vadd.f32 %v5771_v62, %v5723_v51 }
 0x6ee   : > { %v5676_v18 = vadd.f32 %v5675_v27, %v5627_v39 }
 0x6ef   : > { %v5814_v24 = vadd.f32 %v5772_v26, %v518_v54 }
 0x6f1   : > { %5878 = vst [vmem:[#allocation2 + $0x18] sm:$0xff] %v5814_v24 }
 0x6f2   : > { %v5724_v6 = vpop.f32.mrf.mxu2 }
 0x6f3   : > { %v5725_v9 = vadd.f32 %v5724_v6, %v5676_v18  ;;  %v5773_v7 = vpop.f32.mrf.mxu3  ;;  %v5629_v10 = vpop.f32.mrf.mxu0 }
 0x6f4   : > { %v5678_v32 = vpop.f32.mrf.mxu1  ;;  %v5630_v34 = vadd.f32 %v5629_v10, %v12360_v38  ;;  %v530_v38 = vld [vmem:[#allocation2 + $0x60] sm:$0xff] }
 0x6f5   : > { %v5774_v46 = vadd.f32 %v5773_v7, %v5725_v9 }
 0x6f6   : > { %v5679_v17 = vadd.f32 %v5678_v32, %v5630_v34 }
 0x6f7   : > { %v5818_v12 = vadd.f32 %v5774_v46, %v522_v36 }
 0x6f9   : > { %5882 = vst [vmem:[#allocation2 + $0x48] sm:$0xff] %v5818_v12 }
 0x6fa   : > { %v5727_v3 = vpop.f32.mrf.mxu2 }
 0x6fb   : > { %v5728_v2 = vadd.f32 %v5727_v3, %v5679_v17  ;;  %v5776_v19 = vpop.f32.mrf.mxu3  ;;  %v5631_v13 = vpop.f32.mrf.mxu0 }
 0x6fc   : > { %v5680_v14 = vpop.f32.mrf.mxu1  ;;  %v5632_v63 = vadd.f32 %v5631_v13, %v12363_v58  ;;  %v534_v58 = vld [vmem:[#allocation2 + $0x140] sm:$0xff] }
 0x6fd   : > { %v5777_v5 = vadd.f32 %v5776_v19, %v5728_v2 }
 0x6fe   : > { %v5681_v53 = vadd.f32 %v5680_v14, %v5632_v63 }
 0x6ff   : > { %v5822_v15 = vadd.f32 %v5777_v5, %v526_v11 }
 0x701   : > { %5886 = vst [vmem:[#allocation2 + $0x98] sm:$0xff] %v5822_v15 }
 0x702   : > { %v5729_v45 = vpop.f32.mrf.mxu2 }
 0x703   : > { %v5730_v0 = vadd.f32 %v5729_v45, %v5681_v53  ;;  %v5778_v47 = vpop.f32.mrf.mxu3  ;;  %v5634_v50 = vpop.f32.mrf.mxu0 }
 0x704   : > { %v5683_v48 = vpop.f32.mrf.mxu1  ;;  %v5635_v31 = vadd.f32 %v5634_v50, %v12370_v40  ;;  %v538_v40 = vld [vmem:[#allocation2 + $0x28] sm:$0xff] }
 0x705   : > { %v5779_v57 = vadd.f32 %v5778_v47, %v5730_v0 }
 0x706   : > { %v5684_v25 = vadd.f32 %v5683_v48, %v5635_v31 }
 0x707   : > { %v5826_v55 = vadd.f32 %v5779_v57, %v530_v38 }
 0x709   : > { %5890 = vst [vmem:[#allocation2 + $0x60] sm:$0xff] %v5826_v55 }
 0x70a   : > { %v5732_v20 = vpop.f32.mrf.mxu2 }
 0x70b   : > { %v5733_v21 = vadd.f32 %v5732_v20, %v5684_v25  ;;  %v5781_v8 = vpop.f32.mrf.mxu3  ;;  %v5636_v16 = vpop.f32.mrf.mxu0 }
 0x70c   : > { %v5685_v60 = vpop.f32.mrf.mxu1  ;;  %v5637_v23 = vadd.f32 %v5636_v16, %v12373_v4  ;;  %v542_v4 = vld [vmem:[#allocation2 + $0x30] sm:$0xff] }
 0x70d   : > { %v5782_v42 = vadd.f32 %v5781_v8, %v5733_v21 }
 0x70e   : > { %v5686_v33 = vadd.f32 %v5685_v60, %v5637_v23 }
 0x70f   : > { %v5830_v37 = vadd.f32 %v5782_v42, %v534_v58 }
 0x711   : > { %5894 = vst [vmem:[#allocation2 + $0x140] sm:$0xff] %v5830_v37 }
 0x712   : > { %v5734_v43 = vpop.f32.mrf.mxu2 }
 0x713   : > { %v5735_v44 = vadd.f32 %v5734_v43, %v5686_v33  ;;  %v5783_v61 = vpop.f32.mrf.mxu3  ;;  %v5639_v51 = vpop.f32.mrf.mxu0 }
 0x714   : > { %v5688_v62 = vpop.f32.mrf.mxu1  ;;  %v5640_v54 = vadd.f32 %v5639_v51, %v12380_v28  ;;  %v546_v28 = vld [vmem:[#allocation2 + $0x8] sm:$0xff] }
 0x715   : > { %v5784_v30 = vadd.f32 %v5783_v61, %v5735_v44 }
 0x716   : > { %v5689_v26 = vadd.f32 %v5688_v62, %v5640_v54 }
 0x717   : > { %v5834_v27 = vadd.f32 %v5784_v30, %v538_v40 }
 0x719   : > { %5898 = vst [vmem:[#allocation2 + $0x28] sm:$0xff] %v5834_v27 }
 0x71a   : > { %v5737_v39 = vpop.f32.mrf.mxu2 }
 0x71b   : > { %v5738_v24 = vadd.f32 %v5737_v39, %v5689_v26  ;;  %v5786_v18 = vpop.f32.mrf.mxu3  ;;  %v5641_v6 = vpop.f32.mrf.mxu0 }
 0x71c   : > { %v5690_v9 = vpop.f32.mrf.mxu1  ;;  %v5642_v10 = vadd.f32 %v5641_v6, %v12383_v22  ;;  %v550_v22 = vld [vmem:[#allocation2 + $0xc8] sm:$0xff] }
 0x71d   : > { %v5787_v7 = vadd.f32 %v5786_v18, %v5738_v24 }
 0x71e   : > { %v5691_v32 = vadd.f32 %v5690_v9, %v5642_v10 }
 0x71f   : > { %v5838_v36 = vadd.f32 %v5787_v7, %v542_v4 }
 0x721   : > { %5902 = vst [vmem:[#allocation2 + $0x30] sm:$0xff] %v5838_v36 }
 0x722   : > { %v5739_v46 = vpop.f32.mrf.mxu2 }
 0x723   : > { %v5740_v34 = vadd.f32 %v5739_v46, %v5691_v32  ;;  %v5788_v12 = vpop.f32.mrf.mxu3  ;;  %v5644_v17 = vpop.f32.mrf.mxu0 }
 0x724   : > { %v5693_v3 = vpop.f32.mrf.mxu1  ;;  %v5645_v19 = vadd.f32 %v5644_v17, %v12390_v49  ;;  %v554_v49 = vld [vmem:[#allocation2 + $0x128] sm:$0xff] }
 0x725   : > { %v5789_v2 = vadd.f32 %v5788_v12, %v5740_v34 }
 0x726   : > { %v5694_v11 = vadd.f32 %v5693_v3, %v5645_v19 }
 0x727   : > { %v5842_v13 = vadd.f32 %v5789_v2, %v546_v28 }
 0x729   : > { %5906 = vst [vmem:[#allocation2 + $0x8] sm:$0xff] %v5842_v13 }
 0x72a   : > { %v5742_v14 = vpop.f32.mrf.mxu2 }
 0x72b   : > { %v5743_v5 = vadd.f32 %v5742_v14, %v5694_v11  ;;  %v5791_v63 = vpop.f32.mrf.mxu3  ;;  %v5646_v15 = vpop.f32.mrf.mxu0 }
 0x72c   : > { %v5695_v53 = vpop.f32.mrf.mxu1  ;;  %v5647_v0 = vadd.f32 %v5646_v15, %v12393_v41  ;;  %v558_v41 = vld [vmem:[#allocation2 + $0x78] sm:$0xff] }
 0x72d   : > { %v5792_v45 = vadd.f32 %v5791_v63, %v5743_v5 }
 0x72e   : > { %v5696_v50 = vadd.f32 %v5695_v53, %v5647_v0 }
 0x72f   : > { %v5846_v47 = vadd.f32 %v5792_v45, %v550_v22 }
 0x731   : > { %5910 = vst [vmem:[#allocation2 + $0xc8] sm:$0xff] %v5846_v47 }
 0x732   : > { %v5744_v38 = vpop.f32.mrf.mxu2 }
 0x733   : > { %v5745_v48 = vadd.f32 %v5744_v38, %v5696_v50  ;;  %v5793_v57 = vpop.f32.mrf.mxu3  ;;  %v5649_v31 = vpop.f32.mrf.mxu0  ;;  %v578_v38 = vld [vmem:[#allocation2 + $0xa0] sm:$0xff] }
 0x734   : > { %v5698_v55 = vpop.f32.mrf.mxu1  ;;  %v5650_v20 = vadd.f32 %v5649_v31, %v12400_v1  ;;  %v562_v1 = vld [vmem:[#allocation2 + $0xd0] sm:$0xff] }
 0x735   : > { %v5794_v25 = vadd.f32 %v5793_v57, %v5745_v48 }
 0x736   : > { %v5699_v8 = vadd.f32 %v5698_v55, %v5650_v20 }
 0x737   : > { %v5850_v21 = vadd.f32 %v5794_v25, %v554_v49 }
 0x739   : > { %5914 = vst [vmem:[#allocation2 + $0x128] sm:$0xff] %v5850_v21 }
 0x73a   : > { %v5747_v16 = vpop.f32.mrf.mxu2 }
 0x73b   : > { %v5748_v58 = vadd.f32 %v5747_v16, %v5699_v8  ;;  %v5796_v60 = vpop.f32.mrf.mxu3  ;;  %v5651_v42 = vpop.f32.mrf.mxu0 }
 0x73c   : > { %v5700_v23 = vpop.f32.mrf.mxu1  ;;  %v5652_v33 = vadd.f32 %v5651_v42, %v12403_v56  ;;  %v566_v56 = vld [vmem:[#allocation2 + $0x1c8] sm:$0xff] }
 0x73d   : > { %v5797_v37 = vadd.f32 %v5796_v60, %v5748_v58 }
 0x73e   : > { %v5701_v44 = vadd.f32 %v5700_v23, %v5652_v33 }
 0x73f   : > { %v5854_v43 = vadd.f32 %v5797_v37, %v558_v41 }
 0x741   : > { %5918 = vst [vmem:[#allocation2 + $0x78] sm:$0xff] %v5854_v43 }
 0x742   : > { %v5749_v61 = vpop.f32.mrf.mxu2 }
 0x743   : > { %v5750_v51 = vadd.f32 %v5749_v61, %v5701_v44  ;;  %v5798_v40 = vpop.f32.mrf.mxu3  ;;  %v5654_v62 = vpop.f32.mrf.mxu0 }
 0x744   : > { %v5703_v30 = vpop.f32.mrf.mxu1  ;;  %v5655_v27 = vadd.f32 %v5654_v62, %v12410_v29  ;;  %v570_v29 = vld [vmem:[#allocation2 + $0x190] sm:$0xff] }
 0x745   : > { %v5799_v54 = vadd.f32 %v5798_v40, %v5750_v51 }
 0x746   : > { %v5704_v39 = vadd.f32 %v5703_v30, %v5655_v27 }
 0x747   : > { %v5858_v26 = vadd.f32 %v5799_v54, %v562_v1 }
 0x749   : > { %5922 = vst [vmem:[#allocation2 + $0xd0] sm:$0xff] %v5858_v26 }
 0x74a   : > { %v5752_v24 = vpop.f32.mrf.mxu2 }
 0x74b   : > { %v5753_v18 = vadd.f32 %v5752_v24, %v5704_v39  ;;  %v5801_v6 = vpop.f32.mrf.mxu3  ;;  %v5656_v4 = vpop.f32.mrf.mxu0 }
 0x74c   : > { %v5705_v9 = vpop.f32.mrf.mxu1  ;;  %v5657_v10 = vadd.f32 %v5656_v4, %v12413_v35  ;;  %v574_v35 = vld [vmem:[#allocation2 + $0x1c0] sm:$0xff] }
 0x74d   : > { %v5802_v7 = vadd.f32 %v5801_v6, %v5753_v18 }
 0x74e   : > { %v5706_v32 = vadd.f32 %v5705_v9, %v5657_v10 }
 0x74f   : > { %v5862_v36 = vadd.f32 %v5802_v7, %v566_v56 }
 0x751   : > { %5926 = vst [vmem:[#allocation2 + $0x1c8] sm:$0xff] %v5862_v36 }
 0x752   : > { %v5754_v46 = vpop.f32.mrf.mxu2 }
 0x753   : > { %v5755_v34 = vadd.f32 %v5754_v46, %v5706_v32  ;;  %v5803_v12 = vpop.f32.mrf.mxu3  ;;  %v5659_v17 = vpop.f32.mrf.mxu0 }
 0x754   : > { %v5660_v3 = vadd.f32 %v5659_v17, %v12420_v59  ;;  %v5708_v2 = vpop.f32.mrf.mxu1 }
 0x755   : > { %v5804_v28 = vadd.f32 %v5803_v12, %v5755_v34 }
 0x756   : > { %v5709_v13 = vadd.f32 %v5708_v2, %v5660_v3 }
 0x757   : > { %v5866_v19 = vadd.f32 %v5804_v28, %v570_v29 }
 0x759   : > { %5930 = vst [vmem:[#allocation2 + $0x190] sm:$0xff] %v5866_v19 }
 0x75a   : > { %v5757_v11 = vpop.f32.mrf.mxu2 }
 0x75b   : > { %v5758_v14 = vadd.f32 %v5757_v11, %v5709_v13  ;;  %v5806_v5 = vpop.f32.mrf.mxu3  ;;  %v5661_v63 = vpop.f32.mrf.mxu0 }
 0x75c   : > { %v5662_v22 = vadd.f32 %v5661_v63, %v12422_v52  ;;  %v5710_v45 = vpop.f32.mrf.mxu1 }
 0x75d   : > { %v5807_v15 = vadd.f32 %v5806_v5, %v5758_v14 }
 0x75e   : > { %v5711_v0 = vadd.f32 %v5710_v45, %v5662_v22 }
 0x75f   : > { %v5870_v53 = vadd.f32 %v5807_v15, %v574_v35 }
 0x761   : > { %5934 = vst [vmem:[#allocation2 + $0x1c0] sm:$0xff] %v5870_v53 }
 0x762   : > { %v5759_v47 = vpop.f32.mrf.mxu2 }
 0x763   : > { %v5760_v50 = vadd.f32 %v5759_v47, %v5711_v0  ;;  %v5808_v59 = vpop.f32.mrf.mxu3 }
 0x765   : > { %v5809_v48 = vadd.f32 %v5808_v59, %v5760_v50  ;;  %5942 = sbr.rel (%p9272_p10) target bundleno = 2739 (0xab3), region = 71 }
 0x767   : > { %v5874_v57 = vadd.f32 %v5809_v48, %v578_v38 }
 0x769   : > { %5938 = vst [vmem:[#allocation2 + $0xa0] sm:$0xff] %v5874_v57 }
 0x76a   : > { %v9331_v31 = vld [vmem:[%s13252_s2 + $0x70] sm:$0xf]  ;;  %v10030_v52 = vld [vmem:[%s13252_s2 + $0x74] sm:$0xf0]  ;;  %v9323_v42 = vld [vmem:[%s13252_s2 + $0x60] sm:$0xf] }
 0x76b   : > { %v9395_v49 = vld [vmem:[%s13252_s2 + $0xf0] sm:$0xf]  ;;  %v9332_v55 = vor.u32 %v10030_v52, %v9331_v31  ;;  %v10046_v25 = vld [vmem:[%s13252_s2 + $0xf4] sm:$0xf0]  ;;  %v10028_v23 = vld [vmem:[%s13252_s2 + $0x64] sm:$0xf0] }
 0x76c   : > { %v9459_v20 = vld [vmem:[%s13252_s2 + $0x170] sm:$0xf]  ;;  %v10062_v21 = vld [vmem:[%s13252_s2 + $0x174] sm:$0xf0]  ;;  %v9396_v8 = vor.u32 %v10046_v25, %v9395_v49  ;;  %v9387_v37 = vld [vmem:[%s13252_s2 + $0xe0] sm:$0xf]  ;;  %v9324_v43 = vor.u32 %v10028_v23, %v9323_v42 }
 0x76d   : > { %v9460_v16 = vor.u32 %v10062_v21, %v9459_v20  ;;  %v9523_v58 = vld [vmem:[%s13252_s2 + $0x1f0] sm:$0xf]  ;;  %v10078_v60 = vld [vmem:[%s13252_s2 + $0x1f4] sm:$0xf0]  ;;  %6570 = vmatpush.bf16.msra.mxu0 %v9332_v55  ;;  %v10044_v33 = vld [vmem:[%s13252_s2 + $0xe4] sm:$0xf0] }
 0x76e   : > { %v9524_v41 = vor.u32 %v10078_v60, %v9523_v58  ;;  %6619 = vmatpush.bf16.msra.mxu1 %v9396_v8  ;;  %v9388_v44 = vor.u32 %v10044_v33, %v9387_v37  ;;  %v9451_v61 = vld [vmem:[%s13252_s2 + $0x160] sm:$0xf]  ;;  %v10060_v51 = vld [vmem:[%s13252_s2 + $0x164] sm:$0xf0]  ;;  %v9315_v30 = vld [vmem:[%s13252_s2 + $0x50] sm:$0xf] }
 0x76f   : > { %6668 = vmatpush.bf16.msra.mxu2 %v9460_v16  ;;  %v9515_v40 = vld [vmem:[%s13252_s2 + $0x1e0] sm:$0xf]  ;;  %v9452_v62 = vor.u32 %v10060_v51, %v9451_v61  ;;  %v10076_v1 = vld [vmem:[%s13252_s2 + $0x1e4] sm:$0xf0]  ;;  %v10026_v54 = vld [vmem:[%s13252_s2 + $0x54] sm:$0xf0] }
 0x770   : > { %6717 = vmatpush.bf16.msra.mxu3 %v9524_v41  ;;  %v9516_v27 = vor.u32 %v10076_v1, %v9515_v40  ;;  %v9379_v26 = vld [vmem:[%s13252_s2 + $0xd0] sm:$0xf]  ;;  %v10042_v39 = vld [vmem:[%s13252_s2 + $0xd4] sm:$0xf0]  ;;  %v9316_v18 = vor.u32 %v10026_v54, %v9315_v30  ;;  %v9307_v10 = vld [vmem:[%s13252_s2 + $0x40] sm:$0xf] }
 0x771   : > { %v9443_v24 = vld [vmem:[%s13252_s2 + $0x150] sm:$0xf]  ;;  %6571 = vmatpush.bf16.msra.mxu0 %v9324_v43  ;;  %v10058_v6 = vld [vmem:[%s13252_s2 + $0x154] sm:$0xf0]  ;;  %v9380_v9 = vor.u32 %v10042_v39, %v9379_v26  ;;  %v10024_v36 = vld [vmem:[%s13252_s2 + $0x44] sm:$0xf0] }
 0x772   : > { %v9507_v4 = vld [vmem:[%s13252_s2 + $0x1d0] sm:$0xf]  ;;  %v10074_v56 = vld [vmem:[%s13252_s2 + $0x1d4] sm:$0xf0]  ;;  %6620 = vmatpush.bf16.msra.mxu1 %v9388_v44  ;;  %v9444_v7 = vor.u32 %v10058_v6, %v9443_v24  ;;  %v9371_v32 = vld [vmem:[%s13252_s2 + $0xc0] sm:$0xf]  ;;  %v9308_v3 = vor.u32 %v10024_v36, %v9307_v10 }
 0x773   : > { %6669 = vmatpush.bf16.msra.mxu2 %v9452_v62  ;;  %v9508_v46 = vor.u32 %v10074_v56, %v9507_v4  ;;  %v10040_v34 = vld [vmem:[%s13252_s2 + $0xc4] sm:$0xf0]  ;;  %v9435_v12 = vld [vmem:[%s13252_s2 + $0x140] sm:$0xf]  ;;  %v9299_v13 = vld [vmem:[%s13252_s2 + $0x30] sm:$0xf] }
 0x774   : > { %6718 = vmatpush.bf16.msra.mxu3 %v9516_v27  ;;  %v10056_v17 = vld [vmem:[%s13252_s2 + $0x144] sm:$0xf0]  ;;  %v9499_v29 = vld [vmem:[%s13252_s2 + $0x1c0] sm:$0xf]  ;;  %v9372_v2 = vor.u32 %v10040_v34, %v9371_v32  ;;  %v10022_v11 = vld [vmem:[%s13252_s2 + $0x34] sm:$0xf0] }
 0x775   : > { %v10072_v28 = vld [vmem:[%s13252_s2 + $0x1c4] sm:$0xf0]  ;;  %6572 = vmatpush.bf16.msra.mxu0 %v9316_v18  ;;  %v9436_v19 = vor.u32 %v10056_v17, %v9435_v12  ;;  %v9363_v14 = vld [vmem:[%s13252_s2 + $0xb0] sm:$0xf]  ;;  %v10038_v63 = vld [vmem:[%s13252_s2 + $0xb4] sm:$0xf0]  ;;  %v9300_v45 = vor.u32 %v10022_v11, %v9299_v13 }
 0x776   : > { %6621 = vmatpush.bf16.msra.mxu1 %v9380_v9  ;;  %v9500_v5 = vor.u32 %v10072_v28, %v9499_v29  ;;  %v9427_v35 = vld [vmem:[%s13252_s2 + $0x130] sm:$0xf]  ;;  %v10054_v15 = vld [vmem:[%s13252_s2 + $0x134] sm:$0xf0]  ;;  %v9291_v0 = vld [vmem:[%s13252_s2 + $0x20] sm:$0xf]  ;;  %v9364_v47 = vor.u32 %v10038_v63, %v9363_v14 }
 0x777   : > { %6670 = vmatpush.bf16.msra.mxu2 %v9444_v7  ;;  %v9491_v22 = vld [vmem:[%s13252_s2 + $0x1b0] sm:$0xf]  ;;  %v10070_v53 = vld [vmem:[%s13252_s2 + $0x1b4] sm:$0xf0]  ;;  %v9428_v50 = vor.u32 %v10054_v15, %v9427_v35  ;;  %v10020_v38 = vld [vmem:[%s13252_s2 + $0x24] sm:$0xf0] }
 0x778   : > { %6719 = vmatpush.bf16.msra.mxu3 %v9508_v46  ;;  %v9355_v59 = vld [vmem:[%s13252_s2 + $0xa0] sm:$0xf]  ;;  %v10036_v48 = vld [vmem:[%s13252_s2 + $0xa4] sm:$0xf0]  ;;  %v9492_v57 = vor.u32 %v10070_v53, %v9491_v22  ;;  %v9283_v25 = vld [vmem:[%s13252_s2 + $0x10] sm:$0xf]  ;;  %v9292_v21 = vor.u32 %v10020_v38, %v9291_v0 }
 0x779   : > { %6573 = vmatpush.bf16.msra.mxu0 %v9308_v3  ;;  %v9419_v31 = vld [vmem:[%s13252_s2 + $0x120] sm:$0xf]  ;;  %v10052_v52 = vld [vmem:[%s13252_s2 + $0x124] sm:$0xf0]  ;;  %v10018_v20 = vld [vmem:[%s13252_s2 + $0x14] sm:$0xf0]  ;;  %v9356_v60 = vor.u32 %v10036_v48, %v9355_v59 }
 0x77a   : > { %6622 = vmatpush.bf16.msra.mxu1 %v9372_v2  ;;  %v9483_v49 = vld [vmem:[%s13252_s2 + $0x1a0] sm:$0xf]  ;;  %v10068_v55 = vld [vmem:[%s13252_s2 + $0x1a4] sm:$0xf0]  ;;  %v9347_v8 = vld [vmem:[%s13252_s2 + $0x90] sm:$0xf]  ;;  %v9420_v42 = vor.u32 %v10052_v52, %v9419_v31  ;;  %v9284_v40 = vor.u32 %v10018_v20, %v9283_v25 }
 0x77b   : > { %6671 = vmatpush.bf16.msra.mxu2 %v9436_v19  ;;  %v10034_v16 = vld [vmem:[%s13252_s2 + $0x94] sm:$0xf0]  ;;  %v9411_v58 = vld [vmem:[%s13252_s2 + $0x110] sm:$0xf]  ;;  %v9484_v33 = vor.u32 %v10068_v55, %v9483_v49  ;;  %v12612_v43 = vld [vmem:[%s13252_s2] sm:$0xf] }
 0x77c   : > { %6720 = vmatpush.bf16.msra.mxu3 %v9500_v5  ;;  %v10050_v41 = vld [vmem:[%s13252_s2 + $0x114] sm:$0xf0]  ;;  %v9475_v23 = vld [vmem:[%s13252_s2 + $0x190] sm:$0xf]  ;;  %v12617_v44 = vld [vmem:[%s13252_s2 + $0x4] sm:$0xf0]  ;;  %v9348_v39 = vor.u32 %v10034_v16, %v9347_v8 }
 0x77d   : > { %6574 = vmatpush.bf16.msra.mxu0 %v9300_v45  ;;  %v10066_v37 = vld [vmem:[%s13252_s2 + $0x194] sm:$0xf0]  ;;  %v5943_v61 = vld [vmem:[%s13253_s3] sm:$0xf]  ;;  %v5948_v51 = vld [vmem:[#allocation2 + $0xb0] sm:$0xff]  ;;  %v9412_v24 = vor.u32 %v10050_v41, %v9411_v58  ;;  %v9276_v14 = vor.u32 %v12617_v44, %v12612_v43  ;;  %vm7194_vm0 = vcmask 23552  }
 0x77e   : > { %6623 = vmatpush.bf16.msra.mxu1 %v9364_v47  ;;  %v5952_v62 = vld [vmem:[#allocation2 + $0x50] sm:$0xff]  ;;  %v12622_v1 = vperm.slane %v5943_v61, 0  ;;  %v5953_v54 = vld [vmem:[#allocation2 + $0x168] sm:$0xff]  ;;  %v12624_v27 = vperm.slane %v5943_v61, 1  ;;  %v12626_v26 = vperm.slane %v5943_v61, 2  ;;  %v9476_v18 = vor.u32 %v10066_v37, %v9475_v23  ;;  %v5950_v56 = vld [vmem:[#allocation2 + $0xd8] sm:$0xff] }
 0x77f   : > { %6672 = vmatpush.bf16.msra.mxu2 %v9428_v50  ;;  %v5949_v30 = vld [vmem:[#allocation2 + $0x1b0] sm:$0xff]  ;;  %v9339_v6 = vld [vmem:[%s13252_s2 + $0x80] sm:$0xf]  ;;  %v10032_v4 = vld [vmem:[%s13252_s2 + $0x84] sm:$0xf0]  ;;  %v12634_v10 = vperm.slane %v5943_v61, 3 }
 0x780   : > { %6721 = vmatpush.bf16.msra.mxu3 %v9492_v57  ;;  %v5954_v9 = vld [vmem:[#allocation2 + $0x130] sm:$0xff]  ;;  %v5951_v7 = vld [vmem:[#allocation2 + $0x18] sm:$0xff]  ;;  %v9403_v36 = vld [vmem:[%s13252_s2 + $0x100] sm:$0xf]  ;;  %v6021_v46 = vadd.f32 %v12622_v1, %v5948_v51  ;;  %v6025_v34 = vadd.f32 %v12622_v1, %v5952_v62  ;;  %v6022_v12 = vadd.f32 %v12624_v27, %v5949_v30  ;;  %v6026_v3 = vadd.f32 %v12624_v27, %v5953_v54 }
 0x781   : > { %6575 = vmatpush.bf16.msra.mxu0 %v9292_v21  ;;  %v10048_v32 = vld [vmem:[%s13252_s2 + $0x104] sm:$0xf0]  ;;  %v9467_v29 = vld [vmem:[%s13252_s2 + $0x180] sm:$0xf]  ;;  %v6023_v2 = vadd.f32 %v12626_v26, %v5950_v56  ;;  %v6027_v19 = vadd.f32 %v12626_v26, %v5954_v9  ;;  %v6024_v13 = vadd.f32 %v12634_v10, %v5951_v7  ;;  %v10061_v11 = vld [vmem:[%s13252_s2 + $0x174] sm:$0xf]  ;;  %v9340_v38 = vor.u32 %v10032_v4, %v9339_v6 }
 0x782   : > { %6624 = vmatpush.bf16.msra.mxu1 %v9356_v60  ;;  %v5955_v17 = vld [vmem:[#allocation2 + $0x48] sm:$0xff]  ;;  %v6085_v5 = vmax.f32 %v6021_v46, 0.0  ;;  %v6089_v63 = vmax.f32 %v6025_v34, 0.0  ;;  %v9461_v15 = vld [vmem:[%s13252_s2 + $0x178] sm:$0xf0]  ;;  %v6086_v53 = vmax.f32 %v6022_v12, 0.0  ;;  %v9404_v59 = vor.u32 %v10048_v32, %v9403_v36 }
 0x783   : > { %6673 = vmatpush.bf16.msra.mxu2 %v9420_v42  ;;  %v10064_v28 = vld [vmem:[%s13252_s2 + $0x184] sm:$0xf0]  ;;  %v6028_v35 = vadd.f32 %v12634_v10, %v5955_v17  ;;  %v10077_v22 = vld [vmem:[%s13252_s2 + $0x1f4] sm:$0xf]  ;;  %v6090_v45 = vmax.f32 %v6026_v3, 0.0  ;;  %v6087_v0 = vmax.f32 %v6023_v2, 0.0  ;;  %v9464_v52 = vor.u32 %v10061_v11, %v9461_v15 }
 0x784   : > { %6722 = vmatpush.bf16.msra.mxu3 %v9484_v33  ;;  %v6091_v47 = vmax.f32 %v6027_v19, 0.0  ;;  %v9525_v50 = vld [vmem:[%s13252_s2 + $0x1f8] sm:$0xf0]  ;;  %v6088_v48 = vmax.f32 %v6024_v13, 0.0  ;;  %v9468_v31 = vor.u32 %v10064_v28, %v9467_v29  ;;  %v10029_v49 = vld [vmem:[%s13252_s2 + $0x74] sm:$0xf]  ;;  %v12676_v25 = vpack.c.bf16 %v6089_v63, %v6085_v5 }
 0x785   : > { %6576 = vmatpush.bf16.msra.mxu0 %v9284_v40  ;;  %v6092_v57 = vmax.f32 %v6028_v35, 0.0  ;;  %v9333_v55 = vld [vmem:[%s13252_s2 + $0x78] sm:$0xf0]  ;;  %v9528_v20 = vor.u32 %v10077_v22, %v9525_v50  ;;  %v10045_v21 = vld [vmem:[%s13252_s2 + $0xf4] sm:$0xf]  ;;  %v12684_v16 = vpack.c.bf16 %v6090_v45, %v6086_v53  ;;  %v5956_v51 = vld [vmem:[#allocation2 + $0x180] sm:$0xff] }
 0x786   : > { %6625 = vmatpush.bf16.msra.mxu1 %v9348_v39  ;;  %v9397_v8 = vld [vmem:[%s13252_s2 + $0xf8] sm:$0xf0]  ;;  %v12686_v58 = vpack.c.bf16 %v6091_v47, %v6087_v0  ;;  %v10059_v60 = vld [vmem:[%s13252_s2 + $0x164] sm:$0xf]  ;;  %v9453_v42 = vld [vmem:[%s13252_s2 + $0x168] sm:$0xf0]  ;;  %v9336_v23 = vor.u32 %v10029_v49, %v9333_v55  ;;  %v6029_v34 = vadd.f32 %v12622_v1, %v5956_v51 }
 0x787   : > { %6674 = vmatpush.bf16.msra.mxu2 %v9412_v24  ;;  %v12694_v41 = vpack.c.bf16 %v6092_v57, %v6088_v48  ;;  %v10075_v37 = vld [vmem:[%s13252_s2 + $0x1e4] sm:$0xf]  ;;  %v9400_v33 = vor.u32 %v10045_v21, %v9397_v8  ;;  %v9325_v44 = vld [vmem:[%s13252_s2 + $0x68] sm:$0xf0]  ;;  %v9456_v40 = vor.u32 %v10059_v60, %v9453_v42  ;;  %v5957_v39 = vld [vmem:[#allocation2 + $0x110] sm:$0xff]  ;;  %vm7237_vm1 = vcmask 1040384  }
 0x788   : > { %6723 = vmatpush.bf16.msra.mxu3 %v9476_v18  ;;  %v10027_v43 = vld [vmem:[%s13252_s2 + $0x64] sm:$0xf]  ;;  %v9517_v61 = vld [vmem:[%s13252_s2 + $0x1e8] sm:$0xf0]  ;;  %v5961_v24 = vld [vmem:[#allocation2 + $0x150] sm:$0xff]  ;;  %v6030_v28 = vadd.f32 %v12624_v27, %v5957_v39  ;;  %v6093_v53 = vmax.f32 %v6029_v34, 0.0 }
 0x789   : > { %6577 = vmatpush.bf16.msra.mxu0 %v9276_v14  ;;  %v10043_v62 = vld [vmem:[%s13252_s2 + $0xe4] sm:$0xf]  ;;  %v9389_v30 = vld [vmem:[%s13252_s2 + $0xe8] sm:$0xf0]  ;;  %v9520_v18 = vor.u32 %v10075_v37, %v9517_v61  ;;  %v5958_v6 = vld [vmem:[#allocation2 + $0x118] sm:$0xff]  ;;  %v9328_v9 = vor.u32 %v10027_v43, %v9325_v44  ;;  %v6034_v3 = vadd.f32 %v12624_v27, %v5961_v24  ;;  %vm7244_vm2 = vcmask 17408  }
 0x78a   : > { %6626 = vmatpush.bf16.msra.mxu1 %v9340_v38  ;;  %v5960_v54 = vld [vmem:[#allocation2 + $0x120] sm:$0xff]  ;;  %v5962_v4 = vld [vmem:[#allocation2 + $0x108] sm:$0xff]  ;;  %v5959_v56 = vld [vmem:[#allocation2 + $0x98] sm:$0xff]  ;;  %v9392_v36 = vor.u32 %v10043_v62, %v9389_v30  ;;  %v6031_v2 = vadd.f32 %v12626_v26, %v5958_v6  ;;  %v6094_v50 = vmax.f32 %v6030_v28, 0.0 }
 0x78b   : > { %6675 = vmatpush.bf16.msra.mxu2 %v9404_v59  ;;  %v5963_v7 = vld [vmem:[#allocation2 + $0x60] sm:$0xff]  ;;  %v10057_v32 = vld [vmem:[%s13252_s2 + $0x154] sm:$0xf]  ;;  %v9445_v46 = vld [vmem:[%s13252_s2 + $0x158] sm:$0xf0]  ;;  %v6033_v12 = vadd.f32 %v12622_v1, %v5960_v54  ;;  %v6035_v19 = vadd.f32 %v12626_v26, %v5962_v4  ;;  %v6032_v14 = vadd.f32 %v12634_v10, %v5959_v56  ;;  %v6098_v38 = vmax.f32 %v6034_v3, 0.0 }
 0x78c   : > { %6724 = vmatpush.bf16.msra.mxu3 %v9468_v31  ;;  %6578 = vmatmul.bf16.vlgmr.msra.gmra.mxu0 %v12676_v25  ;;  %v10025_v17 = vld [vmem:[%s13252_s2 + $0x54] sm:$0xf]  ;;  %v9317_v29 = vld [vmem:[%s13252_s2 + $0x58] sm:$0xf0]  ;;  %v6036_v5 = vadd.f32 %v12634_v10, %v5963_v7  ;;  %v9448_v63 = vor.u32 %v10057_v32, %v9445_v46  ;;  %v6095_v59 = vmax.f32 %v6031_v2, 0.0  ;;  %v5964_v21 = vld [vmem:[#allocation2 + $0xe0] sm:$0xff] }
 0x78d   : > { %6627 = vmatmul.bf16.vlgmr.msra.gmra.mxu1 %v12684_v16  ;;  %6766 = vmatpush.bf16.msrb.mxu0 %v9336_v23  ;;  %v10073_v13 = vld [vmem:[%s13252_s2 + $0x1d4] sm:$0xf]  ;;  %v9509_v11 = vld [vmem:[%s13252_s2 + $0x1d8] sm:$0xf0]  ;;  %v9320_v15 = vor.u32 %v10025_v17, %v9317_v29  ;;  %v6097_v45 = vmax.f32 %v6033_v12, 0.0  ;;  %v6099_v48 = vmax.f32 %v6035_v19, 0.0  ;;  %v12752_v49 = vpack.c.bf16 %v6098_v38, %v6094_v50 }
 0x78e   : > { %6676 = vmatmul.bf16.vlgmr.msra.gmra.mxu2 %v12686_v58  ;;  %6815 = vmatpush.bf16.msrb.mxu1 %v9400_v33  ;;  %v10041_v35 = vld [vmem:[%s13252_s2 + $0xd4] sm:$0xf]  ;;  %v9381_v22 = vld [vmem:[%s13252_s2 + $0xd8] sm:$0xf0]  ;;  %v9512_v0 = vor.u32 %v10073_v13, %v9509_v11  ;;  %v6096_v57 = vmax.f32 %v6032_v14, 0.0  ;;  %v6100_v31 = vmax.f32 %v6036_v5, 0.0 }
 0x78f   : > { %6864 = vmatpush.bf16.msrb.mxu2 %v9464_v52  ;;  %6725 = vmatmul.bf16.vlgmr.msra.gmra.mxu3 %v12694_v41  ;;  %v9384_v47 = vor.u32 %v10041_v35, %v9381_v22  ;;  %v12750_v52 = vpack.c.bf16 %v6097_v45, %v6093_v53  ;;  %v12754_v55 = vpack.c.bf16 %v6099_v48, %v6095_v59  ;;  %v5968_v8 = vld [vmem:[#allocation2 + $0x80] sm:$0xff]  ;;  %v5965_v60 = vld [vmem:[#allocation2 + $0x188] sm:$0xff]  ;;  %v5966_v23 = vld [vmem:[#allocation2 + $0x138] sm:$0xff] }
 0x790   : > { %6913 = vmatpush.bf16.msrb.mxu3 %v9528_v20  ;;  %v12756_v20 = vpack.c.bf16 %v6100_v31, %v6096_v57  ;;  %v5969_v42 = vld [vmem:[#allocation2 + $0x1a8] sm:$0xff]  ;;  %v5970_v37 = vld [vmem:[#allocation2 + $0x1b8] sm:$0xff]  ;;  %v5967_v33 = vld [vmem:[#allocation2 + $0x140] sm:$0xff]  ;;  %v6041_v24 = vadd.f32 %v12622_v1, %v5968_v8 }
 0x791   : > { %6767 = vmatpush.bf16.msrb.mxu0 %v9328_v9  ;;  %v5971_v43 = vld [vmem:[#allocation2 + $0x28] sm:$0xff]  ;;  %v10055_v44 = vld [vmem:[%s13252_s2 + $0x144] sm:$0xf]  ;;  %v6042_v7 = vadd.f32 %v12624_v27, %v5969_v42  ;;  %v6043_v32 = vadd.f32 %v12626_v26, %v5970_v37  ;;  %v6040_v34 = vadd.f32 %v12634_v10, %v5967_v33  ;;  %v5973_v53 = vld [vmem:[#allocation2 + $0xf8] sm:$0xff] }
 0x792   : > { %6816 = vmatpush.bf16.msrb.mxu1 %v9392_v36  ;;  %v9437_v61 = vld [vmem:[%s13252_s2 + $0x148] sm:$0xf0]  ;;  %v10023_v51 = vld [vmem:[%s13252_s2 + $0x44] sm:$0xf]  ;;  %v6039_v36 = vadd.f32 %v12626_v26, %v5966_v23  ;;  %v6044_v12 = vadd.f32 %v12634_v10, %v5971_v43  ;;  %v6105_v29 = vmax.f32 %v6041_v24, 0.0  ;;  %v5975_v50 = vld [vmem:[#allocation2 + $0x30] sm:$0xff]  ;;  %v6046_v37 = vadd.f32 %v12624_v27, %v5973_v53 }
 0x793   : > { %6865 = vmatpush.bf16.msrb.mxu2 %v9456_v40  ;;  %v6037_v40 = vadd.f32 %v12622_v1, %v5964_v21  ;;  %v9440_v62 = vor.u32 %v10055_v44, %v9437_v61  ;;  %v9309_v30 = vld [vmem:[%s13252_s2 + $0x48] sm:$0xf0]  ;;  %v10071_v54 = vld [vmem:[%s13252_s2 + $0x1c4] sm:$0xf]  ;;  %v6106_v3 = vmax.f32 %v6042_v7, 0.0  ;;  %v6107_v19 = vmax.f32 %v6043_v32, 0.0 }
 0x794   : > { %6914 = vmatpush.bf16.msrb.mxu3 %v9520_v18  ;;  %v9501_v39 = vld [vmem:[%s13252_s2 + $0x1c8] sm:$0xf0]  ;;  %v6038_v18 = vadd.f32 %v12624_v27, %v5965_v60  ;;  %v9312_v6 = vor.u32 %v10023_v51, %v9309_v30  ;;  %v10039_v56 = vld [vmem:[%s13252_s2 + $0xc4] sm:$0xf]  ;;  %v6103_v2 = vmax.f32 %v6039_v36, 0.0  ;;  %v6104_v13 = vmax.f32 %v6040_v34, 0.0 }
 0x795   : > { %6768 = vmatpush.bf16.msrb.mxu0 %v9320_v15  ;;  %v9504_v4 = vor.u32 %v10071_v54, %v9501_v39  ;;  %v9373_v9 = vld [vmem:[%s13252_s2 + $0xc8] sm:$0xf0]  ;;  %v6101_v17 = vmax.f32 %v6037_v40, 0.0  ;;  %v6108_v11 = vmax.f32 %v6044_v12, 0.0  ;;  %v5976_v22 = vld [vmem:[#allocation2 + $0x1e0] sm:$0xff]  ;;  %v6048_v54 = vadd.f32 %v12634_v10, %v5975_v50 }
 0x796   : > { %6817 = vmatpush.bf16.msrb.mxu1 %v9384_v47  ;;  %v9376_v46 = vor.u32 %v10039_v56, %v9373_v9  ;;  %v6102_v28 = vmax.f32 %v6038_v18, 0.0  ;;  %v5972_v15 = vld [vmem:[#allocation2 + $0x1e8] sm:$0xff]  ;;  %v5977_v45 = vld [vmem:[#allocation2] sm:$0xff]  ;;  %v5978_v47 = vld [vmem:[#allocation2 + $0xf0] sm:$0xff]  ;;  %v6049_v23 = vadd.f32 %v12622_v1, %v5976_v22 }
 0x797   : > { %6866 = vmatpush.bf16.msrb.mxu2 %v9448_v63  ;;  %v12794_v14 = vpack.c.bf16 %v6105_v29, %v6101_v17  ;;  %v12798_v63 = vpack.c.bf16 %v6107_v19, %v6103_v2  ;;  %v12800_v35 = vpack.c.bf16 %v6108_v11, %v6104_v13  ;;  %v5979_v38 = vld [vmem:[#allocation2 + $0x8] sm:$0xff]  ;;  %v10053_v59 = vld [vmem:[%s13252_s2 + $0x134] sm:$0xf]  ;;  %v9429_v48 = vld [vmem:[%s13252_s2 + $0x138] sm:$0xf0]  ;;  %v6045_v31 = vadd.f32 %v12622_v1, %v5972_v15 }
 0x798   : > { %6915 = vmatpush.bf16.msrb.mxu3 %v9512_v0  ;;  %v12796_v5 = vpack.c.bf16 %v6106_v3, %v6102_v28  ;;  %v5974_v0 = vld [vmem:[#allocation2 + $0x160] sm:$0xff]  ;;  %v10021_v57 = vld [vmem:[%s13252_s2 + $0x34] sm:$0xf]  ;;  %v9432_v21 = vor.u32 %v10053_v59, %v9429_v48  ;;  %v9301_v8 = vld [vmem:[%s13252_s2 + $0x38] sm:$0xf0]  ;;  %v6050_v51 = vadd.f32 %v12624_v27, %v5977_v45  ;;  %v6052_v39 = vadd.f32 %v12634_v10, %v5979_v38 }
 0x799   : > { %6769 = vmatpush.bf16.msrb.mxu0 %v9312_v6  ;;  %v10069_v60 = vld [vmem:[%s13252_s2 + $0x1b4] sm:$0xf]  ;;  %v9493_v42 = vld [vmem:[%s13252_s2 + $0x1b8] sm:$0xf0]  ;;  %v9304_v33 = vor.u32 %v10021_v57, %v9301_v8  ;;  %v6047_v40 = vadd.f32 %v12626_v26, %v5974_v0  ;;  %v6109_v24 = vmax.f32 %v6045_v31, 0.0  ;;  %v6113_v18 = vmax.f32 %v6049_v23, 0.0 }
 0x79a   : > { %6818 = vmatpush.bf16.msrb.mxu1 %v9376_v46  ;;  %v9496_v43 = vor.u32 %v10069_v60, %v9493_v42  ;;  %v10037_v44 = vld [vmem:[%s13252_s2 + $0xb4] sm:$0xf]  ;;  %v9365_v61 = vld [vmem:[%s13252_s2 + $0xb8] sm:$0xf0]  ;;  %v6110_v6 = vmax.f32 %v6046_v37, 0.0  ;;  %v6112_v7 = vmax.f32 %v6048_v54, 0.0 }
 0x79b   : > { %6867 = vmatpush.bf16.msrb.mxu2 %v9440_v62  ;;  %v6051_v62 = vadd.f32 %v12626_v26, %v5978_v47  ;;  %v9368_v30 = vor.u32 %v10037_v44, %v9365_v61  ;;  %v6111_v56 = vmax.f32 %v6047_v40, 0.0  ;;  %v6116_v36 = vmax.f32 %v6052_v39, 0.0  ;;  %v5980_v17 = vld [vmem:[#allocation2 + $0x148] sm:$0xff]  ;;  %v5984_v29 = vld [vmem:[#allocation2 + $0x40] sm:$0xff]  ;;  %v5981_v28 = vld [vmem:[#allocation2 + $0x1d0] sm:$0xff] }
 0x79c   : > { %6583 = vmatmul.bf16.gmra.mxu0 %v12750_v52  ;;  %6916 = vmatpush.bf16.msrb.mxu3 %v9504_v4  ;;  %v6114_v4 = vmax.f32 %v6050_v51, 0.0  ;;  %v12838_v32 = vpack.c.bf16 %v6113_v18, %v6109_v24  ;;  %v5985_v3 = vld [vmem:[#allocation2 + $0x1f8] sm:$0xff]  ;;  %v5982_v2 = vld [vmem:[#allocation2 + $0x100] sm:$0xff]  ;;  %v5983_v13 = vld [vmem:[#allocation2 + $0xc8] sm:$0xff]  ;;  %v6053_v45 = vadd.f32 %v12622_v1, %v5980_v17  ;;  %v6057_v59 = vadd.f32 %v12622_v1, %v5984_v29 }
 0x79d   : > { %6632 = vmatmul.bf16.gmra.mxu1 %v12752_v49  ;;  %6770 = vmatpush.bf16.msrb.mxu0 %v9304_v33  ;;  %v6115_v9 = vmax.f32 %v6051_v62, 0.0  ;;  %v12844_v12 = vpack.c.bf16 %v6116_v36, %v6112_v7  ;;  %v5986_v19 = vld [vmem:[#allocation2 + $0x20] sm:$0xff]  ;;  %v5987_v11 = vld [vmem:[#allocation2 + $0x128] sm:$0xff]  ;;  %v6054_v48 = vadd.f32 %v12624_v27, %v5981_v28  ;;  %v6058_v60 = vadd.f32 %v12624_v27, %v5985_v3  ;;  %v5989_v7 = vld [vmem:[#allocation2 + $0x1f0] sm:$0xff] }
 0x79e   : > { %6681 = vmatmul.bf16.gmra.mxu2 %v12754_v55  ;;  %6819 = vmatpush.bf16.msrb.mxu1 %v9368_v30  ;;  %v12840_v46 = vpack.c.bf16 %v6114_v4, %v6110_v6  ;;  %v10051_v15 = vld [vmem:[%s13252_s2 + $0x124] sm:$0xf]  ;;  %v9421_v22 = vld [vmem:[%s13252_s2 + $0x128] sm:$0xf0]  ;;  %v6055_v42 = vadd.f32 %v12626_v26, %v5982_v2  ;;  %v6059_v23 = vadd.f32 %v12626_v26, %v5986_v19  ;;  %v6117_v44 = vmax.f32 %v6053_v45, 0.0  ;;  %v5993_v36 = vld [vmem:[#allocation2 + $0x90] sm:$0xff] }
 0x79f   : > { %6730 = vmatmul.bf16.gmra.mxu3 %v12756_v20  ;;  %6868 = vmatpush.bf16.msrb.mxu2 %v9432_v21  ;;  %v12842_v34 = vpack.c.bf16 %v6115_v9, %v6111_v56  ;;  %v10019_v53 = vld [vmem:[%s13252_s2 + $0x24] sm:$0xf]  ;;  %v9424_v0 = vor.u32 %v10051_v15, %v9421_v22  ;;  %v9293_v47 = vld [vmem:[%s13252_s2 + $0x28] sm:$0xf0]  ;;  %v6056_v33 = vadd.f32 %v12634_v10, %v5983_v13  ;;  %v6121_v61 = vmax.f32 %v6057_v59, 0.0  ;;  %v5992_v9 = vld [vmem:[#allocation2 + $0x70] sm:$0xff] }
 0x7a0   : > { %6917 = vmatpush.bf16.msrb.mxu3 %v9496_v43  ;;  %v10067_v50 = vld [vmem:[%s13252_s2 + $0x1a4] sm:$0xf]  ;;  %v9485_v38 = vld [vmem:[%s13252_s2 + $0x1a8] sm:$0xf0]  ;;  %v9296_v57 = vor.u32 %v10019_v53, %v9293_v47  ;;  %v6060_v43 = vadd.f32 %v12634_v10, %v5987_v11  ;;  %v6118_v51 = vmax.f32 %v6054_v48, 0.0  ;;  %v6122_v40 = vmax.f32 %v6058_v60, 0.0 }
 0x7a1   : > { %v9488_v31 = vor.u32 %v10067_v50, %v9485_v38  ;;  %v10035_v21 = vld [vmem:[%s13252_s2 + $0xa4] sm:$0xf]  ;;  %v9357_v8 = vld [vmem:[%s13252_s2 + $0xa8] sm:$0xf0]  ;;  %v6119_v62 = vmax.f32 %v6055_v42, 0.0  ;;  %v6123_v30 = vmax.f32 %v6059_v23, 0.0  ;;  %v12882_v24 = vpack.c.bf16 %v6121_v61, %v6117_v44 }
 0x7a2   : > { %v9360_v37 = vor.u32 %v10035_v21, %v9357_v8  ;;  %6771 = vmatpush.bf16.msrb.mxu0 %v9296_v57  ;;  %v6120_v54 = vmax.f32 %v6056_v33, 0.0  ;;  %v6124_v39 = vmax.f32 %v6060_v43, 0.0  ;;  %v12884_v18 = vpack.c.bf16 %v6122_v40, %v6118_v51  ;;  %v5988_v56 = vld [vmem:[#allocation2 + $0x1a0] sm:$0xff]  ;;  %v5990_v17 = vld [vmem:[#allocation2 + $0xe8] sm:$0xff]  ;;  %v5994_v29 = vld [vmem:[#allocation2 + $0x1d8] sm:$0xff] }
 0x7a3   : > { %6869 = vmatpush.bf16.msrb.mxu2 %v9424_v0  ;;  %v12886_v6 = vpack.c.bf16 %v6123_v30, %v6119_v62  ;;  %v5991_v28 = vld [vmem:[#allocation2 + $0x78] sm:$0xff]  ;;  %v5995_v3 = vld [vmem:[#allocation2 + $0xd0] sm:$0xff]  ;;  %v6061_v11 = vadd.f32 %v12622_v1, %v5988_v56  ;;  %v6065_v0 = vadd.f32 %v12622_v1, %v5992_v9  ;;  %v6062_v47 = vadd.f32 %v12624_v27, %v5989_v7  ;;  %v5997_v7 = vld [vmem:[#allocation2 + $0x88] sm:$0xff] }
 0x7a4   : > { %6918 = vmatpush.bf16.msrb.mxu3 %v9488_v31  ;;  %6820 = vmatpush.bf16.msrb.mxu1 %v9360_v37  ;;  %v12888_v4 = vpack.c.bf16 %v6124_v39, %v6120_v54  ;;  %v10049_v2 = vld [vmem:[%s13252_s2 + $0x114] sm:$0xf]  ;;  %v9413_v19 = vld [vmem:[%s13252_s2 + $0x118] sm:$0xf0]  ;;  %v6066_v57 = vadd.f32 %v12624_v27, %v5993_v36  ;;  %v6063_v31 = vadd.f32 %v12626_v26, %v5990_v17  ;;  %v5998_v17 = vld [vmem:[#allocation2 + $0xa8] sm:$0xff] }
 0x7a5   : > { %v10017_v13 = vld [vmem:[%s13252_s2 + $0x14] sm:$0xf]  ;;  %v9416_v15 = vor.u32 %v10049_v2, %v9413_v19  ;;  %v9285_v22 = vld [vmem:[%s13252_s2 + $0x18] sm:$0xf0]  ;;  %v6067_v21 = vadd.f32 %v12626_v26, %v5994_v29  ;;  %v6064_v60 = vadd.f32 %v12634_v10, %v5991_v28  ;;  %v6068_v42 = vadd.f32 %v12634_v10, %v5995_v3  ;;  %v6002_v29 = vld [vmem:[#allocation2 + $0x68] sm:$0xff] }
 0x7a6   : > { %v10065_v53 = vld [vmem:[%s13252_s2 + $0x194] sm:$0xf]  ;;  %v9477_v45 = vld [vmem:[%s13252_s2 + $0x198] sm:$0xf0]  ;;  %v9288_v50 = vor.u32 %v10017_v13, %v9285_v22  ;;  %v6125_v23 = vmax.f32 %v6061_v11, 0.0  ;;  %v6129_v37 = vmax.f32 %v6065_v0, 0.0 }
 0x7a7   : > { %v9480_v38 = vor.u32 %v10065_v53, %v9477_v45  ;;  %v10033_v59 = vld [vmem:[%s13252_s2 + $0x94] sm:$0xf]  ;;  %v9349_v48 = vld [vmem:[%s13252_s2 + $0x98] sm:$0xf0]  ;;  %6870 = vmatpush.bf16.msrb.mxu2 %v9416_v15  ;;  %v6126_v33 = vmax.f32 %v6062_v47, 0.0  ;;  %v6130_v43 = vmax.f32 %v6066_v57, 0.0  ;;  %v6070_v47 = vadd.f32 %v12624_v27, %v5997_v7 }
 0x7a8   : > { %v9352_v8 = vor.u32 %v10033_v59, %v9349_v48  ;;  %6772 = vmatpush.bf16.msrb.mxu0 %v9288_v50  ;;  %v6127_v44 = vmax.f32 %v6063_v31, 0.0  ;;  %v6131_v61 = vmax.f32 %v6067_v21, 0.0  ;;  %v6128_v51 = vmax.f32 %v6064_v60, 0.0  ;;  %v5996_v56 = vld [vmem:[#allocation2 + $0xb8] sm:$0xff]  ;;  %v6000_v9 = vld [vmem:[#allocation2 + $0x170] sm:$0xff]  ;;  %v5999_v28 = vld [vmem:[#allocation2 + $0x1c8] sm:$0xff] }
 0x7a9   : > { %6919 = vmatpush.bf16.msrb.mxu3 %v9480_v38  ;;  %v6132_v40 = vmax.f32 %v6068_v42, 0.0  ;;  %v12926_v62 = vpack.c.bf16 %v6129_v37, %v6125_v23  ;;  %v12928_v30 = vpack.c.bf16 %v6130_v43, %v6126_v33  ;;  %v6001_v36 = vld [vmem:[#allocation2 + $0x178] sm:$0xff]  ;;  %v6003_v3 = vld [vmem:[#allocation2 + $0x190] sm:$0xff]  ;;  %v10047_v2 = vld [vmem:[%s13252_s2 + $0x104] sm:$0xf]  ;;  %v6069_v11 = vadd.f32 %v12622_v1, %v5996_v56 }
 0x7aa   : > { %6821 = vmatpush.bf16.msrb.mxu1 %v9352_v8  ;;  %v12930_v54 = vpack.c.bf16 %v6131_v61, %v6127_v44  ;;  %v9405_v19 = vld [vmem:[%s13252_s2 + $0x108] sm:$0xf0]  ;;  %v10015_v13 = vld [vmem:[%s13252_s2 + $0x4] sm:$0xf]  ;;  %v6073_v0 = vadd.f32 %v12622_v1, %v6000_v9  ;;  %v6074_v57 = vadd.f32 %v12624_v27, %v6001_v36  ;;  %v6071_v31 = vadd.f32 %v12626_v26, %v5998_v17  ;;  %v6004_v17 = vld [vmem:[#allocation2 + $0x198] sm:$0xff] }
 0x7ab   : > { %v12932_v39 = vpack.c.bf16 %v6132_v40, %v6128_v51  ;;  %v9408_v15 = vor.u32 %v10047_v2, %v9405_v19  ;;  %v9277_v22 = vld [vmem:[%s13252_s2 + $0x8] sm:$0xf0]  ;;  %v10063_v53 = vld [vmem:[%s13252_s2 + $0x184] sm:$0xf]  ;;  %v6075_v21 = vadd.f32 %v12626_v26, %v6002_v29  ;;  %v6072_v60 = vadd.f32 %v12634_v10, %v5999_v28  ;;  %v6008_v29 = vld [vmem:[#allocation2 + $0x158] sm:$0xff] }
 0x7ac   : > { %6588 = vmatmul.bf16.gmra.mxu0 %v12794_v14  ;;  %v9469_v45 = vld [vmem:[%s13252_s2 + $0x188] sm:$0xf0]  ;;  %v9280_v50 = vor.u32 %v10015_v13, %v9277_v22  ;;  %v10031_v59 = vld [vmem:[%s13252_s2 + $0x84] sm:$0xf]  ;;  %v6076_v42 = vadd.f32 %v12634_v10, %v6003_v3  ;;  %v6133_v23 = vmax.f32 %v6069_v11, 0.0  ;;  %v6137_v37 = vmax.f32 %v6073_v0, 0.0 }
 0x7ad   : > { %6637 = vmatmul.bf16.gmra.mxu1 %v12796_v5  ;;  %v9472_v38 = vor.u32 %v10063_v53, %v9469_v45  ;;  %v9341_v48 = vld [vmem:[%s13252_s2 + $0x88] sm:$0xf0]  ;;  %6871 = vmatpush.bf16.msrb.mxu2 %v9408_v15  ;;  %v6134_v33 = vmax.f32 %v6070_v47, 0.0  ;;  %v6138_v43 = vmax.f32 %v6074_v57, 0.0  ;;  %v6135_v44 = vmax.f32 %v6071_v31, 0.0  ;;  %v6005_v28 = vld [vmem:[#allocation2 + $0x38] sm:$0xff] }
 0x7ae   : > { %6686 = vmatmul.bf16.gmra.mxu2 %v12798_v63  ;;  %v9344_v8 = vor.u32 %v10031_v59, %v9341_v48  ;;  %6773 = vmatpush.bf16.msrb.mxu0 %v9280_v50  ;;  %v6139_v61 = vmax.f32 %v6075_v21, 0.0  ;;  %v6136_v51 = vmax.f32 %v6072_v60, 0.0  ;;  %v6140_v40 = vmax.f32 %v6076_v42, 0.0  ;;  %v6009_v3 = vld [vmem:[#allocation2 + $0x10] sm:$0xff]  ;;  %v6006_v2 = vld [vmem:[#allocation2 + $0xc0] sm:$0xff]  ;;  %v6010_v19 = vld [vmem:[#allocation2 + $0x58] sm:$0xff] }
 0x7af   : > { %6735 = vmatmul.bf16.gmra.mxu3 %v12800_v35  ;;  %v12970_v56 = vpack.c.bf16 %v6137_v37, %v6133_v23  ;;  %v12972_v9 = vpack.c.bf16 %v6138_v43, %v6134_v33  ;;  %v6007_v13 = vld [vmem:[#allocation2 + $0x1c0] sm:$0xff]  ;;  %v6077_v15 = vadd.f32 %v12622_v1, %v6004_v17  ;;  %v6081_v22 = vadd.f32 %v12622_v1, %v6008_v29 }
 0x7b0   : > { %6920 = vmatpush.bf16.msrb.mxu3 %v9472_v38  ;;  %6822 = vmatpush.bf16.msrb.mxu1 %v9344_v8  ;;  %v12974_v7 = vpack.c.bf16 %v6139_v61, %v6135_v44  ;;  %v12976_v36 = vpack.c.bf16 %v6140_v40, %v6136_v51  ;;  %v6011_v11 = vld [vmem:[#allocation2 + $0xa0] sm:$0xff]  ;;  %v6078_v53 = vadd.f32 %v12624_v27, %v6005_v28 }
 0x7b1   : > { %v6082_v45 = vadd.f32 %v12624_v27, %v6009_v3  ;;  %v6079_v0 = vadd.f32 %v12626_v26, %v6006_v2  ;;  %v6083_v47 = vadd.f32 %v12626_v26, %v6010_v19  ;;  %v6080_v50 = vadd.f32 %v12634_v10, %v6007_v13  ;;  %v13005_v26 = vld [vmem:[%s13253_s3 + $0x4] sm:$0x3] }
 0x7b2   : > { %v6084_v38 = vadd.f32 %v12634_v10, %v6011_v11  ;;  %v6141_v59 = vmax.f32 %v6077_v15, 0.0  ;;  %v6145_v48 = vmax.f32 %v6081_v22, 0.0  ;;  %v6142_v57 = vmax.f32 %v6078_v53, 0.0 }
 0x7b3   : > { %v6146_v31 = vmax.f32 %v6082_v45, 0.0  ;;  %v6143_v21 = vmax.f32 %v6079_v0, 0.0  ;;  %v6147_v8 = vmax.f32 %v6083_v47, 0.0  ;;  %v6144_v60 = vmax.f32 %v6080_v50, 0.0 }
 0x7b4   : > { %v6148_v1 = vmax.f32 %v6084_v38, 0.0  ;;  %v12990_v42 = vpack.c.bf16 %v6145_v48, %v6141_v59  ;;  %v13008_v10 = vperm.slane %v13005_v26, 0 }
 0x7b5   : > { %v12992_v23 = vpack.c.bf16 %v6146_v31, %v6142_v57  ;;  %v12994_v27 = vpack.c.bf16 %v6147_v8, %v6143_v21 }
 0x7b6   : > { %v12996_v37 = vpack.c.bf16 %v6148_v1, %v6144_v60 }
 0x7bc   : > { %6593 = vmatmul.bf16.gmra.mxu0 %v12838_v32 }
 0x7bd   : > { %6642 = vmatmul.bf16.gmra.mxu1 %v12840_v46 }
 0x7be   : > { %6691 = vmatmul.bf16.gmra.mxu2 %v12842_v34 }
 0x7bf   : > { %6740 = vmatmul.bf16.gmra.mxu3 %v12844_v12 }
 0x7cc   : > { %6598 = vmatmul.bf16.gmra.mxu0 %v12882_v24 }
 0x7cd   : > { %6647 = vmatmul.bf16.gmra.mxu1 %v12884_v18 }
 0x7ce   : > { %6696 = vmatmul.bf16.gmra.mxu2 %v12886_v6 }
 0x7cf   : > { %6745 = vmatmul.bf16.gmra.mxu3 %v12888_v4 }
 0x7dc   : > { %6603 = vmatmul.bf16.gmra.mxu0 %v12926_v62 }
 0x7dd   : > { %6652 = vmatmul.bf16.gmra.mxu1 %v12928_v30 }
 0x7de   : > { %6701 = vmatmul.bf16.gmra.mxu2 %v12930_v54 }
 0x7df   : > { %6750 = vmatmul.bf16.gmra.mxu3 %v12932_v39 }
 0x7ec   : > { %6608 = vmatmul.bf16.gmra.mxu0 %v12970_v56 }
 0x7ed   : > { %6657 = vmatmul.bf16.gmra.mxu1 %v12972_v9 }
 0x7ee   : > { %6706 = vmatmul.bf16.gmra.mxu2 %v12974_v7 }
 0x7ef   : > { %6755 = vmatmul.bf16.gmra.mxu3 %v12976_v36 }
 0x7fc   : > { %6613 = vmatmul.bf16.gmra.mxu0 %v12990_v42 }
 0x7fd   : > { %6662 = vmatmul.bf16.gmra.mxu1 %v12992_v23 }
 0x7fe   : > { %6711 = vmatmul.bf16.gmra.mxu2 %v12994_v27 }
 0x7ff   : > { %6760 = vmatmul.bf16.gmra.mxu3 %v12996_v37 }
 0x809   : > { %v6579_v33 = vpop.f32.mrf.mxu0 }
 0x80a   : > { %v6580_v43 = vadd.f32 %v6579_v33, %v13008_v10  ;;  %v6628_v44 = vpop.f32.mrf.mxu1 }
 0x80c   : > { %v6629_v61 = vadd.f32 %v6628_v44, %v6580_v43  ;;  %6774 = vmatmul.bf16.vlgmr.msrb.gmra.mxu0 %v12676_v25 }
 0x80d   : > { %6823 = vmatmul.bf16.vlgmr.msrb.gmra.mxu1 %v12684_v16 }
 0x80e   : > { %6872 = vmatmul.bf16.vlgmr.msrb.gmra.mxu2 %v12686_v58 }
 0x80f   : > { %6921 = vmatmul.bf16.vlgmr.msrb.gmra.mxu3 %v12694_v41 }
 0x811   : > { %v6677_v51 = vpop.f32.mrf.mxu2  ;;  %v6581_v29 = vpop.f32.mrf.mxu0 }
 0x812   : > { %v6678_v40 = vadd.f32 %v6677_v51, %v6629_v61  ;;  %v6726_v17 = vpop.f32.mrf.mxu3  ;;  %v6582_v28 = vadd.f32 %v6581_v29, %v13008_v10  ;;  %v6630_v3 = vpop.f32.mrf.mxu1 }
 0x814   : > { %v13016_v2 = vadd.f32 %v6726_v17, %v6678_v40  ;;  %v6631_v19 = vadd.f32 %v6630_v3, %v6582_v28 }
 0x819   : > { %v6679_v13 = vpop.f32.mrf.mxu2  ;;  %v6584_v25 = vpop.f32.mrf.mxu0 }
 0x81a   : > { %v6680_v11 = vadd.f32 %v6679_v13, %v6631_v19  ;;  %v6728_v15 = vpop.f32.mrf.mxu3  ;;  %v6585_v16 = vadd.f32 %v6584_v25, %v13008_v10  ;;  %v6633_v22 = vpop.f32.mrf.mxu1 }
 0x81c   : > { %v13019_v58 = vadd.f32 %v6728_v15, %v6680_v11  ;;  %v6634_v41 = vadd.f32 %v6633_v22, %v6585_v16  ;;  %6779 = vmatmul.bf16.gmra.mxu0 %v12750_v52 }
 0x81d   : > { %6828 = vmatmul.bf16.gmra.mxu1 %v12752_v49 }
 0x81e   : > { %6877 = vmatmul.bf16.gmra.mxu2 %v12754_v55 }
 0x81f   : > { %6926 = vmatmul.bf16.gmra.mxu3 %v12756_v20 }
 0x821   : > { %v6682_v53 = vpop.f32.mrf.mxu2  ;;  %v6586_v47 = vpop.f32.mrf.mxu0 }
 0x822   : > { %v6683_v45 = vadd.f32 %v6682_v53, %v6634_v41  ;;  %v6731_v0 = vpop.f32.mrf.mxu3  ;;  %v6587_v50 = vadd.f32 %v6586_v47, %v13008_v10  ;;  %v6635_v38 = vpop.f32.mrf.mxu1 }
 0x824   : > { %v13026_v59 = vadd.f32 %v6731_v0, %v6683_v45  ;;  %v6636_v48 = vadd.f32 %v6635_v38, %v6587_v50 }
 0x829   : > { %v6684_v57 = vpop.f32.mrf.mxu2  ;;  %v6589_v52 = vpop.f32.mrf.mxu0 }
 0x82a   : > { %v6685_v31 = vadd.f32 %v6684_v57, %v6636_v48  ;;  %v6733_v21 = vpop.f32.mrf.mxu3  ;;  %v6590_v49 = vadd.f32 %v6589_v52, %v13008_v10  ;;  %v6638_v8 = vpop.f32.mrf.mxu1 }
 0x82c   : > { %v13029_v55 = vadd.f32 %v6733_v21, %v6685_v31  ;;  %v6639_v20 = vadd.f32 %v6638_v8, %v6590_v49  ;;  %6784 = vmatmul.bf16.gmra.mxu0 %v12794_v14 }
 0x82d   : > { %6833 = vmatmul.bf16.gmra.mxu1 %v12796_v5 }
 0x82e   : > { %6882 = vmatmul.bf16.gmra.mxu2 %v12798_v63 }
 0x82f   : > { %6931 = vmatmul.bf16.gmra.mxu3 %v12800_v35 }
 0x831   : > { %v6687_v60 = vpop.f32.mrf.mxu2  ;;  %v6591_v43 = vpop.f32.mrf.mxu0 }
 0x832   : > { %v6688_v1 = vadd.f32 %v6687_v60, %v6639_v20  ;;  %v6736_v33 = vpop.f32.mrf.mxu3  ;;  %v6592_v44 = vadd.f32 %v6591_v43, %v13008_v10  ;;  %v6640_v61 = vpop.f32.mrf.mxu1 }
 0x834   : > { %v13036_v51 = vadd.f32 %v6736_v33, %v6688_v1  ;;  %v6641_v40 = vadd.f32 %v6640_v61, %v6592_v44 }
 0x839   : > { %v6689_v17 = vpop.f32.mrf.mxu2  ;;  %v6594_v14 = vpop.f32.mrf.mxu0 }
 0x83a   : > { %v6690_v29 = vadd.f32 %v6689_v17, %v6641_v40  ;;  %v6738_v28 = vpop.f32.mrf.mxu3  ;;  %v6595_v5 = vadd.f32 %v6594_v14, %v13008_v10  ;;  %v6643_v3 = vpop.f32.mrf.mxu1 }
 0x83c   : > { %v13039_v63 = vadd.f32 %v6738_v28, %v6690_v29  ;;  %v6644_v35 = vadd.f32 %v6643_v3, %v6595_v5  ;;  %6789 = vmatmul.bf16.gmra.mxu0 %v12838_v32 }
 0x83d   : > { %6838 = vmatmul.bf16.gmra.mxu1 %v12840_v46 }
 0x83e   : > { %6887 = vmatmul.bf16.gmra.mxu2 %v12842_v34 }
 0x83f   : > { %6936 = vmatmul.bf16.gmra.mxu3 %v12844_v12 }
 0x841   : > { %v6692_v19 = vpop.f32.mrf.mxu2  ;;  %v6596_v15 = vpop.f32.mrf.mxu0 }
 0x842   : > { %v6693_v13 = vadd.f32 %v6692_v19, %v6644_v35  ;;  %v6741_v11 = vpop.f32.mrf.mxu3  ;;  %v6597_v25 = vadd.f32 %v6596_v15, %v13008_v10  ;;  %v6645_v16 = vpop.f32.mrf.mxu1 }
 0x844   : > { %v13046_v22 = vadd.f32 %v6741_v11, %v6693_v13  ;;  %v6646_v41 = vadd.f32 %v6645_v16, %v6597_v25 }
 0x849   : > { %v6694_v53 = vpop.f32.mrf.mxu2  ;;  %v6599_v32 = vpop.f32.mrf.mxu0 }
 0x84a   : > { %v6695_v45 = vadd.f32 %v6694_v53, %v6646_v41  ;;  %v6743_v0 = vpop.f32.mrf.mxu3  ;;  %v6600_v46 = vadd.f32 %v6599_v32, %v13008_v10  ;;  %v6648_v47 = vpop.f32.mrf.mxu1 }
 0x84c   : > { %v13049_v34 = vadd.f32 %v6743_v0, %v6695_v45  ;;  %v6649_v12 = vadd.f32 %v6648_v47, %v6600_v46  ;;  %6794 = vmatmul.bf16.gmra.mxu0 %v12882_v24 }
 0x84d   : > { %6843 = vmatmul.bf16.gmra.mxu1 %v12884_v18 }
 0x84e   : > { %6892 = vmatmul.bf16.gmra.mxu2 %v12886_v6 }
 0x84f   : > { %6941 = vmatmul.bf16.gmra.mxu3 %v12888_v4 }
 0x851   : > { %v6697_v50 = vpop.f32.mrf.mxu2  ;;  %v6601_v57 = vpop.f32.mrf.mxu0 }
 0x852   : > { %v6698_v38 = vadd.f32 %v6697_v50, %v6649_v12  ;;  %v6746_v48 = vpop.f32.mrf.mxu3  ;;  %v6602_v31 = vadd.f32 %v6601_v57, %v13008_v10  ;;  %v6650_v21 = vpop.f32.mrf.mxu1 }
 0x854   : > { %v13056_v52 = vadd.f32 %v6746_v48, %v6698_v38  ;;  %v6651_v49 = vadd.f32 %v6650_v21, %v6602_v31 }
 0x859   : > { %v6699_v8 = vpop.f32.mrf.mxu2  ;;  %v6604_v24 = vpop.f32.mrf.mxu0 }
 0x85a   : > { %v6700_v20 = vadd.f32 %v6699_v8, %v6651_v49  ;;  %v6748_v60 = vpop.f32.mrf.mxu3  ;;  %v6605_v18 = vadd.f32 %v6604_v24, %v13008_v10  ;;  %v6653_v1 = vpop.f32.mrf.mxu1  ;;  %v13089_v49 = vperm.slane %v13005_v26, 1 }
 0x85c   : > { %v13059_v6 = vadd.f32 %v6748_v60, %v6700_v20  ;;  %v6654_v4 = vadd.f32 %v6653_v1, %v6605_v18  ;;  %6799 = vmatmul.bf16.gmra.mxu0 %v12926_v62 }
 0x85d   : > { %6848 = vmatmul.bf16.gmra.mxu1 %v12928_v30 }
 0x85e   : > { %6897 = vmatmul.bf16.gmra.mxu2 %v12930_v54 }
 0x85f   : > { %6946 = vmatmul.bf16.gmra.mxu3 %v12932_v39 }
 0x861   : > { %v6702_v33 = vpop.f32.mrf.mxu2  ;;  %v6606_v61 = vpop.f32.mrf.mxu0 }
 0x862   : > { %v6703_v43 = vadd.f32 %v6702_v33, %v6654_v4  ;;  %v6751_v44 = vpop.f32.mrf.mxu3  ;;  %v6607_v40 = vadd.f32 %v6606_v61, %v13008_v10  ;;  %v6655_v17 = vpop.f32.mrf.mxu1 }
 0x864   : > { %v13066_v29 = vadd.f32 %v6751_v44, %v6703_v43  ;;  %v6656_v28 = vadd.f32 %v6655_v17, %v6607_v40 }
 0x869   : > { %v6704_v14 = vpop.f32.mrf.mxu2  ;;  %v6609_v62 = vpop.f32.mrf.mxu0 }
 0x86a   : > { %v6705_v5 = vadd.f32 %v6704_v14, %v6656_v28  ;;  %v6753_v3 = vpop.f32.mrf.mxu3  ;;  %v6610_v30 = vadd.f32 %v6609_v62, %v13008_v10  ;;  %v6658_v35 = vpop.f32.mrf.mxu1 }
 0x86c   : > { %v13069_v54 = vadd.f32 %v6753_v3, %v6705_v5  ;;  %v6659_v39 = vadd.f32 %v6658_v35, %v6610_v30  ;;  %6804 = vmatmul.bf16.gmra.mxu0 %v12970_v56 }
 0x86d   : > { %6853 = vmatmul.bf16.gmra.mxu1 %v12972_v9 }
 0x86e   : > { %6902 = vmatmul.bf16.gmra.mxu2 %v12974_v7 }
 0x86f   : > { %6951 = vmatmul.bf16.gmra.mxu3 %v12976_v36 }
 0x871   : > { %v6707_v19 = vpop.f32.mrf.mxu2  ;;  %v6611_v15 = vpop.f32.mrf.mxu0 }
 0x872   : > { %v6708_v13 = vadd.f32 %v6707_v19, %v6659_v39  ;;  %v6756_v11 = vpop.f32.mrf.mxu3  ;;  %v6612_v25 = vadd.f32 %v6611_v15, %v13008_v10  ;;  %v6660_v16 = vpop.f32.mrf.mxu1 }
 0x874   : > { %v13076_v41 = vadd.f32 %v6756_v11, %v6708_v13  ;;  %v6661_v53 = vadd.f32 %v6660_v16, %v6612_v25 }
 0x879   : > { %v6709_v45 = vpop.f32.mrf.mxu2  ;;  %v6614_v56 = vpop.f32.mrf.mxu0 }
 0x87a   : > { %v6710_v0 = vadd.f32 %v6709_v45, %v6661_v53  ;;  %v6758_v32 = vpop.f32.mrf.mxu3  ;;  %v6615_v9 = vadd.f32 %v6614_v56, %v13008_v10  ;;  %v6663_v46 = vpop.f32.mrf.mxu1 }
 0x87c   : > { %v13079_v7 = vadd.f32 %v6758_v32, %v6710_v0  ;;  %v6664_v36 = vadd.f32 %v6663_v46, %v6615_v9  ;;  %6809 = vmatmul.bf16.gmra.mxu0 %v12990_v42 }
 0x87d   : > { %6858 = vmatmul.bf16.gmra.mxu1 %v12992_v23 }
 0x87e   : > { %6907 = vmatmul.bf16.gmra.mxu2 %v12994_v27 }
 0x87f   : > { %6956 = vmatmul.bf16.gmra.mxu3 %v12996_v37 }
 0x881   : > { %v6712_v47 = vpop.f32.mrf.mxu2  ;;  %v6616_v38 = vpop.f32.mrf.mxu0 }
 0x882   : > { %v6713_v12 = vadd.f32 %v6712_v47, %v6664_v36  ;;  %v6761_v50 = vpop.f32.mrf.mxu3  ;;  %v6617_v48 = vadd.f32 %v6616_v38, %v13008_v10  ;;  %v6665_v57 = vpop.f32.mrf.mxu1  ;;  %v5945_v10 = vld [vmem:[%s13253_s3 + $0x6] sm:$0x3] }
 0x883   : > { %v13097_v1 = vperm.slane %v5945_v10, 0  ;;  %v13099_v43 = vperm.slane %v5945_v10, 1 }
 0x884   : > { %v13086_v31 = vadd.f32 %v6761_v50, %v6713_v12  ;;  %v6666_v21 = vadd.f32 %v6665_v57, %v6617_v48 }
 0x885   : > { %v6967_v17 = vmul.f32 %v13097_v1, %v13016_v2  ;;  %v6969_v25 = vmul.f32 %v13097_v1, %v13019_v58  ;;  %v6971_v46 = vmul.f32 %v13097_v1, %v13026_v59 }
 0x889   : > { %v6714_v42 = vpop.f32.mrf.mxu2  ;;  %v6775_v20 = vpop.f32.mrf.mxu0 }
 0x88a   : > { %v6715_v8 = vadd.f32 %v6714_v42, %v6666_v21  ;;  %v6763_v23 = vpop.f32.mrf.mxu3  ;;  %v6776_v27 = vadd.f32 %v6775_v20, %v13089_v49  ;;  %v6824_v37 = vpop.f32.mrf.mxu1  ;;  %v6973_v20 = vmul.f32 %v13097_v1, %v13029_v55 }
 0x88c   : > { %v13092_v60 = vadd.f32 %v6763_v23, %v6715_v8  ;;  %v6825_v24 = vadd.f32 %v6824_v37, %v6776_v27 }
 0x891   : > { %v6873_v18 = vpop.f32.mrf.mxu2  ;;  %v6777_v33 = vpop.f32.mrf.mxu0 }
 0x892   : > { %v6874_v4 = vadd.f32 %v6873_v18, %v6825_v24  ;;  %v6922_v26 = vpop.f32.mrf.mxu3  ;;  %v6826_v44 = vpop.f32.mrf.mxu1  ;;  %v6778_v40 = vadd.f32 %v6777_v33, %v13089_v49  ;;  %v6975_v33 = vmul.f32 %v13097_v1, %v13036_v51 }
 0x894   : > { %v6923_v61 = vadd.f32 %v6922_v26, %v6874_v4  ;;  %v6827_v14 = vadd.f32 %v6826_v44, %v6778_v40 }
 0x896   : > { %v6968_v28 = vmul.f32 %v13099_v43, %v6923_v61 }
 0x898   : > { %v6999_v5 = vadd.f32 %v6968_v28, %v6967_v17 }
 0x899   : > { %v6875_v3 = vpop.f32.mrf.mxu2  ;;  %v6780_v35 = vpop.f32.mrf.mxu0 }
 0x89a   : > { %v6876_v62 = vadd.f32 %v6875_v3, %v6827_v14  ;;  %v6924_v30 = vpop.f32.mrf.mxu3  ;;  %7000 = vadd.xlane.f32.xlu0 %v6999_v5  ;;  %v6781_v39 = vadd.f32 %v6780_v35, %v13089_v49  ;;  %v6829_v19 = vpop.f32.mrf.mxu1  ;;  %v6977_v35 = vmul.f32 %v13097_v1, %v13039_v63 }
 0x89c   : > { %v6925_v13 = vadd.f32 %v6924_v30, %v6876_v62  ;;  %v6830_v15 = vadd.f32 %v6829_v19, %v6781_v39 }
 0x89e   : > { %v6970_v11 = vmul.f32 %v13099_v43, %v6925_v13 }
 0x8a0   : > { %v7002_v2 = vadd.f32 %v6970_v11, %v6969_v25 }
 0x8a1   : > { %v6878_v16 = vpop.f32.mrf.mxu2  ;;  %v6782_v0 = vpop.f32.mrf.mxu0 }
 0x8a2   : > { %v6879_v53 = vadd.f32 %v6878_v16, %v6830_v15  ;;  %v6927_v45 = vpop.f32.mrf.mxu3  ;;  %7003 = vadd.xlane.f32.xlu0 %v7002_v2  ;;  %v6831_v32 = vpop.f32.mrf.mxu1  ;;  %v6783_v9 = vadd.f32 %v6782_v0, %v13089_v49 }
 0x8a4   : > { %v6928_v56 = vadd.f32 %v6927_v45, %v6879_v53  ;;  %v6832_v47 = vadd.f32 %v6831_v32, %v6783_v9  ;;  %v6979_v53 = vmul.f32 %v13097_v1, %v13046_v22 }
 0x8a6   : > { %v6972_v36 = vmul.f32 %v13099_v43, %v6928_v56 }
 0x8a8   : > { %v7005_v12 = vadd.f32 %v6972_v36, %v6971_v46 }
 0x8a9   : > { %v6880_v50 = vpop.f32.mrf.mxu2  ;;  %v6785_v48 = vpop.f32.mrf.mxu0 }
 0x8aa   : > { %v6881_v38 = vadd.f32 %v6880_v50, %v6832_v47  ;;  %v6929_v58 = vpop.f32.mrf.mxu3  ;;  %7006 = vadd.xlane.f32.xlu2 %v7005_v12  ;;  %v6786_v57 = vadd.f32 %v6785_v48, %v13089_v49  ;;  %v6834_v21 = vpop.f32.mrf.mxu1 }
 0x8ac   : > { %v6930_v42 = vadd.f32 %v6929_v58, %v6881_v38  ;;  %v6835_v23 = vadd.f32 %v6834_v21, %v6786_v57  ;;  %v6981_v58 = vmul.f32 %v13097_v1, %v13049_v34 }
 0x8ae   : > { %v6974_v8 = vmul.f32 %v13099_v43, %v6930_v42 }
 0x8b0   : > { %v7008_v59 = vadd.f32 %v6974_v8, %v6973_v20 }
 0x8b1   : > { %v6883_v27 = vpop.f32.mrf.mxu2  ;;  %v6787_v10 = vpop.f32.mrf.mxu0 }
 0x8b2   : > { %v6884_v37 = vadd.f32 %v6883_v27, %v6835_v23  ;;  %v6932_v24 = vpop.f32.mrf.mxu3  ;;  %7009 = vadd.xlane.f32.xlu0 %v7008_v59  ;;  %v6836_v18 = vpop.f32.mrf.mxu1  ;;  %v6788_v26 = vadd.f32 %v6787_v10, %v13089_v49  ;;  %v6983_v59 = vmul.f32 %v13097_v1, %v13056_v52 }
 0x8b4   : > { %v6933_v4 = vadd.f32 %v6932_v24, %v6884_v37  ;;  %v6837_v61 = vadd.f32 %v6836_v18, %v6788_v26 }
 0x8b6   : > { %v6976_v44 = vmul.f32 %v13099_v43, %v6933_v4 }
 0x8b8   : > { %v7011_v40 = vadd.f32 %v6976_v44, %v6975_v33 }
 0x8b9   : > { %v6885_v17 = vpop.f32.mrf.mxu2  ;;  %v6790_v14 = vpop.f32.mrf.mxu0 }
 0x8ba   : > { %v6886_v28 = vadd.f32 %v6885_v17, %v6837_v61  ;;  %v6934_v55 = vpop.f32.mrf.mxu3  ;;  %7012 = vadd.xlane.f32.xlu2 %v7011_v40  ;;  %v6791_v5 = vadd.f32 %v6790_v14, %v13089_v49  ;;  %v6839_v3 = vpop.f32.mrf.mxu1  ;;  %v6985_v61 = vmul.f32 %v13097_v1, %v13059_v6 }
 0x8bc   : > { %v6935_v62 = vadd.f32 %v6934_v55, %v6886_v28  ;;  %v6840_v30 = vadd.f32 %v6839_v3, %v6791_v5 }
 0x8be   : > { %v6978_v39 = vmul.f32 %v13099_v43, %v6935_v62 }
 0x8c0   : > { %v7014_v51 = vadd.f32 %v6978_v39, %v6977_v35  ;;  %v6987_v35 = vmul.f32 %v13097_v1, %v13066_v29 }
 0x8c1   : > { %v6888_v19 = vpop.f32.mrf.mxu2  ;;  %v6792_v15 = vpop.f32.mrf.mxu0 }
 0x8c2   : > { %v6889_v13 = vadd.f32 %v6888_v19, %v6840_v30  ;;  %v6937_v11 = vpop.f32.mrf.mxu3  ;;  %7015 = vadd.xlane.f32.xlu1 %v7014_v51  ;;  %v6841_v25 = vpop.f32.mrf.mxu1  ;;  %v6793_v16 = vadd.f32 %v6792_v15, %v13089_v49 }
 0x8c4   : > { %v6938_v2 = vadd.f32 %v6937_v11, %v6889_v13  ;;  %v6842_v0 = vadd.f32 %v6841_v25, %v6793_v16 }
 0x8c6   : > { %v6980_v45 = vmul.f32 %v13099_v43, %v6938_v2 }
 0x8c8   : > { %v7017_v32 = vadd.f32 %v6980_v45, %v6979_v53  ;;  %v6989_v53 = vmul.f32 %v13097_v1, %v13069_v54 }
 0x8c9   : > { %v6890_v63 = vpop.f32.mrf.mxu2  ;;  %v6795_v46 = vpop.f32.mrf.mxu0 }
 0x8ca   : > { %v6891_v56 = vadd.f32 %v6890_v63, %v6842_v0  ;;  %v6939_v9 = vpop.f32.mrf.mxu3  ;;  %7018 = vadd.xlane.f32.xlu0 %v7017_v32  ;;  %v6796_v36 = vadd.f32 %v6795_v46, %v13089_v49  ;;  %v6844_v47 = vpop.f32.mrf.mxu1 }
 0x8cc   : > { %v6940_v12 = vadd.f32 %v6939_v9, %v6891_v56  ;;  %v6845_v38 = vadd.f32 %v6844_v47, %v6796_v36 }
 0x8ce   : > { %v6982_v50 = vmul.f32 %v13099_v43, %v6940_v12  ;;  %v6991_v12 = vmul.f32 %v13097_v1, %v13076_v41  ;;  %v6993_v41 = vmul.f32 %v13097_v1, %v13079_v7 }
 0x8d0   : > { %v7020_v22 = vadd.f32 %v6982_v50, %v6981_v58 }
 0x8d1   : > { %v6893_v48 = vpop.f32.mrf.mxu2  ;;  %v6797_v42 = vpop.f32.mrf.mxu0 }
 0x8d2   : > { %v6894_v57 = vadd.f32 %v6893_v48, %v6845_v38  ;;  %v6942_v21 = vpop.f32.mrf.mxu3  ;;  %7021 = vadd.xlane.f32.xlu2 %v7020_v22  ;;  %v6846_v8 = vpop.f32.mrf.mxu1  ;;  %v6798_v20 = vadd.f32 %v6797_v42, %v13089_v49  ;;  %v10180_v22 = vmov 0  }
 0x8d3   : > { %10115 = vset.pattern.permute.xlu2 %v10180_v22  ;;  %10114 = vset.pattern.permute.xlu1 %v10180_v22 }
 0x8d4   : > { %v6943_v23 = vadd.f32 %v6942_v21, %v6894_v57  ;;  %v6847_v37 = vadd.f32 %v6846_v8, %v6798_v20  ;;  %10116 = vset.pattern.permute.xlu0 %v10180_v22 }
 0x8d6   : > { %v6984_v27 = vmul.f32 %v13099_v43, %v6943_v23 }
 0x8d8   : > { %v7023_v24 = vadd.f32 %v6984_v27, %v6983_v59 }
 0x8d9   : > { %v6895_v10 = vpop.f32.mrf.mxu2  ;;  %v6800_v4 = vpop.f32.mrf.mxu0 }
 0x8da   : > { %v6896_v18 = vadd.f32 %v6895_v10, %v6847_v37  ;;  %v6944_v34 = vpop.f32.mrf.mxu3  ;;  %7024 = vadd.xlane.f32.xlu1 %v7023_v24  ;;  %v6801_v26 = vadd.f32 %v6800_v4, %v13089_v49  ;;  %v6849_v33 = vpop.f32.mrf.mxu1 }
 0x8dc   : > { %v6945_v44 = vadd.f32 %v6944_v34, %v6896_v18  ;;  %v6850_v17 = vadd.f32 %v6849_v33, %v6801_v26  ;;  %v6995_v26 = vmul.f32 %v13097_v1, %v13086_v31  ;;  %v10117_v31 = vld [vmem:[%s13253_s3 + $0x8] ss:$0 sm:$0xff] }
 0x8de   : > { %v6986_v40 = vmul.f32 %v13099_v43, %v6945_v44 }
 0x8e0   : > { %v7026_v52 = vadd.f32 %v6986_v40, %v6985_v61 }
 0x8e1   : > { %v6898_v28 = vpop.f32.mrf.mxu2  ;;  %v6802_v5 = vpop.f32.mrf.mxu0 }
 0x8e2   : > { %v6899_v55 = vadd.f32 %v6898_v28, %v6850_v17  ;;  %v6947_v14 = vpop.f32.mrf.mxu3  ;;  %7027 = vadd.xlane.f32.xlu1 %v7026_v52  ;;  %v6851_v3 = vpop.f32.mrf.mxu1  ;;  %v6803_v30 = vadd.f32 %v6802_v5, %v13089_v49 }
 0x8e4   : > { %v6948_v62 = vadd.f32 %v6947_v14, %v6899_v55  ;;  %v6852_v51 = vadd.f32 %v6851_v3, %v6803_v30  ;;  %v6997_v14 = vmul.f32 %v13097_v1, %v13092_v60 }
 0x8e6   : > { %v6988_v39 = vmul.f32 %v13099_v43, %v6948_v62 }
 0x8e8   : > { %v7029_v6 = vadd.f32 %v6988_v39, %v6987_v35 }
 0x8e9   : > { %v6900_v19 = vpop.f32.mrf.mxu2  ;;  %v6805_v15 = vpop.f32.mrf.mxu0 }
 0x8ea   : > { %v6901_v13 = vadd.f32 %v6900_v19, %v6852_v51  ;;  %v6949_v11 = vpop.f32.mrf.mxu3  ;;  %7030 = vadd.xlane.f32.xlu2 %v7029_v6  ;;  %v6806_v25 = vadd.f32 %v6805_v15, %v13089_v49  ;;  %v6854_v2 = vpop.f32.mrf.mxu1 }
 0x8ec   : > { %v6950_v16 = vadd.f32 %v6949_v11, %v6901_v13  ;;  %v6855_v0 = vadd.f32 %v6854_v2, %v6806_v25 }
 0x8ee   : > { %v6990_v45 = vmul.f32 %v13099_v43, %v6950_v16 }
 0x8f0   : > { %v7032_v29 = vadd.f32 %v6990_v45, %v6989_v53 }
 0x8f1   : > { %v6903_v32 = vpop.f32.mrf.mxu2  ;;  %v6807_v9 = vpop.f32.mrf.mxu0 }
 0x8f2   : > { %v6904_v63 = vadd.f32 %v6903_v32, %v6855_v0  ;;  %v6952_v56 = vpop.f32.mrf.mxu3  ;;  %7033 = vadd.xlane.f32.xlu1 %v7032_v29  ;;  %v6856_v46 = vpop.f32.mrf.mxu1  ;;  %v6808_v47 = vadd.f32 %v6807_v9, %v13089_v49 }
 0x8f4   : > { %v6953_v36 = vadd.f32 %v6952_v56, %v6904_v63  ;;  %v6857_v38 = vadd.f32 %v6856_v46, %v6808_v47 }
 0x8f6   : > { %v6992_v50 = vmul.f32 %v13099_v43, %v6953_v36 }
 0x8f8   : > { %v7035_v54 = vadd.f32 %v6992_v50, %v6991_v12 }
 0x8f9   : > { %v6905_v58 = vpop.f32.mrf.mxu2  ;;  %v6810_v21 = vpop.f32.mrf.mxu0 }
 0x8fa   : > { %v6906_v48 = vadd.f32 %v6905_v58, %v6857_v38  ;;  %v6954_v57 = vpop.f32.mrf.mxu3  ;;  %7036 = vadd.xlane.f32.xlu0 %v7035_v54  ;;  %v6811_v42 = vadd.f32 %v6810_v21, %v13089_v49  ;;  %v6859_v23 = vpop.f32.mrf.mxu1 }
 0x8fc   : > { %v6955_v8 = vadd.f32 %v6954_v57, %v6906_v48  ;;  %v6860_v59 = vadd.f32 %v6859_v23, %v6811_v42 }
 0x8fe   : > { %v6994_v20 = vmul.f32 %v13099_v43, %v6955_v8 }
 0x900   : > { %v7038_v27 = vadd.f32 %v6994_v20, %v6993_v41 }
 0x901   : > { %v6908_v37 = vpop.f32.mrf.mxu2  ;;  %v6812_v18 = vpop.f32.mrf.mxu0 }
 0x902   : > { %v6909_v24 = vadd.f32 %v6908_v37, %v6860_v59  ;;  %v6957_v10 = vpop.f32.mrf.mxu3  ;;  %7039 = vadd.xlane.f32.xlu2 %v7038_v27  ;;  %v6813_v4 = vadd.f32 %v6812_v18, %v13089_v49  ;;  %v6861_v44 = vpop.f32.mrf.mxu1 }
 0x904   : > { %v6958_v34 = vadd.f32 %v6957_v10, %v6909_v24  ;;  %v6862_v61 = vadd.f32 %v6861_v44, %v6813_v4 }
 0x906   : > { %v6996_v33 = vmul.f32 %v13099_v43, %v6958_v34 }
 0x908   : > { %v7041_v7 = vadd.f32 %v6996_v33, %v6995_v26 }
 0x909   : > { %v6910_v40 = vpop.f32.mrf.mxu2 }
 0x90a   : > { %v6911_v17 = vadd.f32 %v6910_v40, %v6862_v61  ;;  %7042 = vadd.xlane.f32.xlu1 %v7041_v7  ;;  %v6959_v52 = vpop.f32.mrf.mxu3  ;;  %v7082_v7 = vld [vmem:[%s13254_s4] sm:$0xff]  ;;  %v7083_v40 = vld [vmem:[%s13254_s4 + $0x8] sm:$0xff] }
 0x90c   : > { %v6960_v28 = vadd.f32 %v6959_v52, %v6911_v17  ;;  %v7084_v17 = vld [vmem:[%s13254_s4 + $0x10] sm:$0xff] }
 0x90d   : > { %v7001_v55 = vpop.xlane.xlu0 %7000 }
 0x90e   : > { %v6998_v5 = vmul.f32 %v13099_v43, %v6960_v28  ;;  %v7050_v35 = vadd.f32 %v10117_v31, %v7001_v55  ;;  %v7085_v55 = vld [vmem:[%s13254_s4 + $0x18] sm:$0xff] }
 0x910   : > { %v7044_v49 = vadd.f32 %v6998_v5, %v6997_v14  ;;  %v7066_v39 = vmax.f32 %v7050_v35, 0.0  ;;  %v7090_v5 = vld [vmem:[%s13254_s4 + $0x40] sm:$0xff] }
 0x912   : > { %7045 = vadd.xlane.f32.xlu0 %v7044_v49 }
 0x915   : > { %v7004_v3 = vpop.xlane.xlu0 %7003 }
 0x916   : > { %v7051_v62 = vadd.f32 %v10117_v31, %v7004_v3 }
 0x918   : > { %v7067_v30 = vmax.f32 %v7051_v62, 0.0  ;;  %v7086_v62 = vld [vmem:[%s13254_s4 + $0x20] sm:$0xff] }
 0x91a   : > { %7105 = vperm.xlu2 %10115, %v7067_v30   ;;  %v7091_v30 = vld [vmem:[%s13254_s4 + $0x48] sm:$0xff] }
 0x91d   : > { %v7007_v51 = vpop.xlane.xlu2 %7006 }
 0x91e   : > { %v7052_v6 = vadd.f32 %v10117_v31, %v7007_v51 }
 0x920   : > { %v7068_v19 = vmax.f32 %v7052_v6, 0.0 }
 0x923   : > { %7100 = vperm.xlu1 %10114, %v7066_v39  }
 0x925   : > { %v7010_v13 = vpop.xlane.xlu0 %7009 }
 0x926   : > { %v7053_v60 = vadd.f32 %v10117_v31, %v7010_v13 }
 0x928   : > { %v7069_v1 = vmax.f32 %v7053_v60, 0.0 }
 0x92b   : > { %7110 = vperm.xlu1 %10114, %v7068_v19  }
 0x92d   : > { %v7013_v43 = vpop.xlane.xlu2 %7012 }
 0x92e   : > { %v7054_v11 = vadd.f32 %v10117_v31, %v7013_v43  ;;  %v7092_v43 = vld [vmem:[%s13254_s4 + $0x50] sm:$0xff] }
 0x930   : > { %v7070_v16 = vmax.f32 %v7054_v11, 0.0 }
 0x933   : > { %7115 = vperm.xlu1 %10114, %v7069_v1  }
 0x935   : > { %v7016_v15 = vpop.xlane.xlu1 %7015 }
 0x936   : > { %v7055_v25 = vadd.f32 %v10117_v31, %v7016_v15 }
 0x938   : > { %v7071_v2 = vmax.f32 %v7055_v25, 0.0  ;;  %v7087_v25 = vld [vmem:[%s13254_s4 + $0x28] sm:$0xff] }
 0x93a   : > { %7125 = vperm.xlu2 %10115, %v7071_v2  }
 0x93b   : > { %7120 = vperm.xlu1 %10114, %v7070_v16   ;;  %v7088_v16 = vld [vmem:[%s13254_s4 + $0x30] sm:$0xff] }
 0x93d   : > { %v7019_v53 = vpop.xlane.xlu0 %7018 }
 0x93e   : > { %v7056_v45 = vadd.f32 %v10117_v31, %v7019_v53 }
 0x940   : > { %v7072_v0 = vmax.f32 %v7056_v45, 0.0 }
 0x942   : > { %7130 = vperm.xlu0 %10116, %v7072_v0  }
 0x945   : > { %v7022_v56 = vpop.xlane.xlu2 %7021 }
 0x946   : > { %v7057_v23 = vadd.f32 %v10117_v31, %v7022_v56 }
 0x948   : > { %v7073_v59 = vmax.f32 %v7057_v23, 0.0 }
 0x94d   : > { %v7025_v29 = vpop.xlane.xlu1 %7024 }
 0x94e   : > { %v7058_v32 = vadd.f32 %v10117_v31, %v7025_v29 }
 0x950   : > { %v7074_v63 = vmax.f32 %v7058_v32, 0.0 }
 0x952   : > { %7140 = vperm.xlu0 %10116, %v7074_v63   ;;  %v7093_v63 = vld [vmem:[%s13254_s4 + $0x58] sm:$0xff] }
 0x955   : > { %v7028_v9 = vpop.xlane.xlu1 %7027 }
 0x956   : > { %v7059_v46 = vadd.f32 %v10117_v31, %v7028_v9 }
 0x958   : > { %v7075_v36 = vmax.f32 %v7059_v46, 0.0  ;;  %v7094_v46 = vld [vmem:[%s13254_s4 + $0x60] sm:$0xff] }
 0x95a   : > { %7145 = vperm.xlu2 %10115, %v7075_v36  }
 0x95d   : > { %v7031_v47 = vpop.xlane.xlu2 %7030 }
 0x95e   : > { %v7060_v12 = vadd.f32 %v10117_v31, %v7031_v47 }
 0x960   : > { %v7076_v50 = vmax.f32 %v7060_v12, 0.0 }
 0x962   : > { %7150 = vperm.xlu2 %10115, %v7076_v50  }
 0x965   : > { %v7034_v38 = vpop.xlane.xlu1 %7033 }
 0x966   : > { %v7061_v54 = vadd.f32 %v10117_v31, %v7034_v38  ;;  %v7095_v38 = vld [vmem:[%s13254_s4 + $0x68] sm:$0xff] }
 0x968   : > { %v7077_v58 = vmax.f32 %v7061_v54, 0.0 }
 0x96a   : > { %7155 = vperm.xlu2 %10115, %v7077_v58  }
 0x96d   : > { %v7037_v22 = vpop.xlane.xlu0 %7036 }
 0x96e   : > { %v7062_v48 = vadd.f32 %v10117_v31, %v7037_v22 }
 0x970   : > { %v7078_v57 = vmax.f32 %v7062_v48, 0.0 }
 0x972   : > { %7160 = vperm.xlu0 %10116, %v7078_v57   ;;  %v7089_v57 = vld [vmem:[%s13254_s4 + $0x38] sm:$0xff] }
 0x975   : > { %v7040_v21 = vpop.xlane.xlu2 %7039 }
 0x976   : > { %v7063_v42 = vadd.f32 %v10117_v31, %v7040_v21 }
 0x978   : > { %v7079_v8 = vmax.f32 %v7063_v42, 0.0 }
 0x97a   : > { %7165 = vperm.xlu1 %10114, %v7079_v8  }
 0x97d   : > { %v7043_v41 = vpop.xlane.xlu1 %7042  ;;  %v7106_v34 = vpop.permute.xlu2 %7105 }
 0x97e   : > { %v7064_v20 = vadd.f32 %v10117_v31, %v7043_v41 }
 0x980   : > { %v7080_v27 = vmax.f32 %v7064_v20, 0.0 }
 0x982   : > { %7170 = vperm.xlu2 %10115, %v7080_v27   ;;  %7135 = vperm.xlu1 %10114, %v7073_v59  }
 0x985   : > { %v7046_v37 = vpop.xlane.xlu0 %7045 }
 0x986   : > { %v7065_v24 = vadd.f32 %v10117_v31, %v7046_v37  ;;  %v7179_v31 = vmul.f32 %v7106_v34, %v7083_v40  ;;  %v7097_v40 = vld [vmem:[%s13254_s4 + $0x78] sm:$0xff] }
 0x988   : > { %v7081_v10 = vmax.f32 %v7065_v24, 0.0  ;;  %v7196_v6 = vsel %vm7194_vm0, %v7179_v31, 0.0  ;;  %v7096_v24 = vld [vmem:[%s13254_s4 + $0x70] sm:$0xff] }
 0x98a   : > { %7175 = vperm.xlu0 %10116, %v7081_v10  }
 0x994   : > { %v7126_v26 = vpop.permute.xlu2 %7125 }
 0x995   : > { %v7101_v18 = vpop.permute.xlu1 %7100  ;;  %v7183_v47 = vmul.f32 %v7126_v26, %v7087_v25 }
 0x996   : > { %v7178_v52 = vmul.f32 %v7101_v18, %v7082_v7 }
 0x997   : > { %v7204_v21 = vsel %vm7194_vm0, %v7183_v47, 0.0 }
 0x998   : > { %v7195_v35 = vsel %vm7194_vm0, %v7178_v52, 0.0 }
 0x999   : > { %v7197_v1 = vadd.f32 %v7196_v6, %v7195_v35 }
 0x99d   : > { %v7111_v4 = vpop.permute.xlu1 %7110 }
 0x99e   : > { %v7180_v3 = vmul.f32 %v7111_v4, %v7084_v17 }
 0x9a0   : > { %v7198_v19 = vsel %vm7194_vm0, %v7180_v3, 0.0 }
 0x9a1   : > { %v7199_v2 = vadd.f32 %v7198_v19, %v7197_v1  ;;  %v10118_v19 = vld [vmem:[%s13253_s3 + $0x9] ss:$0 sm:$0xff] }
 0x9a5   : > { %v7116_v33 = vpop.permute.xlu1 %7115 }
 0x9a6   : > { %v7181_v39 = vmul.f32 %v7116_v33, %v7085_v55 }
 0x9a8   : > { %v7200_v11 = vsel %vm7194_vm0, %v7181_v39, 0.0 }
 0x9a9   : > { %v7201_v32 = vadd.f32 %v7200_v11, %v7199_v2 }
 0x9ad   : > { %v7121_v28 = vpop.permute.xlu1 %7120 }
 0x9ae   : > { %v7182_v13 = vmul.f32 %v7121_v28, %v7086_v62 }
 0x9b0   : > { %v7202_v45 = vsel %vm7194_vm0, %v7182_v13, 0.0 }
 0x9b1   : > { %v7203_v50 = vadd.f32 %v7202_v45, %v7201_v32 }
 0x9b3   : > { %v7205_v23 = vadd.f32 %v7204_v21, %v7203_v50 }
 0x9b4   : > { %v7146_v44 = vpop.permute.xlu2 %7145  ;;  %v7131_v61 = vpop.permute.xlu0 %7130 }
 0x9b5   : > { %v7187_v60 = vmul.f32 %v7146_v44, %v7091_v30  ;;  %v7184_v12 = vmul.f32 %v7131_v61, %v7088_v16 }
 0x9b7   : > { %v7217_v0 = vsel %vm7194_vm0, %v7187_v60, 0.0  ;;  %v7206_v42 = vsel %vm7194_vm0, %v7184_v12, 0.0 }
 0x9b8   : > { %v7207_v37 = vadd.f32 %v7206_v42, %v7205_v23 }
 0x9bc   : > { %v7151_v14 = vpop.permute.xlu2 %7150 }
 0x9bd   : > { %v7188_v29 = vmul.f32 %v7151_v14, %v7092_v43 }
 0x9bf   : > { %v7219_v54 = vsel %vm7194_vm0, %v7188_v29, 0.0 }
 0x9c4   : > { %v7141_v49 = vpop.permute.xlu0 %7140  ;;  %v7156_v56 = vpop.permute.xlu2 %7155 }
 0x9c5   : > { %v7186_v51 = vmul.f32 %v7141_v49, %v7090_v5  ;;  %v7189_v58 = vmul.f32 %v7156_v56, %v7093_v63 }
 0x9c7   : > { %v7216_v15 = vsel %vm7194_vm0, %v7186_v51, 0.0  ;;  %v7221_v20 = vsel %vm7194_vm0, %v7189_v58, 0.0 }
 0x9c8   : > { %v7218_v9 = vadd.f32 %v7217_v0, %v7216_v15 }
 0x9ca   : > { %v7220_v48 = vadd.f32 %v7219_v54, %v7218_v9 }
 0x9cc   : > { %v7222_v18 = vadd.f32 %v7221_v20, %v7220_v48 }
 0x9dc   : > { %v7171_v10 = vpop.permute.xlu2 %7170 }
 0x9dd   : > { %v7192_v44 = vmul.f32 %v7171_v10, %v7096_v24 }
 0x9df   : > { %v7227_v28 = vsel %vm7194_vm0, %v7192_v44, 0.0 }
 0x9e4   : > { %v7161_v36 = vpop.permute.xlu0 %7160 }
 0x9e5   : > { %v7190_v22 = vmul.f32 %v7161_v36, %v7094_v46 }
 0x9e7   : > { %v7223_v59 = vsel %vm7194_vm0, %v7190_v22, 0.0 }
 0x9e8   : > { %v7224_v26 = vadd.f32 %v7223_v59, %v7222_v18 }
 0x9ec   : > { %v7166_v53 = vpop.permute.xlu1 %7165 }
 0x9ed   : > { %v7191_v8 = vmul.f32 %v7166_v53, %v7095_v38 }
 0x9ef   : > { %v7225_v34 = vsel %vm7194_vm0, %v7191_v8, 0.0 }
 0x9f0   : > { %v7226_v61 = vadd.f32 %v7225_v34, %v7224_v26 }
 0x9f2   : > { %v7228_v14 = vadd.f32 %v7227_v28, %v7226_v61 }
 0x9f4   : > { %v7136_v41 = vpop.permute.xlu1 %7135 }
 0x9f5   : > { %v7185_v27 = vmul.f32 %v7136_v41, %v7089_v57 }
 0x9f7   : > { %v7208_v4 = vsel %vm7194_vm0, %v7185_v27, 0.0 }
 0x9f8   : > { %v7209_v33 = vadd.f32 %v7208_v4, %v7207_v37 }
 0x9fa   : > { %v7210_v7 = vrot.slane %v7209_v33, 4 }
 0x9fc   : > { %v7211_v17 = vadd.f32 %v7210_v7, %v7209_v33  ;;  %v7176_v52 = vpop.permute.xlu0 %7175 }
 0x9fd   : > { %v7193_v55 = vmul.f32 %v7176_v52, %v7097_v40 }
 0x9fe   : > { %v7212_v49 = vrot.slane %v7211_v17, 2 }
 0x9ff   : > { %v7229_v5 = vsel %vm7194_vm0, %v7193_v55, 0.0 }
 0xa00   : > { %v7230_v31 = vadd.f32 %v7229_v5, %v7228_v14  ;;  %v7213_v62 = vadd.f32 %v7212_v49, %v7211_v17 }
 0xa02   : > { %v7231_v3 = vrot.slane %v7230_v31, 4  ;;  %v7214_v39 = vrot.slane %v7213_v62, 1 }
 0xa04   : > { %v7232_v30 = vadd.f32 %v7231_v3, %v7230_v31  ;;  %v7215_v13 = vadd.f32 %v7214_v39, %v7213_v62 }
 0xa06   : > { %v7233_v35 = vrot.slane %v7232_v30, 2 }
 0xa08   : > { %v7234_v51 = vadd.f32 %v7233_v35, %v7232_v30 }
 0xa0a   : > { %v7235_v6 = vrot.slane %v7234_v51, 1 }
 0xa0c   : > { %v7236_v60 = vadd.f32 %v7235_v6, %v7234_v51 }
 0xa0e   : > { %v7238_v1 = vsel %vm7237_vm1, %v7215_v13, %v7236_v60 }
 0xa0f   : > { %v7242_v43 = vadd.f32 %v10118_v19, %v7238_v1 }
 0xa11   : > { %v7243_v11 = vmul.f32 %v7242_v43, %v7242_v43 }
 0xa13   : > { %v7245_v15 = vsel %vm7244_vm2, %v7243_v11, 0.0 }
 0xa14   : > { %7246 = vadd.xlane.f32.xlu2 %v7245_v15 }
 0xa87   : > { %v7247_v25 = vpop.xlane.xlu2 %7246 }
 0xa88   : > { %10119 = vrsqrt.f32 %v7247_v25  ;;  %vm7255_vm3 = vcmp.eq.f32.partialorder %v7247_v25, inf  ;;  %v7258_v63 = vand.u32 2147483648, %v7247_v25  ;;  %vm7257_vm4 = vcmp.eq.f32.partialorder %v7247_v25, 0.0 }
 0xa8e   : > { %v10120_v2 = vpop.eup %10119 }
 0xa8f   : > { %v7249_v16 = vmul.f32 %v10120_v2, %v7247_v25 }
 0xa91   : > { %v7250_v53 = vmul.f32 %v10120_v2, %v7249_v16 }
 0xa93   : > { %v7251_v45 = vmul.f32 0.5, %v7250_v53 }
 0xa95   : > { %v7252_v0 = vsub.f32 1.5, %v7251_v45 }
 0xa97   : > { %v7253_v29 = vmul.f32 %v10120_v2, %v7252_v0 }
 0xa99   : > { %v7254_v32 = vmul.f32 %v7253_v29, %v7247_v25 }
 0xa9b   : > { %v7256_v56 = vsel %vm7255_vm3, %v7247_v25, %v7254_v32 }
 0xa9c   : > { %v7259_v9 = vsel %vm7257_vm4, %v7258_v63, %v7256_v56 }
 0xa9d   : > { %vm7260_vm5 = vcmp.le.f32.partialorder %v7259_v9, 0.0 }
 0xa9e   : > { %v7261_v46 = vsel %vm7260_vm5, 1.0, %v7259_v9 }
 0xa9f   : > { %10121 = vrcp.f32 %v7261_v46  ;;  %v7273_v50 = vand.u32 2147483648, %v7261_v46  ;;  %v7271_v54 = vand.u32 2147483647, %v7261_v46  ;;  %vm7267_vm7 = vweird.f32 %v7261_v46 }
 0xaa1   : > { %v7274_v22 = vor.u32 1.1754944e-38, %v7273_v50  ;;  %vm7272_vm9 = vcmp.eq.f32.partialorder %v7271_v54, 8.507059e+37 }
 0xaa5   : > { %v10122_v36 = vpop.eup %10121 }
 0xaa6   : > { %v7263_v47 = vmul.f32 %v10122_v36, %v7261_v46  ;;  %vm7268_vm6 = vweird.f32 %v10122_v36 }
 0xaa7   : > { %vm7269_vm8 = vmor %vm7267_vm7, %vm7268_vm6 }
 0xaa8   : > { %v7264_v12 = vsub.f32 1.0, %v7263_v47 }
 0xaaa   : > { %v7265_v38 = vmul.f32 %v10122_v36, %v7264_v12 }
 0xaac   : > { %v7266_v58 = vadd.f32 %v10122_v36, %v7265_v38 }
 0xaae   : > { %v7270_v48 = vsel %vm7269_vm8, %v10122_v36, %v7266_v58 }
 0xaaf   : > { %v7275_v57 = vsel %vm7272_vm9, %v7274_v22, %v7270_v48 }
 0xab0   : > { %v7276_v21 = vmul.f32 %v7275_v57, %v7242_v43 }
 0xab2   : > { %7277 = vst.msk [vmem:[#allocation4] sm:$0x3] %vm7244_vm2, %v7276_v21 }
 0xab3 PF: > { %p10085_p11 = scmp.eq.s32.totalorder %s10228_s21, 1  ;;  %s10181_s23 = smov [#allocation4]  }
 0xab4   : > { %s7284_s24 = sshll.u32 %s10181_s23, 4  ;;  %s7286_s28 = sshll.u32 %s13255_s5, 4  ;;  %s7285_s24 = int_to_ptr.vmem [resolvable:$true] %s7284_s24  ;;  %s7287_s28 = int_to_ptr.hbm [resolvable:$true] %s7286_s28 }
 0xab5   : > { %10082 = dma.vmem_to_hbm [thread:$0]  (%p10085_p11), %s7285_s24, 32, %s7287_s28, [#allocation5]  }
 0xab6   : > { %10164 = dma.done.wait (%p10085_p11), [#allocation5], 32  }
 0xab7   : > { %10166 = vsyncadd (%p10085_p11), [#allocation5], 4294967264 }
 0xab8 PF: > { %p13_p12 = scmp.ge.s32.totalorder %s10231_s22, 4   ;;  %s13668_s18 = smov %s10173_s19 }
 0xab9   : > { %s13669_s19 = smov %s10240_s25  ;;  %s13670_s20 = smov %s10231_s22 }
 0xaba   :  { %15 = sbr.rel (!%p13_p12) target bundleno = 2 (0x2), region = 106 }
 0xabf   :  { %7300 = vsyncpa [#allocation5], 1 }
 0xac0   :  { %7302 = vsyncpa [#allocation5 + $0x1], 1 }

</bundles_post_ra>
